<compile_context>
chip_gen: v6e
topology: v6e:2x2x1
jax: 0.10.0
libtpu: 0.0.40
codegen_flags: <defaults>
</compile_context>

<pallas_src>
import jax
import jax.numpy as jnp
from jax.experimental import pallas as pl
from jax.experimental.pallas import tpu as pltpu


def _conv3x3_relu_to_slab(src, dst, w_ref, b_ref, cin, cout, H, W):
    """Valid 3x3 cross-correlation over the zero-ringed (cin, H+2, W+2) slab
    `src`, + bias + ReLU, writing each output channel's HxW result into the
    interior of the pre-zeroed (cout, H+2, W+2) slab `dst` (the memset ring is
    exactly the padding=1 border the next layer needs).

    w_ref : SMEM f32[cout*cin*9], layout w[co, ci, ky, kx] row-major.
    b_ref : SMEM f32[cout].
    """
    accs = [jnp.zeros((H, W), jnp.float32) for _ in range(cout)]
    for ci in range(cin):
        for ky in range(3):
            for kx in range(3):
                # Ref-slice load (vld slot has slack); tap reused for all cout.
                tap = src[ci, ky:ky + H, kx:kx + W]
                base = ci * 9 + ky * 3 + kx
                for co in range(cout):
                    accs[co] = accs[co] + tap * w_ref[co * cin * 9 + base]
    # One whole-window store per finished channel (keeps vst traffic low; the
    # zero ring of `dst` is never touched, so it stays the padding=1 border).
    for co in range(cout):
        dst[co, 1:1 + H, 1:1 + W] = jnp.maximum(accs[co] + b_ref[co], 0.0)


def _preprocess_kernel(x_ref, w1_ref, b1_ref, w2_ref, b2_ref, w3_ref, b3_ref,
                       o_ref, slab_in, slab_a, slab_b):
    # x_ref   : [C, H, W]   (one batch sample; batch dim squeezed by BlockSpec)
    # o_ref   : [H+2, W+2]
    # slab_in : VMEM [C,  H+2, W+2]   padded input
    # slab_a  : VMEM [C1, H+2, W+2]   conv1 output (padded)
    # slab_b  : VMEM [C2, H+2, W+2]   conv2 output (padded)
    C, H, W = x_ref.shape
    c1 = b1_ref.shape[0]
    c2 = b2_ref.shape[0]

    # Fused padding: memset (zero ring = per-layer padding=1), then drop the
    # raw sample into the interior.  Re-done every grid step so it is correct
    # no matter how the parallel grid axis is sharded across cores.
    slab_in[...] = jnp.zeros_like(slab_in)
    slab_a[...] = jnp.zeros_like(slab_a)
    slab_b[...] = jnp.zeros_like(slab_b)
    slab_in[:, 1:1 + H, 1:1 + W] = x_ref[...]

    # conv1 + ReLU and conv2 + ReLU: valid window only, result into zeroed slab.
    _conv3x3_relu_to_slab(slab_in, slab_a, w1_ref, b1_ref, C, c1, H, W)
    _conv3x3_relu_to_slab(slab_a, slab_b, w2_ref, b2_ref, c1, c2, H, W)

    # conv3: 1x1 conv with padding=1 -> elementwise over the whole (H+2, W+2)
    # slab (border of slab_b is zero, so border output = ReLU(b3), as PyTorch).
    acc = jnp.zeros((H + 2, W + 2), jnp.float32)
    for ci in range(c2):
        acc = acc + slab_b[ci] * w3_ref[ci]
    o_ref[...] = jnp.maximum(acc + b3_ref[0], 0.0).astype(o_ref.dtype)


def pack_params(w1, b1, w2, b2, w3, b3):
    """Done ONCE at init time: flatten conv weights for SMEM scalar access."""
    return (jnp.asarray(w1, jnp.float32).reshape(-1),
            jnp.asarray(b1, jnp.float32),
            jnp.asarray(w2, jnp.float32).reshape(-1),
            jnp.asarray(b2, jnp.float32),
            jnp.asarray(w3, jnp.float32).reshape(-1),
            jnp.asarray(b3, jnp.float32))


@jax.jit
def preprocess_forward(x, params):
    """x:[B, 5, H, W] f32 -> [B, 1, H+2, W+2] f32 (matches PreProcess.forward)."""
    w1f, b1, w2f, b2, w3f, b3 = params
    B, C, H, W = x.shape
    c1, c2 = b1.shape[0], b2.shape[0]

    flops = (2 * B * H * W * c1 * C * 9 +
             2 * B * H * W * c2 * c1 * 9 +
             2 * B * (H + 2) * (W + 2) * c2)
    bytes_accessed = 4 * (x.size + w1f.size + b1.size + w2f.size + b2.size +
                          w3f.size + b3.size + B * (H + 2) * (W + 2))

    smem = pl.BlockSpec(memory_space=pltpu.MemorySpace.SMEM)

    y = pl.pallas_call(
        _preprocess_kernel,
        out_shape=jax.ShapeDtypeStruct((B, 1, H + 2, W + 2), jnp.float32),
        grid=(B,),
        in_specs=[pl.BlockSpec((None, C, H, W), lambda b: (b, 0, 0, 0)),
                  smem, smem, smem, smem, smem, smem],
        out_specs=pl.BlockSpec((None, None, H + 2, W + 2),
                               lambda b: (b, 0, 0, 0)),
        scratch_shapes=[pltpu.VMEM((C, H + 2, W + 2), jnp.float32),
                        pltpu.VMEM((c1, H + 2, W + 2), jnp.float32),
                        pltpu.VMEM((c2, H + 2, W + 2), jnp.float32)],
        compiler_params=pltpu.CompilerParams(
            dimension_semantics=("parallel",)),
        cost_estimate=pl.CostEstimate(flops=flops, transcendentals=0,
                                      bytes_accessed=bytes_accessed),
    )(x, w1f, b1, w2f, b2, w3f, b3)

    return y


def _init_params(key):
    """Mirror nn.Conv2d default init: uniform(+-1/sqrt(fan_in))."""
    ks = jax.random.split(key, 6)

    def u(k, shape, fan_in):
        bound = 1.0 / (fan_in ** 0.5)
        return jax.random.uniform(k, shape, jnp.float32, -bound, bound)

    w1 = u(ks[0], (5, 5, 3, 3), 5 * 9); b1 = u(ks[1], (5,), 5 * 9)
    w2 = u(ks[2], (5, 5, 3, 3), 5 * 9); b2 = u(ks[3], (5,), 5 * 9)
    w3 = u(ks[4], (1, 5, 1, 1), 5);     b3 = u(ks[5], (1,), 5)
    return w1, b1, w2, b2, w3, b3


def _reference(x, w1, b1, w2, b2, w3, b3):
    def conv(v, w, b, pad):
        out = jax.lax.conv_general_dilated(
            v, w, window_strides=(1, 1), padding=[(pad, pad), (pad, pad)],
            dimension_numbers=("NCHW", "OIHW", "NCHW"))
        return jnp.maximum(out + b.reshape(1, -1, 1, 1), 0.0)

    h = conv(x, w1, b1, 1)
    h = conv(h, w2, b2, 1)
    return conv(h, w3, b3, 1)


if __name__ == "__main__":
    key = jax.random.PRNGKey(0)
    kx, kp = jax.random.split(key)

    B, C, H, W = 2, 5, 16, 16
    x = jax.random.normal(kx, (B, C, H, W), dtype=jnp.float32)
    w1, b1, w2, b2, w3, b3 = _init_params(kp)
    params = pack_params(w1, b1, w2, b2, w3, b3)      # one-time packing

    y = preprocess_forward(x, params)
    y = jax.block_until_ready(y)

    ref = _reference(x, w1, b1, w2, b2, w3, b3)
    assert y.shape == (B, 1, H + 2, W + 2), y.shape
    assert jnp.allclose(y, ref, atol=1e-4, rtol=1e-4), \
        float(jnp.max(jnp.abs(y - ref)))

    print("KERNEL_OK")
</pallas_src>

<mosaic_0001>
module attributes {stable_mosaic.version = 11 : i64} {
  func.func @_preprocess_kernel(%arg0: i32, %arg1: memref<1x5x16x16xf32, #tpu.memory_space<vmem>>, %arg2: memref<225xf32, #tpu.memory_space<smem>>, %arg3: memref<5xf32, #tpu.memory_space<smem>>, %arg4: memref<225xf32, #tpu.memory_space<smem>>, %arg5: memref<5xf32, #tpu.memory_space<smem>>, %arg6: memref<5xf32, #tpu.memory_space<smem>>, %arg7: memref<1xf32, #tpu.memory_space<smem>>, %arg8: memref<1x1x18x18xf32, #tpu.memory_space<vmem>>, %arg9: memref<5x18x18xf32, #tpu.memory_space<vmem>>, %arg10: memref<5x18x18xf32, #tpu.memory_space<vmem>>, %arg11: memref<5x18x18xf32, #tpu.memory_space<vmem>>) attributes {dimension_semantics = [#tpu.dimension_semantics<parallel>], iteration_bounds = array<i64: 2>, scalar_prefetch = 0 : i64, scratch_operands = 3 : i64, tpu.core_type = #tpu.core_type<tc>, window_params = [{transform_indices = @transform_0, window_bounds = array<i64: 1, 5, 16, 16>}, {transform_indices = @transform_1, window_bounds = array<i64: 225>}, {transform_indices = @transform_2, window_bounds = array<i64: 5>}, {transform_indices = @transform_3, window_bounds = array<i64: 225>}, {transform_indices = @transform_4, window_bounds = array<i64: 5>}, {transform_indices = @transform_5, window_bounds = array<i64: 5>}, {transform_indices = @transform_6, window_bounds = array<i64: 1>}, {transform_indices = @transform_7, window_bounds = array<i64: 1, 1, 18, 18>}]} {
    %cst = arith.constant 0.000000e+00 : f32
    %0 = vector.broadcast %cst : f32 to vector<5x18x18xf32>
    %c0 = arith.constant 0 : index
    %c0_0 = arith.constant 0 : index
    %c0_1 = arith.constant 0 : index
    %1 = vector.load %arg9[%c0, %c0_0, %c0_1] : memref<5x18x18xf32, #tpu.memory_space<vmem>>, vector<5x18x18xf32>
    tpu.vector_store %arg9[%c0, %c0_0, %c0_1], %0 {strides = array<i32>} : memref<5x18x18xf32, #tpu.memory_space<vmem>>, vector<5x18x18xf32>,
    %cst_2 = arith.constant 0.000000e+00 : f32
    %2 = vector.broadcast %cst_2 : f32 to vector<5x18x18xf32>
    %c0_3 = arith.constant 0 : index
    %c0_4 = arith.constant 0 : index
    %c0_5 = arith.constant 0 : index
    %3 = vector.load %arg10[%c0_3, %c0_4, %c0_5] : memref<5x18x18xf32, #tpu.memory_space<vmem>>, vector<5x18x18xf32>
    tpu.vector_store %arg10[%c0_3, %c0_4, %c0_5], %2 {strides = array<i32>} : memref<5x18x18xf32, #tpu.memory_space<vmem>>, vector<5x18x18xf32>,
    %cst_6 = arith.constant 0.000000e+00 : f32
    %4 = vector.broadcast %cst_6 : f32 to vector<5x18x18xf32>
    %c0_7 = arith.constant 0 : index
    %c0_8 = arith.constant 0 : index
    %c0_9 = arith.constant 0 : index
    %5 = vector.load %arg11[%c0_7, %c0_8, %c0_9] : memref<5x18x18xf32, #tpu.memory_space<vmem>>, vector<5x18x18xf32>
    tpu.vector_store %arg11[%c0_7, %c0_8, %c0_9], %4 {strides = array<i32>} : memref<5x18x18xf32, #tpu.memory_space<vmem>>, vector<5x18x18xf32>,
    %c0_10 = arith.constant 0 : index
    %c0_11 = arith.constant 0 : index
    %c0_12 = arith.constant 0 : index
    %c0_13 = arith.constant 0 : index
    %6 = vector.load %arg1[%c0_10, %c0_11, %c0_12, %c0_13] : memref<1x5x16x16xf32, #tpu.memory_space<vmem>>, vector<1x5x16x16xf32>
    %7 = vector.shape_cast %6 : vector<1x5x16x16xf32> to vector<5x16x16xf32>
    %c0_14 = arith.constant 0 : index
    %c1 = arith.constant 1 : index
    %c1_15 = arith.constant 1 : index
    %8 = vector.load %arg9[%c0_14, %c1, %c1_15] : memref<5x18x18xf32, #tpu.memory_space<vmem>>, vector<5x16x16xf32>
    tpu.vector_store %arg9[%c0_14, %c1, %c1_15], %7 {strides = array<i32>} : memref<5x18x18xf32, #tpu.memory_space<vmem>>, vector<5x16x16xf32>,
    %cst_16 = arith.constant 0.000000e+00 : f32
    %9 = vector.broadcast %cst_16 : f32 to vector<16x16xf32>
    %cst_17 = arith.constant 0.000000e+00 : f32
    %10 = vector.broadcast %cst_17 : f32 to vector<16x16xf32>
    %cst_18 = arith.constant 0.000000e+00 : f32
    %11 = vector.broadcast %cst_18 : f32 to vector<16x16xf32>
    %cst_19 = arith.constant 0.000000e+00 : f32
    %12 = vector.broadcast %cst_19 : f32 to vector<16x16xf32>
    %cst_20 = arith.constant 0.000000e+00 : f32
    %13 = vector.broadcast %cst_20 : f32 to vector<16x16xf32>
    %c0_21 = arith.constant 0 : index
    %c0_22 = arith.constant 0 : index
    %c0_23 = arith.constant 0 : index
    %14 = vector.load %arg9[%c0_21, %c0_22, %c0_23] : memref<5x18x18xf32, #tpu.memory_space<vmem>>, vector<1x16x16xf32>
    %15 = vector.shape_cast %14 : vector<1x16x16xf32> to vector<16x16xf32>
    %c0_24 = arith.constant 0 : index
    %16 = memref.load %arg2[%c0_24] : memref<225xf32, #tpu.memory_space<smem>>
    %17 = vector.broadcast %16 : f32 to vector<16x16xf32>
    %18 = arith.mulf %15, %17 : vector<16x16xf32>
    %19 = arith.addf %9, %18 : vector<16x16xf32>
    %c45 = arith.constant 45 : index
    %20 = memref.load %arg2[%c45] : memref<225xf32, #tpu.memory_space<smem>>
    %21 = vector.broadcast %20 : f32 to vector<16x16xf32>
    %22 = arith.mulf %15, %21 : vector<16x16xf32>
    %23 = arith.addf %10, %22 : vector<16x16xf32>
    %c90 = arith.constant 90 : index
    %24 = memref.load %arg2[%c90] : memref<225xf32, #tpu.memory_space<smem>>
    %25 = vector.broadcast %24 : f32 to vector<16x16xf32>
    %26 = arith.mulf %15, %25 : vector<16x16xf32>
    %27 = arith.addf %11, %26 : vector<16x16xf32>
    %c135 = arith.constant 135 : index
    %28 = memref.load %arg2[%c135] : memref<225xf32, #tpu.memory_space<smem>>
    %29 = vector.broadcast %28 : f32 to vector<16x16xf32>
    %30 = arith.mulf %15, %29 : vector<16x16xf32>
    %31 = arith.addf %12, %30 : vector<16x16xf32>
    %c180 = arith.constant 180 : index
    %32 = memref.load %arg2[%c180] : memref<225xf32, #tpu.memory_space<smem>>
    %33 = vector.broadcast %32 : f32 to vector<16x16xf32>
    %34 = arith.mulf %15, %33 : vector<16x16xf32>
    %35 = arith.addf %13, %34 : vector<16x16xf32>
    %c0_25 = arith.constant 0 : index
    %c0_26 = arith.constant 0 : index
    %c1_27 = arith.constant 1 : index
    %36 = vector.load %arg9[%c0_25, %c0_26, %c1_27] : memref<5x18x18xf32, #tpu.memory_space<vmem>>, vector<1x16x16xf32>
    %37 = vector.shape_cast %36 : vector<1x16x16xf32> to vector<16x16xf32>
    %c1_28 = arith.constant 1 : index
    %38 = memref.load %arg2[%c1_28] : memref<225xf32, #tpu.memory_space<smem>>
    %39 = vector.broadcast %38 : f32 to vector<16x16xf32>
    %40 = arith.mulf %37, %39 : vector<16x16xf32>
    %41 = arith.addf %19, %40 : vector<16x16xf32>
    %c46 = arith.constant 46 : index
    %42 = memref.load %arg2[%c46] : memref<225xf32, #tpu.memory_space<smem>>
    %43 = vector.broadcast %42 : f32 to vector<16x16xf32>
    %44 = arith.mulf %37, %43 : vector<16x16xf32>
    %45 = arith.addf %23, %44 : vector<16x16xf32>
    %c91 = arith.constant 91 : index
    %46 = memref.load %arg2[%c91] : memref<225xf32, #tpu.memory_space<smem>>
    %47 = vector.broadcast %46 : f32 to vector<16x16xf32>
    %48 = arith.mulf %37, %47 : vector<16x16xf32>
    %49 = arith.addf %27, %48 : vector<16x16xf32>
    %c136 = arith.constant 136 : index
    %50 = memref.load %arg2[%c136] : memref<225xf32, #tpu.memory_space<smem>>
    %51 = vector.broadcast %50 : f32 to vector<16x16xf32>
    %52 = arith.mulf %37, %51 : vector<16x16xf32>
    %53 = arith.addf %31, %52 : vector<16x16xf32>
    %c181 = arith.constant 181 : index
    %54 = memref.load %arg2[%c181] : memref<225xf32, #tpu.memory_space<smem>>
    %55 = vector.broadcast %54 : f32 to vector<16x16xf32>
    %56 = arith.mulf %37, %55 : vector<16x16xf32>
    %57 = arith.addf %35, %56 : vector<16x16xf32>
    %c0_29 = arith.constant 0 : index
    %c0_30 = arith.constant 0 : index
    %c2 = arith.constant 2 : index
    %58 = vector.load %arg9[%c0_29, %c0_30, %c2] : memref<5x18x18xf32, #tpu.memory_space<vmem>>, vector<1x16x16xf32>
    %59 = vector.shape_cast %58 : vector<1x16x16xf32> to vector<16x16xf32>
    %c2_31 = arith.constant 2 : index
    %60 = memref.load %arg2[%c2_31] : memref<225xf32, #tpu.memory_space<smem>>
    %61 = vector.broadcast %60 : f32 to vector<16x16xf32>
    %62 = arith.mulf %59, %61 : vector<16x16xf32>
    %63 = arith.addf %41, %62 : vector<16x16xf32>
    %c47 = arith.constant 47 : index
    %64 = memref.load %arg2[%c47] : memref<225xf32, #tpu.memory_space<smem>>
    %65 = vector.broadcast %64 : f32 to vector<16x16xf32>
    %66 = arith.mulf %59, %65 : vector<16x16xf32>
    %67 = arith.addf %45, %66 : vector<16x16xf32>
    %c92 = arith.constant 92 : index
    %68 = memref.load %arg2[%c92] : memref<225xf32, #tpu.memory_space<smem>>
    %69 = vector.broadcast %68 : f32 to vector<16x16xf32>
    %70 = arith.mulf %59, %69 : vector<16x16xf32>
    %71 = arith.addf %49, %70 : vector<16x16xf32>
    %c137 = arith.constant 137 : index
    %72 = memref.load %arg2[%c137] : memref<225xf32, #tpu.memory_space<smem>>
    %73 = vector.broadcast %72 : f32 to vector<16x16xf32>
    %74 = arith.mulf %59, %73 : vector<16x16xf32>
    %75 = arith.addf %53, %74 : vector<16x16xf32>
    %c182 = arith.constant 182 : index
    %76 = memref.load %arg2[%c182] : memref<225xf32, #tpu.memory_space<smem>>
    %77 = vector.broadcast %76 : f32 to vector<16x16xf32>
    %78 = arith.mulf %59, %77 : vector<16x16xf32>
    %79 = arith.addf %57, %78 : vector<16x16xf32>
    %c0_32 = arith.constant 0 : index
    %c1_33 = arith.constant 1 : index
    %c0_34 = arith.constant 0 : index
    %80 = vector.load %arg9[%c0_32, %c1_33, %c0_34] : memref<5x18x18xf32, #tpu.memory_space<vmem>>, vector<1x16x16xf32>
    %81 = vector.shape_cast %80 : vector<1x16x16xf32> to vector<16x16xf32>
    %c3 = arith.constant 3 : index
    %82 = memref.load %arg2[%c3] : memref<225xf32, #tpu.memory_space<smem>>
    %83 = vector.broadcast %82 : f32 to vector<16x16xf32>
    %84 = arith.mulf %81, %83 : vector<16x16xf32>
    %85 = arith.addf %63, %84 : vector<16x16xf32>
    %c48 = arith.constant 48 : index
    %86 = memref.load %arg2[%c48] : memref<225xf32, #tpu.memory_space<smem>>
    %87 = vector.broadcast %86 : f32 to vector<16x16xf32>
    %88 = arith.mulf %81, %87 : vector<16x16xf32>
    %89 = arith.addf %67, %88 : vector<16x16xf32>
    %c93 = arith.constant 93 : index
    %90 = memref.load %arg2[%c93] : memref<225xf32, #tpu.memory_space<smem>>
    %91 = vector.broadcast %90 : f32 to vector<16x16xf32>
    %92 = arith.mulf %81, %91 : vector<16x16xf32>
    %93 = arith.addf %71, %92 : vector<16x16xf32>
    %c138 = arith.constant 138 : index
    %94 = memref.load %arg2[%c138] : memref<225xf32, #tpu.memory_space<smem>>
    %95 = vector.broadcast %94 : f32 to vector<16x16xf32>
    %96 = arith.mulf %81, %95 : vector<16x16xf32>
    %97 = arith.addf %75, %96 : vector<16x16xf32>
    %c183 = arith.constant 183 : index
    %98 = memref.load %arg2[%c183] : memref<225xf32, #tpu.memory_space<smem>>
    %99 = vector.broadcast %98 : f32 to vector<16x16xf32>
    %100 = arith.mulf %81, %99 : vector<16x16xf32>
    %101 = arith.addf %79, %100 : vector<16x16xf32>
    %c0_35 = arith.constant 0 : index
    %c1_36 = arith.constant 1 : index
    %c1_37 = arith.constant 1 : index
    %102 = vector.load %arg9[%c0_35, %c1_36, %c1_37] : memref<5x18x18xf32, #tpu.memory_space<vmem>>, vector<1x16x16xf32>
    %103 = vector.shape_cast %102 : vector<1x16x16xf32> to vector<16x16xf32>
    %c4 = arith.constant 4 : index
    %104 = memref.load %arg2[%c4] : memref<225xf32, #tpu.memory_space<smem>>
    %105 = vector.broadcast %104 : f32 to vector<16x16xf32>
    %106 = arith.mulf %103, %105 : vector<16x16xf32>
    %107 = arith.addf %85, %106 : vector<16x16xf32>
    %c49 = arith.constant 49 : index
    %108 = memref.load %arg2[%c49] : memref<225xf32, #tpu.memory_space<smem>>
    %109 = vector.broadcast %108 : f32 to vector<16x16xf32>
    %110 = arith.mulf %103, %109 : vector<16x16xf32>
    %111 = arith.addf %89, %110 : vector<16x16xf32>
    %c94 = arith.constant 94 : index
    %112 = memref.load %arg2[%c94] : memref<225xf32, #tpu.memory_space<smem>>
    %113 = vector.broadcast %112 : f32 to vector<16x16xf32>
    %114 = arith.mulf %103, %113 : vector<16x16xf32>
    %115 = arith.addf %93, %114 : vector<16x16xf32>
    %c139 = arith.constant 139 : index
    %116 = memref.load %arg2[%c139] : memref<225xf32, #tpu.memory_space<smem>>
    %117 = vector.broadcast %116 : f32 to vector<16x16xf32>
    %118 = arith.mulf %103, %117 : vector<16x16xf32>
    %119 = arith.addf %97, %118 : vector<16x16xf32>
    %c184 = arith.constant 184 : index
    %120 = memref.load %arg2[%c184] : memref<225xf32, #tpu.memory_space<smem>>
    %121 = vector.broadcast %120 : f32 to vector<16x16xf32>
    %122 = arith.mulf %103, %121 : vector<16x16xf32>
    %123 = arith.addf %101, %122 : vector<16x16xf32>
    %c0_38 = arith.constant 0 : index
    %c1_39 = arith.constant 1 : index
    %c2_40 = arith.constant 2 : index
    %124 = vector.load %arg9[%c0_38, %c1_39, %c2_40] : memref<5x18x18xf32, #tpu.memory_space<vmem>>, vector<1x16x16xf32>
    %125 = vector.shape_cast %124 : vector<1x16x16xf32> to vector<16x16xf32>
    %c5 = arith.constant 5 : index
    %126 = memref.load %arg2[%c5] : memref<225xf32, #tpu.memory_space<smem>>
    %127 = vector.broadcast %126 : f32 to vector<16x16xf32>
    %128 = arith.mulf %125, %127 : vector<16x16xf32>
    %129 = arith.addf %107, %128 : vector<16x16xf32>
    %c50 = arith.constant 50 : index
    %130 = memref.load %arg2[%c50] : memref<225xf32, #tpu.memory_space<smem>>
    %131 = vector.broadcast %130 : f32 to vector<16x16xf32>
    %132 = arith.mulf %125, %131 : vector<16x16xf32>
    %133 = arith.addf %111, %132 : vector<16x16xf32>
    %c95 = arith.constant 95 : index
    %134 = memref.load %arg2[%c95] : memref<225xf32, #tpu.memory_space<smem>>
    %135 = vector.broadcast %134 : f32 to vector<16x16xf32>
    %136 = arith.mulf %125, %135 : vector<16x16xf32>
    %137 = arith.addf %115, %136 : vector<16x16xf32>
    %c140 = arith.constant 140 : index
    %138 = memref.load %arg2[%c140] : memref<225xf32, #tpu.memory_space<smem>>
    %139 = vector.broadcast %138 : f32 to vector<16x16xf32>
    %140 = arith.mulf %125, %139 : vector<16x16xf32>
    %141 = arith.addf %119, %140 : vector<16x16xf32>
    %c185 = arith.constant 185 : index
    %142 = memref.load %arg2[%c185] : memref<225xf32, #tpu.memory_space<smem>>
    %143 = vector.broadcast %142 : f32 to vector<16x16xf32>
    %144 = arith.mulf %125, %143 : vector<16x16xf32>
    %145 = arith.addf %123, %144 : vector<16x16xf32>
    %c0_41 = arith.constant 0 : index
    %c2_42 = arith.constant 2 : index
    %c0_43 = arith.constant 0 : index
    %146 = vector.load %arg9[%c0_41, %c2_42, %c0_43] : memref<5x18x18xf32, #tpu.memory_space<vmem>>, vector<1x16x16xf32>
    %147 = vector.shape_cast %146 : vector<1x16x16xf32> to vector<16x16xf32>
    %c6 = arith.constant 6 : index
    %148 = memref.load %arg2[%c6] : memref<225xf32, #tpu.memory_space<smem>>
    %149 = vector.broadcast %148 : f32 to vector<16x16xf32>
    %150 = arith.mulf %147, %149 : vector<16x16xf32>
    %151 = arith.addf %129, %150 : vector<16x16xf32>
    %c51 = arith.constant 51 : index
    %152 = memref.load %arg2[%c51] : memref<225xf32, #tpu.memory_space<smem>>
    %153 = vector.broadcast %152 : f32 to vector<16x16xf32>
    %154 = arith.mulf %147, %153 : vector<16x16xf32>
    %155 = arith.addf %133, %154 : vector<16x16xf32>
    %c96 = arith.constant 96 : index
    %156 = memref.load %arg2[%c96] : memref<225xf32, #tpu.memory_space<smem>>
    %157 = vector.broadcast %156 : f32 to vector<16x16xf32>
    %158 = arith.mulf %147, %157 : vector<16x16xf32>
    %159 = arith.addf %137, %158 : vector<16x16xf32>
    %c141 = arith.constant 141 : index
    %160 = memref.load %arg2[%c141] : memref<225xf32, #tpu.memory_space<smem>>
    %161 = vector.broadcast %160 : f32 to vector<16x16xf32>
    %162 = arith.mulf %147, %161 : vector<16x16xf32>
    %163 = arith.addf %141, %162 : vector<16x16xf32>
    %c186 = arith.constant 186 : index
    %164 = memref.load %arg2[%c186] : memref<225xf32, #tpu.memory_space<smem>>
    %165 = vector.broadcast %164 : f32 to vector<16x16xf32>
    %166 = arith.mulf %147, %165 : vector<16x16xf32>
    %167 = arith.addf %145, %166 : vector<16x16xf32>
    %c0_44 = arith.constant 0 : index
    %c2_45 = arith.constant 2 : index
    %c1_46 = arith.constant 1 : index
    %168 = vector.load %arg9[%c0_44, %c2_45, %c1_46] : memref<5x18x18xf32, #tpu.memory_space<vmem>>, vector<1x16x16xf32>
    %169 = vector.shape_cast %168 : vector<1x16x16xf32> to vector<16x16xf32>
    %c7 = arith.constant 7 : index
    %170 = memref.load %arg2[%c7] : memref<225xf32, #tpu.memory_space<smem>>
    %171 = vector.broadcast %170 : f32 to vector<16x16xf32>
    %172 = arith.mulf %169, %171 : vector<16x16xf32>
    %173 = arith.addf %151, %172 : vector<16x16xf32>
    %c52 = arith.constant 52 : index
    %174 = memref.load %arg2[%c52] : memref<225xf32, #tpu.memory_space<smem>>
    %175 = vector.broadcast %174 : f32 to vector<16x16xf32>
    %176 = arith.mulf %169, %175 : vector<16x16xf32>
    %177 = arith.addf %155, %176 : vector<16x16xf32>
    %c97 = arith.constant 97 : index
    %178 = memref.load %arg2[%c97] : memref<225xf32, #tpu.memory_space<smem>>
    %179 = vector.broadcast %178 : f32 to vector<16x16xf32>
    %180 = arith.mulf %169, %179 : vector<16x16xf32>
    %181 = arith.addf %159, %180 : vector<16x16xf32>
    %c142 = arith.constant 142 : index
    %182 = memref.load %arg2[%c142] : memref<225xf32, #tpu.memory_space<smem>>
    %183 = vector.broadcast %182 : f32 to vector<16x16xf32>
    %184 = arith.mulf %169, %183 : vector<16x16xf32>
    %185 = arith.addf %163, %184 : vector<16x16xf32>
    %c187 = arith.constant 187 : index
    %186 = memref.load %arg2[%c187] : memref<225xf32, #tpu.memory_space<smem>>
    %187 = vector.broadcast %186 : f32 to vector<16x16xf32>
    %188 = arith.mulf %169, %187 : vector<16x16xf32>
    %189 = arith.addf %167, %188 : vector<16x16xf32>
    %c0_47 = arith.constant 0 : index
    %c2_48 = arith.constant 2 : index
    %c2_49 = arith.constant 2 : index
    %190 = vector.load %arg9[%c0_47, %c2_48, %c2_49] : memref<5x18x18xf32, #tpu.memory_space<vmem>>, vector<1x16x16xf32>
    %191 = vector.shape_cast %190 : vector<1x16x16xf32> to vector<16x16xf32>
    %c8 = arith.constant 8 : index
    %192 = memref.load %arg2[%c8] : memref<225xf32, #tpu.memory_space<smem>>
    %193 = vector.broadcast %192 : f32 to vector<16x16xf32>
    %194 = arith.mulf %191, %193 : vector<16x16xf32>
    %195 = arith.addf %173, %194 : vector<16x16xf32>
    %c53 = arith.constant 53 : index
    %196 = memref.load %arg2[%c53] : memref<225xf32, #tpu.memory_space<smem>>
    %197 = vector.broadcast %196 : f32 to vector<16x16xf32>
    %198 = arith.mulf %191, %197 : vector<16x16xf32>
    %199 = arith.addf %177, %198 : vector<16x16xf32>
    %c98 = arith.constant 98 : index
    %200 = memref.load %arg2[%c98] : memref<225xf32, #tpu.memory_space<smem>>
    %201 = vector.broadcast %200 : f32 to vector<16x16xf32>
    %202 = arith.mulf %191, %201 : vector<16x16xf32>
    %203 = arith.addf %181, %202 : vector<16x16xf32>
    %c143 = arith.constant 143 : index
    %204 = memref.load %arg2[%c143] : memref<225xf32, #tpu.memory_space<smem>>
    %205 = vector.broadcast %204 : f32 to vector<16x16xf32>
    %206 = arith.mulf %191, %205 : vector<16x16xf32>
    %207 = arith.addf %185, %206 : vector<16x16xf32>
    %c188 = arith.constant 188 : index
    %208 = memref.load %arg2[%c188] : memref<225xf32, #tpu.memory_space<smem>>
    %209 = vector.broadcast %208 : f32 to vector<16x16xf32>
    %210 = arith.mulf %191, %209 : vector<16x16xf32>
    %211 = arith.addf %189, %210 : vector<16x16xf32>
    %c1_50 = arith.constant 1 : index
    %c0_51 = arith.constant 0 : index
    %c0_52 = arith.constant 0 : index
    %212 = vector.load %arg9[%c1_50, %c0_51, %c0_52] : memref<5x18x18xf32, #tpu.memory_space<vmem>>, vector<1x16x16xf32>
    %213 = vector.shape_cast %212 : vector<1x16x16xf32> to vector<16x16xf32>
    %c9 = arith.constant 9 : index
    %214 = memref.load %arg2[%c9] : memref<225xf32, #tpu.memory_space<smem>>
    %215 = vector.broadcast %214 : f32 to vector<16x16xf32>
    %216 = arith.mulf %213, %215 : vector<16x16xf32>
    %217 = arith.addf %195, %216 : vector<16x16xf32>
    %c54 = arith.constant 54 : index
    %218 = memref.load %arg2[%c54] : memref<225xf32, #tpu.memory_space<smem>>
    %219 = vector.broadcast %218 : f32 to vector<16x16xf32>
    %220 = arith.mulf %213, %219 : vector<16x16xf32>
    %221 = arith.addf %199, %220 : vector<16x16xf32>
    %c99 = arith.constant 99 : index
    %222 = memref.load %arg2[%c99] : memref<225xf32, #tpu.memory_space<smem>>
    %223 = vector.broadcast %222 : f32 to vector<16x16xf32>
    %224 = arith.mulf %213, %223 : vector<16x16xf32>
    %225 = arith.addf %203, %224 : vector<16x16xf32>
    %c144 = arith.constant 144 : index
    %226 = memref.load %arg2[%c144] : memref<225xf32, #tpu.memory_space<smem>>
    %227 = vector.broadcast %226 : f32 to vector<16x16xf32>
    %228 = arith.mulf %213, %227 : vector<16x16xf32>
    %229 = arith.addf %207, %228 : vector<16x16xf32>
    %c189 = arith.constant 189 : index
    %230 = memref.load %arg2[%c189] : memref<225xf32, #tpu.memory_space<smem>>
    %231 = vector.broadcast %230 : f32 to vector<16x16xf32>
    %232 = arith.mulf %213, %231 : vector<16x16xf32>
    %233 = arith.addf %211, %232 : vector<16x16xf32>
    %c1_53 = arith.constant 1 : index
    %c0_54 = arith.constant 0 : index
    %c1_55 = arith.constant 1 : index
    %234 = vector.load %arg9[%c1_53, %c0_54, %c1_55] : memref<5x18x18xf32, #tpu.memory_space<vmem>>, vector<1x16x16xf32>
    %235 = vector.shape_cast %234 : vector<1x16x16xf32> to vector<16x16xf32>
    %c10 = arith.constant 10 : index
    %236 = memref.load %arg2[%c10] : memref<225xf32, #tpu.memory_space<smem>>
    %237 = vector.broadcast %236 : f32 to vector<16x16xf32>
    %238 = arith.mulf %235, %237 : vector<16x16xf32>
    %239 = arith.addf %217, %238 : vector<16x16xf32>
    %c55 = arith.constant 55 : index
    %240 = memref.load %arg2[%c55] : memref<225xf32, #tpu.memory_space<smem>>
    %241 = vector.broadcast %240 : f32 to vector<16x16xf32>
    %242 = arith.mulf %235, %241 : vector<16x16xf32>
    %243 = arith.addf %221, %242 : vector<16x16xf32>
    %c100 = arith.constant 100 : index
    %244 = memref.load %arg2[%c100] : memref<225xf32, #tpu.memory_space<smem>>
    %245 = vector.broadcast %244 : f32 to vector<16x16xf32>
    %246 = arith.mulf %235, %245 : vector<16x16xf32>
    %247 = arith.addf %225, %246 : vector<16x16xf32>
    %c145 = arith.constant 145 : index
    %248 = memref.load %arg2[%c145] : memref<225xf32, #tpu.memory_space<smem>>
    %249 = vector.broadcast %248 : f32 to vector<16x16xf32>
    %250 = arith.mulf %235, %249 : vector<16x16xf32>
    %251 = arith.addf %229, %250 : vector<16x16xf32>
    %c190 = arith.constant 190 : index
    %252 = memref.load %arg2[%c190] : memref<225xf32, #tpu.memory_space<smem>>
    %253 = vector.broadcast %252 : f32 to vector<16x16xf32>
    %254 = arith.mulf %235, %253 : vector<16x16xf32>
    %255 = arith.addf %233, %254 : vector<16x16xf32>
    %c1_56 = arith.constant 1 : index
    %c0_57 = arith.constant 0 : index
    %c2_58 = arith.constant 2 : index
    %256 = vector.load %arg9[%c1_56, %c0_57, %c2_58] : memref<5x18x18xf32, #tpu.memory_space<vmem>>, vector<1x16x16xf32>
    %257 = vector.shape_cast %256 : vector<1x16x16xf32> to vector<16x16xf32>
    %c11 = arith.constant 11 : index
    %258 = memref.load %arg2[%c11] : memref<225xf32, #tpu.memory_space<smem>>
    %259 = vector.broadcast %258 : f32 to vector<16x16xf32>
    %260 = arith.mulf %257, %259 : vector<16x16xf32>
    %261 = arith.addf %239, %260 : vector<16x16xf32>
    %c56 = arith.constant 56 : index
    %262 = memref.load %arg2[%c56] : memref<225xf32, #tpu.memory_space<smem>>
    %263 = vector.broadcast %262 : f32 to vector<16x16xf32>
    %264 = arith.mulf %257, %263 : vector<16x16xf32>
    %265 = arith.addf %243, %264 : vector<16x16xf32>
    %c101 = arith.constant 101 : index
    %266 = memref.load %arg2[%c101] : memref<225xf32, #tpu.memory_space<smem>>
    %267 = vector.broadcast %266 : f32 to vector<16x16xf32>
    %268 = arith.mulf %257, %267 : vector<16x16xf32>
    %269 = arith.addf %247, %268 : vector<16x16xf32>
    %c146 = arith.constant 146 : index
    %270 = memref.load %arg2[%c146] : memref<225xf32, #tpu.memory_space<smem>>
    %271 = vector.broadcast %270 : f32 to vector<16x16xf32>
    %272 = arith.mulf %257, %271 : vector<16x16xf32>
    %273 = arith.addf %251, %272 : vector<16x16xf32>
    %c191 = arith.constant 191 : index
    %274 = memref.load %arg2[%c191] : memref<225xf32, #tpu.memory_space<smem>>
    %275 = vector.broadcast %274 : f32 to vector<16x16xf32>
    %276 = arith.mulf %257, %275 : vector<16x16xf32>
    %277 = arith.addf %255, %276 : vector<16x16xf32>
    %c1_59 = arith.constant 1 : index
    %c1_60 = arith.constant 1 : index
    %c0_61 = arith.constant 0 : index
    %278 = vector.load %arg9[%c1_59, %c1_60, %c0_61] : memref<5x18x18xf32, #tpu.memory_space<vmem>>, vector<1x16x16xf32>
    %279 = vector.shape_cast %278 : vector<1x16x16xf32> to vector<16x16xf32>
    %c12 = arith.constant 12 : index
    %280 = memref.load %arg2[%c12] : memref<225xf32, #tpu.memory_space<smem>>
    %281 = vector.broadcast %280 : f32 to vector<16x16xf32>
    %282 = arith.mulf %279, %281 : vector<16x16xf32>
    %283 = arith.addf %261, %282 : vector<16x16xf32>
    %c57 = arith.constant 57 : index
    %284 = memref.load %arg2[%c57] : memref<225xf32, #tpu.memory_space<smem>>
    %285 = vector.broadcast %284 : f32 to vector<16x16xf32>
    %286 = arith.mulf %279, %285 : vector<16x16xf32>
    %287 = arith.addf %265, %286 : vector<16x16xf32>
    %c102 = arith.constant 102 : index
    %288 = memref.load %arg2[%c102] : memref<225xf32, #tpu.memory_space<smem>>
    %289 = vector.broadcast %288 : f32 to vector<16x16xf32>
    %290 = arith.mulf %279, %289 : vector<16x16xf32>
    %291 = arith.addf %269, %290 : vector<16x16xf32>
    %c147 = arith.constant 147 : index
    %292 = memref.load %arg2[%c147] : memref<225xf32, #tpu.memory_space<smem>>
    %293 = vector.broadcast %292 : f32 to vector<16x16xf32>
    %294 = arith.mulf %279, %293 : vector<16x16xf32>
    %295 = arith.addf %273, %294 : vector<16x16xf32>
    %c192 = arith.constant 192 : index
    %296 = memref.load %arg2[%c192] : memref<225xf32, #tpu.memory_space<smem>>
    %297 = vector.broadcast %296 : f32 to vector<16x16xf32>
    %298 = arith.mulf %279, %297 : vector<16x16xf32>
    %299 = arith.addf %277, %298 : vector<16x16xf32>
    %c1_62 = arith.constant 1 : index
    %c1_63 = arith.constant 1 : index
    %c1_64 = arith.constant 1 : index
    %300 = vector.load %arg9[%c1_62, %c1_63, %c1_64] : memref<5x18x18xf32, #tpu.memory_space<vmem>>, vector<1x16x16xf32>
    %301 = vector.shape_cast %300 : vector<1x16x16xf32> to vector<16x16xf32>
    %c13 = arith.constant 13 : index
    %302 = memref.load %arg2[%c13] : memref<225xf32, #tpu.memory_space<smem>>
    %303 = vector.broadcast %302 : f32 to vector<16x16xf32>
    %304 = arith.mulf %301, %303 : vector<16x16xf32>
    %305 = arith.addf %283, %304 : vector<16x16xf32>
    %c58 = arith.constant 58 : index
    %306 = memref.load %arg2[%c58] : memref<225xf32, #tpu.memory_space<smem>>
    %307 = vector.broadcast %306 : f32 to vector<16x16xf32>
    %308 = arith.mulf %301, %307 : vector<16x16xf32>
    %309 = arith.addf %287, %308 : vector<16x16xf32>
    %c103 = arith.constant 103 : index
    %310 = memref.load %arg2[%c103] : memref<225xf32, #tpu.memory_space<smem>>
    %311 = vector.broadcast %310 : f32 to vector<16x16xf32>
    %312 = arith.mulf %301, %311 : vector<16x16xf32>
    %313 = arith.addf %291, %312 : vector<16x16xf32>
    %c148 = arith.constant 148 : index
    %314 = memref.load %arg2[%c148] : memref<225xf32, #tpu.memory_space<smem>>
    %315 = vector.broadcast %314 : f32 to vector<16x16xf32>
    %316 = arith.mulf %301, %315 : vector<16x16xf32>
    %317 = arith.addf %295, %316 : vector<16x16xf32>
    %c193 = arith.constant 193 : index
    %318 = memref.load %arg2[%c193] : memref<225xf32, #tpu.memory_space<smem>>
    %319 = vector.broadcast %318 : f32 to vector<16x16xf32>
    %320 = arith.mulf %301, %319 : vector<16x16xf32>
    %321 = arith.addf %299, %320 : vector<16x16xf32>
    %c1_65 = arith.constant 1 : index
    %c1_66 = arith.constant 1 : index
    %c2_67 = arith.constant 2 : index
    %322 = vector.load %arg9[%c1_65, %c1_66, %c2_67] : memref<5x18x18xf32, #tpu.memory_space<vmem>>, vector<1x16x16xf32>
    %323 = vector.shape_cast %322 : vector<1x16x16xf32> to vector<16x16xf32>
    %c14 = arith.constant 14 : index
    %324 = memref.load %arg2[%c14] : memref<225xf32, #tpu.memory_space<smem>>
    %325 = vector.broadcast %324 : f32 to vector<16x16xf32>
    %326 = arith.mulf %323, %325 : vector<16x16xf32>
    %327 = arith.addf %305, %326 : vector<16x16xf32>
    %c59 = arith.constant 59 : index
    %328 = memref.load %arg2[%c59] : memref<225xf32, #tpu.memory_space<smem>>
    %329 = vector.broadcast %328 : f32 to vector<16x16xf32>
    %330 = arith.mulf %323, %329 : vector<16x16xf32>
    %331 = arith.addf %309, %330 : vector<16x16xf32>
    %c104 = arith.constant 104 : index
    %332 = memref.load %arg2[%c104] : memref<225xf32, #tpu.memory_space<smem>>
    %333 = vector.broadcast %332 : f32 to vector<16x16xf32>
    %334 = arith.mulf %323, %333 : vector<16x16xf32>
    %335 = arith.addf %313, %334 : vector<16x16xf32>
    %c149 = arith.constant 149 : index
    %336 = memref.load %arg2[%c149] : memref<225xf32, #tpu.memory_space<smem>>
    %337 = vector.broadcast %336 : f32 to vector<16x16xf32>
    %338 = arith.mulf %323, %337 : vector<16x16xf32>
    %339 = arith.addf %317, %338 : vector<16x16xf32>
    %c194 = arith.constant 194 : index
    %340 = memref.load %arg2[%c194] : memref<225xf32, #tpu.memory_space<smem>>
    %341 = vector.broadcast %340 : f32 to vector<16x16xf32>
    %342 = arith.mulf %323, %341 : vector<16x16xf32>
    %343 = arith.addf %321, %342 : vector<16x16xf32>
    %c1_68 = arith.constant 1 : index
    %c2_69 = arith.constant 2 : index
    %c0_70 = arith.constant 0 : index
    %344 = vector.load %arg9[%c1_68, %c2_69, %c0_70] : memref<5x18x18xf32, #tpu.memory_space<vmem>>, vector<1x16x16xf32>
    %345 = vector.shape_cast %344 : vector<1x16x16xf32> to vector<16x16xf32>
    %c15 = arith.constant 15 : index
    %346 = memref.load %arg2[%c15] : memref<225xf32, #tpu.memory_space<smem>>
    %347 = vector.broadcast %346 : f32 to vector<16x16xf32>
    %348 = arith.mulf %345, %347 : vector<16x16xf32>
    %349 = arith.addf %327, %348 : vector<16x16xf32>
    %c60 = arith.constant 60 : index
    %350 = memref.load %arg2[%c60] : memref<225xf32, #tpu.memory_space<smem>>
    %351 = vector.broadcast %350 : f32 to vector<16x16xf32>
    %352 = arith.mulf %345, %351 : vector<16x16xf32>
    %353 = arith.addf %331, %352 : vector<16x16xf32>
    %c105 = arith.constant 105 : index
    %354 = memref.load %arg2[%c105] : memref<225xf32, #tpu.memory_space<smem>>
    %355 = vector.broadcast %354 : f32 to vector<16x16xf32>
    %356 = arith.mulf %345, %355 : vector<16x16xf32>
    %357 = arith.addf %335, %356 : vector<16x16xf32>
    %c150 = arith.constant 150 : index
    %358 = memref.load %arg2[%c150] : memref<225xf32, #tpu.memory_space<smem>>
    %359 = vector.broadcast %358 : f32 to vector<16x16xf32>
    %360 = arith.mulf %345, %359 : vector<16x16xf32>
    %361 = arith.addf %339, %360 : vector<16x16xf32>
    %c195 = arith.constant 195 : index
    %362 = memref.load %arg2[%c195] : memref<225xf32, #tpu.memory_space<smem>>
    %363 = vector.broadcast %362 : f32 to vector<16x16xf32>
    %364 = arith.mulf %345, %363 : vector<16x16xf32>
    %365 = arith.addf %343, %364 : vector<16x16xf32>
    %c1_71 = arith.constant 1 : index
    %c2_72 = arith.constant 2 : index
    %c1_73 = arith.constant 1 : index
    %366 = vector.load %arg9[%c1_71, %c2_72, %c1_73] : memref<5x18x18xf32, #tpu.memory_space<vmem>>, vector<1x16x16xf32>
    %367 = vector.shape_cast %366 : vector<1x16x16xf32> to vector<16x16xf32>
    %c16 = arith.constant 16 : index
    %368 = memref.load %arg2[%c16] : memref<225xf32, #tpu.memory_space<smem>>
    %369 = vector.broadcast %368 : f32 to vector<16x16xf32>
    %370 = arith.mulf %367, %369 : vector<16x16xf32>
    %371 = arith.addf %349, %370 : vector<16x16xf32>
    %c61 = arith.constant 61 : index
    %372 = memref.load %arg2[%c61] : memref<225xf32, #tpu.memory_space<smem>>
    %373 = vector.broadcast %372 : f32 to vector<16x16xf32>
    %374 = arith.mulf %367, %373 : vector<16x16xf32>
    %375 = arith.addf %353, %374 : vector<16x16xf32>
    %c106 = arith.constant 106 : index
    %376 = memref.load %arg2[%c106] : memref<225xf32, #tpu.memory_space<smem>>
    %377 = vector.broadcast %376 : f32 to vector<16x16xf32>
    %378 = arith.mulf %367, %377 : vector<16x16xf32>
    %379 = arith.addf %357, %378 : vector<16x16xf32>
    %c151 = arith.constant 151 : index
    %380 = memref.load %arg2[%c151] : memref<225xf32, #tpu.memory_space<smem>>
    %381 = vector.broadcast %380 : f32 to vector<16x16xf32>
    %382 = arith.mulf %367, %381 : vector<16x16xf32>
    %383 = arith.addf %361, %382 : vector<16x16xf32>
    %c196 = arith.constant 196 : index
    %384 = memref.load %arg2[%c196] : memref<225xf32, #tpu.memory_space<smem>>
    %385 = vector.broadcast %384 : f32 to vector<16x16xf32>
    %386 = arith.mulf %367, %385 : vector<16x16xf32>
    %387 = arith.addf %365, %386 : vector<16x16xf32>
    %c1_74 = arith.constant 1 : index
    %c2_75 = arith.constant 2 : index
    %c2_76 = arith.constant 2 : index
    %388 = vector.load %arg9[%c1_74, %c2_75, %c2_76] : memref<5x18x18xf32, #tpu.memory_space<vmem>>, vector<1x16x16xf32>
    %389 = vector.shape_cast %388 : vector<1x16x16xf32> to vector<16x16xf32>
    %c17 = arith.constant 17 : index
    %390 = memref.load %arg2[%c17] : memref<225xf32, #tpu.memory_space<smem>>
    %391 = vector.broadcast %390 : f32 to vector<16x16xf32>
    %392 = arith.mulf %389, %391 : vector<16x16xf32>
    %393 = arith.addf %371, %392 : vector<16x16xf32>
    %c62 = arith.constant 62 : index
    %394 = memref.load %arg2[%c62] : memref<225xf32, #tpu.memory_space<smem>>
    %395 = vector.broadcast %394 : f32 to vector<16x16xf32>
    %396 = arith.mulf %389, %395 : vector<16x16xf32>
    %397 = arith.addf %375, %396 : vector<16x16xf32>
    %c107 = arith.constant 107 : index
    %398 = memref.load %arg2[%c107] : memref<225xf32, #tpu.memory_space<smem>>
    %399 = vector.broadcast %398 : f32 to vector<16x16xf32>
    %400 = arith.mulf %389, %399 : vector<16x16xf32>
    %401 = arith.addf %379, %400 : vector<16x16xf32>
    %c152 = arith.constant 152 : index
    %402 = memref.load %arg2[%c152] : memref<225xf32, #tpu.memory_space<smem>>
    %403 = vector.broadcast %402 : f32 to vector<16x16xf32>
    %404 = arith.mulf %389, %403 : vector<16x16xf32>
    %405 = arith.addf %383, %404 : vector<16x16xf32>
    %c197 = arith.constant 197 : index
    %406 = memref.load %arg2[%c197] : memref<225xf32, #tpu.memory_space<smem>>
    %407 = vector.broadcast %406 : f32 to vector<16x16xf32>
    %408 = arith.mulf %389, %407 : vector<16x16xf32>
    %409 = arith.addf %387, %408 : vector<16x16xf32>
    %c2_77 = arith.constant 2 : index
    %c0_78 = arith.constant 0 : index
    %c0_79 = arith.constant 0 : index
    %410 = vector.load %arg9[%c2_77, %c0_78, %c0_79] : memref<5x18x18xf32, #tpu.memory_space<vmem>>, vector<1x16x16xf32>
    %411 = vector.shape_cast %410 : vector<1x16x16xf32> to vector<16x16xf32>
    %c18 = arith.constant 18 : index
    %412 = memref.load %arg2[%c18] : memref<225xf32, #tpu.memory_space<smem>>
    %413 = vector.broadcast %412 : f32 to vector<16x16xf32>
    %414 = arith.mulf %411, %413 : vector<16x16xf32>
    %415 = arith.addf %393, %414 : vector<16x16xf32>
    %c63 = arith.constant 63 : index
    %416 = memref.load %arg2[%c63] : memref<225xf32, #tpu.memory_space<smem>>
    %417 = vector.broadcast %416 : f32 to vector<16x16xf32>
    %418 = arith.mulf %411, %417 : vector<16x16xf32>
    %419 = arith.addf %397, %418 : vector<16x16xf32>
    %c108 = arith.constant 108 : index
    %420 = memref.load %arg2[%c108] : memref<225xf32, #tpu.memory_space<smem>>
    %421 = vector.broadcast %420 : f32 to vector<16x16xf32>
    %422 = arith.mulf %411, %421 : vector<16x16xf32>
    %423 = arith.addf %401, %422 : vector<16x16xf32>
    %c153 = arith.constant 153 : index
    %424 = memref.load %arg2[%c153] : memref<225xf32, #tpu.memory_space<smem>>
    %425 = vector.broadcast %424 : f32 to vector<16x16xf32>
    %426 = arith.mulf %411, %425 : vector<16x16xf32>
    %427 = arith.addf %405, %426 : vector<16x16xf32>
    %c198 = arith.constant 198 : index
    %428 = memref.load %arg2[%c198] : memref<225xf32, #tpu.memory_space<smem>>
    %429 = vector.broadcast %428 : f32 to vector<16x16xf32>
    %430 = arith.mulf %411, %429 : vector<16x16xf32>
    %431 = arith.addf %409, %430 : vector<16x16xf32>
    %c2_80 = arith.constant 2 : index
    %c0_81 = arith.constant 0 : index
    %c1_82 = arith.constant 1 : index
    %432 = vector.load %arg9[%c2_80, %c0_81, %c1_82] : memref<5x18x18xf32, #tpu.memory_space<vmem>>, vector<1x16x16xf32>
    %433 = vector.shape_cast %432 : vector<1x16x16xf32> to vector<16x16xf32>
    %c19 = arith.constant 19 : index
    %434 = memref.load %arg2[%c19] : memref<225xf32, #tpu.memory_space<smem>>
    %435 = vector.broadcast %434 : f32 to vector<16x16xf32>
    %436 = arith.mulf %433, %435 : vector<16x16xf32>
    %437 = arith.addf %415, %436 : vector<16x16xf32>
    %c64 = arith.constant 64 : index
    %438 = memref.load %arg2[%c64] : memref<225xf32, #tpu.memory_space<smem>>
    %439 = vector.broadcast %438 : f32 to vector<16x16xf32>
    %440 = arith.mulf %433, %439 : vector<16x16xf32>
    %441 = arith.addf %419, %440 : vector<16x16xf32>
    %c109 = arith.constant 109 : index
    %442 = memref.load %arg2[%c109] : memref<225xf32, #tpu.memory_space<smem>>
    %443 = vector.broadcast %442 : f32 to vector<16x16xf32>
    %444 = arith.mulf %433, %443 : vector<16x16xf32>
    %445 = arith.addf %423, %444 : vector<16x16xf32>
    %c154 = arith.constant 154 : index
    %446 = memref.load %arg2[%c154] : memref<225xf32, #tpu.memory_space<smem>>
    %447 = vector.broadcast %446 : f32 to vector<16x16xf32>
    %448 = arith.mulf %433, %447 : vector<16x16xf32>
    %449 = arith.addf %427, %448 : vector<16x16xf32>
    %c199 = arith.constant 199 : index
    %450 = memref.load %arg2[%c199] : memref<225xf32, #tpu.memory_space<smem>>
    %451 = vector.broadcast %450 : f32 to vector<16x16xf32>
    %452 = arith.mulf %433, %451 : vector<16x16xf32>
    %453 = arith.addf %431, %452 : vector<16x16xf32>
    %c2_83 = arith.constant 2 : index
    %c0_84 = arith.constant 0 : index
    %c2_85 = arith.constant 2 : index
    %454 = vector.load %arg9[%c2_83, %c0_84, %c2_85] : memref<5x18x18xf32, #tpu.memory_space<vmem>>, vector<1x16x16xf32>
    %455 = vector.shape_cast %454 : vector<1x16x16xf32> to vector<16x16xf32>
    %c20 = arith.constant 20 : index
    %456 = memref.load %arg2[%c20] : memref<225xf32, #tpu.memory_space<smem>>
    %457 = vector.broadcast %456 : f32 to vector<16x16xf32>
    %458 = arith.mulf %455, %457 : vector<16x16xf32>
    %459 = arith.addf %437, %458 : vector<16x16xf32>
    %c65 = arith.constant 65 : index
    %460 = memref.load %arg2[%c65] : memref<225xf32, #tpu.memory_space<smem>>
    %461 = vector.broadcast %460 : f32 to vector<16x16xf32>
    %462 = arith.mulf %455, %461 : vector<16x16xf32>
    %463 = arith.addf %441, %462 : vector<16x16xf32>
    %c110 = arith.constant 110 : index
    %464 = memref.load %arg2[%c110] : memref<225xf32, #tpu.memory_space<smem>>
    %465 = vector.broadcast %464 : f32 to vector<16x16xf32>
    %466 = arith.mulf %455, %465 : vector<16x16xf32>
    %467 = arith.addf %445, %466 : vector<16x16xf32>
    %c155 = arith.constant 155 : index
    %468 = memref.load %arg2[%c155] : memref<225xf32, #tpu.memory_space<smem>>
    %469 = vector.broadcast %468 : f32 to vector<16x16xf32>
    %470 = arith.mulf %455, %469 : vector<16x16xf32>
    %471 = arith.addf %449, %470 : vector<16x16xf32>
    %c200 = arith.constant 200 : index
    %472 = memref.load %arg2[%c200] : memref<225xf32, #tpu.memory_space<smem>>
    %473 = vector.broadcast %472 : f32 to vector<16x16xf32>
    %474 = arith.mulf %455, %473 : vector<16x16xf32>
    %475 = arith.addf %453, %474 : vector<16x16xf32>
    %c2_86 = arith.constant 2 : index
    %c1_87 = arith.constant 1 : index
    %c0_88 = arith.constant 0 : index
    %476 = vector.load %arg9[%c2_86, %c1_87, %c0_88] : memref<5x18x18xf32, #tpu.memory_space<vmem>>, vector<1x16x16xf32>
    %477 = vector.shape_cast %476 : vector<1x16x16xf32> to vector<16x16xf32>
    %c21 = arith.constant 21 : index
    %478 = memref.load %arg2[%c21] : memref<225xf32, #tpu.memory_space<smem>>
    %479 = vector.broadcast %478 : f32 to vector<16x16xf32>
    %480 = arith.mulf %477, %479 : vector<16x16xf32>
    %481 = arith.addf %459, %480 : vector<16x16xf32>
    %c66 = arith.constant 66 : index
    %482 = memref.load %arg2[%c66] : memref<225xf32, #tpu.memory_space<smem>>
    %483 = vector.broadcast %482 : f32 to vector<16x16xf32>
    %484 = arith.mulf %477, %483 : vector<16x16xf32>
    %485 = arith.addf %463, %484 : vector<16x16xf32>
    %c111 = arith.constant 111 : index
    %486 = memref.load %arg2[%c111] : memref<225xf32, #tpu.memory_space<smem>>
    %487 = vector.broadcast %486 : f32 to vector<16x16xf32>
    %488 = arith.mulf %477, %487 : vector<16x16xf32>
    %489 = arith.addf %467, %488 : vector<16x16xf32>
    %c156 = arith.constant 156 : index
    %490 = memref.load %arg2[%c156] : memref<225xf32, #tpu.memory_space<smem>>
    %491 = vector.broadcast %490 : f32 to vector<16x16xf32>
    %492 = arith.mulf %477, %491 : vector<16x16xf32>
    %493 = arith.addf %471, %492 : vector<16x16xf32>
    %c201 = arith.constant 201 : index
    %494 = memref.load %arg2[%c201] : memref<225xf32, #tpu.memory_space<smem>>
    %495 = vector.broadcast %494 : f32 to vector<16x16xf32>
    %496 = arith.mulf %477, %495 : vector<16x16xf32>
    %497 = arith.addf %475, %496 : vector<16x16xf32>
    %c2_89 = arith.constant 2 : index
    %c1_90 = arith.constant 1 : index
    %c1_91 = arith.constant 1 : index
    %498 = vector.load %arg9[%c2_89, %c1_90, %c1_91] : memref<5x18x18xf32, #tpu.memory_space<vmem>>, vector<1x16x16xf32>
    %499 = vector.shape_cast %498 : vector<1x16x16xf32> to vector<16x16xf32>
    %c22 = arith.constant 22 : index
    %500 = memref.load %arg2[%c22] : memref<225xf32, #tpu.memory_space<smem>>
    %501 = vector.broadcast %500 : f32 to vector<16x16xf32>
    %502 = arith.mulf %499, %501 : vector<16x16xf32>
    %503 = arith.addf %481, %502 : vector<16x16xf32>
    %c67 = arith.constant 67 : index
    %504 = memref.load %arg2[%c67] : memref<225xf32, #tpu.memory_space<smem>>
    %505 = vector.broadcast %504 : f32 to vector<16x16xf32>
    %506 = arith.mulf %499, %505 : vector<16x16xf32>
    %507 = arith.addf %485, %506 : vector<16x16xf32>
    %c112 = arith.constant 112 : index
    %508 = memref.load %arg2[%c112] : memref<225xf32, #tpu.memory_space<smem>>
    %509 = vector.broadcast %508 : f32 to vector<16x16xf32>
    %510 = arith.mulf %499, %509 : vector<16x16xf32>
    %511 = arith.addf %489, %510 : vector<16x16xf32>
    %c157 = arith.constant 157 : index
    %512 = memref.load %arg2[%c157] : memref<225xf32, #tpu.memory_space<smem>>
    %513 = vector.broadcast %512 : f32 to vector<16x16xf32>
    %514 = arith.mulf %499, %513 : vector<16x16xf32>
    %515 = arith.addf %493, %514 : vector<16x16xf32>
    %c202 = arith.constant 202 : index
    %516 = memref.load %arg2[%c202] : memref<225xf32, #tpu.memory_space<smem>>
    %517 = vector.broadcast %516 : f32 to vector<16x16xf32>
    %518 = arith.mulf %499, %517 : vector<16x16xf32>
    %519 = arith.addf %497, %518 : vector<16x16xf32>
    %c2_92 = arith.constant 2 : index
    %c1_93 = arith.constant 1 : index
    %c2_94 = arith.constant 2 : index
    %520 = vector.load %arg9[%c2_92, %c1_93, %c2_94] : memref<5x18x18xf32, #tpu.memory_space<vmem>>, vector<1x16x16xf32>
    %521 = vector.shape_cast %520 : vector<1x16x16xf32> to vector<16x16xf32>
    %c23 = arith.constant 23 : index
    %522 = memref.load %arg2[%c23] : memref<225xf32, #tpu.memory_space<smem>>
    %523 = vector.broadcast %522 : f32 to vector<16x16xf32>
    %524 = arith.mulf %521, %523 : vector<16x16xf32>
    %525 = arith.addf %503, %524 : vector<16x16xf32>
    %c68 = arith.constant 68 : index
    %526 = memref.load %arg2[%c68] : memref<225xf32, #tpu.memory_space<smem>>
    %527 = vector.broadcast %526 : f32 to vector<16x16xf32>
    %528 = arith.mulf %521, %527 : vector<16x16xf32>
    %529 = arith.addf %507, %528 : vector<16x16xf32>
    %c113 = arith.constant 113 : index
    %530 = memref.load %arg2[%c113] : memref<225xf32, #tpu.memory_space<smem>>
    %531 = vector.broadcast %530 : f32 to vector<16x16xf32>
    %532 = arith.mulf %521, %531 : vector<16x16xf32>
    %533 = arith.addf %511, %532 : vector<16x16xf32>
    %c158 = arith.constant 158 : index
    %534 = memref.load %arg2[%c158] : memref<225xf32, #tpu.memory_space<smem>>
    %535 = vector.broadcast %534 : f32 to vector<16x16xf32>
    %536 = arith.mulf %521, %535 : vector<16x16xf32>
    %537 = arith.addf %515, %536 : vector<16x16xf32>
    %c203 = arith.constant 203 : index
    %538 = memref.load %arg2[%c203] : memref<225xf32, #tpu.memory_space<smem>>
    %539 = vector.broadcast %538 : f32 to vector<16x16xf32>
    %540 = arith.mulf %521, %539 : vector<16x16xf32>
    %541 = arith.addf %519, %540 : vector<16x16xf32>
    %c2_95 = arith.constant 2 : index
    %c2_96 = arith.constant 2 : index
    %c0_97 = arith.constant 0 : index
    %542 = vector.load %arg9[%c2_95, %c2_96, %c0_97] : memref<5x18x18xf32, #tpu.memory_space<vmem>>, vector<1x16x16xf32>
    %543 = vector.shape_cast %542 : vector<1x16x16xf32> to vector<16x16xf32>
    %c24 = arith.constant 24 : index
    %544 = memref.load %arg2[%c24] : memref<225xf32, #tpu.memory_space<smem>>
    %545 = vector.broadcast %544 : f32 to vector<16x16xf32>
    %546 = arith.mulf %543, %545 : vector<16x16xf32>
    %547 = arith.addf %525, %546 : vector<16x16xf32>
    %c69 = arith.constant 69 : index
    %548 = memref.load %arg2[%c69] : memref<225xf32, #tpu.memory_space<smem>>
    %549 = vector.broadcast %548 : f32 to vector<16x16xf32>
    %550 = arith.mulf %543, %549 : vector<16x16xf32>
    %551 = arith.addf %529, %550 : vector<16x16xf32>
    %c114 = arith.constant 114 : index
    %552 = memref.load %arg2[%c114] : memref<225xf32, #tpu.memory_space<smem>>
    %553 = vector.broadcast %552 : f32 to vector<16x16xf32>
    %554 = arith.mulf %543, %553 : vector<16x16xf32>
    %555 = arith.addf %533, %554 : vector<16x16xf32>
    %c159 = arith.constant 159 : index
    %556 = memref.load %arg2[%c159] : memref<225xf32, #tpu.memory_space<smem>>
    %557 = vector.broadcast %556 : f32 to vector<16x16xf32>
    %558 = arith.mulf %543, %557 : vector<16x16xf32>
    %559 = arith.addf %537, %558 : vector<16x16xf32>
    %c204 = arith.constant 204 : index
    %560 = memref.load %arg2[%c204] : memref<225xf32, #tpu.memory_space<smem>>
    %561 = vector.broadcast %560 : f32 to vector<16x16xf32>
    %562 = arith.mulf %543, %561 : vector<16x16xf32>
    %563 = arith.addf %541, %562 : vector<16x16xf32>
    %c2_98 = arith.constant 2 : index
    %c2_99 = arith.constant 2 : index
    %c1_100 = arith.constant 1 : index
    %564 = vector.load %arg9[%c2_98, %c2_99, %c1_100] : memref<5x18x18xf32, #tpu.memory_space<vmem>>, vector<1x16x16xf32>
    %565 = vector.shape_cast %564 : vector<1x16x16xf32> to vector<16x16xf32>
    %c25 = arith.constant 25 : index
    %566 = memref.load %arg2[%c25] : memref<225xf32, #tpu.memory_space<smem>>
    %567 = vector.broadcast %566 : f32 to vector<16x16xf32>
    %568 = arith.mulf %565, %567 : vector<16x16xf32>
    %569 = arith.addf %547, %568 : vector<16x16xf32>
    %c70 = arith.constant 70 : index
    %570 = memref.load %arg2[%c70] : memref<225xf32, #tpu.memory_space<smem>>
    %571 = vector.broadcast %570 : f32 to vector<16x16xf32>
    %572 = arith.mulf %565, %571 : vector<16x16xf32>
    %573 = arith.addf %551, %572 : vector<16x16xf32>
    %c115 = arith.constant 115 : index
    %574 = memref.load %arg2[%c115] : memref<225xf32, #tpu.memory_space<smem>>
    %575 = vector.broadcast %574 : f32 to vector<16x16xf32>
    %576 = arith.mulf %565, %575 : vector<16x16xf32>
    %577 = arith.addf %555, %576 : vector<16x16xf32>
    %c160 = arith.constant 160 : index
    %578 = memref.load %arg2[%c160] : memref<225xf32, #tpu.memory_space<smem>>
    %579 = vector.broadcast %578 : f32 to vector<16x16xf32>
    %580 = arith.mulf %565, %579 : vector<16x16xf32>
    %581 = arith.addf %559, %580 : vector<16x16xf32>
    %c205 = arith.constant 205 : index
    %582 = memref.load %arg2[%c205] : memref<225xf32, #tpu.memory_space<smem>>
    %583 = vector.broadcast %582 : f32 to vector<16x16xf32>
    %584 = arith.mulf %565, %583 : vector<16x16xf32>
    %585 = arith.addf %563, %584 : vector<16x16xf32>
    %c2_101 = arith.constant 2 : index
    %c2_102 = arith.constant 2 : index
    %c2_103 = arith.constant 2 : index
    %586 = vector.load %arg9[%c2_101, %c2_102, %c2_103] : memref<5x18x18xf32, #tpu.memory_space<vmem>>, vector<1x16x16xf32>
    %587 = vector.shape_cast %586 : vector<1x16x16xf32> to vector<16x16xf32>
    %c26 = arith.constant 26 : index
    %588 = memref.load %arg2[%c26] : memref<225xf32, #tpu.memory_space<smem>>
    %589 = vector.broadcast %588 : f32 to vector<16x16xf32>
    %590 = arith.mulf %587, %589 : vector<16x16xf32>
    %591 = arith.addf %569, %590 : vector<16x16xf32>
    %c71 = arith.constant 71 : index
    %592 = memref.load %arg2[%c71] : memref<225xf32, #tpu.memory_space<smem>>
    %593 = vector.broadcast %592 : f32 to vector<16x16xf32>
    %594 = arith.mulf %587, %593 : vector<16x16xf32>
    %595 = arith.addf %573, %594 : vector<16x16xf32>
    %c116 = arith.constant 116 : index
    %596 = memref.load %arg2[%c116] : memref<225xf32, #tpu.memory_space<smem>>
    %597 = vector.broadcast %596 : f32 to vector<16x16xf32>
    %598 = arith.mulf %587, %597 : vector<16x16xf32>
    %599 = arith.addf %577, %598 : vector<16x16xf32>
    %c161 = arith.constant 161 : index
    %600 = memref.load %arg2[%c161] : memref<225xf32, #tpu.memory_space<smem>>
    %601 = vector.broadcast %600 : f32 to vector<16x16xf32>
    %602 = arith.mulf %587, %601 : vector<16x16xf32>
    %603 = arith.addf %581, %602 : vector<16x16xf32>
    %c206 = arith.constant 206 : index
    %604 = memref.load %arg2[%c206] : memref<225xf32, #tpu.memory_space<smem>>
    %605 = vector.broadcast %604 : f32 to vector<16x16xf32>
    %606 = arith.mulf %587, %605 : vector<16x16xf32>
    %607 = arith.addf %585, %606 : vector<16x16xf32>
    %c3_104 = arith.constant 3 : index
    %c0_105 = arith.constant 0 : index
    %c0_106 = arith.constant 0 : index
    %608 = vector.load %arg9[%c3_104, %c0_105, %c0_106] : memref<5x18x18xf32, #tpu.memory_space<vmem>>, vector<1x16x16xf32>
    %609 = vector.shape_cast %608 : vector<1x16x16xf32> to vector<16x16xf32>
    %c27 = arith.constant 27 : index
    %610 = memref.load %arg2[%c27] : memref<225xf32, #tpu.memory_space<smem>>
    %611 = vector.broadcast %610 : f32 to vector<16x16xf32>
    %612 = arith.mulf %609, %611 : vector<16x16xf32>
    %613 = arith.addf %591, %612 : vector<16x16xf32>
    %c72 = arith.constant 72 : index
    %614 = memref.load %arg2[%c72] : memref<225xf32, #tpu.memory_space<smem>>
    %615 = vector.broadcast %614 : f32 to vector<16x16xf32>
    %616 = arith.mulf %609, %615 : vector<16x16xf32>
    %617 = arith.addf %595, %616 : vector<16x16xf32>
    %c117 = arith.constant 117 : index
    %618 = memref.load %arg2[%c117] : memref<225xf32, #tpu.memory_space<smem>>
    %619 = vector.broadcast %618 : f32 to vector<16x16xf32>
    %620 = arith.mulf %609, %619 : vector<16x16xf32>
    %621 = arith.addf %599, %620 : vector<16x16xf32>
    %c162 = arith.constant 162 : index
    %622 = memref.load %arg2[%c162] : memref<225xf32, #tpu.memory_space<smem>>
    %623 = vector.broadcast %622 : f32 to vector<16x16xf32>
    %624 = arith.mulf %609, %623 : vector<16x16xf32>
    %625 = arith.addf %603, %624 : vector<16x16xf32>
    %c207 = arith.constant 207 : index
    %626 = memref.load %arg2[%c207] : memref<225xf32, #tpu.memory_space<smem>>
    %627 = vector.broadcast %626 : f32 to vector<16x16xf32>
    %628 = arith.mulf %609, %627 : vector<16x16xf32>
    %629 = arith.addf %607, %628 : vector<16x16xf32>
    %c3_107 = arith.constant 3 : index
    %c0_108 = arith.constant 0 : index
    %c1_109 = arith.constant 1 : index
    %630 = vector.load %arg9[%c3_107, %c0_108, %c1_109] : memref<5x18x18xf32, #tpu.memory_space<vmem>>, vector<1x16x16xf32>
    %631 = vector.shape_cast %630 : vector<1x16x16xf32> to vector<16x16xf32>
    %c28 = arith.constant 28 : index
    %632 = memref.load %arg2[%c28] : memref<225xf32, #tpu.memory_space<smem>>
    %633 = vector.broadcast %632 : f32 to vector<16x16xf32>
    %634 = arith.mulf %631, %633 : vector<16x16xf32>
    %635 = arith.addf %613, %634 : vector<16x16xf32>
    %c73 = arith.constant 73 : index
    %636 = memref.load %arg2[%c73] : memref<225xf32, #tpu.memory_space<smem>>
    %637 = vector.broadcast %636 : f32 to vector<16x16xf32>
    %638 = arith.mulf %631, %637 : vector<16x16xf32>
    %639 = arith.addf %617, %638 : vector<16x16xf32>
    %c118 = arith.constant 118 : index
    %640 = memref.load %arg2[%c118] : memref<225xf32, #tpu.memory_space<smem>>
    %641 = vector.broadcast %640 : f32 to vector<16x16xf32>
    %642 = arith.mulf %631, %641 : vector<16x16xf32>
    %643 = arith.addf %621, %642 : vector<16x16xf32>
    %c163 = arith.constant 163 : index
    %644 = memref.load %arg2[%c163] : memref<225xf32, #tpu.memory_space<smem>>
    %645 = vector.broadcast %644 : f32 to vector<16x16xf32>
    %646 = arith.mulf %631, %645 : vector<16x16xf32>
    %647 = arith.addf %625, %646 : vector<16x16xf32>
    %c208 = arith.constant 208 : index
    %648 = memref.load %arg2[%c208] : memref<225xf32, #tpu.memory_space<smem>>
    %649 = vector.broadcast %648 : f32 to vector<16x16xf32>
    %650 = arith.mulf %631, %649 : vector<16x16xf32>
    %651 = arith.addf %629, %650 : vector<16x16xf32>
    %c3_110 = arith.constant 3 : index
    %c0_111 = arith.constant 0 : index
    %c2_112 = arith.constant 2 : index
    %652 = vector.load %arg9[%c3_110, %c0_111, %c2_112] : memref<5x18x18xf32, #tpu.memory_space<vmem>>, vector<1x16x16xf32>
    %653 = vector.shape_cast %652 : vector<1x16x16xf32> to vector<16x16xf32>
    %c29 = arith.constant 29 : index
    %654 = memref.load %arg2[%c29] : memref<225xf32, #tpu.memory_space<smem>>
    %655 = vector.broadcast %654 : f32 to vector<16x16xf32>
    %656 = arith.mulf %653, %655 : vector<16x16xf32>
    %657 = arith.addf %635, %656 : vector<16x16xf32>
    %c74 = arith.constant 74 : index
    %658 = memref.load %arg2[%c74] : memref<225xf32, #tpu.memory_space<smem>>
    %659 = vector.broadcast %658 : f32 to vector<16x16xf32>
    %660 = arith.mulf %653, %659 : vector<16x16xf32>
    %661 = arith.addf %639, %660 : vector<16x16xf32>
    %c119 = arith.constant 119 : index
    %662 = memref.load %arg2[%c119] : memref<225xf32, #tpu.memory_space<smem>>
    %663 = vector.broadcast %662 : f32 to vector<16x16xf32>
    %664 = arith.mulf %653, %663 : vector<16x16xf32>
    %665 = arith.addf %643, %664 : vector<16x16xf32>
    %c164 = arith.constant 164 : index
    %666 = memref.load %arg2[%c164] : memref<225xf32, #tpu.memory_space<smem>>
    %667 = vector.broadcast %666 : f32 to vector<16x16xf32>
    %668 = arith.mulf %653, %667 : vector<16x16xf32>
    %669 = arith.addf %647, %668 : vector<16x16xf32>
    %c209 = arith.constant 209 : index
    %670 = memref.load %arg2[%c209] : memref<225xf32, #tpu.memory_space<smem>>
    %671 = vector.broadcast %670 : f32 to vector<16x16xf32>
    %672 = arith.mulf %653, %671 : vector<16x16xf32>
    %673 = arith.addf %651, %672 : vector<16x16xf32>
    %c3_113 = arith.constant 3 : index
    %c1_114 = arith.constant 1 : index
    %c0_115 = arith.constant 0 : index
    %674 = vector.load %arg9[%c3_113, %c1_114, %c0_115] : memref<5x18x18xf32, #tpu.memory_space<vmem>>, vector<1x16x16xf32>
    %675 = vector.shape_cast %674 : vector<1x16x16xf32> to vector<16x16xf32>
    %c30 = arith.constant 30 : index
    %676 = memref.load %arg2[%c30] : memref<225xf32, #tpu.memory_space<smem>>
    %677 = vector.broadcast %676 : f32 to vector<16x16xf32>
    %678 = arith.mulf %675, %677 : vector<16x16xf32>
    %679 = arith.addf %657, %678 : vector<16x16xf32>
    %c75 = arith.constant 75 : index
    %680 = memref.load %arg2[%c75] : memref<225xf32, #tpu.memory_space<smem>>
    %681 = vector.broadcast %680 : f32 to vector<16x16xf32>
    %682 = arith.mulf %675, %681 : vector<16x16xf32>
    %683 = arith.addf %661, %682 : vector<16x16xf32>
    %c120 = arith.constant 120 : index
    %684 = memref.load %arg2[%c120] : memref<225xf32, #tpu.memory_space<smem>>
    %685 = vector.broadcast %684 : f32 to vector<16x16xf32>
    %686 = arith.mulf %675, %685 : vector<16x16xf32>
    %687 = arith.addf %665, %686 : vector<16x16xf32>
    %c165 = arith.constant 165 : index
    %688 = memref.load %arg2[%c165] : memref<225xf32, #tpu.memory_space<smem>>
    %689 = vector.broadcast %688 : f32 to vector<16x16xf32>
    %690 = arith.mulf %675, %689 : vector<16x16xf32>
    %691 = arith.addf %669, %690 : vector<16x16xf32>
    %c210 = arith.constant 210 : index
    %692 = memref.load %arg2[%c210] : memref<225xf32, #tpu.memory_space<smem>>
    %693 = vector.broadcast %692 : f32 to vector<16x16xf32>
    %694 = arith.mulf %675, %693 : vector<16x16xf32>
    %695 = arith.addf %673, %694 : vector<16x16xf32>
    %c3_116 = arith.constant 3 : index
    %c1_117 = arith.constant 1 : index
    %c1_118 = arith.constant 1 : index
    %696 = vector.load %arg9[%c3_116, %c1_117, %c1_118] : memref<5x18x18xf32, #tpu.memory_space<vmem>>, vector<1x16x16xf32>
    %697 = vector.shape_cast %696 : vector<1x16x16xf32> to vector<16x16xf32>
    %c31 = arith.constant 31 : index
    %698 = memref.load %arg2[%c31] : memref<225xf32, #tpu.memory_space<smem>>
    %699 = vector.broadcast %698 : f32 to vector<16x16xf32>
    %700 = arith.mulf %697, %699 : vector<16x16xf32>
    %701 = arith.addf %679, %700 : vector<16x16xf32>
    %c76 = arith.constant 76 : index
    %702 = memref.load %arg2[%c76] : memref<225xf32, #tpu.memory_space<smem>>
    %703 = vector.broadcast %702 : f32 to vector<16x16xf32>
    %704 = arith.mulf %697, %703 : vector<16x16xf32>
    %705 = arith.addf %683, %704 : vector<16x16xf32>
    %c121 = arith.constant 121 : index
    %706 = memref.load %arg2[%c121] : memref<225xf32, #tpu.memory_space<smem>>
    %707 = vector.broadcast %706 : f32 to vector<16x16xf32>
    %708 = arith.mulf %697, %707 : vector<16x16xf32>
    %709 = arith.addf %687, %708 : vector<16x16xf32>
    %c166 = arith.constant 166 : index
    %710 = memref.load %arg2[%c166] : memref<225xf32, #tpu.memory_space<smem>>
    %711 = vector.broadcast %710 : f32 to vector<16x16xf32>
    %712 = arith.mulf %697, %711 : vector<16x16xf32>
    %713 = arith.addf %691, %712 : vector<16x16xf32>
    %c211 = arith.constant 211 : index
    %714 = memref.load %arg2[%c211] : memref<225xf32, #tpu.memory_space<smem>>
    %715 = vector.broadcast %714 : f32 to vector<16x16xf32>
    %716 = arith.mulf %697, %715 : vector<16x16xf32>
    %717 = arith.addf %695, %716 : vector<16x16xf32>
    %c3_119 = arith.constant 3 : index
    %c1_120 = arith.constant 1 : index
    %c2_121 = arith.constant 2 : index
    %718 = vector.load %arg9[%c3_119, %c1_120, %c2_121] : memref<5x18x18xf32, #tpu.memory_space<vmem>>, vector<1x16x16xf32>
    %719 = vector.shape_cast %718 : vector<1x16x16xf32> to vector<16x16xf32>
    %c32 = arith.constant 32 : index
    %720 = memref.load %arg2[%c32] : memref<225xf32, #tpu.memory_space<smem>>
    %721 = vector.broadcast %720 : f32 to vector<16x16xf32>
    %722 = arith.mulf %719, %721 : vector<16x16xf32>
    %723 = arith.addf %701, %722 : vector<16x16xf32>
    %c77 = arith.constant 77 : index
    %724 = memref.load %arg2[%c77] : memref<225xf32, #tpu.memory_space<smem>>
    %725 = vector.broadcast %724 : f32 to vector<16x16xf32>
    %726 = arith.mulf %719, %725 : vector<16x16xf32>
    %727 = arith.addf %705, %726 : vector<16x16xf32>
    %c122 = arith.constant 122 : index
    %728 = memref.load %arg2[%c122] : memref<225xf32, #tpu.memory_space<smem>>
    %729 = vector.broadcast %728 : f32 to vector<16x16xf32>
    %730 = arith.mulf %719, %729 : vector<16x16xf32>
    %731 = arith.addf %709, %730 : vector<16x16xf32>
    %c167 = arith.constant 167 : index
    %732 = memref.load %arg2[%c167] : memref<225xf32, #tpu.memory_space<smem>>
    %733 = vector.broadcast %732 : f32 to vector<16x16xf32>
    %734 = arith.mulf %719, %733 : vector<16x16xf32>
    %735 = arith.addf %713, %734 : vector<16x16xf32>
    %c212 = arith.constant 212 : index
    %736 = memref.load %arg2[%c212] : memref<225xf32, #tpu.memory_space<smem>>
    %737 = vector.broadcast %736 : f32 to vector<16x16xf32>
    %738 = arith.mulf %719, %737 : vector<16x16xf32>
    %739 = arith.addf %717, %738 : vector<16x16xf32>
    %c3_122 = arith.constant 3 : index
    %c2_123 = arith.constant 2 : index
    %c0_124 = arith.constant 0 : index
    %740 = vector.load %arg9[%c3_122, %c2_123, %c0_124] : memref<5x18x18xf32, #tpu.memory_space<vmem>>, vector<1x16x16xf32>
    %741 = vector.shape_cast %740 : vector<1x16x16xf32> to vector<16x16xf32>
    %c33 = arith.constant 33 : index
    %742 = memref.load %arg2[%c33] : memref<225xf32, #tpu.memory_space<smem>>
    %743 = vector.broadcast %742 : f32 to vector<16x16xf32>
    %744 = arith.mulf %741, %743 : vector<16x16xf32>
    %745 = arith.addf %723, %744 : vector<16x16xf32>
    %c78 = arith.constant 78 : index
    %746 = memref.load %arg2[%c78] : memref<225xf32, #tpu.memory_space<smem>>
    %747 = vector.broadcast %746 : f32 to vector<16x16xf32>
    %748 = arith.mulf %741, %747 : vector<16x16xf32>
    %749 = arith.addf %727, %748 : vector<16x16xf32>
    %c123 = arith.constant 123 : index
    %750 = memref.load %arg2[%c123] : memref<225xf32, #tpu.memory_space<smem>>
    %751 = vector.broadcast %750 : f32 to vector<16x16xf32>
    %752 = arith.mulf %741, %751 : vector<16x16xf32>
    %753 = arith.addf %731, %752 : vector<16x16xf32>
    %c168 = arith.constant 168 : index
    %754 = memref.load %arg2[%c168] : memref<225xf32, #tpu.memory_space<smem>>
    %755 = vector.broadcast %754 : f32 to vector<16x16xf32>
    %756 = arith.mulf %741, %755 : vector<16x16xf32>
    %757 = arith.addf %735, %756 : vector<16x16xf32>
    %c213 = arith.constant 213 : index
    %758 = memref.load %arg2[%c213] : memref<225xf32, #tpu.memory_space<smem>>
    %759 = vector.broadcast %758 : f32 to vector<16x16xf32>
    %760 = arith.mulf %741, %759 : vector<16x16xf32>
    %761 = arith.addf %739, %760 : vector<16x16xf32>
    %c3_125 = arith.constant 3 : index
    %c2_126 = arith.constant 2 : index
    %c1_127 = arith.constant 1 : index
    %762 = vector.load %arg9[%c3_125, %c2_126, %c1_127] : memref<5x18x18xf32, #tpu.memory_space<vmem>>, vector<1x16x16xf32>
    %763 = vector.shape_cast %762 : vector<1x16x16xf32> to vector<16x16xf32>
    %c34 = arith.constant 34 : index
    %764 = memref.load %arg2[%c34] : memref<225xf32, #tpu.memory_space<smem>>
    %765 = vector.broadcast %764 : f32 to vector<16x16xf32>
    %766 = arith.mulf %763, %765 : vector<16x16xf32>
    %767 = arith.addf %745, %766 : vector<16x16xf32>
    %c79 = arith.constant 79 : index
    %768 = memref.load %arg2[%c79] : memref<225xf32, #tpu.memory_space<smem>>
    %769 = vector.broadcast %768 : f32 to vector<16x16xf32>
    %770 = arith.mulf %763, %769 : vector<16x16xf32>
    %771 = arith.addf %749, %770 : vector<16x16xf32>
    %c124 = arith.constant 124 : index
    %772 = memref.load %arg2[%c124] : memref<225xf32, #tpu.memory_space<smem>>
    %773 = vector.broadcast %772 : f32 to vector<16x16xf32>
    %774 = arith.mulf %763, %773 : vector<16x16xf32>
    %775 = arith.addf %753, %774 : vector<16x16xf32>
    %c169 = arith.constant 169 : index
    %776 = memref.load %arg2[%c169] : memref<225xf32, #tpu.memory_space<smem>>
    %777 = vector.broadcast %776 : f32 to vector<16x16xf32>
    %778 = arith.mulf %763, %777 : vector<16x16xf32>
    %779 = arith.addf %757, %778 : vector<16x16xf32>
    %c214 = arith.constant 214 : index
    %780 = memref.load %arg2[%c214] : memref<225xf32, #tpu.memory_space<smem>>
    %781 = vector.broadcast %780 : f32 to vector<16x16xf32>
    %782 = arith.mulf %763, %781 : vector<16x16xf32>
    %783 = arith.addf %761, %782 : vector<16x16xf32>
    %c3_128 = arith.constant 3 : index
    %c2_129 = arith.constant 2 : index
    %c2_130 = arith.constant 2 : index
    %784 = vector.load %arg9[%c3_128, %c2_129, %c2_130] : memref<5x18x18xf32, #tpu.memory_space<vmem>>, vector<1x16x16xf32>
    %785 = vector.shape_cast %784 : vector<1x16x16xf32> to vector<16x16xf32>
    %c35 = arith.constant 35 : index
    %786 = memref.load %arg2[%c35] : memref<225xf32, #tpu.memory_space<smem>>
    %787 = vector.broadcast %786 : f32 to vector<16x16xf32>
    %788 = arith.mulf %785, %787 : vector<16x16xf32>
    %789 = arith.addf %767, %788 : vector<16x16xf32>
    %c80 = arith.constant 80 : index
    %790 = memref.load %arg2[%c80] : memref<225xf32, #tpu.memory_space<smem>>
    %791 = vector.broadcast %790 : f32 to vector<16x16xf32>
    %792 = arith.mulf %785, %791 : vector<16x16xf32>
    %793 = arith.addf %771, %792 : vector<16x16xf32>
    %c125 = arith.constant 125 : index
    %794 = memref.load %arg2[%c125] : memref<225xf32, #tpu.memory_space<smem>>
    %795 = vector.broadcast %794 : f32 to vector<16x16xf32>
    %796 = arith.mulf %785, %795 : vector<16x16xf32>
    %797 = arith.addf %775, %796 : vector<16x16xf32>
    %c170 = arith.constant 170 : index
    %798 = memref.load %arg2[%c170] : memref<225xf32, #tpu.memory_space<smem>>
    %799 = vector.broadcast %798 : f32 to vector<16x16xf32>
    %800 = arith.mulf %785, %799 : vector<16x16xf32>
    %801 = arith.addf %779, %800 : vector<16x16xf32>
    %c215 = arith.constant 215 : index
    %802 = memref.load %arg2[%c215] : memref<225xf32, #tpu.memory_space<smem>>
    %803 = vector.broadcast %802 : f32 to vector<16x16xf32>
    %804 = arith.mulf %785, %803 : vector<16x16xf32>
    %805 = arith.addf %783, %804 : vector<16x16xf32>
    %c4_131 = arith.constant 4 : index
    %c0_132 = arith.constant 0 : index
    %c0_133 = arith.constant 0 : index
    %806 = vector.load %arg9[%c4_131, %c0_132, %c0_133] : memref<5x18x18xf32, #tpu.memory_space<vmem>>, vector<1x16x16xf32>
    %807 = vector.shape_cast %806 : vector<1x16x16xf32> to vector<16x16xf32>
    %c36 = arith.constant 36 : index
    %808 = memref.load %arg2[%c36] : memref<225xf32, #tpu.memory_space<smem>>
    %809 = vector.broadcast %808 : f32 to vector<16x16xf32>
    %810 = arith.mulf %807, %809 : vector<16x16xf32>
    %811 = arith.addf %789, %810 : vector<16x16xf32>
    %c81 = arith.constant 81 : index
    %812 = memref.load %arg2[%c81] : memref<225xf32, #tpu.memory_space<smem>>
    %813 = vector.broadcast %812 : f32 to vector<16x16xf32>
    %814 = arith.mulf %807, %813 : vector<16x16xf32>
    %815 = arith.addf %793, %814 : vector<16x16xf32>
    %c126 = arith.constant 126 : index
    %816 = memref.load %arg2[%c126] : memref<225xf32, #tpu.memory_space<smem>>
    %817 = vector.broadcast %816 : f32 to vector<16x16xf32>
    %818 = arith.mulf %807, %817 : vector<16x16xf32>
    %819 = arith.addf %797, %818 : vector<16x16xf32>
    %c171 = arith.constant 171 : index
    %820 = memref.load %arg2[%c171] : memref<225xf32, #tpu.memory_space<smem>>
    %821 = vector.broadcast %820 : f32 to vector<16x16xf32>
    %822 = arith.mulf %807, %821 : vector<16x16xf32>
    %823 = arith.addf %801, %822 : vector<16x16xf32>
    %c216 = arith.constant 216 : index
    %824 = memref.load %arg2[%c216] : memref<225xf32, #tpu.memory_space<smem>>
    %825 = vector.broadcast %824 : f32 to vector<16x16xf32>
    %826 = arith.mulf %807, %825 : vector<16x16xf32>
    %827 = arith.addf %805, %826 : vector<16x16xf32>
    %c4_134 = arith.constant 4 : index
    %c0_135 = arith.constant 0 : index
    %c1_136 = arith.constant 1 : index
    %828 = vector.load %arg9[%c4_134, %c0_135, %c1_136] : memref<5x18x18xf32, #tpu.memory_space<vmem>>, vector<1x16x16xf32>
    %829 = vector.shape_cast %828 : vector<1x16x16xf32> to vector<16x16xf32>
    %c37 = arith.constant 37 : index
    %830 = memref.load %arg2[%c37] : memref<225xf32, #tpu.memory_space<smem>>
    %831 = vector.broadcast %830 : f32 to vector<16x16xf32>
    %832 = arith.mulf %829, %831 : vector<16x16xf32>
    %833 = arith.addf %811, %832 : vector<16x16xf32>
    %c82 = arith.constant 82 : index
    %834 = memref.load %arg2[%c82] : memref<225xf32, #tpu.memory_space<smem>>
    %835 = vector.broadcast %834 : f32 to vector<16x16xf32>
    %836 = arith.mulf %829, %835 : vector<16x16xf32>
    %837 = arith.addf %815, %836 : vector<16x16xf32>
    %c127 = arith.constant 127 : index
    %838 = memref.load %arg2[%c127] : memref<225xf32, #tpu.memory_space<smem>>
    %839 = vector.broadcast %838 : f32 to vector<16x16xf32>
    %840 = arith.mulf %829, %839 : vector<16x16xf32>
    %841 = arith.addf %819, %840 : vector<16x16xf32>
    %c172 = arith.constant 172 : index
    %842 = memref.load %arg2[%c172] : memref<225xf32, #tpu.memory_space<smem>>
    %843 = vector.broadcast %842 : f32 to vector<16x16xf32>
    %844 = arith.mulf %829, %843 : vector<16x16xf32>
    %845 = arith.addf %823, %844 : vector<16x16xf32>
    %c217 = arith.constant 217 : index
    %846 = memref.load %arg2[%c217] : memref<225xf32, #tpu.memory_space<smem>>
    %847 = vector.broadcast %846 : f32 to vector<16x16xf32>
    %848 = arith.mulf %829, %847 : vector<16x16xf32>
    %849 = arith.addf %827, %848 : vector<16x16xf32>
    %c4_137 = arith.constant 4 : index
    %c0_138 = arith.constant 0 : index
    %c2_139 = arith.constant 2 : index
    %850 = vector.load %arg9[%c4_137, %c0_138, %c2_139] : memref<5x18x18xf32, #tpu.memory_space<vmem>>, vector<1x16x16xf32>
    %851 = vector.shape_cast %850 : vector<1x16x16xf32> to vector<16x16xf32>
    %c38 = arith.constant 38 : index
    %852 = memref.load %arg2[%c38] : memref<225xf32, #tpu.memory_space<smem>>
    %853 = vector.broadcast %852 : f32 to vector<16x16xf32>
    %854 = arith.mulf %851, %853 : vector<16x16xf32>
    %855 = arith.addf %833, %854 : vector<16x16xf32>
    %c83 = arith.constant 83 : index
    %856 = memref.load %arg2[%c83] : memref<225xf32, #tpu.memory_space<smem>>
    %857 = vector.broadcast %856 : f32 to vector<16x16xf32>
    %858 = arith.mulf %851, %857 : vector<16x16xf32>
    %859 = arith.addf %837, %858 : vector<16x16xf32>
    %c128 = arith.constant 128 : index
    %860 = memref.load %arg2[%c128] : memref<225xf32, #tpu.memory_space<smem>>
    %861 = vector.broadcast %860 : f32 to vector<16x16xf32>
    %862 = arith.mulf %851, %861 : vector<16x16xf32>
    %863 = arith.addf %841, %862 : vector<16x16xf32>
    %c173 = arith.constant 173 : index
    %864 = memref.load %arg2[%c173] : memref<225xf32, #tpu.memory_space<smem>>
    %865 = vector.broadcast %864 : f32 to vector<16x16xf32>
    %866 = arith.mulf %851, %865 : vector<16x16xf32>
    %867 = arith.addf %845, %866 : vector<16x16xf32>
    %c218 = arith.constant 218 : index
    %868 = memref.load %arg2[%c218] : memref<225xf32, #tpu.memory_space<smem>>
    %869 = vector.broadcast %868 : f32 to vector<16x16xf32>
    %870 = arith.mulf %851, %869 : vector<16x16xf32>
    %871 = arith.addf %849, %870 : vector<16x16xf32>
    %c4_140 = arith.constant 4 : index
    %c1_141 = arith.constant 1 : index
    %c0_142 = arith.constant 0 : index
    %872 = vector.load %arg9[%c4_140, %c1_141, %c0_142] : memref<5x18x18xf32, #tpu.memory_space<vmem>>, vector<1x16x16xf32>
    %873 = vector.shape_cast %872 : vector<1x16x16xf32> to vector<16x16xf32>
    %c39 = arith.constant 39 : index
    %874 = memref.load %arg2[%c39] : memref<225xf32, #tpu.memory_space<smem>>
    %875 = vector.broadcast %874 : f32 to vector<16x16xf32>
    %876 = arith.mulf %873, %875 : vector<16x16xf32>
    %877 = arith.addf %855, %876 : vector<16x16xf32>
    %c84 = arith.constant 84 : index
    %878 = memref.load %arg2[%c84] : memref<225xf32, #tpu.memory_space<smem>>
    %879 = vector.broadcast %878 : f32 to vector<16x16xf32>
    %880 = arith.mulf %873, %879 : vector<16x16xf32>
    %881 = arith.addf %859, %880 : vector<16x16xf32>
    %c129 = arith.constant 129 : index
    %882 = memref.load %arg2[%c129] : memref<225xf32, #tpu.memory_space<smem>>
    %883 = vector.broadcast %882 : f32 to vector<16x16xf32>
    %884 = arith.mulf %873, %883 : vector<16x16xf32>
    %885 = arith.addf %863, %884 : vector<16x16xf32>
    %c174 = arith.constant 174 : index
    %886 = memref.load %arg2[%c174] : memref<225xf32, #tpu.memory_space<smem>>
    %887 = vector.broadcast %886 : f32 to vector<16x16xf32>
    %888 = arith.mulf %873, %887 : vector<16x16xf32>
    %889 = arith.addf %867, %888 : vector<16x16xf32>
    %c219 = arith.constant 219 : index
    %890 = memref.load %arg2[%c219] : memref<225xf32, #tpu.memory_space<smem>>
    %891 = vector.broadcast %890 : f32 to vector<16x16xf32>
    %892 = arith.mulf %873, %891 : vector<16x16xf32>
    %893 = arith.addf %871, %892 : vector<16x16xf32>
    %c4_143 = arith.constant 4 : index
    %c1_144 = arith.constant 1 : index
    %c1_145 = arith.constant 1 : index
    %894 = vector.load %arg9[%c4_143, %c1_144, %c1_145] : memref<5x18x18xf32, #tpu.memory_space<vmem>>, vector<1x16x16xf32>
    %895 = vector.shape_cast %894 : vector<1x16x16xf32> to vector<16x16xf32>
    %c40 = arith.constant 40 : index
    %896 = memref.load %arg2[%c40] : memref<225xf32, #tpu.memory_space<smem>>
    %897 = vector.broadcast %896 : f32 to vector<16x16xf32>
    %898 = arith.mulf %895, %897 : vector<16x16xf32>
    %899 = arith.addf %877, %898 : vector<16x16xf32>
    %c85 = arith.constant 85 : index
    %900 = memref.load %arg2[%c85] : memref<225xf32, #tpu.memory_space<smem>>
    %901 = vector.broadcast %900 : f32 to vector<16x16xf32>
    %902 = arith.mulf %895, %901 : vector<16x16xf32>
    %903 = arith.addf %881, %902 : vector<16x16xf32>
    %c130 = arith.constant 130 : index
    %904 = memref.load %arg2[%c130] : memref<225xf32, #tpu.memory_space<smem>>
    %905 = vector.broadcast %904 : f32 to vector<16x16xf32>
    %906 = arith.mulf %895, %905 : vector<16x16xf32>
    %907 = arith.addf %885, %906 : vector<16x16xf32>
    %c175 = arith.constant 175 : index
    %908 = memref.load %arg2[%c175] : memref<225xf32, #tpu.memory_space<smem>>
    %909 = vector.broadcast %908 : f32 to vector<16x16xf32>
    %910 = arith.mulf %895, %909 : vector<16x16xf32>
    %911 = arith.addf %889, %910 : vector<16x16xf32>
    %c220 = arith.constant 220 : index
    %912 = memref.load %arg2[%c220] : memref<225xf32, #tpu.memory_space<smem>>
    %913 = vector.broadcast %912 : f32 to vector<16x16xf32>
    %914 = arith.mulf %895, %913 : vector<16x16xf32>
    %915 = arith.addf %893, %914 : vector<16x16xf32>
    %c4_146 = arith.constant 4 : index
    %c1_147 = arith.constant 1 : index
    %c2_148 = arith.constant 2 : index
    %916 = vector.load %arg9[%c4_146, %c1_147, %c2_148] : memref<5x18x18xf32, #tpu.memory_space<vmem>>, vector<1x16x16xf32>
    %917 = vector.shape_cast %916 : vector<1x16x16xf32> to vector<16x16xf32>
    %c41 = arith.constant 41 : index
    %918 = memref.load %arg2[%c41] : memref<225xf32, #tpu.memory_space<smem>>
    %919 = vector.broadcast %918 : f32 to vector<16x16xf32>
    %920 = arith.mulf %917, %919 : vector<16x16xf32>
    %921 = arith.addf %899, %920 : vector<16x16xf32>
    %c86 = arith.constant 86 : index
    %922 = memref.load %arg2[%c86] : memref<225xf32, #tpu.memory_space<smem>>
    %923 = vector.broadcast %922 : f32 to vector<16x16xf32>
    %924 = arith.mulf %917, %923 : vector<16x16xf32>
    %925 = arith.addf %903, %924 : vector<16x16xf32>
    %c131 = arith.constant 131 : index
    %926 = memref.load %arg2[%c131] : memref<225xf32, #tpu.memory_space<smem>>
    %927 = vector.broadcast %926 : f32 to vector<16x16xf32>
    %928 = arith.mulf %917, %927 : vector<16x16xf32>
    %929 = arith.addf %907, %928 : vector<16x16xf32>
    %c176 = arith.constant 176 : index
    %930 = memref.load %arg2[%c176] : memref<225xf32, #tpu.memory_space<smem>>
    %931 = vector.broadcast %930 : f32 to vector<16x16xf32>
    %932 = arith.mulf %917, %931 : vector<16x16xf32>
    %933 = arith.addf %911, %932 : vector<16x16xf32>
    %c221 = arith.constant 221 : index
    %934 = memref.load %arg2[%c221] : memref<225xf32, #tpu.memory_space<smem>>
    %935 = vector.broadcast %934 : f32 to vector<16x16xf32>
    %936 = arith.mulf %917, %935 : vector<16x16xf32>
    %937 = arith.addf %915, %936 : vector<16x16xf32>
    %c4_149 = arith.constant 4 : index
    %c2_150 = arith.constant 2 : index
    %c0_151 = arith.constant 0 : index
    %938 = vector.load %arg9[%c4_149, %c2_150, %c0_151] : memref<5x18x18xf32, #tpu.memory_space<vmem>>, vector<1x16x16xf32>
    %939 = vector.shape_cast %938 : vector<1x16x16xf32> to vector<16x16xf32>
    %c42 = arith.constant 42 : index
    %940 = memref.load %arg2[%c42] : memref<225xf32, #tpu.memory_space<smem>>
    %941 = vector.broadcast %940 : f32 to vector<16x16xf32>
    %942 = arith.mulf %939, %941 : vector<16x16xf32>
    %943 = arith.addf %921, %942 : vector<16x16xf32>
    %c87 = arith.constant 87 : index
    %944 = memref.load %arg2[%c87] : memref<225xf32, #tpu.memory_space<smem>>
    %945 = vector.broadcast %944 : f32 to vector<16x16xf32>
    %946 = arith.mulf %939, %945 : vector<16x16xf32>
    %947 = arith.addf %925, %946 : vector<16x16xf32>
    %c132 = arith.constant 132 : index
    %948 = memref.load %arg2[%c132] : memref<225xf32, #tpu.memory_space<smem>>
    %949 = vector.broadcast %948 : f32 to vector<16x16xf32>
    %950 = arith.mulf %939, %949 : vector<16x16xf32>
    %951 = arith.addf %929, %950 : vector<16x16xf32>
    %c177 = arith.constant 177 : index
    %952 = memref.load %arg2[%c177] : memref<225xf32, #tpu.memory_space<smem>>
    %953 = vector.broadcast %952 : f32 to vector<16x16xf32>
    %954 = arith.mulf %939, %953 : vector<16x16xf32>
    %955 = arith.addf %933, %954 : vector<16x16xf32>
    %c222 = arith.constant 222 : index
    %956 = memref.load %arg2[%c222] : memref<225xf32, #tpu.memory_space<smem>>
    %957 = vector.broadcast %956 : f32 to vector<16x16xf32>
    %958 = arith.mulf %939, %957 : vector<16x16xf32>
    %959 = arith.addf %937, %958 : vector<16x16xf32>
    %c4_152 = arith.constant 4 : index
    %c2_153 = arith.constant 2 : index
    %c1_154 = arith.constant 1 : index
    %960 = vector.load %arg9[%c4_152, %c2_153, %c1_154] : memref<5x18x18xf32, #tpu.memory_space<vmem>>, vector<1x16x16xf32>
    %961 = vector.shape_cast %960 : vector<1x16x16xf32> to vector<16x16xf32>
    %c43 = arith.constant 43 : index
    %962 = memref.load %arg2[%c43] : memref<225xf32, #tpu.memory_space<smem>>
    %963 = vector.broadcast %962 : f32 to vector<16x16xf32>
    %964 = arith.mulf %961, %963 : vector<16x16xf32>
    %965 = arith.addf %943, %964 : vector<16x16xf32>
    %c88 = arith.constant 88 : index
    %966 = memref.load %arg2[%c88] : memref<225xf32, #tpu.memory_space<smem>>
    %967 = vector.broadcast %966 : f32 to vector<16x16xf32>
    %968 = arith.mulf %961, %967 : vector<16x16xf32>
    %969 = arith.addf %947, %968 : vector<16x16xf32>
    %c133 = arith.constant 133 : index
    %970 = memref.load %arg2[%c133] : memref<225xf32, #tpu.memory_space<smem>>
    %971 = vector.broadcast %970 : f32 to vector<16x16xf32>
    %972 = arith.mulf %961, %971 : vector<16x16xf32>
    %973 = arith.addf %951, %972 : vector<16x16xf32>
    %c178 = arith.constant 178 : index
    %974 = memref.load %arg2[%c178] : memref<225xf32, #tpu.memory_space<smem>>
    %975 = vector.broadcast %974 : f32 to vector<16x16xf32>
    %976 = arith.mulf %961, %975 : vector<16x16xf32>
    %977 = arith.addf %955, %976 : vector<16x16xf32>
    %c223 = arith.constant 223 : index
    %978 = memref.load %arg2[%c223] : memref<225xf32, #tpu.memory_space<smem>>
    %979 = vector.broadcast %978 : f32 to vector<16x16xf32>
    %980 = arith.mulf %961, %979 : vector<16x16xf32>
    %981 = arith.addf %959, %980 : vector<16x16xf32>
    %c4_155 = arith.constant 4 : index
    %c2_156 = arith.constant 2 : index
    %c2_157 = arith.constant 2 : index
    %982 = vector.load %arg9[%c4_155, %c2_156, %c2_157] : memref<5x18x18xf32, #tpu.memory_space<vmem>>, vector<1x16x16xf32>
    %983 = vector.shape_cast %982 : vector<1x16x16xf32> to vector<16x16xf32>
    %c44 = arith.constant 44 : index
    %984 = memref.load %arg2[%c44] : memref<225xf32, #tpu.memory_space<smem>>
    %985 = vector.broadcast %984 : f32 to vector<16x16xf32>
    %986 = arith.mulf %983, %985 : vector<16x16xf32>
    %987 = arith.addf %965, %986 : vector<16x16xf32>
    %c89 = arith.constant 89 : index
    %988 = memref.load %arg2[%c89] : memref<225xf32, #tpu.memory_space<smem>>
    %989 = vector.broadcast %988 : f32 to vector<16x16xf32>
    %990 = arith.mulf %983, %989 : vector<16x16xf32>
    %991 = arith.addf %969, %990 : vector<16x16xf32>
    %c134 = arith.constant 134 : index
    %992 = memref.load %arg2[%c134] : memref<225xf32, #tpu.memory_space<smem>>
    %993 = vector.broadcast %992 : f32 to vector<16x16xf32>
    %994 = arith.mulf %983, %993 : vector<16x16xf32>
    %995 = arith.addf %973, %994 : vector<16x16xf32>
    %c179 = arith.constant 179 : index
    %996 = memref.load %arg2[%c179] : memref<225xf32, #tpu.memory_space<smem>>
    %997 = vector.broadcast %996 : f32 to vector<16x16xf32>
    %998 = arith.mulf %983, %997 : vector<16x16xf32>
    %999 = arith.addf %977, %998 : vector<16x16xf32>
    %c224 = arith.constant 224 : index
    %1000 = memref.load %arg2[%c224] : memref<225xf32, #tpu.memory_space<smem>>
    %1001 = vector.broadcast %1000 : f32 to vector<16x16xf32>
    %1002 = arith.mulf %983, %1001 : vector<16x16xf32>
    %1003 = arith.addf %981, %1002 : vector<16x16xf32>
    %c0_158 = arith.constant 0 : index
    %1004 = memref.load %arg3[%c0_158] : memref<5xf32, #tpu.memory_space<smem>>
    %1005 = vector.broadcast %1004 : f32 to vector<16x16xf32>
    %1006 = arith.addf %987, %1005 : vector<16x16xf32>
    %cst_159 = arith.constant 0.000000e+00 : f32
    %1007 = vector.broadcast %cst_159 : f32 to vector<16x16xf32>
    %1008 = arith.maximumf %1006, %1007 : vector<16x16xf32>
    %c0_160 = arith.constant 0 : index
    %c1_161 = arith.constant 1 : index
    %c1_162 = arith.constant 1 : index
    %1009 = vector.load %arg10[%c0_160, %c1_161, %c1_162] : memref<5x18x18xf32, #tpu.memory_space<vmem>>, vector<1x16x16xf32>
    %1010 = vector.shape_cast %1009 : vector<1x16x16xf32> to vector<16x16xf32>
    %1011 = vector.shape_cast %1008 : vector<16x16xf32> to vector<1x16x16xf32>
    tpu.vector_store %arg10[%c0_160, %c1_161, %c1_162], %1011 {strides = array<i32>} : memref<5x18x18xf32, #tpu.memory_space<vmem>>, vector<1x16x16xf32>,
    %c1_163 = arith.constant 1 : index
    %1012 = memref.load %arg3[%c1_163] : memref<5xf32, #tpu.memory_space<smem>>
    %1013 = vector.broadcast %1012 : f32 to vector<16x16xf32>
    %1014 = arith.addf %991, %1013 : vector<16x16xf32>
    %cst_164 = arith.constant 0.000000e+00 : f32
    %1015 = vector.broadcast %cst_164 : f32 to vector<16x16xf32>
    %1016 = arith.maximumf %1014, %1015 : vector<16x16xf32>
    %c1_165 = arith.constant 1 : index
    %c1_166 = arith.constant 1 : index
    %c1_167 = arith.constant 1 : index
    %1017 = vector.load %arg10[%c1_165, %c1_166, %c1_167] : memref<5x18x18xf32, #tpu.memory_space<vmem>>, vector<1x16x16xf32>
    %1018 = vector.shape_cast %1017 : vector<1x16x16xf32> to vector<16x16xf32>
    %1019 = vector.shape_cast %1016 : vector<16x16xf32> to vector<1x16x16xf32>
    tpu.vector_store %arg10[%c1_165, %c1_166, %c1_167], %1019 {strides = array<i32>} : memref<5x18x18xf32, #tpu.memory_space<vmem>>, vector<1x16x16xf32>,
    %c2_168 = arith.constant 2 : index
    %1020 = memref.load %arg3[%c2_168] : memref<5xf32, #tpu.memory_space<smem>>
    %1021 = vector.broadcast %1020 : f32 to vector<16x16xf32>
    %1022 = arith.addf %995, %1021 : vector<16x16xf32>
    %cst_169 = arith.constant 0.000000e+00 : f32
    %1023 = vector.broadcast %cst_169 : f32 to vector<16x16xf32>
    %1024 = arith.maximumf %1022, %1023 : vector<16x16xf32>
    %c2_170 = arith.constant 2 : index
    %c1_171 = arith.constant 1 : index
    %c1_172 = arith.constant 1 : index
    %1025 = vector.load %arg10[%c2_170, %c1_171, %c1_172] : memref<5x18x18xf32, #tpu.memory_space<vmem>>, vector<1x16x16xf32>
    %1026 = vector.shape_cast %1025 : vector<1x16x16xf32> to vector<16x16xf32>
    %1027 = vector.shape_cast %1024 : vector<16x16xf32> to vector<1x16x16xf32>
    tpu.vector_store %arg10[%c2_170, %c1_171, %c1_172], %1027 {strides = array<i32>} : memref<5x18x18xf32, #tpu.memory_space<vmem>>, vector<1x16x16xf32>,
    %c3_173 = arith.constant 3 : index
    %1028 = memref.load %arg3[%c3_173] : memref<5xf32, #tpu.memory_space<smem>>
    %1029 = vector.broadcast %1028 : f32 to vector<16x16xf32>
    %1030 = arith.addf %999, %1029 : vector<16x16xf32>
    %cst_174 = arith.constant 0.000000e+00 : f32
    %1031 = vector.broadcast %cst_174 : f32 to vector<16x16xf32>
    %1032 = arith.maximumf %1030, %1031 : vector<16x16xf32>
    %c3_175 = arith.constant 3 : index
    %c1_176 = arith.constant 1 : index
    %c1_177 = arith.constant 1 : index
    %1033 = vector.load %arg10[%c3_175, %c1_176, %c1_177] : memref<5x18x18xf32, #tpu.memory_space<vmem>>, vector<1x16x16xf32>
    %1034 = vector.shape_cast %1033 : vector<1x16x16xf32> to vector<16x16xf32>
    %1035 = vector.shape_cast %1032 : vector<16x16xf32> to vector<1x16x16xf32>
    tpu.vector_store %arg10[%c3_175, %c1_176, %c1_177], %1035 {strides = array<i32>} : memref<5x18x18xf32, #tpu.memory_space<vmem>>, vector<1x16x16xf32>,
    %c4_178 = arith.constant 4 : index
    %1036 = memref.load %arg3[%c4_178] : memref<5xf32, #tpu.memory_space<smem>>
    %1037 = vector.broadcast %1036 : f32 to vector<16x16xf32>
    %1038 = arith.addf %1003, %1037 : vector<16x16xf32>
    %cst_179 = arith.constant 0.000000e+00 : f32
    %1039 = vector.broadcast %cst_179 : f32 to vector<16x16xf32>
    %1040 = arith.maximumf %1038, %1039 : vector<16x16xf32>
    %c4_180 = arith.constant 4 : index
    %c1_181 = arith.constant 1 : index
    %c1_182 = arith.constant 1 : index
    %1041 = vector.load %arg10[%c4_180, %c1_181, %c1_182] : memref<5x18x18xf32, #tpu.memory_space<vmem>>, vector<1x16x16xf32>
    %1042 = vector.shape_cast %1041 : vector<1x16x16xf32> to vector<16x16xf32>
    %1043 = vector.shape_cast %1040 : vector<16x16xf32> to vector<1x16x16xf32>
    tpu.vector_store %arg10[%c4_180, %c1_181, %c1_182], %1043 {strides = array<i32>} : memref<5x18x18xf32, #tpu.memory_space<vmem>>, vector<1x16x16xf32>,
    %cst_183 = arith.constant 0.000000e+00 : f32
    %1044 = vector.broadcast %cst_183 : f32 to vector<16x16xf32>
    %cst_184 = arith.constant 0.000000e+00 : f32
    %1045 = vector.broadcast %cst_184 : f32 to vector<16x16xf32>
    %cst_185 = arith.constant 0.000000e+00 : f32
    %1046 = vector.broadcast %cst_185 : f32 to vector<16x16xf32>
    %cst_186 = arith.constant 0.000000e+00 : f32
    %1047 = vector.broadcast %cst_186 : f32 to vector<16x16xf32>
    %cst_187 = arith.constant 0.000000e+00 : f32
    %1048 = vector.broadcast %cst_187 : f32 to vector<16x16xf32>
    %c0_188 = arith.constant 0 : index
    %c0_189 = arith.constant 0 : index
    %c0_190 = arith.constant 0 : index
    %1049 = vector.load %arg10[%c0_188, %c0_189, %c0_190] : memref<5x18x18xf32, #tpu.memory_space<vmem>>, vector<1x16x16xf32>
    %1050 = vector.shape_cast %1049 : vector<1x16x16xf32> to vector<16x16xf32>
    %c0_191 = arith.constant 0 : index
    %1051 = memref.load %arg4[%c0_191] : memref<225xf32, #tpu.memory_space<smem>>
    %1052 = vector.broadcast %1051 : f32 to vector<16x16xf32>
    %1053 = arith.mulf %1050, %1052 : vector<16x16xf32>
    %1054 = arith.addf %1044, %1053 : vector<16x16xf32>
    %c45_192 = arith.constant 45 : index
    %1055 = memref.load %arg4[%c45_192] : memref<225xf32, #tpu.memory_space<smem>>
    %1056 = vector.broadcast %1055 : f32 to vector<16x16xf32>
    %1057 = arith.mulf %1050, %1056 : vector<16x16xf32>
    %1058 = arith.addf %1045, %1057 : vector<16x16xf32>
    %c90_193 = arith.constant 90 : index
    %1059 = memref.load %arg4[%c90_193] : memref<225xf32, #tpu.memory_space<smem>>
    %1060 = vector.broadcast %1059 : f32 to vector<16x16xf32>
    %1061 = arith.mulf %1050, %1060 : vector<16x16xf32>
    %1062 = arith.addf %1046, %1061 : vector<16x16xf32>
    %c135_194 = arith.constant 135 : index
    %1063 = memref.load %arg4[%c135_194] : memref<225xf32, #tpu.memory_space<smem>>
    %1064 = vector.broadcast %1063 : f32 to vector<16x16xf32>
    %1065 = arith.mulf %1050, %1064 : vector<16x16xf32>
    %1066 = arith.addf %1047, %1065 : vector<16x16xf32>
    %c180_195 = arith.constant 180 : index
    %1067 = memref.load %arg4[%c180_195] : memref<225xf32, #tpu.memory_space<smem>>
    %1068 = vector.broadcast %1067 : f32 to vector<16x16xf32>
    %1069 = arith.mulf %1050, %1068 : vector<16x16xf32>
    %1070 = arith.addf %1048, %1069 : vector<16x16xf32>
    %c0_196 = arith.constant 0 : index
    %c0_197 = arith.constant 0 : index
    %c1_198 = arith.constant 1 : index
    %1071 = vector.load %arg10[%c0_196, %c0_197, %c1_198] : memref<5x18x18xf32, #tpu.memory_space<vmem>>, vector<1x16x16xf32>
    %1072 = vector.shape_cast %1071 : vector<1x16x16xf32> to vector<16x16xf32>
    %c1_199 = arith.constant 1 : index
    %1073 = memref.load %arg4[%c1_199] : memref<225xf32, #tpu.memory_space<smem>>
    %1074 = vector.broadcast %1073 : f32 to vector<16x16xf32>
    %1075 = arith.mulf %1072, %1074 : vector<16x16xf32>
    %1076 = arith.addf %1054, %1075 : vector<16x16xf32>
    %c46_200 = arith.constant 46 : index
    %1077 = memref.load %arg4[%c46_200] : memref<225xf32, #tpu.memory_space<smem>>
    %1078 = vector.broadcast %1077 : f32 to vector<16x16xf32>
    %1079 = arith.mulf %1072, %1078 : vector<16x16xf32>
    %1080 = arith.addf %1058, %1079 : vector<16x16xf32>
    %c91_201 = arith.constant 91 : index
    %1081 = memref.load %arg4[%c91_201] : memref<225xf32, #tpu.memory_space<smem>>
    %1082 = vector.broadcast %1081 : f32 to vector<16x16xf32>
    %1083 = arith.mulf %1072, %1082 : vector<16x16xf32>
    %1084 = arith.addf %1062, %1083 : vector<16x16xf32>
    %c136_202 = arith.constant 136 : index
    %1085 = memref.load %arg4[%c136_202] : memref<225xf32, #tpu.memory_space<smem>>
    %1086 = vector.broadcast %1085 : f32 to vector<16x16xf32>
    %1087 = arith.mulf %1072, %1086 : vector<16x16xf32>
    %1088 = arith.addf %1066, %1087 : vector<16x16xf32>
    %c181_203 = arith.constant 181 : index
    %1089 = memref.load %arg4[%c181_203] : memref<225xf32, #tpu.memory_space<smem>>
    %1090 = vector.broadcast %1089 : f32 to vector<16x16xf32>
    %1091 = arith.mulf %1072, %1090 : vector<16x16xf32>
    %1092 = arith.addf %1070, %1091 : vector<16x16xf32>
    %c0_204 = arith.constant 0 : index
    %c0_205 = arith.constant 0 : index
    %c2_206 = arith.constant 2 : index
    %1093 = vector.load %arg10[%c0_204, %c0_205, %c2_206] : memref<5x18x18xf32, #tpu.memory_space<vmem>>, vector<1x16x16xf32>
    %1094 = vector.shape_cast %1093 : vector<1x16x16xf32> to vector<16x16xf32>
    %c2_207 = arith.constant 2 : index
    %1095 = memref.load %arg4[%c2_207] : memref<225xf32, #tpu.memory_space<smem>>
    %1096 = vector.broadcast %1095 : f32 to vector<16x16xf32>
    %1097 = arith.mulf %1094, %1096 : vector<16x16xf32>
    %1098 = arith.addf %1076, %1097 : vector<16x16xf32>
    %c47_208 = arith.constant 47 : index
    %1099 = memref.load %arg4[%c47_208] : memref<225xf32, #tpu.memory_space<smem>>
    %1100 = vector.broadcast %1099 : f32 to vector<16x16xf32>
    %1101 = arith.mulf %1094, %1100 : vector<16x16xf32>
    %1102 = arith.addf %1080, %1101 : vector<16x16xf32>
    %c92_209 = arith.constant 92 : index
    %1103 = memref.load %arg4[%c92_209] : memref<225xf32, #tpu.memory_space<smem>>
    %1104 = vector.broadcast %1103 : f32 to vector<16x16xf32>
    %1105 = arith.mulf %1094, %1104 : vector<16x16xf32>
    %1106 = arith.addf %1084, %1105 : vector<16x16xf32>
    %c137_210 = arith.constant 137 : index
    %1107 = memref.load %arg4[%c137_210] : memref<225xf32, #tpu.memory_space<smem>>
    %1108 = vector.broadcast %1107 : f32 to vector<16x16xf32>
    %1109 = arith.mulf %1094, %1108 : vector<16x16xf32>
    %1110 = arith.addf %1088, %1109 : vector<16x16xf32>
    %c182_211 = arith.constant 182 : index
    %1111 = memref.load %arg4[%c182_211] : memref<225xf32, #tpu.memory_space<smem>>
    %1112 = vector.broadcast %1111 : f32 to vector<16x16xf32>
    %1113 = arith.mulf %1094, %1112 : vector<16x16xf32>
    %1114 = arith.addf %1092, %1113 : vector<16x16xf32>
    %c0_212 = arith.constant 0 : index
    %c1_213 = arith.constant 1 : index
    %c0_214 = arith.constant 0 : index
    %1115 = vector.load %arg10[%c0_212, %c1_213, %c0_214] : memref<5x18x18xf32, #tpu.memory_space<vmem>>, vector<1x16x16xf32>
    %1116 = vector.shape_cast %1115 : vector<1x16x16xf32> to vector<16x16xf32>
    %c3_215 = arith.constant 3 : index
    %1117 = memref.load %arg4[%c3_215] : memref<225xf32, #tpu.memory_space<smem>>
    %1118 = vector.broadcast %1117 : f32 to vector<16x16xf32>
    %1119 = arith.mulf %1116, %1118 : vector<16x16xf32>
    %1120 = arith.addf %1098, %1119 : vector<16x16xf32>
    %c48_216 = arith.constant 48 : index
    %1121 = memref.load %arg4[%c48_216] : memref<225xf32, #tpu.memory_space<smem>>
    %1122 = vector.broadcast %1121 : f32 to vector<16x16xf32>
    %1123 = arith.mulf %1116, %1122 : vector<16x16xf32>
    %1124 = arith.addf %1102, %1123 : vector<16x16xf32>
    %c93_217 = arith.constant 93 : index
    %1125 = memref.load %arg4[%c93_217] : memref<225xf32, #tpu.memory_space<smem>>
    %1126 = vector.broadcast %1125 : f32 to vector<16x16xf32>
    %1127 = arith.mulf %1116, %1126 : vector<16x16xf32>
    %1128 = arith.addf %1106, %1127 : vector<16x16xf32>
    %c138_218 = arith.constant 138 : index
    %1129 = memref.load %arg4[%c138_218] : memref<225xf32, #tpu.memory_space<smem>>
    %1130 = vector.broadcast %1129 : f32 to vector<16x16xf32>
    %1131 = arith.mulf %1116, %1130 : vector<16x16xf32>
    %1132 = arith.addf %1110, %1131 : vector<16x16xf32>
    %c183_219 = arith.constant 183 : index
    %1133 = memref.load %arg4[%c183_219] : memref<225xf32, #tpu.memory_space<smem>>
    %1134 = vector.broadcast %1133 : f32 to vector<16x16xf32>
    %1135 = arith.mulf %1116, %1134 : vector<16x16xf32>
    %1136 = arith.addf %1114, %1135 : vector<16x16xf32>
    %c0_220 = arith.constant 0 : index
    %c1_221 = arith.constant 1 : index
    %c1_222 = arith.constant 1 : index
    %1137 = vector.load %arg10[%c0_220, %c1_221, %c1_222] : memref<5x18x18xf32, #tpu.memory_space<vmem>>, vector<1x16x16xf32>
    %1138 = vector.shape_cast %1137 : vector<1x16x16xf32> to vector<16x16xf32>
    %c4_223 = arith.constant 4 : index
    %1139 = memref.load %arg4[%c4_223] : memref<225xf32, #tpu.memory_space<smem>>
    %1140 = vector.broadcast %1139 : f32 to vector<16x16xf32>
    %1141 = arith.mulf %1138, %1140 : vector<16x16xf32>
    %1142 = arith.addf %1120, %1141 : vector<16x16xf32>
    %c49_224 = arith.constant 49 : index
    %1143 = memref.load %arg4[%c49_224] : memref<225xf32, #tpu.memory_space<smem>>
    %1144 = vector.broadcast %1143 : f32 to vector<16x16xf32>
    %1145 = arith.mulf %1138, %1144 : vector<16x16xf32>
    %1146 = arith.addf %1124, %1145 : vector<16x16xf32>
    %c94_225 = arith.constant 94 : index
    %1147 = memref.load %arg4[%c94_225] : memref<225xf32, #tpu.memory_space<smem>>
    %1148 = vector.broadcast %1147 : f32 to vector<16x16xf32>
    %1149 = arith.mulf %1138, %1148 : vector<16x16xf32>
    %1150 = arith.addf %1128, %1149 : vector<16x16xf32>
    %c139_226 = arith.constant 139 : index
    %1151 = memref.load %arg4[%c139_226] : memref<225xf32, #tpu.memory_space<smem>>
    %1152 = vector.broadcast %1151 : f32 to vector<16x16xf32>
    %1153 = arith.mulf %1138, %1152 : vector<16x16xf32>
    %1154 = arith.addf %1132, %1153 : vector<16x16xf32>
    %c184_227 = arith.constant 184 : index
    %1155 = memref.load %arg4[%c184_227] : memref<225xf32, #tpu.memory_space<smem>>
    %1156 = vector.broadcast %1155 : f32 to vector<16x16xf32>
    %1157 = arith.mulf %1138, %1156 : vector<16x16xf32>
    %1158 = arith.addf %1136, %1157 : vector<16x16xf32>
    %c0_228 = arith.constant 0 : index
    %c1_229 = arith.constant 1 : index
    %c2_230 = arith.constant 2 : index
    %1159 = vector.load %arg10[%c0_228, %c1_229, %c2_230] : memref<5x18x18xf32, #tpu.memory_space<vmem>>, vector<1x16x16xf32>
    %1160 = vector.shape_cast %1159 : vector<1x16x16xf32> to vector<16x16xf32>
    %c5_231 = arith.constant 5 : index
    %1161 = memref.load %arg4[%c5_231] : memref<225xf32, #tpu.memory_space<smem>>
    %1162 = vector.broadcast %1161 : f32 to vector<16x16xf32>
    %1163 = arith.mulf %1160, %1162 : vector<16x16xf32>
    %1164 = arith.addf %1142, %1163 : vector<16x16xf32>
    %c50_232 = arith.constant 50 : index
    %1165 = memref.load %arg4[%c50_232] : memref<225xf32, #tpu.memory_space<smem>>
    %1166 = vector.broadcast %1165 : f32 to vector<16x16xf32>
    %1167 = arith.mulf %1160, %1166 : vector<16x16xf32>
    %1168 = arith.addf %1146, %1167 : vector<16x16xf32>
    %c95_233 = arith.constant 95 : index
    %1169 = memref.load %arg4[%c95_233] : memref<225xf32, #tpu.memory_space<smem>>
    %1170 = vector.broadcast %1169 : f32 to vector<16x16xf32>
    %1171 = arith.mulf %1160, %1170 : vector<16x16xf32>
    %1172 = arith.addf %1150, %1171 : vector<16x16xf32>
    %c140_234 = arith.constant 140 : index
    %1173 = memref.load %arg4[%c140_234] : memref<225xf32, #tpu.memory_space<smem>>
    %1174 = vector.broadcast %1173 : f32 to vector<16x16xf32>
    %1175 = arith.mulf %1160, %1174 : vector<16x16xf32>
    %1176 = arith.addf %1154, %1175 : vector<16x16xf32>
    %c185_235 = arith.constant 185 : index
    %1177 = memref.load %arg4[%c185_235] : memref<225xf32, #tpu.memory_space<smem>>
    %1178 = vector.broadcast %1177 : f32 to vector<16x16xf32>
    %1179 = arith.mulf %1160, %1178 : vector<16x16xf32>
    %1180 = arith.addf %1158, %1179 : vector<16x16xf32>
    %c0_236 = arith.constant 0 : index
    %c2_237 = arith.constant 2 : index
    %c0_238 = arith.constant 0 : index
    %1181 = vector.load %arg10[%c0_236, %c2_237, %c0_238] : memref<5x18x18xf32, #tpu.memory_space<vmem>>, vector<1x16x16xf32>
    %1182 = vector.shape_cast %1181 : vector<1x16x16xf32> to vector<16x16xf32>
    %c6_239 = arith.constant 6 : index
    %1183 = memref.load %arg4[%c6_239] : memref<225xf32, #tpu.memory_space<smem>>
    %1184 = vector.broadcast %1183 : f32 to vector<16x16xf32>
    %1185 = arith.mulf %1182, %1184 : vector<16x16xf32>
    %1186 = arith.addf %1164, %1185 : vector<16x16xf32>
    %c51_240 = arith.constant 51 : index
    %1187 = memref.load %arg4[%c51_240] : memref<225xf32, #tpu.memory_space<smem>>
    %1188 = vector.broadcast %1187 : f32 to vector<16x16xf32>
    %1189 = arith.mulf %1182, %1188 : vector<16x16xf32>
    %1190 = arith.addf %1168, %1189 : vector<16x16xf32>
    %c96_241 = arith.constant 96 : index
    %1191 = memref.load %arg4[%c96_241] : memref<225xf32, #tpu.memory_space<smem>>
    %1192 = vector.broadcast %1191 : f32 to vector<16x16xf32>
    %1193 = arith.mulf %1182, %1192 : vector<16x16xf32>
    %1194 = arith.addf %1172, %1193 : vector<16x16xf32>
    %c141_242 = arith.constant 141 : index
    %1195 = memref.load %arg4[%c141_242] : memref<225xf32, #tpu.memory_space<smem>>
    %1196 = vector.broadcast %1195 : f32 to vector<16x16xf32>
    %1197 = arith.mulf %1182, %1196 : vector<16x16xf32>
    %1198 = arith.addf %1176, %1197 : vector<16x16xf32>
    %c186_243 = arith.constant 186 : index
    %1199 = memref.load %arg4[%c186_243] : memref<225xf32, #tpu.memory_space<smem>>
    %1200 = vector.broadcast %1199 : f32 to vector<16x16xf32>
    %1201 = arith.mulf %1182, %1200 : vector<16x16xf32>
    %1202 = arith.addf %1180, %1201 : vector<16x16xf32>
    %c0_244 = arith.constant 0 : index
    %c2_245 = arith.constant 2 : index
    %c1_246 = arith.constant 1 : index
    %1203 = vector.load %arg10[%c0_244, %c2_245, %c1_246] : memref<5x18x18xf32, #tpu.memory_space<vmem>>, vector<1x16x16xf32>
    %1204 = vector.shape_cast %1203 : vector<1x16x16xf32> to vector<16x16xf32>
    %c7_247 = arith.constant 7 : index
    %1205 = memref.load %arg4[%c7_247] : memref<225xf32, #tpu.memory_space<smem>>
    %1206 = vector.broadcast %1205 : f32 to vector<16x16xf32>
    %1207 = arith.mulf %1204, %1206 : vector<16x16xf32>
    %1208 = arith.addf %1186, %1207 : vector<16x16xf32>
    %c52_248 = arith.constant 52 : index
    %1209 = memref.load %arg4[%c52_248] : memref<225xf32, #tpu.memory_space<smem>>
    %1210 = vector.broadcast %1209 : f32 to vector<16x16xf32>
    %1211 = arith.mulf %1204, %1210 : vector<16x16xf32>
    %1212 = arith.addf %1190, %1211 : vector<16x16xf32>
    %c97_249 = arith.constant 97 : index
    %1213 = memref.load %arg4[%c97_249] : memref<225xf32, #tpu.memory_space<smem>>
    %1214 = vector.broadcast %1213 : f32 to vector<16x16xf32>
    %1215 = arith.mulf %1204, %1214 : vector<16x16xf32>
    %1216 = arith.addf %1194, %1215 : vector<16x16xf32>
    %c142_250 = arith.constant 142 : index
    %1217 = memref.load %arg4[%c142_250] : memref<225xf32, #tpu.memory_space<smem>>
    %1218 = vector.broadcast %1217 : f32 to vector<16x16xf32>
    %1219 = arith.mulf %1204, %1218 : vector<16x16xf32>
    %1220 = arith.addf %1198, %1219 : vector<16x16xf32>
    %c187_251 = arith.constant 187 : index
    %1221 = memref.load %arg4[%c187_251] : memref<225xf32, #tpu.memory_space<smem>>
    %1222 = vector.broadcast %1221 : f32 to vector<16x16xf32>
    %1223 = arith.mulf %1204, %1222 : vector<16x16xf32>
    %1224 = arith.addf %1202, %1223 : vector<16x16xf32>
    %c0_252 = arith.constant 0 : index
    %c2_253 = arith.constant 2 : index
    %c2_254 = arith.constant 2 : index
    %1225 = vector.load %arg10[%c0_252, %c2_253, %c2_254] : memref<5x18x18xf32, #tpu.memory_space<vmem>>, vector<1x16x16xf32>
    %1226 = vector.shape_cast %1225 : vector<1x16x16xf32> to vector<16x16xf32>
    %c8_255 = arith.constant 8 : index
    %1227 = memref.load %arg4[%c8_255] : memref<225xf32, #tpu.memory_space<smem>>
    %1228 = vector.broadcast %1227 : f32 to vector<16x16xf32>
    %1229 = arith.mulf %1226, %1228 : vector<16x16xf32>
    %1230 = arith.addf %1208, %1229 : vector<16x16xf32>
    %c53_256 = arith.constant 53 : index
    %1231 = memref.load %arg4[%c53_256] : memref<225xf32, #tpu.memory_space<smem>>
    %1232 = vector.broadcast %1231 : f32 to vector<16x16xf32>
    %1233 = arith.mulf %1226, %1232 : vector<16x16xf32>
    %1234 = arith.addf %1212, %1233 : vector<16x16xf32>
    %c98_257 = arith.constant 98 : index
    %1235 = memref.load %arg4[%c98_257] : memref<225xf32, #tpu.memory_space<smem>>
    %1236 = vector.broadcast %1235 : f32 to vector<16x16xf32>
    %1237 = arith.mulf %1226, %1236 : vector<16x16xf32>
    %1238 = arith.addf %1216, %1237 : vector<16x16xf32>
    %c143_258 = arith.constant 143 : index
    %1239 = memref.load %arg4[%c143_258] : memref<225xf32, #tpu.memory_space<smem>>
    %1240 = vector.broadcast %1239 : f32 to vector<16x16xf32>
    %1241 = arith.mulf %1226, %1240 : vector<16x16xf32>
    %1242 = arith.addf %1220, %1241 : vector<16x16xf32>
    %c188_259 = arith.constant 188 : index
    %1243 = memref.load %arg4[%c188_259] : memref<225xf32, #tpu.memory_space<smem>>
    %1244 = vector.broadcast %1243 : f32 to vector<16x16xf32>
    %1245 = arith.mulf %1226, %1244 : vector<16x16xf32>
    %1246 = arith.addf %1224, %1245 : vector<16x16xf32>
    %c1_260 = arith.constant 1 : index
    %c0_261 = arith.constant 0 : index
    %c0_262 = arith.constant 0 : index
    %1247 = vector.load %arg10[%c1_260, %c0_261, %c0_262] : memref<5x18x18xf32, #tpu.memory_space<vmem>>, vector<1x16x16xf32>
    %1248 = vector.shape_cast %1247 : vector<1x16x16xf32> to vector<16x16xf32>
    %c9_263 = arith.constant 9 : index
    %1249 = memref.load %arg4[%c9_263] : memref<225xf32, #tpu.memory_space<smem>>
    %1250 = vector.broadcast %1249 : f32 to vector<16x16xf32>
    %1251 = arith.mulf %1248, %1250 : vector<16x16xf32>
    %1252 = arith.addf %1230, %1251 : vector<16x16xf32>
    %c54_264 = arith.constant 54 : index
    %1253 = memref.load %arg4[%c54_264] : memref<225xf32, #tpu.memory_space<smem>>
    %1254 = vector.broadcast %1253 : f32 to vector<16x16xf32>
    %1255 = arith.mulf %1248, %1254 : vector<16x16xf32>
    %1256 = arith.addf %1234, %1255 : vector<16x16xf32>
    %c99_265 = arith.constant 99 : index
    %1257 = memref.load %arg4[%c99_265] : memref<225xf32, #tpu.memory_space<smem>>
    %1258 = vector.broadcast %1257 : f32 to vector<16x16xf32>
    %1259 = arith.mulf %1248, %1258 : vector<16x16xf32>
    %1260 = arith.addf %1238, %1259 : vector<16x16xf32>
    %c144_266 = arith.constant 144 : index
    %1261 = memref.load %arg4[%c144_266] : memref<225xf32, #tpu.memory_space<smem>>
    %1262 = vector.broadcast %1261 : f32 to vector<16x16xf32>
    %1263 = arith.mulf %1248, %1262 : vector<16x16xf32>
    %1264 = arith.addf %1242, %1263 : vector<16x16xf32>
    %c189_267 = arith.constant 189 : index
    %1265 = memref.load %arg4[%c189_267] : memref<225xf32, #tpu.memory_space<smem>>
    %1266 = vector.broadcast %1265 : f32 to vector<16x16xf32>
    %1267 = arith.mulf %1248, %1266 : vector<16x16xf32>
    %1268 = arith.addf %1246, %1267 : vector<16x16xf32>
    %c1_268 = arith.constant 1 : index
    %c0_269 = arith.constant 0 : index
    %c1_270 = arith.constant 1 : index
    %1269 = vector.load %arg10[%c1_268, %c0_269, %c1_270] : memref<5x18x18xf32, #tpu.memory_space<vmem>>, vector<1x16x16xf32>
    %1270 = vector.shape_cast %1269 : vector<1x16x16xf32> to vector<16x16xf32>
    %c10_271 = arith.constant 10 : index
    %1271 = memref.load %arg4[%c10_271] : memref<225xf32, #tpu.memory_space<smem>>
    %1272 = vector.broadcast %1271 : f32 to vector<16x16xf32>
    %1273 = arith.mulf %1270, %1272 : vector<16x16xf32>
    %1274 = arith.addf %1252, %1273 : vector<16x16xf32>
    %c55_272 = arith.constant 55 : index
    %1275 = memref.load %arg4[%c55_272] : memref<225xf32, #tpu.memory_space<smem>>
    %1276 = vector.broadcast %1275 : f32 to vector<16x16xf32>
    %1277 = arith.mulf %1270, %1276 : vector<16x16xf32>
    %1278 = arith.addf %1256, %1277 : vector<16x16xf32>
    %c100_273 = arith.constant 100 : index
    %1279 = memref.load %arg4[%c100_273] : memref<225xf32, #tpu.memory_space<smem>>
    %1280 = vector.broadcast %1279 : f32 to vector<16x16xf32>
    %1281 = arith.mulf %1270, %1280 : vector<16x16xf32>
    %1282 = arith.addf %1260, %1281 : vector<16x16xf32>
    %c145_274 = arith.constant 145 : index
    %1283 = memref.load %arg4[%c145_274] : memref<225xf32, #tpu.memory_space<smem>>
    %1284 = vector.broadcast %1283 : f32 to vector<16x16xf32>
    %1285 = arith.mulf %1270, %1284 : vector<16x16xf32>
    %1286 = arith.addf %1264, %1285 : vector<16x16xf32>
    %c190_275 = arith.constant 190 : index
    %1287 = memref.load %arg4[%c190_275] : memref<225xf32, #tpu.memory_space<smem>>
    %1288 = vector.broadcast %1287 : f32 to vector<16x16xf32>
    %1289 = arith.mulf %1270, %1288 : vector<16x16xf32>
    %1290 = arith.addf %1268, %1289 : vector<16x16xf32>
    %c1_276 = arith.constant 1 : index
    %c0_277 = arith.constant 0 : index
    %c2_278 = arith.constant 2 : index
    %1291 = vector.load %arg10[%c1_276, %c0_277, %c2_278] : memref<5x18x18xf32, #tpu.memory_space<vmem>>, vector<1x16x16xf32>
    %1292 = vector.shape_cast %1291 : vector<1x16x16xf32> to vector<16x16xf32>
    %c11_279 = arith.constant 11 : index
    %1293 = memref.load %arg4[%c11_279] : memref<225xf32, #tpu.memory_space<smem>>
    %1294 = vector.broadcast %1293 : f32 to vector<16x16xf32>
    %1295 = arith.mulf %1292, %1294 : vector<16x16xf32>
    %1296 = arith.addf %1274, %1295 : vector<16x16xf32>
    %c56_280 = arith.constant 56 : index
    %1297 = memref.load %arg4[%c56_280] : memref<225xf32, #tpu.memory_space<smem>>
    %1298 = vector.broadcast %1297 : f32 to vector<16x16xf32>
    %1299 = arith.mulf %1292, %1298 : vector<16x16xf32>
    %1300 = arith.addf %1278, %1299 : vector<16x16xf32>
    %c101_281 = arith.constant 101 : index
    %1301 = memref.load %arg4[%c101_281] : memref<225xf32, #tpu.memory_space<smem>>
    %1302 = vector.broadcast %1301 : f32 to vector<16x16xf32>
    %1303 = arith.mulf %1292, %1302 : vector<16x16xf32>
    %1304 = arith.addf %1282, %1303 : vector<16x16xf32>
    %c146_282 = arith.constant 146 : index
    %1305 = memref.load %arg4[%c146_282] : memref<225xf32, #tpu.memory_space<smem>>
    %1306 = vector.broadcast %1305 : f32 to vector<16x16xf32>
    %1307 = arith.mulf %1292, %1306 : vector<16x16xf32>
    %1308 = arith.addf %1286, %1307 : vector<16x16xf32>
    %c191_283 = arith.constant 191 : index
    %1309 = memref.load %arg4[%c191_283] : memref<225xf32, #tpu.memory_space<smem>>
    %1310 = vector.broadcast %1309 : f32 to vector<16x16xf32>
    %1311 = arith.mulf %1292, %1310 : vector<16x16xf32>
    %1312 = arith.addf %1290, %1311 : vector<16x16xf32>
    %c1_284 = arith.constant 1 : index
    %c1_285 = arith.constant 1 : index
    %c0_286 = arith.constant 0 : index
    %1313 = vector.load %arg10[%c1_284, %c1_285, %c0_286] : memref<5x18x18xf32, #tpu.memory_space<vmem>>, vector<1x16x16xf32>
    %1314 = vector.shape_cast %1313 : vector<1x16x16xf32> to vector<16x16xf32>
    %c12_287 = arith.constant 12 : index
    %1315 = memref.load %arg4[%c12_287] : memref<225xf32, #tpu.memory_space<smem>>
    %1316 = vector.broadcast %1315 : f32 to vector<16x16xf32>
    %1317 = arith.mulf %1314, %1316 : vector<16x16xf32>
    %1318 = arith.addf %1296, %1317 : vector<16x16xf32>
    %c57_288 = arith.constant 57 : index
    %1319 = memref.load %arg4[%c57_288] : memref<225xf32, #tpu.memory_space<smem>>
    %1320 = vector.broadcast %1319 : f32 to vector<16x16xf32>
    %1321 = arith.mulf %1314, %1320 : vector<16x16xf32>
    %1322 = arith.addf %1300, %1321 : vector<16x16xf32>
    %c102_289 = arith.constant 102 : index
    %1323 = memref.load %arg4[%c102_289] : memref<225xf32, #tpu.memory_space<smem>>
    %1324 = vector.broadcast %1323 : f32 to vector<16x16xf32>
    %1325 = arith.mulf %1314, %1324 : vector<16x16xf32>
    %1326 = arith.addf %1304, %1325 : vector<16x16xf32>
    %c147_290 = arith.constant 147 : index
    %1327 = memref.load %arg4[%c147_290] : memref<225xf32, #tpu.memory_space<smem>>
    %1328 = vector.broadcast %1327 : f32 to vector<16x16xf32>
    %1329 = arith.mulf %1314, %1328 : vector<16x16xf32>
    %1330 = arith.addf %1308, %1329 : vector<16x16xf32>
    %c192_291 = arith.constant 192 : index
    %1331 = memref.load %arg4[%c192_291] : memref<225xf32, #tpu.memory_space<smem>>
    %1332 = vector.broadcast %1331 : f32 to vector<16x16xf32>
    %1333 = arith.mulf %1314, %1332 : vector<16x16xf32>
    %1334 = arith.addf %1312, %1333 : vector<16x16xf32>
    %c1_292 = arith.constant 1 : index
    %c1_293 = arith.constant 1 : index
    %c1_294 = arith.constant 1 : index
    %1335 = vector.load %arg10[%c1_292, %c1_293, %c1_294] : memref<5x18x18xf32, #tpu.memory_space<vmem>>, vector<1x16x16xf32>
    %1336 = vector.shape_cast %1335 : vector<1x16x16xf32> to vector<16x16xf32>
    %c13_295 = arith.constant 13 : index
    %1337 = memref.load %arg4[%c13_295] : memref<225xf32, #tpu.memory_space<smem>>
    %1338 = vector.broadcast %1337 : f32 to vector<16x16xf32>
    %1339 = arith.mulf %1336, %1338 : vector<16x16xf32>
    %1340 = arith.addf %1318, %1339 : vector<16x16xf32>
    %c58_296 = arith.constant 58 : index
    %1341 = memref.load %arg4[%c58_296] : memref<225xf32, #tpu.memory_space<smem>>
    %1342 = vector.broadcast %1341 : f32 to vector<16x16xf32>
    %1343 = arith.mulf %1336, %1342 : vector<16x16xf32>
    %1344 = arith.addf %1322, %1343 : vector<16x16xf32>
    %c103_297 = arith.constant 103 : index
    %1345 = memref.load %arg4[%c103_297] : memref<225xf32, #tpu.memory_space<smem>>
    %1346 = vector.broadcast %1345 : f32 to vector<16x16xf32>
    %1347 = arith.mulf %1336, %1346 : vector<16x16xf32>
    %1348 = arith.addf %1326, %1347 : vector<16x16xf32>
    %c148_298 = arith.constant 148 : index
    %1349 = memref.load %arg4[%c148_298] : memref<225xf32, #tpu.memory_space<smem>>
    %1350 = vector.broadcast %1349 : f32 to vector<16x16xf32>
    %1351 = arith.mulf %1336, %1350 : vector<16x16xf32>
    %1352 = arith.addf %1330, %1351 : vector<16x16xf32>
    %c193_299 = arith.constant 193 : index
    %1353 = memref.load %arg4[%c193_299] : memref<225xf32, #tpu.memory_space<smem>>
    %1354 = vector.broadcast %1353 : f32 to vector<16x16xf32>
    %1355 = arith.mulf %1336, %1354 : vector<16x16xf32>
    %1356 = arith.addf %1334, %1355 : vector<16x16xf32>
    %c1_300 = arith.constant 1 : index
    %c1_301 = arith.constant 1 : index
    %c2_302 = arith.constant 2 : index
    %1357 = vector.load %arg10[%c1_300, %c1_301, %c2_302] : memref<5x18x18xf32, #tpu.memory_space<vmem>>, vector<1x16x16xf32>
    %1358 = vector.shape_cast %1357 : vector<1x16x16xf32> to vector<16x16xf32>
    %c14_303 = arith.constant 14 : index
    %1359 = memref.load %arg4[%c14_303] : memref<225xf32, #tpu.memory_space<smem>>
    %1360 = vector.broadcast %1359 : f32 to vector<16x16xf32>
    %1361 = arith.mulf %1358, %1360 : vector<16x16xf32>
    %1362 = arith.addf %1340, %1361 : vector<16x16xf32>
    %c59_304 = arith.constant 59 : index
    %1363 = memref.load %arg4[%c59_304] : memref<225xf32, #tpu.memory_space<smem>>
    %1364 = vector.broadcast %1363 : f32 to vector<16x16xf32>
    %1365 = arith.mulf %1358, %1364 : vector<16x16xf32>
    %1366 = arith.addf %1344, %1365 : vector<16x16xf32>
    %c104_305 = arith.constant 104 : index
    %1367 = memref.load %arg4[%c104_305] : memref<225xf32, #tpu.memory_space<smem>>
    %1368 = vector.broadcast %1367 : f32 to vector<16x16xf32>
    %1369 = arith.mulf %1358, %1368 : vector<16x16xf32>
    %1370 = arith.addf %1348, %1369 : vector<16x16xf32>
    %c149_306 = arith.constant 149 : index
    %1371 = memref.load %arg4[%c149_306] : memref<225xf32, #tpu.memory_space<smem>>
    %1372 = vector.broadcast %1371 : f32 to vector<16x16xf32>
    %1373 = arith.mulf %1358, %1372 : vector<16x16xf32>
    %1374 = arith.addf %1352, %1373 : vector<16x16xf32>
    %c194_307 = arith.constant 194 : index
    %1375 = memref.load %arg4[%c194_307] : memref<225xf32, #tpu.memory_space<smem>>
    %1376 = vector.broadcast %1375 : f32 to vector<16x16xf32>
    %1377 = arith.mulf %1358, %1376 : vector<16x16xf32>
    %1378 = arith.addf %1356, %1377 : vector<16x16xf32>
    %c1_308 = arith.constant 1 : index
    %c2_309 = arith.constant 2 : index
    %c0_310 = arith.constant 0 : index
    %1379 = vector.load %arg10[%c1_308, %c2_309, %c0_310] : memref<5x18x18xf32, #tpu.memory_space<vmem>>, vector<1x16x16xf32>
    %1380 = vector.shape_cast %1379 : vector<1x16x16xf32> to vector<16x16xf32>
    %c15_311 = arith.constant 15 : index
    %1381 = memref.load %arg4[%c15_311] : memref<225xf32, #tpu.memory_space<smem>>
    %1382 = vector.broadcast %1381 : f32 to vector<16x16xf32>
    %1383 = arith.mulf %1380, %1382 : vector<16x16xf32>
    %1384 = arith.addf %1362, %1383 : vector<16x16xf32>
    %c60_312 = arith.constant 60 : index
    %1385 = memref.load %arg4[%c60_312] : memref<225xf32, #tpu.memory_space<smem>>
    %1386 = vector.broadcast %1385 : f32 to vector<16x16xf32>
    %1387 = arith.mulf %1380, %1386 : vector<16x16xf32>
    %1388 = arith.addf %1366, %1387 : vector<16x16xf32>
    %c105_313 = arith.constant 105 : index
    %1389 = memref.load %arg4[%c105_313] : memref<225xf32, #tpu.memory_space<smem>>
    %1390 = vector.broadcast %1389 : f32 to vector<16x16xf32>
    %1391 = arith.mulf %1380, %1390 : vector<16x16xf32>
    %1392 = arith.addf %1370, %1391 : vector<16x16xf32>
    %c150_314 = arith.constant 150 : index
    %1393 = memref.load %arg4[%c150_314] : memref<225xf32, #tpu.memory_space<smem>>
    %1394 = vector.broadcast %1393 : f32 to vector<16x16xf32>
    %1395 = arith.mulf %1380, %1394 : vector<16x16xf32>
    %1396 = arith.addf %1374, %1395 : vector<16x16xf32>
    %c195_315 = arith.constant 195 : index
    %1397 = memref.load %arg4[%c195_315] : memref<225xf32, #tpu.memory_space<smem>>
    %1398 = vector.broadcast %1397 : f32 to vector<16x16xf32>
    %1399 = arith.mulf %1380, %1398 : vector<16x16xf32>
    %1400 = arith.addf %1378, %1399 : vector<16x16xf32>
    %c1_316 = arith.constant 1 : index
    %c2_317 = arith.constant 2 : index
    %c1_318 = arith.constant 1 : index
    %1401 = vector.load %arg10[%c1_316, %c2_317, %c1_318] : memref<5x18x18xf32, #tpu.memory_space<vmem>>, vector<1x16x16xf32>
    %1402 = vector.shape_cast %1401 : vector<1x16x16xf32> to vector<16x16xf32>
    %c16_319 = arith.constant 16 : index
    %1403 = memref.load %arg4[%c16_319] : memref<225xf32, #tpu.memory_space<smem>>
    %1404 = vector.broadcast %1403 : f32 to vector<16x16xf32>
    %1405 = arith.mulf %1402, %1404 : vector<16x16xf32>
    %1406 = arith.addf %1384, %1405 : vector<16x16xf32>
    %c61_320 = arith.constant 61 : index
    %1407 = memref.load %arg4[%c61_320] : memref<225xf32, #tpu.memory_space<smem>>
    %1408 = vector.broadcast %1407 : f32 to vector<16x16xf32>
    %1409 = arith.mulf %1402, %1408 : vector<16x16xf32>
    %1410 = arith.addf %1388, %1409 : vector<16x16xf32>
    %c106_321 = arith.constant 106 : index
    %1411 = memref.load %arg4[%c106_321] : memref<225xf32, #tpu.memory_space<smem>>
    %1412 = vector.broadcast %1411 : f32 to vector<16x16xf32>
    %1413 = arith.mulf %1402, %1412 : vector<16x16xf32>
    %1414 = arith.addf %1392, %1413 : vector<16x16xf32>
    %c151_322 = arith.constant 151 : index
    %1415 = memref.load %arg4[%c151_322] : memref<225xf32, #tpu.memory_space<smem>>
    %1416 = vector.broadcast %1415 : f32 to vector<16x16xf32>
    %1417 = arith.mulf %1402, %1416 : vector<16x16xf32>
    %1418 = arith.addf %1396, %1417 : vector<16x16xf32>
    %c196_323 = arith.constant 196 : index
    %1419 = memref.load %arg4[%c196_323] : memref<225xf32, #tpu.memory_space<smem>>
    %1420 = vector.broadcast %1419 : f32 to vector<16x16xf32>
    %1421 = arith.mulf %1402, %1420 : vector<16x16xf32>
    %1422 = arith.addf %1400, %1421 : vector<16x16xf32>
    %c1_324 = arith.constant 1 : index
    %c2_325 = arith.constant 2 : index
    %c2_326 = arith.constant 2 : index
    %1423 = vector.load %arg10[%c1_324, %c2_325, %c2_326] : memref<5x18x18xf32, #tpu.memory_space<vmem>>, vector<1x16x16xf32>
    %1424 = vector.shape_cast %1423 : vector<1x16x16xf32> to vector<16x16xf32>
    %c17_327 = arith.constant 17 : index
    %1425 = memref.load %arg4[%c17_327] : memref<225xf32, #tpu.memory_space<smem>>
    %1426 = vector.broadcast %1425 : f32 to vector<16x16xf32>
    %1427 = arith.mulf %1424, %1426 : vector<16x16xf32>
    %1428 = arith.addf %1406, %1427 : vector<16x16xf32>
    %c62_328 = arith.constant 62 : index
    %1429 = memref.load %arg4[%c62_328] : memref<225xf32, #tpu.memory_space<smem>>
    %1430 = vector.broadcast %1429 : f32 to vector<16x16xf32>
    %1431 = arith.mulf %1424, %1430 : vector<16x16xf32>
    %1432 = arith.addf %1410, %1431 : vector<16x16xf32>
    %c107_329 = arith.constant 107 : index
    %1433 = memref.load %arg4[%c107_329] : memref<225xf32, #tpu.memory_space<smem>>
    %1434 = vector.broadcast %1433 : f32 to vector<16x16xf32>
    %1435 = arith.mulf %1424, %1434 : vector<16x16xf32>
    %1436 = arith.addf %1414, %1435 : vector<16x16xf32>
    %c152_330 = arith.constant 152 : index
    %1437 = memref.load %arg4[%c152_330] : memref<225xf32, #tpu.memory_space<smem>>
    %1438 = vector.broadcast %1437 : f32 to vector<16x16xf32>
    %1439 = arith.mulf %1424, %1438 : vector<16x16xf32>
    %1440 = arith.addf %1418, %1439 : vector<16x16xf32>
    %c197_331 = arith.constant 197 : index
    %1441 = memref.load %arg4[%c197_331] : memref<225xf32, #tpu.memory_space<smem>>
    %1442 = vector.broadcast %1441 : f32 to vector<16x16xf32>
    %1443 = arith.mulf %1424, %1442 : vector<16x16xf32>
    %1444 = arith.addf %1422, %1443 : vector<16x16xf32>
    %c2_332 = arith.constant 2 : index
    %c0_333 = arith.constant 0 : index
    %c0_334 = arith.constant 0 : index
    %1445 = vector.load %arg10[%c2_332, %c0_333, %c0_334] : memref<5x18x18xf32, #tpu.memory_space<vmem>>, vector<1x16x16xf32>
    %1446 = vector.shape_cast %1445 : vector<1x16x16xf32> to vector<16x16xf32>
    %c18_335 = arith.constant 18 : index
    %1447 = memref.load %arg4[%c18_335] : memref<225xf32, #tpu.memory_space<smem>>
    %1448 = vector.broadcast %1447 : f32 to vector<16x16xf32>
    %1449 = arith.mulf %1446, %1448 : vector<16x16xf32>
    %1450 = arith.addf %1428, %1449 : vector<16x16xf32>
    %c63_336 = arith.constant 63 : index
    %1451 = memref.load %arg4[%c63_336] : memref<225xf32, #tpu.memory_space<smem>>
    %1452 = vector.broadcast %1451 : f32 to vector<16x16xf32>
    %1453 = arith.mulf %1446, %1452 : vector<16x16xf32>
    %1454 = arith.addf %1432, %1453 : vector<16x16xf32>
    %c108_337 = arith.constant 108 : index
    %1455 = memref.load %arg4[%c108_337] : memref<225xf32, #tpu.memory_space<smem>>
    %1456 = vector.broadcast %1455 : f32 to vector<16x16xf32>
    %1457 = arith.mulf %1446, %1456 : vector<16x16xf32>
    %1458 = arith.addf %1436, %1457 : vector<16x16xf32>
    %c153_338 = arith.constant 153 : index
    %1459 = memref.load %arg4[%c153_338] : memref<225xf32, #tpu.memory_space<smem>>
    %1460 = vector.broadcast %1459 : f32 to vector<16x16xf32>
    %1461 = arith.mulf %1446, %1460 : vector<16x16xf32>
    %1462 = arith.addf %1440, %1461 : vector<16x16xf32>
    %c198_339 = arith.constant 198 : index
    %1463 = memref.load %arg4[%c198_339] : memref<225xf32, #tpu.memory_space<smem>>
    %1464 = vector.broadcast %1463 : f32 to vector<16x16xf32>
    %1465 = arith.mulf %1446, %1464 : vector<16x16xf32>
    %1466 = arith.addf %1444, %1465 : vector<16x16xf32>
    %c2_340 = arith.constant 2 : index
    %c0_341 = arith.constant 0 : index
    %c1_342 = arith.constant 1 : index
    %1467 = vector.load %arg10[%c2_340, %c0_341, %c1_342] : memref<5x18x18xf32, #tpu.memory_space<vmem>>, vector<1x16x16xf32>
    %1468 = vector.shape_cast %1467 : vector<1x16x16xf32> to vector<16x16xf32>
    %c19_343 = arith.constant 19 : index
    %1469 = memref.load %arg4[%c19_343] : memref<225xf32, #tpu.memory_space<smem>>
    %1470 = vector.broadcast %1469 : f32 to vector<16x16xf32>
    %1471 = arith.mulf %1468, %1470 : vector<16x16xf32>
    %1472 = arith.addf %1450, %1471 : vector<16x16xf32>
    %c64_344 = arith.constant 64 : index
    %1473 = memref.load %arg4[%c64_344] : memref<225xf32, #tpu.memory_space<smem>>
    %1474 = vector.broadcast %1473 : f32 to vector<16x16xf32>
    %1475 = arith.mulf %1468, %1474 : vector<16x16xf32>
    %1476 = arith.addf %1454, %1475 : vector<16x16xf32>
    %c109_345 = arith.constant 109 : index
    %1477 = memref.load %arg4[%c109_345] : memref<225xf32, #tpu.memory_space<smem>>
    %1478 = vector.broadcast %1477 : f32 to vector<16x16xf32>
    %1479 = arith.mulf %1468, %1478 : vector<16x16xf32>
    %1480 = arith.addf %1458, %1479 : vector<16x16xf32>
    %c154_346 = arith.constant 154 : index
    %1481 = memref.load %arg4[%c154_346] : memref<225xf32, #tpu.memory_space<smem>>
    %1482 = vector.broadcast %1481 : f32 to vector<16x16xf32>
    %1483 = arith.mulf %1468, %1482 : vector<16x16xf32>
    %1484 = arith.addf %1462, %1483 : vector<16x16xf32>
    %c199_347 = arith.constant 199 : index
    %1485 = memref.load %arg4[%c199_347] : memref<225xf32, #tpu.memory_space<smem>>
    %1486 = vector.broadcast %1485 : f32 to vector<16x16xf32>
    %1487 = arith.mulf %1468, %1486 : vector<16x16xf32>
    %1488 = arith.addf %1466, %1487 : vector<16x16xf32>
    %c2_348 = arith.constant 2 : index
    %c0_349 = arith.constant 0 : index
    %c2_350 = arith.constant 2 : index
    %1489 = vector.load %arg10[%c2_348, %c0_349, %c2_350] : memref<5x18x18xf32, #tpu.memory_space<vmem>>, vector<1x16x16xf32>
    %1490 = vector.shape_cast %1489 : vector<1x16x16xf32> to vector<16x16xf32>
    %c20_351 = arith.constant 20 : index
    %1491 = memref.load %arg4[%c20_351] : memref<225xf32, #tpu.memory_space<smem>>
    %1492 = vector.broadcast %1491 : f32 to vector<16x16xf32>
    %1493 = arith.mulf %1490, %1492 : vector<16x16xf32>
    %1494 = arith.addf %1472, %1493 : vector<16x16xf32>
    %c65_352 = arith.constant 65 : index
    %1495 = memref.load %arg4[%c65_352] : memref<225xf32, #tpu.memory_space<smem>>
    %1496 = vector.broadcast %1495 : f32 to vector<16x16xf32>
    %1497 = arith.mulf %1490, %1496 : vector<16x16xf32>
    %1498 = arith.addf %1476, %1497 : vector<16x16xf32>
    %c110_353 = arith.constant 110 : index
    %1499 = memref.load %arg4[%c110_353] : memref<225xf32, #tpu.memory_space<smem>>
    %1500 = vector.broadcast %1499 : f32 to vector<16x16xf32>
    %1501 = arith.mulf %1490, %1500 : vector<16x16xf32>
    %1502 = arith.addf %1480, %1501 : vector<16x16xf32>
    %c155_354 = arith.constant 155 : index
    %1503 = memref.load %arg4[%c155_354] : memref<225xf32, #tpu.memory_space<smem>>
    %1504 = vector.broadcast %1503 : f32 to vector<16x16xf32>
    %1505 = arith.mulf %1490, %1504 : vector<16x16xf32>
    %1506 = arith.addf %1484, %1505 : vector<16x16xf32>
    %c200_355 = arith.constant 200 : index
    %1507 = memref.load %arg4[%c200_355] : memref<225xf32, #tpu.memory_space<smem>>
    %1508 = vector.broadcast %1507 : f32 to vector<16x16xf32>
    %1509 = arith.mulf %1490, %1508 : vector<16x16xf32>
    %1510 = arith.addf %1488, %1509 : vector<16x16xf32>
    %c2_356 = arith.constant 2 : index
    %c1_357 = arith.constant 1 : index
    %c0_358 = arith.constant 0 : index
    %1511 = vector.load %arg10[%c2_356, %c1_357, %c0_358] : memref<5x18x18xf32, #tpu.memory_space<vmem>>, vector<1x16x16xf32>
    %1512 = vector.shape_cast %1511 : vector<1x16x16xf32> to vector<16x16xf32>
    %c21_359 = arith.constant 21 : index
    %1513 = memref.load %arg4[%c21_359] : memref<225xf32, #tpu.memory_space<smem>>
    %1514 = vector.broadcast %1513 : f32 to vector<16x16xf32>
    %1515 = arith.mulf %1512, %1514 : vector<16x16xf32>
    %1516 = arith.addf %1494, %1515 : vector<16x16xf32>
    %c66_360 = arith.constant 66 : index
    %1517 = memref.load %arg4[%c66_360] : memref<225xf32, #tpu.memory_space<smem>>
    %1518 = vector.broadcast %1517 : f32 to vector<16x16xf32>
    %1519 = arith.mulf %1512, %1518 : vector<16x16xf32>
    %1520 = arith.addf %1498, %1519 : vector<16x16xf32>
    %c111_361 = arith.constant 111 : index
    %1521 = memref.load %arg4[%c111_361] : memref<225xf32, #tpu.memory_space<smem>>
    %1522 = vector.broadcast %1521 : f32 to vector<16x16xf32>
    %1523 = arith.mulf %1512, %1522 : vector<16x16xf32>
    %1524 = arith.addf %1502, %1523 : vector<16x16xf32>
    %c156_362 = arith.constant 156 : index
    %1525 = memref.load %arg4[%c156_362] : memref<225xf32, #tpu.memory_space<smem>>
    %1526 = vector.broadcast %1525 : f32 to vector<16x16xf32>
    %1527 = arith.mulf %1512, %1526 : vector<16x16xf32>
    %1528 = arith.addf %1506, %1527 : vector<16x16xf32>
    %c201_363 = arith.constant 201 : index
    %1529 = memref.load %arg4[%c201_363] : memref<225xf32, #tpu.memory_space<smem>>
    %1530 = vector.broadcast %1529 : f32 to vector<16x16xf32>
    %1531 = arith.mulf %1512, %1530 : vector<16x16xf32>
    %1532 = arith.addf %1510, %1531 : vector<16x16xf32>
    %c2_364 = arith.constant 2 : index
    %c1_365 = arith.constant 1 : index
    %c1_366 = arith.constant 1 : index
    %1533 = vector.load %arg10[%c2_364, %c1_365, %c1_366] : memref<5x18x18xf32, #tpu.memory_space<vmem>>, vector<1x16x16xf32>
    %1534 = vector.shape_cast %1533 : vector<1x16x16xf32> to vector<16x16xf32>
    %c22_367 = arith.constant 22 : index
    %1535 = memref.load %arg4[%c22_367] : memref<225xf32, #tpu.memory_space<smem>>
    %1536 = vector.broadcast %1535 : f32 to vector<16x16xf32>
    %1537 = arith.mulf %1534, %1536 : vector<16x16xf32>
    %1538 = arith.addf %1516, %1537 : vector<16x16xf32>
    %c67_368 = arith.constant 67 : index
    %1539 = memref.load %arg4[%c67_368] : memref<225xf32, #tpu.memory_space<smem>>
    %1540 = vector.broadcast %1539 : f32 to vector<16x16xf32>
    %1541 = arith.mulf %1534, %1540 : vector<16x16xf32>
    %1542 = arith.addf %1520, %1541 : vector<16x16xf32>
    %c112_369 = arith.constant 112 : index
    %1543 = memref.load %arg4[%c112_369] : memref<225xf32, #tpu.memory_space<smem>>
    %1544 = vector.broadcast %1543 : f32 to vector<16x16xf32>
    %1545 = arith.mulf %1534, %1544 : vector<16x16xf32>
    %1546 = arith.addf %1524, %1545 : vector<16x16xf32>
    %c157_370 = arith.constant 157 : index
    %1547 = memref.load %arg4[%c157_370] : memref<225xf32, #tpu.memory_space<smem>>
    %1548 = vector.broadcast %1547 : f32 to vector<16x16xf32>
    %1549 = arith.mulf %1534, %1548 : vector<16x16xf32>
    %1550 = arith.addf %1528, %1549 : vector<16x16xf32>
    %c202_371 = arith.constant 202 : index
    %1551 = memref.load %arg4[%c202_371] : memref<225xf32, #tpu.memory_space<smem>>
    %1552 = vector.broadcast %1551 : f32 to vector<16x16xf32>
    %1553 = arith.mulf %1534, %1552 : vector<16x16xf32>
    %1554 = arith.addf %1532, %1553 : vector<16x16xf32>
    %c2_372 = arith.constant 2 : index
    %c1_373 = arith.constant 1 : index
    %c2_374 = arith.constant 2 : index
    %1555 = vector.load %arg10[%c2_372, %c1_373, %c2_374] : memref<5x18x18xf32, #tpu.memory_space<vmem>>, vector<1x16x16xf32>
    %1556 = vector.shape_cast %1555 : vector<1x16x16xf32> to vector<16x16xf32>
    %c23_375 = arith.constant 23 : index
    %1557 = memref.load %arg4[%c23_375] : memref<225xf32, #tpu.memory_space<smem>>
    %1558 = vector.broadcast %1557 : f32 to vector<16x16xf32>
    %1559 = arith.mulf %1556, %1558 : vector<16x16xf32>
    %1560 = arith.addf %1538, %1559 : vector<16x16xf32>
    %c68_376 = arith.constant 68 : index
    %1561 = memref.load %arg4[%c68_376] : memref<225xf32, #tpu.memory_space<smem>>
    %1562 = vector.broadcast %1561 : f32 to vector<16x16xf32>
    %1563 = arith.mulf %1556, %1562 : vector<16x16xf32>
    %1564 = arith.addf %1542, %1563 : vector<16x16xf32>
    %c113_377 = arith.constant 113 : index
    %1565 = memref.load %arg4[%c113_377] : memref<225xf32, #tpu.memory_space<smem>>
    %1566 = vector.broadcast %1565 : f32 to vector<16x16xf32>
    %1567 = arith.mulf %1556, %1566 : vector<16x16xf32>
    %1568 = arith.addf %1546, %1567 : vector<16x16xf32>
    %c158_378 = arith.constant 158 : index
    %1569 = memref.load %arg4[%c158_378] : memref<225xf32, #tpu.memory_space<smem>>
    %1570 = vector.broadcast %1569 : f32 to vector<16x16xf32>
    %1571 = arith.mulf %1556, %1570 : vector<16x16xf32>
    %1572 = arith.addf %1550, %1571 : vector<16x16xf32>
    %c203_379 = arith.constant 203 : index
    %1573 = memref.load %arg4[%c203_379] : memref<225xf32, #tpu.memory_space<smem>>
    %1574 = vector.broadcast %1573 : f32 to vector<16x16xf32>
    %1575 = arith.mulf %1556, %1574 : vector<16x16xf32>
    %1576 = arith.addf %1554, %1575 : vector<16x16xf32>
    %c2_380 = arith.constant 2 : index
    %c2_381 = arith.constant 2 : index
    %c0_382 = arith.constant 0 : index
    %1577 = vector.load %arg10[%c2_380, %c2_381, %c0_382] : memref<5x18x18xf32, #tpu.memory_space<vmem>>, vector<1x16x16xf32>
    %1578 = vector.shape_cast %1577 : vector<1x16x16xf32> to vector<16x16xf32>
    %c24_383 = arith.constant 24 : index
    %1579 = memref.load %arg4[%c24_383] : memref<225xf32, #tpu.memory_space<smem>>
    %1580 = vector.broadcast %1579 : f32 to vector<16x16xf32>
    %1581 = arith.mulf %1578, %1580 : vector<16x16xf32>
    %1582 = arith.addf %1560, %1581 : vector<16x16xf32>
    %c69_384 = arith.constant 69 : index
    %1583 = memref.load %arg4[%c69_384] : memref<225xf32, #tpu.memory_space<smem>>
    %1584 = vector.broadcast %1583 : f32 to vector<16x16xf32>
    %1585 = arith.mulf %1578, %1584 : vector<16x16xf32>
    %1586 = arith.addf %1564, %1585 : vector<16x16xf32>
    %c114_385 = arith.constant 114 : index
    %1587 = memref.load %arg4[%c114_385] : memref<225xf32, #tpu.memory_space<smem>>
    %1588 = vector.broadcast %1587 : f32 to vector<16x16xf32>
    %1589 = arith.mulf %1578, %1588 : vector<16x16xf32>
    %1590 = arith.addf %1568, %1589 : vector<16x16xf32>
    %c159_386 = arith.constant 159 : index
    %1591 = memref.load %arg4[%c159_386] : memref<225xf32, #tpu.memory_space<smem>>
    %1592 = vector.broadcast %1591 : f32 to vector<16x16xf32>
    %1593 = arith.mulf %1578, %1592 : vector<16x16xf32>
    %1594 = arith.addf %1572, %1593 : vector<16x16xf32>
    %c204_387 = arith.constant 204 : index
    %1595 = memref.load %arg4[%c204_387] : memref<225xf32, #tpu.memory_space<smem>>
    %1596 = vector.broadcast %1595 : f32 to vector<16x16xf32>
    %1597 = arith.mulf %1578, %1596 : vector<16x16xf32>
    %1598 = arith.addf %1576, %1597 : vector<16x16xf32>
    %c2_388 = arith.constant 2 : index
    %c2_389 = arith.constant 2 : index
    %c1_390 = arith.constant 1 : index
    %1599 = vector.load %arg10[%c2_388, %c2_389, %c1_390] : memref<5x18x18xf32, #tpu.memory_space<vmem>>, vector<1x16x16xf32>
    %1600 = vector.shape_cast %1599 : vector<1x16x16xf32> to vector<16x16xf32>
    %c25_391 = arith.constant 25 : index
    %1601 = memref.load %arg4[%c25_391] : memref<225xf32, #tpu.memory_space<smem>>
    %1602 = vector.broadcast %1601 : f32 to vector<16x16xf32>
    %1603 = arith.mulf %1600, %1602 : vector<16x16xf32>
    %1604 = arith.addf %1582, %1603 : vector<16x16xf32>
    %c70_392 = arith.constant 70 : index
    %1605 = memref.load %arg4[%c70_392] : memref<225xf32, #tpu.memory_space<smem>>
    %1606 = vector.broadcast %1605 : f32 to vector<16x16xf32>
    %1607 = arith.mulf %1600, %1606 : vector<16x16xf32>
    %1608 = arith.addf %1586, %1607 : vector<16x16xf32>
    %c115_393 = arith.constant 115 : index
    %1609 = memref.load %arg4[%c115_393] : memref<225xf32, #tpu.memory_space<smem>>
    %1610 = vector.broadcast %1609 : f32 to vector<16x16xf32>
    %1611 = arith.mulf %1600, %1610 : vector<16x16xf32>
    %1612 = arith.addf %1590, %1611 : vector<16x16xf32>
    %c160_394 = arith.constant 160 : index
    %1613 = memref.load %arg4[%c160_394] : memref<225xf32, #tpu.memory_space<smem>>
    %1614 = vector.broadcast %1613 : f32 to vector<16x16xf32>
    %1615 = arith.mulf %1600, %1614 : vector<16x16xf32>
    %1616 = arith.addf %1594, %1615 : vector<16x16xf32>
    %c205_395 = arith.constant 205 : index
    %1617 = memref.load %arg4[%c205_395] : memref<225xf32, #tpu.memory_space<smem>>
    %1618 = vector.broadcast %1617 : f32 to vector<16x16xf32>
    %1619 = arith.mulf %1600, %1618 : vector<16x16xf32>
    %1620 = arith.addf %1598, %1619 : vector<16x16xf32>
    %c2_396 = arith.constant 2 : index
    %c2_397 = arith.constant 2 : index
    %c2_398 = arith.constant 2 : index
    %1621 = vector.load %arg10[%c2_396, %c2_397, %c2_398] : memref<5x18x18xf32, #tpu.memory_space<vmem>>, vector<1x16x16xf32>
    %1622 = vector.shape_cast %1621 : vector<1x16x16xf32> to vector<16x16xf32>
    %c26_399 = arith.constant 26 : index
    %1623 = memref.load %arg4[%c26_399] : memref<225xf32, #tpu.memory_space<smem>>
    %1624 = vector.broadcast %1623 : f32 to vector<16x16xf32>
    %1625 = arith.mulf %1622, %1624 : vector<16x16xf32>
    %1626 = arith.addf %1604, %1625 : vector<16x16xf32>
    %c71_400 = arith.constant 71 : index
    %1627 = memref.load %arg4[%c71_400] : memref<225xf32, #tpu.memory_space<smem>>
    %1628 = vector.broadcast %1627 : f32 to vector<16x16xf32>
    %1629 = arith.mulf %1622, %1628 : vector<16x16xf32>
    %1630 = arith.addf %1608, %1629 : vector<16x16xf32>
    %c116_401 = arith.constant 116 : index
    %1631 = memref.load %arg4[%c116_401] : memref<225xf32, #tpu.memory_space<smem>>
    %1632 = vector.broadcast %1631 : f32 to vector<16x16xf32>
    %1633 = arith.mulf %1622, %1632 : vector<16x16xf32>
    %1634 = arith.addf %1612, %1633 : vector<16x16xf32>
    %c161_402 = arith.constant 161 : index
    %1635 = memref.load %arg4[%c161_402] : memref<225xf32, #tpu.memory_space<smem>>
    %1636 = vector.broadcast %1635 : f32 to vector<16x16xf32>
    %1637 = arith.mulf %1622, %1636 : vector<16x16xf32>
    %1638 = arith.addf %1616, %1637 : vector<16x16xf32>
    %c206_403 = arith.constant 206 : index
    %1639 = memref.load %arg4[%c206_403] : memref<225xf32, #tpu.memory_space<smem>>
    %1640 = vector.broadcast %1639 : f32 to vector<16x16xf32>
    %1641 = arith.mulf %1622, %1640 : vector<16x16xf32>
    %1642 = arith.addf %1620, %1641 : vector<16x16xf32>
    %c3_404 = arith.constant 3 : index
    %c0_405 = arith.constant 0 : index
    %c0_406 = arith.constant 0 : index
    %1643 = vector.load %arg10[%c3_404, %c0_405, %c0_406] : memref<5x18x18xf32, #tpu.memory_space<vmem>>, vector<1x16x16xf32>
    %1644 = vector.shape_cast %1643 : vector<1x16x16xf32> to vector<16x16xf32>
    %c27_407 = arith.constant 27 : index
    %1645 = memref.load %arg4[%c27_407] : memref<225xf32, #tpu.memory_space<smem>>
    %1646 = vector.broadcast %1645 : f32 to vector<16x16xf32>
    %1647 = arith.mulf %1644, %1646 : vector<16x16xf32>
    %1648 = arith.addf %1626, %1647 : vector<16x16xf32>
    %c72_408 = arith.constant 72 : index
    %1649 = memref.load %arg4[%c72_408] : memref<225xf32, #tpu.memory_space<smem>>
    %1650 = vector.broadcast %1649 : f32 to vector<16x16xf32>
    %1651 = arith.mulf %1644, %1650 : vector<16x16xf32>
    %1652 = arith.addf %1630, %1651 : vector<16x16xf32>
    %c117_409 = arith.constant 117 : index
    %1653 = memref.load %arg4[%c117_409] : memref<225xf32, #tpu.memory_space<smem>>
    %1654 = vector.broadcast %1653 : f32 to vector<16x16xf32>
    %1655 = arith.mulf %1644, %1654 : vector<16x16xf32>
    %1656 = arith.addf %1634, %1655 : vector<16x16xf32>
    %c162_410 = arith.constant 162 : index
    %1657 = memref.load %arg4[%c162_410] : memref<225xf32, #tpu.memory_space<smem>>
    %1658 = vector.broadcast %1657 : f32 to vector<16x16xf32>
    %1659 = arith.mulf %1644, %1658 : vector<16x16xf32>
    %1660 = arith.addf %1638, %1659 : vector<16x16xf32>
    %c207_411 = arith.constant 207 : index
    %1661 = memref.load %arg4[%c207_411] : memref<225xf32, #tpu.memory_space<smem>>
    %1662 = vector.broadcast %1661 : f32 to vector<16x16xf32>
    %1663 = arith.mulf %1644, %1662 : vector<16x16xf32>
    %1664 = arith.addf %1642, %1663 : vector<16x16xf32>
    %c3_412 = arith.constant 3 : index
    %c0_413 = arith.constant 0 : index
    %c1_414 = arith.constant 1 : index
    %1665 = vector.load %arg10[%c3_412, %c0_413, %c1_414] : memref<5x18x18xf32, #tpu.memory_space<vmem>>, vector<1x16x16xf32>
    %1666 = vector.shape_cast %1665 : vector<1x16x16xf32> to vector<16x16xf32>
    %c28_415 = arith.constant 28 : index
    %1667 = memref.load %arg4[%c28_415] : memref<225xf32, #tpu.memory_space<smem>>
    %1668 = vector.broadcast %1667 : f32 to vector<16x16xf32>
    %1669 = arith.mulf %1666, %1668 : vector<16x16xf32>
    %1670 = arith.addf %1648, %1669 : vector<16x16xf32>
    %c73_416 = arith.constant 73 : index
    %1671 = memref.load %arg4[%c73_416] : memref<225xf32, #tpu.memory_space<smem>>
    %1672 = vector.broadcast %1671 : f32 to vector<16x16xf32>
    %1673 = arith.mulf %1666, %1672 : vector<16x16xf32>
    %1674 = arith.addf %1652, %1673 : vector<16x16xf32>
    %c118_417 = arith.constant 118 : index
    %1675 = memref.load %arg4[%c118_417] : memref<225xf32, #tpu.memory_space<smem>>
    %1676 = vector.broadcast %1675 : f32 to vector<16x16xf32>
    %1677 = arith.mulf %1666, %1676 : vector<16x16xf32>
    %1678 = arith.addf %1656, %1677 : vector<16x16xf32>
    %c163_418 = arith.constant 163 : index
    %1679 = memref.load %arg4[%c163_418] : memref<225xf32, #tpu.memory_space<smem>>
    %1680 = vector.broadcast %1679 : f32 to vector<16x16xf32>
    %1681 = arith.mulf %1666, %1680 : vector<16x16xf32>
    %1682 = arith.addf %1660, %1681 : vector<16x16xf32>
    %c208_419 = arith.constant 208 : index
    %1683 = memref.load %arg4[%c208_419] : memref<225xf32, #tpu.memory_space<smem>>
    %1684 = vector.broadcast %1683 : f32 to vector<16x16xf32>
    %1685 = arith.mulf %1666, %1684 : vector<16x16xf32>
    %1686 = arith.addf %1664, %1685 : vector<16x16xf32>
    %c3_420 = arith.constant 3 : index
    %c0_421 = arith.constant 0 : index
    %c2_422 = arith.constant 2 : index
    %1687 = vector.load %arg10[%c3_420, %c0_421, %c2_422] : memref<5x18x18xf32, #tpu.memory_space<vmem>>, vector<1x16x16xf32>
    %1688 = vector.shape_cast %1687 : vector<1x16x16xf32> to vector<16x16xf32>
    %c29_423 = arith.constant 29 : index
    %1689 = memref.load %arg4[%c29_423] : memref<225xf32, #tpu.memory_space<smem>>
    %1690 = vector.broadcast %1689 : f32 to vector<16x16xf32>
    %1691 = arith.mulf %1688, %1690 : vector<16x16xf32>
    %1692 = arith.addf %1670, %1691 : vector<16x16xf32>
    %c74_424 = arith.constant 74 : index
    %1693 = memref.load %arg4[%c74_424] : memref<225xf32, #tpu.memory_space<smem>>
    %1694 = vector.broadcast %1693 : f32 to vector<16x16xf32>
    %1695 = arith.mulf %1688, %1694 : vector<16x16xf32>
    %1696 = arith.addf %1674, %1695 : vector<16x16xf32>
    %c119_425 = arith.constant 119 : index
    %1697 = memref.load %arg4[%c119_425] : memref<225xf32, #tpu.memory_space<smem>>
    %1698 = vector.broadcast %1697 : f32 to vector<16x16xf32>
    %1699 = arith.mulf %1688, %1698 : vector<16x16xf32>
    %1700 = arith.addf %1678, %1699 : vector<16x16xf32>
    %c164_426 = arith.constant 164 : index
    %1701 = memref.load %arg4[%c164_426] : memref<225xf32, #tpu.memory_space<smem>>
    %1702 = vector.broadcast %1701 : f32 to vector<16x16xf32>
    %1703 = arith.mulf %1688, %1702 : vector<16x16xf32>
    %1704 = arith.addf %1682, %1703 : vector<16x16xf32>
    %c209_427 = arith.constant 209 : index
    %1705 = memref.load %arg4[%c209_427] : memref<225xf32, #tpu.memory_space<smem>>
    %1706 = vector.broadcast %1705 : f32 to vector<16x16xf32>
    %1707 = arith.mulf %1688, %1706 : vector<16x16xf32>
    %1708 = arith.addf %1686, %1707 : vector<16x16xf32>
    %c3_428 = arith.constant 3 : index
    %c1_429 = arith.constant 1 : index
    %c0_430 = arith.constant 0 : index
    %1709 = vector.load %arg10[%c3_428, %c1_429, %c0_430] : memref<5x18x18xf32, #tpu.memory_space<vmem>>, vector<1x16x16xf32>
    %1710 = vector.shape_cast %1709 : vector<1x16x16xf32> to vector<16x16xf32>
    %c30_431 = arith.constant 30 : index
    %1711 = memref.load %arg4[%c30_431] : memref<225xf32, #tpu.memory_space<smem>>
    %1712 = vector.broadcast %1711 : f32 to vector<16x16xf32>
    %1713 = arith.mulf %1710, %1712 : vector<16x16xf32>
    %1714 = arith.addf %1692, %1713 : vector<16x16xf32>
    %c75_432 = arith.constant 75 : index
    %1715 = memref.load %arg4[%c75_432] : memref<225xf32, #tpu.memory_space<smem>>
    %1716 = vector.broadcast %1715 : f32 to vector<16x16xf32>
    %1717 = arith.mulf %1710, %1716 : vector<16x16xf32>
    %1718 = arith.addf %1696, %1717 : vector<16x16xf32>
    %c120_433 = arith.constant 120 : index
    %1719 = memref.load %arg4[%c120_433] : memref<225xf32, #tpu.memory_space<smem>>
    %1720 = vector.broadcast %1719 : f32 to vector<16x16xf32>
    %1721 = arith.mulf %1710, %1720 : vector<16x16xf32>
    %1722 = arith.addf %1700, %1721 : vector<16x16xf32>
    %c165_434 = arith.constant 165 : index
    %1723 = memref.load %arg4[%c165_434] : memref<225xf32, #tpu.memory_space<smem>>
    %1724 = vector.broadcast %1723 : f32 to vector<16x16xf32>
    %1725 = arith.mulf %1710, %1724 : vector<16x16xf32>
    %1726 = arith.addf %1704, %1725 : vector<16x16xf32>
    %c210_435 = arith.constant 210 : index
    %1727 = memref.load %arg4[%c210_435] : memref<225xf32, #tpu.memory_space<smem>>
    %1728 = vector.broadcast %1727 : f32 to vector<16x16xf32>
    %1729 = arith.mulf %1710, %1728 : vector<16x16xf32>
    %1730 = arith.addf %1708, %1729 : vector<16x16xf32>
    %c3_436 = arith.constant 3 : index
    %c1_437 = arith.constant 1 : index
    %c1_438 = arith.constant 1 : index
    %1731 = vector.load %arg10[%c3_436, %c1_437, %c1_438] : memref<5x18x18xf32, #tpu.memory_space<vmem>>, vector<1x16x16xf32>
    %1732 = vector.shape_cast %1731 : vector<1x16x16xf32> to vector<16x16xf32>
    %c31_439 = arith.constant 31 : index
    %1733 = memref.load %arg4[%c31_439] : memref<225xf32, #tpu.memory_space<smem>>
    %1734 = vector.broadcast %1733 : f32 to vector<16x16xf32>
    %1735 = arith.mulf %1732, %1734 : vector<16x16xf32>
    %1736 = arith.addf %1714, %1735 : vector<16x16xf32>
    %c76_440 = arith.constant 76 : index
    %1737 = memref.load %arg4[%c76_440] : memref<225xf32, #tpu.memory_space<smem>>
    %1738 = vector.broadcast %1737 : f32 to vector<16x16xf32>
    %1739 = arith.mulf %1732, %1738 : vector<16x16xf32>
    %1740 = arith.addf %1718, %1739 : vector<16x16xf32>
    %c121_441 = arith.constant 121 : index
    %1741 = memref.load %arg4[%c121_441] : memref<225xf32, #tpu.memory_space<smem>>
    %1742 = vector.broadcast %1741 : f32 to vector<16x16xf32>
    %1743 = arith.mulf %1732, %1742 : vector<16x16xf32>
    %1744 = arith.addf %1722, %1743 : vector<16x16xf32>
    %c166_442 = arith.constant 166 : index
    %1745 = memref.load %arg4[%c166_442] : memref<225xf32, #tpu.memory_space<smem>>
    %1746 = vector.broadcast %1745 : f32 to vector<16x16xf32>
    %1747 = arith.mulf %1732, %1746 : vector<16x16xf32>
    %1748 = arith.addf %1726, %1747 : vector<16x16xf32>
    %c211_443 = arith.constant 211 : index
    %1749 = memref.load %arg4[%c211_443] : memref<225xf32, #tpu.memory_space<smem>>
    %1750 = vector.broadcast %1749 : f32 to vector<16x16xf32>
    %1751 = arith.mulf %1732, %1750 : vector<16x16xf32>
    %1752 = arith.addf %1730, %1751 : vector<16x16xf32>
    %c3_444 = arith.constant 3 : index
    %c1_445 = arith.constant 1 : index
    %c2_446 = arith.constant 2 : index
    %1753 = vector.load %arg10[%c3_444, %c1_445, %c2_446] : memref<5x18x18xf32, #tpu.memory_space<vmem>>, vector<1x16x16xf32>
    %1754 = vector.shape_cast %1753 : vector<1x16x16xf32> to vector<16x16xf32>
    %c32_447 = arith.constant 32 : index
    %1755 = memref.load %arg4[%c32_447] : memref<225xf32, #tpu.memory_space<smem>>
    %1756 = vector.broadcast %1755 : f32 to vector<16x16xf32>
    %1757 = arith.mulf %1754, %1756 : vector<16x16xf32>
    %1758 = arith.addf %1736, %1757 : vector<16x16xf32>
    %c77_448 = arith.constant 77 : index
    %1759 = memref.load %arg4[%c77_448] : memref<225xf32, #tpu.memory_space<smem>>
    %1760 = vector.broadcast %1759 : f32 to vector<16x16xf32>
    %1761 = arith.mulf %1754, %1760 : vector<16x16xf32>
    %1762 = arith.addf %1740, %1761 : vector<16x16xf32>
    %c122_449 = arith.constant 122 : index
    %1763 = memref.load %arg4[%c122_449] : memref<225xf32, #tpu.memory_space<smem>>
    %1764 = vector.broadcast %1763 : f32 to vector<16x16xf32>
    %1765 = arith.mulf %1754, %1764 : vector<16x16xf32>
    %1766 = arith.addf %1744, %1765 : vector<16x16xf32>
    %c167_450 = arith.constant 167 : index
    %1767 = memref.load %arg4[%c167_450] : memref<225xf32, #tpu.memory_space<smem>>
    %1768 = vector.broadcast %1767 : f32 to vector<16x16xf32>
    %1769 = arith.mulf %1754, %1768 : vector<16x16xf32>
    %1770 = arith.addf %1748, %1769 : vector<16x16xf32>
    %c212_451 = arith.constant 212 : index
    %1771 = memref.load %arg4[%c212_451] : memref<225xf32, #tpu.memory_space<smem>>
    %1772 = vector.broadcast %1771 : f32 to vector<16x16xf32>
    %1773 = arith.mulf %1754, %1772 : vector<16x16xf32>
    %1774 = arith.addf %1752, %1773 : vector<16x16xf32>
    %c3_452 = arith.constant 3 : index
    %c2_453 = arith.constant 2 : index
    %c0_454 = arith.constant 0 : index
    %1775 = vector.load %arg10[%c3_452, %c2_453, %c0_454] : memref<5x18x18xf32, #tpu.memory_space<vmem>>, vector<1x16x16xf32>
    %1776 = vector.shape_cast %1775 : vector<1x16x16xf32> to vector<16x16xf32>
    %c33_455 = arith.constant 33 : index
    %1777 = memref.load %arg4[%c33_455] : memref<225xf32, #tpu.memory_space<smem>>
    %1778 = vector.broadcast %1777 : f32 to vector<16x16xf32>
    %1779 = arith.mulf %1776, %1778 : vector<16x16xf32>
    %1780 = arith.addf %1758, %1779 : vector<16x16xf32>
    %c78_456 = arith.constant 78 : index
    %1781 = memref.load %arg4[%c78_456] : memref<225xf32, #tpu.memory_space<smem>>
    %1782 = vector.broadcast %1781 : f32 to vector<16x16xf32>
    %1783 = arith.mulf %1776, %1782 : vector<16x16xf32>
    %1784 = arith.addf %1762, %1783 : vector<16x16xf32>
    %c123_457 = arith.constant 123 : index
    %1785 = memref.load %arg4[%c123_457] : memref<225xf32, #tpu.memory_space<smem>>
    %1786 = vector.broadcast %1785 : f32 to vector<16x16xf32>
    %1787 = arith.mulf %1776, %1786 : vector<16x16xf32>
    %1788 = arith.addf %1766, %1787 : vector<16x16xf32>
    %c168_458 = arith.constant 168 : index
    %1789 = memref.load %arg4[%c168_458] : memref<225xf32, #tpu.memory_space<smem>>
    %1790 = vector.broadcast %1789 : f32 to vector<16x16xf32>
    %1791 = arith.mulf %1776, %1790 : vector<16x16xf32>
    %1792 = arith.addf %1770, %1791 : vector<16x16xf32>
    %c213_459 = arith.constant 213 : index
    %1793 = memref.load %arg4[%c213_459] : memref<225xf32, #tpu.memory_space<smem>>
    %1794 = vector.broadcast %1793 : f32 to vector<16x16xf32>
    %1795 = arith.mulf %1776, %1794 : vector<16x16xf32>
    %1796 = arith.addf %1774, %1795 : vector<16x16xf32>
    %c3_460 = arith.constant 3 : index
    %c2_461 = arith.constant 2 : index
    %c1_462 = arith.constant 1 : index
    %1797 = vector.load %arg10[%c3_460, %c2_461, %c1_462] : memref<5x18x18xf32, #tpu.memory_space<vmem>>, vector<1x16x16xf32>
    %1798 = vector.shape_cast %1797 : vector<1x16x16xf32> to vector<16x16xf32>
    %c34_463 = arith.constant 34 : index
    %1799 = memref.load %arg4[%c34_463] : memref<225xf32, #tpu.memory_space<smem>>
    %1800 = vector.broadcast %1799 : f32 to vector<16x16xf32>
    %1801 = arith.mulf %1798, %1800 : vector<16x16xf32>
    %1802 = arith.addf %1780, %1801 : vector<16x16xf32>
    %c79_464 = arith.constant 79 : index
    %1803 = memref.load %arg4[%c79_464] : memref<225xf32, #tpu.memory_space<smem>>
    %1804 = vector.broadcast %1803 : f32 to vector<16x16xf32>
    %1805 = arith.mulf %1798, %1804 : vector<16x16xf32>
    %1806 = arith.addf %1784, %1805 : vector<16x16xf32>
    %c124_465 = arith.constant 124 : index
    %1807 = memref.load %arg4[%c124_465] : memref<225xf32, #tpu.memory_space<smem>>
    %1808 = vector.broadcast %1807 : f32 to vector<16x16xf32>
    %1809 = arith.mulf %1798, %1808 : vector<16x16xf32>
    %1810 = arith.addf %1788, %1809 : vector<16x16xf32>
    %c169_466 = arith.constant 169 : index
    %1811 = memref.load %arg4[%c169_466] : memref<225xf32, #tpu.memory_space<smem>>
    %1812 = vector.broadcast %1811 : f32 to vector<16x16xf32>
    %1813 = arith.mulf %1798, %1812 : vector<16x16xf32>
    %1814 = arith.addf %1792, %1813 : vector<16x16xf32>
    %c214_467 = arith.constant 214 : index
    %1815 = memref.load %arg4[%c214_467] : memref<225xf32, #tpu.memory_space<smem>>
    %1816 = vector.broadcast %1815 : f32 to vector<16x16xf32>
    %1817 = arith.mulf %1798, %1816 : vector<16x16xf32>
    %1818 = arith.addf %1796, %1817 : vector<16x16xf32>
    %c3_468 = arith.constant 3 : index
    %c2_469 = arith.constant 2 : index
    %c2_470 = arith.constant 2 : index
    %1819 = vector.load %arg10[%c3_468, %c2_469, %c2_470] : memref<5x18x18xf32, #tpu.memory_space<vmem>>, vector<1x16x16xf32>
    %1820 = vector.shape_cast %1819 : vector<1x16x16xf32> to vector<16x16xf32>
    %c35_471 = arith.constant 35 : index
    %1821 = memref.load %arg4[%c35_471] : memref<225xf32, #tpu.memory_space<smem>>
    %1822 = vector.broadcast %1821 : f32 to vector<16x16xf32>
    %1823 = arith.mulf %1820, %1822 : vector<16x16xf32>
    %1824 = arith.addf %1802, %1823 : vector<16x16xf32>
    %c80_472 = arith.constant 80 : index
    %1825 = memref.load %arg4[%c80_472] : memref<225xf32, #tpu.memory_space<smem>>
    %1826 = vector.broadcast %1825 : f32 to vector<16x16xf32>
    %1827 = arith.mulf %1820, %1826 : vector<16x16xf32>
    %1828 = arith.addf %1806, %1827 : vector<16x16xf32>
    %c125_473 = arith.constant 125 : index
    %1829 = memref.load %arg4[%c125_473] : memref<225xf32, #tpu.memory_space<smem>>
    %1830 = vector.broadcast %1829 : f32 to vector<16x16xf32>
    %1831 = arith.mulf %1820, %1830 : vector<16x16xf32>
    %1832 = arith.addf %1810, %1831 : vector<16x16xf32>
    %c170_474 = arith.constant 170 : index
    %1833 = memref.load %arg4[%c170_474] : memref<225xf32, #tpu.memory_space<smem>>
    %1834 = vector.broadcast %1833 : f32 to vector<16x16xf32>
    %1835 = arith.mulf %1820, %1834 : vector<16x16xf32>
    %1836 = arith.addf %1814, %1835 : vector<16x16xf32>
    %c215_475 = arith.constant 215 : index
    %1837 = memref.load %arg4[%c215_475] : memref<225xf32, #tpu.memory_space<smem>>
    %1838 = vector.broadcast %1837 : f32 to vector<16x16xf32>
    %1839 = arith.mulf %1820, %1838 : vector<16x16xf32>
    %1840 = arith.addf %1818, %1839 : vector<16x16xf32>
    %c4_476 = arith.constant 4 : index
    %c0_477 = arith.constant 0 : index
    %c0_478 = arith.constant 0 : index
    %1841 = vector.load %arg10[%c4_476, %c0_477, %c0_478] : memref<5x18x18xf32, #tpu.memory_space<vmem>>, vector<1x16x16xf32>
    %1842 = vector.shape_cast %1841 : vector<1x16x16xf32> to vector<16x16xf32>
    %c36_479 = arith.constant 36 : index
    %1843 = memref.load %arg4[%c36_479] : memref<225xf32, #tpu.memory_space<smem>>
    %1844 = vector.broadcast %1843 : f32 to vector<16x16xf32>
    %1845 = arith.mulf %1842, %1844 : vector<16x16xf32>
    %1846 = arith.addf %1824, %1845 : vector<16x16xf32>
    %c81_480 = arith.constant 81 : index
    %1847 = memref.load %arg4[%c81_480] : memref<225xf32, #tpu.memory_space<smem>>
    %1848 = vector.broadcast %1847 : f32 to vector<16x16xf32>
    %1849 = arith.mulf %1842, %1848 : vector<16x16xf32>
    %1850 = arith.addf %1828, %1849 : vector<16x16xf32>
    %c126_481 = arith.constant 126 : index
    %1851 = memref.load %arg4[%c126_481] : memref<225xf32, #tpu.memory_space<smem>>
    %1852 = vector.broadcast %1851 : f32 to vector<16x16xf32>
    %1853 = arith.mulf %1842, %1852 : vector<16x16xf32>
    %1854 = arith.addf %1832, %1853 : vector<16x16xf32>
    %c171_482 = arith.constant 171 : index
    %1855 = memref.load %arg4[%c171_482] : memref<225xf32, #tpu.memory_space<smem>>
    %1856 = vector.broadcast %1855 : f32 to vector<16x16xf32>
    %1857 = arith.mulf %1842, %1856 : vector<16x16xf32>
    %1858 = arith.addf %1836, %1857 : vector<16x16xf32>
    %c216_483 = arith.constant 216 : index
    %1859 = memref.load %arg4[%c216_483] : memref<225xf32, #tpu.memory_space<smem>>
    %1860 = vector.broadcast %1859 : f32 to vector<16x16xf32>
    %1861 = arith.mulf %1842, %1860 : vector<16x16xf32>
    %1862 = arith.addf %1840, %1861 : vector<16x16xf32>
    %c4_484 = arith.constant 4 : index
    %c0_485 = arith.constant 0 : index
    %c1_486 = arith.constant 1 : index
    %1863 = vector.load %arg10[%c4_484, %c0_485, %c1_486] : memref<5x18x18xf32, #tpu.memory_space<vmem>>, vector<1x16x16xf32>
    %1864 = vector.shape_cast %1863 : vector<1x16x16xf32> to vector<16x16xf32>
    %c37_487 = arith.constant 37 : index
    %1865 = memref.load %arg4[%c37_487] : memref<225xf32, #tpu.memory_space<smem>>
    %1866 = vector.broadcast %1865 : f32 to vector<16x16xf32>
    %1867 = arith.mulf %1864, %1866 : vector<16x16xf32>
    %1868 = arith.addf %1846, %1867 : vector<16x16xf32>
    %c82_488 = arith.constant 82 : index
    %1869 = memref.load %arg4[%c82_488] : memref<225xf32, #tpu.memory_space<smem>>
    %1870 = vector.broadcast %1869 : f32 to vector<16x16xf32>
    %1871 = arith.mulf %1864, %1870 : vector<16x16xf32>
    %1872 = arith.addf %1850, %1871 : vector<16x16xf32>
    %c127_489 = arith.constant 127 : index
    %1873 = memref.load %arg4[%c127_489] : memref<225xf32, #tpu.memory_space<smem>>
    %1874 = vector.broadcast %1873 : f32 to vector<16x16xf32>
    %1875 = arith.mulf %1864, %1874 : vector<16x16xf32>
    %1876 = arith.addf %1854, %1875 : vector<16x16xf32>
    %c172_490 = arith.constant 172 : index
    %1877 = memref.load %arg4[%c172_490] : memref<225xf32, #tpu.memory_space<smem>>
    %1878 = vector.broadcast %1877 : f32 to vector<16x16xf32>
    %1879 = arith.mulf %1864, %1878 : vector<16x16xf32>
    %1880 = arith.addf %1858, %1879 : vector<16x16xf32>
    %c217_491 = arith.constant 217 : index
    %1881 = memref.load %arg4[%c217_491] : memref<225xf32, #tpu.memory_space<smem>>
    %1882 = vector.broadcast %1881 : f32 to vector<16x16xf32>
    %1883 = arith.mulf %1864, %1882 : vector<16x16xf32>
    %1884 = arith.addf %1862, %1883 : vector<16x16xf32>
    %c4_492 = arith.constant 4 : index
    %c0_493 = arith.constant 0 : index
    %c2_494 = arith.constant 2 : index
    %1885 = vector.load %arg10[%c4_492, %c0_493, %c2_494] : memref<5x18x18xf32, #tpu.memory_space<vmem>>, vector<1x16x16xf32>
    %1886 = vector.shape_cast %1885 : vector<1x16x16xf32> to vector<16x16xf32>
    %c38_495 = arith.constant 38 : index
    %1887 = memref.load %arg4[%c38_495] : memref<225xf32, #tpu.memory_space<smem>>
    %1888 = vector.broadcast %1887 : f32 to vector<16x16xf32>
    %1889 = arith.mulf %1886, %1888 : vector<16x16xf32>
    %1890 = arith.addf %1868, %1889 : vector<16x16xf32>
    %c83_496 = arith.constant 83 : index
    %1891 = memref.load %arg4[%c83_496] : memref<225xf32, #tpu.memory_space<smem>>
    %1892 = vector.broadcast %1891 : f32 to vector<16x16xf32>
    %1893 = arith.mulf %1886, %1892 : vector<16x16xf32>
    %1894 = arith.addf %1872, %1893 : vector<16x16xf32>
    %c128_497 = arith.constant 128 : index
    %1895 = memref.load %arg4[%c128_497] : memref<225xf32, #tpu.memory_space<smem>>
    %1896 = vector.broadcast %1895 : f32 to vector<16x16xf32>
    %1897 = arith.mulf %1886, %1896 : vector<16x16xf32>
    %1898 = arith.addf %1876, %1897 : vector<16x16xf32>
    %c173_498 = arith.constant 173 : index
    %1899 = memref.load %arg4[%c173_498] : memref<225xf32, #tpu.memory_space<smem>>
    %1900 = vector.broadcast %1899 : f32 to vector<16x16xf32>
    %1901 = arith.mulf %1886, %1900 : vector<16x16xf32>
    %1902 = arith.addf %1880, %1901 : vector<16x16xf32>
    %c218_499 = arith.constant 218 : index
    %1903 = memref.load %arg4[%c218_499] : memref<225xf32, #tpu.memory_space<smem>>
    %1904 = vector.broadcast %1903 : f32 to vector<16x16xf32>
    %1905 = arith.mulf %1886, %1904 : vector<16x16xf32>
    %1906 = arith.addf %1884, %1905 : vector<16x16xf32>
    %c4_500 = arith.constant 4 : index
    %c1_501 = arith.constant 1 : index
    %c0_502 = arith.constant 0 : index
    %1907 = vector.load %arg10[%c4_500, %c1_501, %c0_502] : memref<5x18x18xf32, #tpu.memory_space<vmem>>, vector<1x16x16xf32>
    %1908 = vector.shape_cast %1907 : vector<1x16x16xf32> to vector<16x16xf32>
    %c39_503 = arith.constant 39 : index
    %1909 = memref.load %arg4[%c39_503] : memref<225xf32, #tpu.memory_space<smem>>
    %1910 = vector.broadcast %1909 : f32 to vector<16x16xf32>
    %1911 = arith.mulf %1908, %1910 : vector<16x16xf32>
    %1912 = arith.addf %1890, %1911 : vector<16x16xf32>
    %c84_504 = arith.constant 84 : index
    %1913 = memref.load %arg4[%c84_504] : memref<225xf32, #tpu.memory_space<smem>>
    %1914 = vector.broadcast %1913 : f32 to vector<16x16xf32>
    %1915 = arith.mulf %1908, %1914 : vector<16x16xf32>
    %1916 = arith.addf %1894, %1915 : vector<16x16xf32>
    %c129_505 = arith.constant 129 : index
    %1917 = memref.load %arg4[%c129_505] : memref<225xf32, #tpu.memory_space<smem>>
    %1918 = vector.broadcast %1917 : f32 to vector<16x16xf32>
    %1919 = arith.mulf %1908, %1918 : vector<16x16xf32>
    %1920 = arith.addf %1898, %1919 : vector<16x16xf32>
    %c174_506 = arith.constant 174 : index
    %1921 = memref.load %arg4[%c174_506] : memref<225xf32, #tpu.memory_space<smem>>
    %1922 = vector.broadcast %1921 : f32 to vector<16x16xf32>
    %1923 = arith.mulf %1908, %1922 : vector<16x16xf32>
    %1924 = arith.addf %1902, %1923 : vector<16x16xf32>
    %c219_507 = arith.constant 219 : index
    %1925 = memref.load %arg4[%c219_507] : memref<225xf32, #tpu.memory_space<smem>>
    %1926 = vector.broadcast %1925 : f32 to vector<16x16xf32>
    %1927 = arith.mulf %1908, %1926 : vector<16x16xf32>
    %1928 = arith.addf %1906, %1927 : vector<16x16xf32>
    %c4_508 = arith.constant 4 : index
    %c1_509 = arith.constant 1 : index
    %c1_510 = arith.constant 1 : index
    %1929 = vector.load %arg10[%c4_508, %c1_509, %c1_510] : memref<5x18x18xf32, #tpu.memory_space<vmem>>, vector<1x16x16xf32>
    %1930 = vector.shape_cast %1929 : vector<1x16x16xf32> to vector<16x16xf32>
    %c40_511 = arith.constant 40 : index
    %1931 = memref.load %arg4[%c40_511] : memref<225xf32, #tpu.memory_space<smem>>
    %1932 = vector.broadcast %1931 : f32 to vector<16x16xf32>
    %1933 = arith.mulf %1930, %1932 : vector<16x16xf32>
    %1934 = arith.addf %1912, %1933 : vector<16x16xf32>
    %c85_512 = arith.constant 85 : index
    %1935 = memref.load %arg4[%c85_512] : memref<225xf32, #tpu.memory_space<smem>>
    %1936 = vector.broadcast %1935 : f32 to vector<16x16xf32>
    %1937 = arith.mulf %1930, %1936 : vector<16x16xf32>
    %1938 = arith.addf %1916, %1937 : vector<16x16xf32>
    %c130_513 = arith.constant 130 : index
    %1939 = memref.load %arg4[%c130_513] : memref<225xf32, #tpu.memory_space<smem>>
    %1940 = vector.broadcast %1939 : f32 to vector<16x16xf32>
    %1941 = arith.mulf %1930, %1940 : vector<16x16xf32>
    %1942 = arith.addf %1920, %1941 : vector<16x16xf32>
    %c175_514 = arith.constant 175 : index
    %1943 = memref.load %arg4[%c175_514] : memref<225xf32, #tpu.memory_space<smem>>
    %1944 = vector.broadcast %1943 : f32 to vector<16x16xf32>
    %1945 = arith.mulf %1930, %1944 : vector<16x16xf32>
    %1946 = arith.addf %1924, %1945 : vector<16x16xf32>
    %c220_515 = arith.constant 220 : index
    %1947 = memref.load %arg4[%c220_515] : memref<225xf32, #tpu.memory_space<smem>>
    %1948 = vector.broadcast %1947 : f32 to vector<16x16xf32>
    %1949 = arith.mulf %1930, %1948 : vector<16x16xf32>
    %1950 = arith.addf %1928, %1949 : vector<16x16xf32>
    %c4_516 = arith.constant 4 : index
    %c1_517 = arith.constant 1 : index
    %c2_518 = arith.constant 2 : index
    %1951 = vector.load %arg10[%c4_516, %c1_517, %c2_518] : memref<5x18x18xf32, #tpu.memory_space<vmem>>, vector<1x16x16xf32>
    %1952 = vector.shape_cast %1951 : vector<1x16x16xf32> to vector<16x16xf32>
    %c41_519 = arith.constant 41 : index
    %1953 = memref.load %arg4[%c41_519] : memref<225xf32, #tpu.memory_space<smem>>
    %1954 = vector.broadcast %1953 : f32 to vector<16x16xf32>
    %1955 = arith.mulf %1952, %1954 : vector<16x16xf32>
    %1956 = arith.addf %1934, %1955 : vector<16x16xf32>
    %c86_520 = arith.constant 86 : index
    %1957 = memref.load %arg4[%c86_520] : memref<225xf32, #tpu.memory_space<smem>>
    %1958 = vector.broadcast %1957 : f32 to vector<16x16xf32>
    %1959 = arith.mulf %1952, %1958 : vector<16x16xf32>
    %1960 = arith.addf %1938, %1959 : vector<16x16xf32>
    %c131_521 = arith.constant 131 : index
    %1961 = memref.load %arg4[%c131_521] : memref<225xf32, #tpu.memory_space<smem>>
    %1962 = vector.broadcast %1961 : f32 to vector<16x16xf32>
    %1963 = arith.mulf %1952, %1962 : vector<16x16xf32>
    %1964 = arith.addf %1942, %1963 : vector<16x16xf32>
    %c176_522 = arith.constant 176 : index
    %1965 = memref.load %arg4[%c176_522] : memref<225xf32, #tpu.memory_space<smem>>
    %1966 = vector.broadcast %1965 : f32 to vector<16x16xf32>
    %1967 = arith.mulf %1952, %1966 : vector<16x16xf32>
    %1968 = arith.addf %1946, %1967 : vector<16x16xf32>
    %c221_523 = arith.constant 221 : index
    %1969 = memref.load %arg4[%c221_523] : memref<225xf32, #tpu.memory_space<smem>>
    %1970 = vector.broadcast %1969 : f32 to vector<16x16xf32>
    %1971 = arith.mulf %1952, %1970 : vector<16x16xf32>
    %1972 = arith.addf %1950, %1971 : vector<16x16xf32>
    %c4_524 = arith.constant 4 : index
    %c2_525 = arith.constant 2 : index
    %c0_526 = arith.constant 0 : index
    %1973 = vector.load %arg10[%c4_524, %c2_525, %c0_526] : memref<5x18x18xf32, #tpu.memory_space<vmem>>, vector<1x16x16xf32>
    %1974 = vector.shape_cast %1973 : vector<1x16x16xf32> to vector<16x16xf32>
    %c42_527 = arith.constant 42 : index
    %1975 = memref.load %arg4[%c42_527] : memref<225xf32, #tpu.memory_space<smem>>
    %1976 = vector.broadcast %1975 : f32 to vector<16x16xf32>
    %1977 = arith.mulf %1974, %1976 : vector<16x16xf32>
    %1978 = arith.addf %1956, %1977 : vector<16x16xf32>
    %c87_528 = arith.constant 87 : index
    %1979 = memref.load %arg4[%c87_528] : memref<225xf32, #tpu.memory_space<smem>>
    %1980 = vector.broadcast %1979 : f32 to vector<16x16xf32>
    %1981 = arith.mulf %1974, %1980 : vector<16x16xf32>
    %1982 = arith.addf %1960, %1981 : vector<16x16xf32>
    %c132_529 = arith.constant 132 : index
    %1983 = memref.load %arg4[%c132_529] : memref<225xf32, #tpu.memory_space<smem>>
    %1984 = vector.broadcast %1983 : f32 to vector<16x16xf32>
    %1985 = arith.mulf %1974, %1984 : vector<16x16xf32>
    %1986 = arith.addf %1964, %1985 : vector<16x16xf32>
    %c177_530 = arith.constant 177 : index
    %1987 = memref.load %arg4[%c177_530] : memref<225xf32, #tpu.memory_space<smem>>
    %1988 = vector.broadcast %1987 : f32 to vector<16x16xf32>
    %1989 = arith.mulf %1974, %1988 : vector<16x16xf32>
    %1990 = arith.addf %1968, %1989 : vector<16x16xf32>
    %c222_531 = arith.constant 222 : index
    %1991 = memref.load %arg4[%c222_531] : memref<225xf32, #tpu.memory_space<smem>>
    %1992 = vector.broadcast %1991 : f32 to vector<16x16xf32>
    %1993 = arith.mulf %1974, %1992 : vector<16x16xf32>
    %1994 = arith.addf %1972, %1993 : vector<16x16xf32>
    %c4_532 = arith.constant 4 : index
    %c2_533 = arith.constant 2 : index
    %c1_534 = arith.constant 1 : index
    %1995 = vector.load %arg10[%c4_532, %c2_533, %c1_534] : memref<5x18x18xf32, #tpu.memory_space<vmem>>, vector<1x16x16xf32>
    %1996 = vector.shape_cast %1995 : vector<1x16x16xf32> to vector<16x16xf32>
    %c43_535 = arith.constant 43 : index
    %1997 = memref.load %arg4[%c43_535] : memref<225xf32, #tpu.memory_space<smem>>
    %1998 = vector.broadcast %1997 : f32 to vector<16x16xf32>
    %1999 = arith.mulf %1996, %1998 : vector<16x16xf32>
    %2000 = arith.addf %1978, %1999 : vector<16x16xf32>
    %c88_536 = arith.constant 88 : index
    %2001 = memref.load %arg4[%c88_536] : memref<225xf32, #tpu.memory_space<smem>>
    %2002 = vector.broadcast %2001 : f32 to vector<16x16xf32>
    %2003 = arith.mulf %1996, %2002 : vector<16x16xf32>
    %2004 = arith.addf %1982, %2003 : vector<16x16xf32>
    %c133_537 = arith.constant 133 : index
    %2005 = memref.load %arg4[%c133_537] : memref<225xf32, #tpu.memory_space<smem>>
    %2006 = vector.broadcast %2005 : f32 to vector<16x16xf32>
    %2007 = arith.mulf %1996, %2006 : vector<16x16xf32>
    %2008 = arith.addf %1986, %2007 : vector<16x16xf32>
    %c178_538 = arith.constant 178 : index
    %2009 = memref.load %arg4[%c178_538] : memref<225xf32, #tpu.memory_space<smem>>
    %2010 = vector.broadcast %2009 : f32 to vector<16x16xf32>
    %2011 = arith.mulf %1996, %2010 : vector<16x16xf32>
    %2012 = arith.addf %1990, %2011 : vector<16x16xf32>
    %c223_539 = arith.constant 223 : index
    %2013 = memref.load %arg4[%c223_539] : memref<225xf32, #tpu.memory_space<smem>>
    %2014 = vector.broadcast %2013 : f32 to vector<16x16xf32>
    %2015 = arith.mulf %1996, %2014 : vector<16x16xf32>
    %2016 = arith.addf %1994, %2015 : vector<16x16xf32>
    %c4_540 = arith.constant 4 : index
    %c2_541 = arith.constant 2 : index
    %c2_542 = arith.constant 2 : index
    %2017 = vector.load %arg10[%c4_540, %c2_541, %c2_542] : memref<5x18x18xf32, #tpu.memory_space<vmem>>, vector<1x16x16xf32>
    %2018 = vector.shape_cast %2017 : vector<1x16x16xf32> to vector<16x16xf32>
    %c44_543 = arith.constant 44 : index
    %2019 = memref.load %arg4[%c44_543] : memref<225xf32, #tpu.memory_space<smem>>
    %2020 = vector.broadcast %2019 : f32 to vector<16x16xf32>
    %2021 = arith.mulf %2018, %2020 : vector<16x16xf32>
    %2022 = arith.addf %2000, %2021 : vector<16x16xf32>
    %c89_544 = arith.constant 89 : index
    %2023 = memref.load %arg4[%c89_544] : memref<225xf32, #tpu.memory_space<smem>>
    %2024 = vector.broadcast %2023 : f32 to vector<16x16xf32>
    %2025 = arith.mulf %2018, %2024 : vector<16x16xf32>
    %2026 = arith.addf %2004, %2025 : vector<16x16xf32>
    %c134_545 = arith.constant 134 : index
    %2027 = memref.load %arg4[%c134_545] : memref<225xf32, #tpu.memory_space<smem>>
    %2028 = vector.broadcast %2027 : f32 to vector<16x16xf32>
    %2029 = arith.mulf %2018, %2028 : vector<16x16xf32>
    %2030 = arith.addf %2008, %2029 : vector<16x16xf32>
    %c179_546 = arith.constant 179 : index
    %2031 = memref.load %arg4[%c179_546] : memref<225xf32, #tpu.memory_space<smem>>
    %2032 = vector.broadcast %2031 : f32 to vector<16x16xf32>
    %2033 = arith.mulf %2018, %2032 : vector<16x16xf32>
    %2034 = arith.addf %2012, %2033 : vector<16x16xf32>
    %c224_547 = arith.constant 224 : index
    %2035 = memref.load %arg4[%c224_547] : memref<225xf32, #tpu.memory_space<smem>>
    %2036 = vector.broadcast %2035 : f32 to vector<16x16xf32>
    %2037 = arith.mulf %2018, %2036 : vector<16x16xf32>
    %2038 = arith.addf %2016, %2037 : vector<16x16xf32>
    %c0_548 = arith.constant 0 : index
    %2039 = memref.load %arg5[%c0_548] : memref<5xf32, #tpu.memory_space<smem>>
    %2040 = vector.broadcast %2039 : f32 to vector<16x16xf32>
    %2041 = arith.addf %2022, %2040 : vector<16x16xf32>
    %cst_549 = arith.constant 0.000000e+00 : f32
    %2042 = vector.broadcast %cst_549 : f32 to vector<16x16xf32>
    %2043 = arith.maximumf %2041, %2042 : vector<16x16xf32>
    %c0_550 = arith.constant 0 : index
    %c1_551 = arith.constant 1 : index
    %c1_552 = arith.constant 1 : index
    %2044 = vector.load %arg11[%c0_550, %c1_551, %c1_552] : memref<5x18x18xf32, #tpu.memory_space<vmem>>, vector<1x16x16xf32>
    %2045 = vector.shape_cast %2044 : vector<1x16x16xf32> to vector<16x16xf32>
    %2046 = vector.shape_cast %2043 : vector<16x16xf32> to vector<1x16x16xf32>
    tpu.vector_store %arg11[%c0_550, %c1_551, %c1_552], %2046 {strides = array<i32>} : memref<5x18x18xf32, #tpu.memory_space<vmem>>, vector<1x16x16xf32>,
    %c1_553 = arith.constant 1 : index
    %2047 = memref.load %arg5[%c1_553] : memref<5xf32, #tpu.memory_space<smem>>
    %2048 = vector.broadcast %2047 : f32 to vector<16x16xf32>
    %2049 = arith.addf %2026, %2048 : vector<16x16xf32>
    %cst_554 = arith.constant 0.000000e+00 : f32
    %2050 = vector.broadcast %cst_554 : f32 to vector<16x16xf32>
    %2051 = arith.maximumf %2049, %2050 : vector<16x16xf32>
    %c1_555 = arith.constant 1 : index
    %c1_556 = arith.constant 1 : index
    %c1_557 = arith.constant 1 : index
    %2052 = vector.load %arg11[%c1_555, %c1_556, %c1_557] : memref<5x18x18xf32, #tpu.memory_space<vmem>>, vector<1x16x16xf32>
    %2053 = vector.shape_cast %2052 : vector<1x16x16xf32> to vector<16x16xf32>
    %2054 = vector.shape_cast %2051 : vector<16x16xf32> to vector<1x16x16xf32>
    tpu.vector_store %arg11[%c1_555, %c1_556, %c1_557], %2054 {strides = array<i32>} : memref<5x18x18xf32, #tpu.memory_space<vmem>>, vector<1x16x16xf32>,
    %c2_558 = arith.constant 2 : index
    %2055 = memref.load %arg5[%c2_558] : memref<5xf32, #tpu.memory_space<smem>>
    %2056 = vector.broadcast %2055 : f32 to vector<16x16xf32>
    %2057 = arith.addf %2030, %2056 : vector<16x16xf32>
    %cst_559 = arith.constant 0.000000e+00 : f32
    %2058 = vector.broadcast %cst_559 : f32 to vector<16x16xf32>
    %2059 = arith.maximumf %2057, %2058 : vector<16x16xf32>
    %c2_560 = arith.constant 2 : index
    %c1_561 = arith.constant 1 : index
    %c1_562 = arith.constant 1 : index
    %2060 = vector.load %arg11[%c2_560, %c1_561, %c1_562] : memref<5x18x18xf32, #tpu.memory_space<vmem>>, vector<1x16x16xf32>
    %2061 = vector.shape_cast %2060 : vector<1x16x16xf32> to vector<16x16xf32>
    %2062 = vector.shape_cast %2059 : vector<16x16xf32> to vector<1x16x16xf32>
    tpu.vector_store %arg11[%c2_560, %c1_561, %c1_562], %2062 {strides = array<i32>} : memref<5x18x18xf32, #tpu.memory_space<vmem>>, vector<1x16x16xf32>,
    %c3_563 = arith.constant 3 : index
    %2063 = memref.load %arg5[%c3_563] : memref<5xf32, #tpu.memory_space<smem>>
    %2064 = vector.broadcast %2063 : f32 to vector<16x16xf32>
    %2065 = arith.addf %2034, %2064 : vector<16x16xf32>
    %cst_564 = arith.constant 0.000000e+00 : f32
    %2066 = vector.broadcast %cst_564 : f32 to vector<16x16xf32>
    %2067 = arith.maximumf %2065, %2066 : vector<16x16xf32>
    %c3_565 = arith.constant 3 : index
    %c1_566 = arith.constant 1 : index
    %c1_567 = arith.constant 1 : index
    %2068 = vector.load %arg11[%c3_565, %c1_566, %c1_567] : memref<5x18x18xf32, #tpu.memory_space<vmem>>, vector<1x16x16xf32>
    %2069 = vector.shape_cast %2068 : vector<1x16x16xf32> to vector<16x16xf32>
    %2070 = vector.shape_cast %2067 : vector<16x16xf32> to vector<1x16x16xf32>
    tpu.vector_store %arg11[%c3_565, %c1_566, %c1_567], %2070 {strides = array<i32>} : memref<5x18x18xf32, #tpu.memory_space<vmem>>, vector<1x16x16xf32>,
    %c4_568 = arith.constant 4 : index
    %2071 = memref.load %arg5[%c4_568] : memref<5xf32, #tpu.memory_space<smem>>
    %2072 = vector.broadcast %2071 : f32 to vector<16x16xf32>
    %2073 = arith.addf %2038, %2072 : vector<16x16xf32>
    %cst_569 = arith.constant 0.000000e+00 : f32
    %2074 = vector.broadcast %cst_569 : f32 to vector<16x16xf32>
    %2075 = arith.maximumf %2073, %2074 : vector<16x16xf32>
    %c4_570 = arith.constant 4 : index
    %c1_571 = arith.constant 1 : index
    %c1_572 = arith.constant 1 : index
    %2076 = vector.load %arg11[%c4_570, %c1_571, %c1_572] : memref<5x18x18xf32, #tpu.memory_space<vmem>>, vector<1x16x16xf32>
    %2077 = vector.shape_cast %2076 : vector<1x16x16xf32> to vector<16x16xf32>
    %2078 = vector.shape_cast %2075 : vector<16x16xf32> to vector<1x16x16xf32>
    tpu.vector_store %arg11[%c4_570, %c1_571, %c1_572], %2078 {strides = array<i32>} : memref<5x18x18xf32, #tpu.memory_space<vmem>>, vector<1x16x16xf32>,
    %cst_573 = arith.constant 0.000000e+00 : f32
    %2079 = vector.broadcast %cst_573 : f32 to vector<18x18xf32>
    %c0_574 = arith.constant 0 : index
    %c0_575 = arith.constant 0 : index
    %c0_576 = arith.constant 0 : index
    %2080 = vector.load %arg11[%c0_574, %c0_575, %c0_576] : memref<5x18x18xf32, #tpu.memory_space<vmem>>, vector<1x18x18xf32>
    %2081 = vector.shape_cast %2080 : vector<1x18x18xf32> to vector<18x18xf32>
    %c0_577 = arith.constant 0 : index
    %2082 = memref.load %arg6[%c0_577] : memref<5xf32, #tpu.memory_space<smem>>
    %2083 = vector.broadcast %2082 : f32 to vector<18x18xf32>
    %2084 = arith.mulf %2081, %2083 : vector<18x18xf32>
    %2085 = arith.addf %2079, %2084 : vector<18x18xf32>
    %c1_578 = arith.constant 1 : index
    %c0_579 = arith.constant 0 : index
    %c0_580 = arith.constant 0 : index
    %2086 = vector.load %arg11[%c1_578, %c0_579, %c0_580] : memref<5x18x18xf32, #tpu.memory_space<vmem>>, vector<1x18x18xf32>
    %2087 = vector.shape_cast %2086 : vector<1x18x18xf32> to vector<18x18xf32>
    %c1_581 = arith.constant 1 : index
    %2088 = memref.load %arg6[%c1_581] : memref<5xf32, #tpu.memory_space<smem>>
    %2089 = vector.broadcast %2088 : f32 to vector<18x18xf32>
    %2090 = arith.mulf %2087, %2089 : vector<18x18xf32>
    %2091 = arith.addf %2085, %2090 : vector<18x18xf32>
    %c2_582 = arith.constant 2 : index
    %c0_583 = arith.constant 0 : index
    %c0_584 = arith.constant 0 : index
    %2092 = vector.load %arg11[%c2_582, %c0_583, %c0_584] : memref<5x18x18xf32, #tpu.memory_space<vmem>>, vector<1x18x18xf32>
    %2093 = vector.shape_cast %2092 : vector<1x18x18xf32> to vector<18x18xf32>
    %c2_585 = arith.constant 2 : index
    %2094 = memref.load %arg6[%c2_585] : memref<5xf32, #tpu.memory_space<smem>>
    %2095 = vector.broadcast %2094 : f32 to vector<18x18xf32>
    %2096 = arith.mulf %2093, %2095 : vector<18x18xf32>
    %2097 = arith.addf %2091, %2096 : vector<18x18xf32>
    %c3_586 = arith.constant 3 : index
    %c0_587 = arith.constant 0 : index
    %c0_588 = arith.constant 0 : index
    %2098 = vector.load %arg11[%c3_586, %c0_587, %c0_588] : memref<5x18x18xf32, #tpu.memory_space<vmem>>, vector<1x18x18xf32>
    %2099 = vector.shape_cast %2098 : vector<1x18x18xf32> to vector<18x18xf32>
    %c3_589 = arith.constant 3 : index
    %2100 = memref.load %arg6[%c3_589] : memref<5xf32, #tpu.memory_space<smem>>
    %2101 = vector.broadcast %2100 : f32 to vector<18x18xf32>
    %2102 = arith.mulf %2099, %2101 : vector<18x18xf32>
    %2103 = arith.addf %2097, %2102 : vector<18x18xf32>
    %c4_590 = arith.constant 4 : index
    %c0_591 = arith.constant 0 : index
    %c0_592 = arith.constant 0 : index
    %2104 = vector.load %arg11[%c4_590, %c0_591, %c0_592] : memref<5x18x18xf32, #tpu.memory_space<vmem>>, vector<1x18x18xf32>
    %2105 = vector.shape_cast %2104 : vector<1x18x18xf32> to vector<18x18xf32>
    %c4_593 = arith.constant 4 : index
    %2106 = memref.load %arg6[%c4_593] : memref<5xf32, #tpu.memory_space<smem>>
    %2107 = vector.broadcast %2106 : f32 to vector<18x18xf32>
    %2108 = arith.mulf %2105, %2107 : vector<18x18xf32>
    %2109 = arith.addf %2103, %2108 : vector<18x18xf32>
    %c0_594 = arith.constant 0 : index
    %2110 = memref.load %arg7[%c0_594] : memref<1xf32, #tpu.memory_space<smem>>
    %2111 = vector.broadcast %2110 : f32 to vector<18x18xf32>
    %2112 = arith.addf %2109, %2111 : vector<18x18xf32>
    %cst_595 = arith.constant 0.000000e+00 : f32
    %2113 = vector.broadcast %cst_595 : f32 to vector<18x18xf32>
    %2114 = arith.maximumf %2112, %2113 : vector<18x18xf32>
    %c0_596 = arith.constant 0 : index
    %c0_597 = arith.constant 0 : index
    %c0_598 = arith.constant 0 : index
    %c0_599 = arith.constant 0 : index
    %2115 = vector.load %arg8[%c0_596, %c0_597, %c0_598, %c0_599] : memref<1x1x18x18xf32, #tpu.memory_space<vmem>>, vector<1x1x18x18xf32>
    %2116 = vector.shape_cast %2115 : vector<1x1x18x18xf32> to vector<18x18xf32>
    %2117 = vector.shape_cast %2114 : vector<18x18xf32> to vector<1x1x18x18xf32>
    tpu.vector_store %arg8[%c0_596, %c0_597, %c0_598, %c0_599], %2117 {strides = array<i32>} : memref<1x1x18x18xf32, #tpu.memory_space<vmem>>, vector<1x1x18x18xf32>,
    return
  }
  func.func @transform_0(%arg0: i32) -> (i32, i32, i32, i32) {
    %c0_i32 = arith.constant 0 : i32
    %c0_i32_0 = arith.constant 0 : i32
    %c0_i32_1 = arith.constant 0 : i32
    %c0_i32_2 = arith.constant 0 : i32
    return %arg0, %c0_i32, %c0_i32_0, %c0_i32_1 : i32, i32, i32, i32
  }
  func.func @transform_1(%arg0: i32) -> i32 {
    %c0_i32 = arith.constant 0 : i32
    %c0_i32_0 = arith.constant 0 : i32
    return %c0_i32 : i32
  }
  func.func @transform_2(%arg0: i32) -> i32 {
    %c0_i32 = arith.constant 0 : i32
    %c0_i32_0 = arith.constant 0 : i32
    return %c0_i32 : i32
  }
  func.func @transform_3(%arg0: i32) -> i32 {
    %c0_i32 = arith.constant 0 : i32
    %c0_i32_0 = arith.constant 0 : i32
    return %c0_i32 : i32
  }
  func.func @transform_4(%arg0: i32) -> i32 {
    %c0_i32 = arith.constant 0 : i32
    %c0_i32_0 = arith.constant 0 : i32
    return %c0_i32 : i32
  }
  func.func @transform_5(%arg0: i32) -> i32 {
    %c0_i32 = arith.constant 0 : i32
    %c0_i32_0 = arith.constant 0 : i32
    return %c0_i32 : i32
  }
  func.func @transform_6(%arg0: i32) -> i32 {
    %c0_i32 = arith.constant 0 : i32
    %c0_i32_0 = arith.constant 0 : i32
    return %c0_i32 : i32
  }
  func.func @transform_7(%arg0: i32) -> (i32, i32, i32, i32) {
    %c0_i32 = arith.constant 0 : i32
    %c0_i32_0 = arith.constant 0 : i32
    %c0_i32_1 = arith.constant 0 : i32
    %c0_i32_2 = arith.constant 0 : i32
    return %arg0, %c0_i32, %c0_i32_0, %c0_i32_1 : i32, i32, i32, i32
  }
}

</mosaic_0001>

<bundles_post_ra>
// kernel: preprocess_forward.1
= control target key start
LH: loop header
LB: loop body
LE: loop exit
PB: predicated region body
PF: predicated region fallthrough
CT: control target
= control target key end

     0   :  { %s10935_s0 = inlined_call_operand.hbm [shape: f32[2,5,16,16], index: 0, kind: input, shape index: {}]   ;;  %s10936_s1 = inlined_call_operand.vmem [shape: f32[225], index: 1, kind: input, shape index: {}]   ;;  %s10937_s2 = inlined_call_operand.vmem [shape: f32[5], index: 2, kind: input, shape index: {}]   ;;  %s10938_s3 = inlined_call_operand.vmem [shape: f32[225], index: 3, kind: input, shape index: {}]   ;;  %s10939_s4 = inlined_call_operand.vmem [shape: f32[5], index: 4, kind: input, shape index: {}]   ;;  %s10940_s5 = inlined_call_operand.vmem [shape: f32[5], index: 5, kind: input, shape index: {}]   ;;  %s10941_s6 = inlined_call_operand.<no memory space> [shape: f32[1], index: 6, kind: input, shape index: {}]   ;;  %s10942_s7 = inlined_call_operand.vmem [shape: f32[2,1,18,18], index: 7, kind: output, shape index: {}]  }
   0x1   :  { %12 = sst [smem:[#allocation5]] %s10941_s6 }
   0x2   :  { %13 = vsyncpa [#allocation7], 0 }
   0x3   :  { %15 = vsyncpa [#allocation7 + $0x1], 0 }
   0x4   :  { %16 = vsyncpa [#allocation8], 0 }
   0x5   :  { %17 = vsyncpa [#allocation11], 0 }
   0x6   :  { %18 = vsyncpa [#allocation14], 0  ;;  %s6771_s26 = smov 0   ;;  %s6773_s27 = smov 0  }
   0x7   :  { %s6775_s28 = smov 0   ;;  %s6777_s29 = smov 0  }
   0x8 LB: > { %s231_s8 = sshll.u32 %s10937_s2, 4  ;;  %s6795_s9 = sadd.s32 4294967295, %s6714_s29   ;;  %s6714_s29 = sphi %s6777_s29, %s10963_s29   ;;  %s6710_s28 = sphi %s6775_s28, %s10962_s28   ;;  %s6706_s27 = sphi %s6773_s27, %s10961_s27   ;;  %s6702_s26 = sphi %s6771_s26, %s10960_s26   ;;  %s232_s8 = int_to_ptr.vmem [resolvable:$true] %s231_s8 }
   0x9   : > { %p5988_p0 = scmp.ge.s32.totalorder %s6714_s29, 1  ;;  %p10943_p1 = scmp.eq.s32.totalorder %s6795_s9, 0 }
   0xa   : > { %p207_p2 = scmp.lt.s32.totalorder %s6714_s29, 3  ;;  %s253_s13 = sshll.u32 %s10939_s4, 4  ;;  %s254_s13 = int_to_ptr.vmem [resolvable:$true] %s253_s13 }
   0xb   : > { %s220_s16 = sshll.u32 %s10936_s1, 4  ;;  %s242_s20 = sshll.u32 %s10938_s3, 4  ;;  %s6818_s16 = int_to_ptr.vmem [resolvable:$true] %s220_s16  ;;  %s6823_s20 = int_to_ptr.vmem [resolvable:$true] %s242_s20 }
   0xc   : > { %p6800_p3 = pnand %p5988_p0, %p207_p2  ;;  %s6565_s21 = scalar_lea.vmem %s232_s8, 16 }
   0xd   : > { %p6566_p6 = scmp.ne.s32.totalorder %s232_s8, %s6565_s21  ;;  %p6573_p10 = scmp.lt.s32.totalorder %s232_s8, %s232_s8 }
   0xe   : > { %s10946_s10 = scalar_select %p6800_p3, 1, 0 }
   0xf   : > { %p6491_p4 = pneg %p6800_p3  ;;  %p6574_p11 = scmp.lt.s32.totalorder %s6565_s21, %s6565_s21 }
  0x11   : > { %p6814_p5 = pnand %p6491_p4, %p10943_p1  ;;  %p6575_p12 = por %p6574_p11, %p6573_p10 }
  0x13   : > { %p6827_p7 = pneg %p6814_p5 }
  0x15   : > { %p6568_p8 = pnand %p6827_p7, %p6566_p6 }
  0x17   : > { %p6569_p9 = pneg %p6568_p8 }
  0x19   : > { %p6576_p13 = pnand %p6575_p12, %p6569_p9 }
  0x1b   : > { %6579 = shalt.err (!%p6576_p13)
}
  0x1c   : > { %s6716_s23 = smov [#allocation10]   ;;  %s6580_s24 = scalar_lea.vmem %s254_s13, 16 }
  0x1d   : > { %6497 = dma.vmem_to_smem (!%p6814_p5), %s232_s8, 16, %s6716_s23, [#allocation11]  }
  0x1e   : > { %p6581_p0 = scmp.ne.s32.totalorder %s254_s13, %s6580_s24  ;;  %p6588_p1 = scmp.lt.s32.totalorder %s254_s13, %s254_s13 }
  0x1f   : > { %p6589_p3 = scmp.lt.s32.totalorder %s6580_s24, %s6580_s24 }
  0x20   : > { %p6583_p2 = pnand %p6581_p0, %p6827_p7 }
  0x21   : > { %p6590_p6 = por %p6589_p3, %p6588_p1 }
  0x22   : > { %p6584_p4 = pneg %p6583_p2 }
  0x24   : > { %p6591_p8 = pnand %p6590_p6, %p6584_p4 }
  0x26   : > { %6594 = shalt.err (!%p6591_p8)
}
  0x27   : > { %s6717_s25 = smov [#allocation13]   ;;  %s6595_s6 = scalar_lea.vmem %s6818_s16, 32 }
  0x28   : > { %6503 = dma.vmem_to_smem (!%p6814_p5), %s254_s13, 16, %s6717_s25, [#allocation14]  }
  0x29   : > { %p6596_p9 = scmp.ne.s32.totalorder %s6818_s16, %s6595_s6  ;;  %p6603_p12 = scmp.lt.s32.totalorder %s6818_s16, %s6818_s16 }
  0x2a   : > { %p6604_p13 = scmp.lt.s32.totalorder %s6595_s6, %s6595_s6 }
  0x2b   : > { %p6598_p10 = pnand %p6596_p9, %p6827_p7 }
  0x2c   : > { %p6605_p0 = por %p6604_p13, %p6603_p12 }
  0x2d   : > { %p6599_p11 = pneg %p6598_p10 }
  0x2f   : > { %p6606_p1 = pnand %p6605_p0, %p6599_p11 }
  0x31   : > { %6609 = shalt.err (!%p6606_p1)
}
  0x32   : > { %s6718_s30 = smov [#allocation9]   ;;  %s6610_s8 = scalar_lea.vmem %s6823_s20, 32 }
  0x33   : > { %6494 = dma.vmem_to_smem (!%p6814_p5), %s6818_s16, 32, %s6718_s30, [#allocation8]  }
  0x34   : > { %p6611_p3 = scmp.ne.s32.totalorder %s6823_s20, %s6610_s8  ;;  %p6618_p6 = scmp.lt.s32.totalorder %s6823_s20, %s6823_s20 }
  0x35   : > { %p6619_p8 = scmp.lt.s32.totalorder %s6610_s8, %s6610_s8 }
  0x36   : > { %p6613_p2 = pnand %p6611_p3, %p6827_p7 }
  0x37   : > { %p6620_p9 = por %p6619_p8, %p6618_p6 }
  0x38   : > { %p6614_p4 = pneg %p6613_p2 }
  0x3a   : > { %p6621_p10 = pnand %p6620_p9, %p6614_p4 }
  0x3c   : > { %6624 = shalt.err (!%p6621_p10)
}
  0x3d   : > { %s6719_s11 = smov [#allocation12]   ;;  %s264_s14 = sshll.u32 %s10940_s5, 4  ;;  %s265_s14 = int_to_ptr.vmem [resolvable:$true] %s264_s14 }
  0x3e   : > { %6500 = dma.vmem_to_smem (!%p6814_p5), %s6823_s20, 32, %s6719_s11, [#allocation11]  }
  0x3f   : > { %s6625_s15 = scalar_lea.vmem %s265_s14, 16  ;;  %p6633_p0 = scmp.lt.s32.totalorder %s265_s14, %s265_s14 }
  0x40   : > { %p6626_p11 = scmp.ne.s32.totalorder %s265_s14, %s6625_s15  ;;  %p6634_p1 = scmp.lt.s32.totalorder %s6625_s15, %s6625_s15 }
  0x42   : > { %p6628_p12 = pnand %p6626_p11, %p6827_p7  ;;  %p6635_p3 = por %p6634_p1, %p6633_p0 }
  0x44   : > { %p6629_p13 = pneg %p6628_p12 }
  0x46   : > { %p6636_p2 = pnand %p6635_p3, %p6629_p13 }
  0x48   : > { %6639 = shalt.err (!%p6636_p2)
}
  0x49   : > { %s6720_s16 = smov [#allocation15]   ;;  %s6865_s18 = sadd.s32 1, %s6714_s29  }
  0x4a   : > { %6506 = dma.vmem_to_smem (!%p6814_p5), %s265_s14, 16, %s6720_s16, [#allocation14]  }
  0x4b   : > { %s28_s19 = ssub.s32 %s6714_s29, %s6865_s18  ;;  %s31_s20 = sadd.s32 1, %s6710_s28 }
  0x4c   : > { %p29_p7 = scmp.eq.s32.totalorder %s28_s19, 0  ;;  %p38_p4 = scmp.ne.s32.totalorder %s6710_s28, %s6706_s27 }
  0x4d   : > { %p39_p6 = scmp.eq.s32.totalorder %s6714_s29, 0  ;;  %p44_p8 = scmp.ne.s32.totalorder %s6706_s27, %s6702_s26 }
  0x4e   : > { %s6876_s17 = scalar_select %p29_p7, %s6710_s28, %s31_s20  }
  0x4f   : > { %p40_p9 = por %p39_p6, %p38_p4  ;;  %p10949_p10 = scmp.eq.s32.totalorder %s6795_s9, 0 }
  0x50   : > { %p6516_p12 = scmp.lt.s32.totalorder %s6714_s29, 2  ;;  %s278_s22 = sand.u32 1, %s6710_s28  }
  0x51   : > { %p6880_p11 = por %p10949_p10, %p44_p8  ;;  %s6465_s23 = smul.u32 80, %s278_s22 }
  0x52   : > { %s6466_s24 = smul.u32 1280, %s6714_s29  ;;  %p6887_p5 = pnand %p6516_p12, %p40_p9 }
  0x53   : > { %s10950_s21 = scalar_select %p6880_p11, 1, 0 }
  0x54   : > { %s6894_s26 = scalar_lea.hbm %s10935_s0, %s6466_s24  ;;  %s282_s8 = scalar_lea.vmem [#allocation6], %s6465_s23 }
  0x55   : > { %s289_s11 = sshll.u32 %s282_s8, 4  ;;  %s6898_s12 = scalar_lea.sflag [#allocation7], %s278_s22  ;;  %s6896_s11 = int_to_ptr.vmem [resolvable:$true] %s289_s11 }
  0x56   : > { %s6640_s29 = scalar_lea.hbm %s6894_s26, 1280  ;;  %p6642_p0 = pneg %p6887_p5 }
  0x57   : > { %p6641_p13 = scmp.ne.s32.totalorder %s6894_s26, %s6640_s29  ;;  %s6645_s15 = scalar_lea.hbm %s10935_s0, 2560 }
  0x58   : > { %p6646_p2 = scmp.lt.s32.totalorder %s6894_s26, %s10935_s0  ;;  %p6647_p7 = scmp.lt.s32.totalorder %s6645_s15, %s6640_s29 }
  0x59   : > { %p6643_p1 = pnand %p6642_p0, %p6641_p13 }
  0x5a   : > { %p6648_p4 = por %p6647_p7, %p6646_p2 }
  0x5b   : > { %p6644_p3 = pneg %p6643_p1 }
  0x5d   : > { %p6649_p6 = pnand %p6648_p4, %p6644_p3 }
  0x5f   : > { %6652 = shalt.err (!%p6649_p6)
}
  0x60   : > { %s6653_s20 = scalar_lea.vmem %s6896_s11, 1280  ;;  %s6721_s22 = smov [#allocation6]  }
  0x61   : > { %p6654_p8 = scmp.ne.s32.totalorder %s6896_s11, %s6653_s20  ;;  %s6658_s23 = sshll.u32 %s6721_s22, 4  ;;  %s6659_s23 = int_to_ptr.vmem [resolvable:$false] %s6658_s23 }
  0x62   : > { %s6660_s24 = scalar_lea.vmem %s6659_s23, 2560  ;;  %p6661_p12 = scmp.lt.s32.totalorder %s6896_s11, %s6659_s23 }
  0x63   : > { %p6656_p9 = pnand %p6654_p8, %p6642_p0  ;;  %p6662_p13 = scmp.lt.s32.totalorder %s6660_s24, %s6653_s20 }
  0x65   : > { %p6657_p10 = pneg %p6656_p9  ;;  %p6663_p1 = por %p6662_p13, %p6661_p12 }
  0x67   : > { %p6664_p11 = pnand %p6663_p1, %p6657_p10 }
  0x69   : > { %6667 = shalt.err (!%p6664_p11)
}
  0x6a   : > { %s6722_s6 = smov 128   ;;  %s6723_s30 = smov 8  }
  0x6b   : > { %6510 = dma.hbm_to_vmem [thread:$0]  (!%p6887_p5), %s6894_s26, 1280, %s6896_s11, %s6898_s12, %s6722_s6, %s6722_s6, %s6723_s30  }
  0x6c   : > { %p10952_p0 = scmp.ne.s32.totalorder %s10946_s10, 0 }
  0x6d   : > { %s303_s8 = sand.u32 (!%p10952_p0), 1, %s6706_s27   ;;  %p10953_p3 = scmp.ne.s32.totalorder (!%p10952_p0), %s10950_s21, 0 }
  0x6e   : > { %301 = sbr.rel (%p10952_p0) target bundleno = 1935 (0x78f), region = 48  ;;  %s304_s13 = scalar_lea.sflag (!%p10952_p0), [#allocation7], %s303_s8 }
  0x6f   : > { %s6467_s29 = smul.u32 (!%p10952_p0), 80, %s303_s8 }
  0x71   : > { %s6922_s14 = scalar_lea.vmem (!%p10952_p0), [#allocation6], %s6467_s29 }
  0x73   : > { %6685 = dma.done.wait (%p10953_p3), %s304_s13, 1280  }
  0x74   : > { %6687 = vsyncadd (%p10953_p3), %s304_s13, 4294966016  ;;  %p10954_p11 = scmp.eq.s32.totalorder %s6795_s9, 0 }
  0x76   : > { %6689 = dma.done.wait (%p10954_p11), [#allocation8], 32   ;;  %p10955_p5 = pmov %p10954_p11 }
  0x78   : > { %6691 = vsyncadd (%p10955_p5), [#allocation8], 4294967264  ;;  %p10956_p2 = pmov %p10955_p5 }
  0x7a   : > { %6693 = dma.done.wait (%p10956_p2), [#allocation11], 48   ;;  %p10957_p7 = pmov %p10956_p2 }
  0x7b   : > { %p10958_p4 = pmov %p10956_p2 }
  0x7c   : > { %6695 = vsyncadd (%p10957_p7), [#allocation11], 4294967248 }
  0x7d   : > { %6697 = dma.done.wait (%p10958_p4), [#allocation14], 32   ;;  %p10959_p6 = pmov %p10956_p2 }
  0x7f   : > { %6699 = vsyncadd (%p10959_p6), [#allocation14], 4294967264 }
  0x80   : > { %332 = sfence }
  0x81   : > { %v411_v0 = vld [vmem:[%s6922_s14] sm:$0xff]  ;;  %v413_v1 = vld [vmem:[%s6922_s14 + $0x10] sm:$0xff]  ;;  %vm364_vm0 = vcmask 146432   ;;  %s6724_s10 = smov 1   ;;  %vm367_vm1 = vcmask 140288   ;;  %v412_v2 = vld [vmem:[%s6922_s14 + $0x8] sm:$0xff] }
  0x82   : > { %431 = vrot.lane.b32.xlu0 %v411_v0, %s6724_s10  ;;  %435 = vrot.lane.b32.xlu1 %v413_v1, %s6724_s10  ;;  %v414_v3 = vld [vmem:[%s6922_s14 + $0x18] sm:$0xff]  ;;  %v6725_v4 = vmov 0.0   ;;  %v415_v5 = vld [vmem:[%s6922_s14 + $0x20] sm:$0xff]  ;;  %vm461_vm2 = vcmask 138248   ;;  %s6007_s21 = sld [smem:[#allocation9 + $0x1]]  ;;  %s6726_s12 = smov 127  }
  0x83   : > { %365 = vst.msk [vmem:[#allocation2] sm:$0xff] %vm364_vm0, %v6725_v4  ;;  %366 = vst.msk [vmem:[#allocation2 + $0x8] sm:$0xff] %vm364_vm0, %v6725_v4  ;;  %v416_v6 = vld [vmem:[%s6922_s14 + $0x28] sm:$0xff]  ;;  %v417_v7 = vld [vmem:[%s6922_s14 + $0x30] sm:$0xff]  ;;  %s6008_s25 = sld [smem:[#allocation9 + $0x2e]]  ;;  %s6727_s23 = smov 126  }
  0x84   : > { %369 = vst.msk [vmem:[#allocation2 + $0x18] sm:$0xff] %vm364_vm0, %v6725_v4  ;;  %370 = vst.msk [vmem:[#allocation2 + $0x20] sm:$0xff] %vm364_vm0, %v6725_v4  ;;  %v418_v8 = vld [vmem:[%s6922_s14 + $0x38] sm:$0xff]  ;;  %v419_v9 = vld [vmem:[%s6922_s14 + $0x40] sm:$0xff]  ;;  %s7009_s26 = sld [smem:[#allocation9 + $0x5b]]  ;;  %p359_p8 = scmp.lt.s32.totalorder %s6795_s9, 1 }
  0x85   : > { %372 = vst.msk [vmem:[#allocation2 + $0x30] sm:$0xff] %vm364_vm0, %v6725_v4  ;;  %373 = vst.msk [vmem:[#allocation2 + $0x38] sm:$0xff] %vm364_vm0, %v6725_v4  ;;  %v420_v10 = vld [vmem:[%s6922_s14 + $0x48] sm:$0xff]  ;;  %s7016_s11 = sld [smem:[#allocation9 + $0x88]] }
  0x86   : > { %375 = vst.msk [vmem:[#allocation2 + $0x48] sm:$0xff] %vm364_vm0, %v6725_v4  ;;  %376 = vst.msk [vmem:[#allocation2 + $0x50] sm:$0xff] %vm364_vm0, %v6725_v4  ;;  %433 = vrot.lane.b32.xlu0 %v412_v2, %s6724_s10  ;;  %437 = vrot.lane.b32.xlu1 %v414_v3, %s6724_s10  ;;  %s6011_s15 = sld [smem:[#allocation9 + $0xb5]]  ;;  %s10965_s9 = smov (!%p359_p8, %s6795_s9), 1 }
  0x87   : > { %378 = vst.msk [vmem:[#allocation2 + $0x60] sm:$0xff] %vm364_vm0, %v6725_v4  ;;  %379 = vst.msk [vmem:[#allocation2 + $0x68] sm:$0xff] %vm364_vm0, %v6725_v4  ;;  %s6012_s16 = sld [smem:[#allocation9 + $0x2]] }
  0x88   : > { %381 = vst.msk [vmem:[#allocation3] sm:$0xff] %vm364_vm0, %v6725_v4  ;;  %382 = vst.msk [vmem:[#allocation3 + $0x8] sm:$0xff] %vm364_vm0, %v6725_v4  ;;  %v505_v15 = vstv %s6007_s21  ;;  %s6013_s19 = sld [smem:[#allocation9 + $0x2f]] }
  0x89   : > { %384 = vst.msk [vmem:[#allocation3 + $0x18] sm:$0xff] %vm364_vm0, %v6725_v4  ;;  %385 = vst.msk [vmem:[#allocation3 + $0x20] sm:$0xff] %vm364_vm0, %v6725_v4  ;;  %v519_v20 = vstv %s6008_s25  ;;  %s6014_s20 = sld [smem:[#allocation9 + $0x5c]] }
  0x8a   : > { %387 = vst.msk [vmem:[#allocation3 + $0x30] sm:$0xff] %vm364_vm0, %v6725_v4  ;;  %388 = vst.msk [vmem:[#allocation3 + $0x38] sm:$0xff] %vm364_vm0, %v6725_v4  ;;  %439 = vrot.lane.b32.xlu0 %v415_v5, %s6724_s10  ;;  %441 = vrot.lane.b32.xlu1 %v416_v6, %s6724_s10  ;;  %v533_v26 = vstv %s7009_s26  ;;  %s6015_s22 = sld [smem:[#allocation9 + $0x89]] }
  0x8b   : > { %390 = vst.msk [vmem:[#allocation3 + $0x48] sm:$0xff] %vm364_vm0, %v6725_v4  ;;  %391 = vst.msk [vmem:[#allocation3 + $0x50] sm:$0xff] %vm364_vm0, %v6725_v4  ;;  %v547_v31 = vstv %s7016_s11  ;;  %s6016_s24 = sld [smem:[#allocation9 + $0xb6]] }
  0x8c   : > { %393 = vst.msk [vmem:[#allocation3 + $0x60] sm:$0xff] %vm364_vm0, %v6725_v4  ;;  %394 = vst.msk [vmem:[#allocation3 + $0x68] sm:$0xff] %vm364_vm0, %v6725_v4  ;;  %v561_v34 = vstv %s6011_s15  ;;  %s6022_s6 = sld [smem:[#allocation9 + $0x4]] }
  0x8d   : > { %396 = vst.msk [vmem:[#allocation4] sm:$0xff] %vm364_vm0, %v6725_v4  ;;  %397 = vst.msk [vmem:[#allocation4 + $0x8] sm:$0xff] %vm364_vm0, %v6725_v4  ;;  %v575_v37 = vstv %s6012_s16  ;;  %s6023_s30 = sld [smem:[#allocation9 + $0x31]] }
  0x8e   : > { %399 = vst.msk [vmem:[#allocation4 + $0x18] sm:$0xff] %vm364_vm0, %v6725_v4  ;;  %400 = vst.msk [vmem:[#allocation4 + $0x20] sm:$0xff] %vm364_vm0, %v6725_v4  ;;  %443 = vrot.lane.b32.xlu0 %v417_v7, %s6724_s10  ;;  %445 = vrot.lane.b32.xlu1 %v418_v8, %s6724_s10  ;;  %v589_v40 = vstv %s6013_s19  ;;  %s6024_s8 = sld [smem:[#allocation9 + $0x5e]] }
  0x8f   : > { %402 = vst.msk [vmem:[#allocation4 + $0x30] sm:$0xff] %vm364_vm0, %v6725_v4  ;;  %403 = vst.msk [vmem:[#allocation4 + $0x38] sm:$0xff] %vm364_vm0, %v6725_v4  ;;  %v603_v43 = vstv %s6014_s20  ;;  %s6025_s29 = sld [smem:[#allocation9 + $0x8b]] }
  0x90   : > { %405 = vst.msk [vmem:[#allocation4 + $0x48] sm:$0xff] %vm364_vm0, %v6725_v4  ;;  %406 = vst.msk [vmem:[#allocation4 + $0x50] sm:$0xff] %vm364_vm0, %v6725_v4  ;;  %v617_v46 = vstv %s6015_s22  ;;  %s6026_s13 = sld [smem:[#allocation9 + $0xb8]] }
  0x91   : > { %408 = vst.msk [vmem:[#allocation4 + $0x60] sm:$0xff] %vm364_vm0, %v6725_v4  ;;  %409 = vst.msk [vmem:[#allocation4 + $0x68] sm:$0xff] %vm364_vm0, %v6725_v4  ;;  %v631_v49 = vstv %s6016_s24  ;;  %s6027_s14 = sld [smem:[#allocation9 + $0x5]] }
  0x92   : > { %368 = vst.msk [vmem:[#allocation2 + $0x10] sm:$0x3] %vm367_vm1, %v6725_v4  ;;  %371 = vst.msk [vmem:[#allocation2 + $0x28] sm:$0x3] %vm367_vm1, %v6725_v4  ;;  %447 = vrot.lane.b32.xlu0 %v419_v9, %s6724_s10  ;;  %449 = vrot.lane.b32.xlu1 %v420_v10, %s6724_s10  ;;  %v677_v53 = vstv %s6022_s6  ;;  %s6028_s21 = sld [smem:[#allocation9 + $0x32]] }
  0x93   : > { %374 = vst.msk [vmem:[#allocation2 + $0x40] sm:$0x3] %vm367_vm1, %v6725_v4  ;;  %377 = vst.msk [vmem:[#allocation2 + $0x58] sm:$0x3] %vm367_vm1, %v6725_v4  ;;  %v691_v57 = vstv %s6023_s30  ;;  %s6029_s25 = sld [smem:[#allocation9 + $0x5f]] }
  0x94   : > { %380 = vst.msk [vmem:[#allocation2 + $0x70] sm:$0x3] %vm367_vm1, %v6725_v4  ;;  %383 = vst.msk [vmem:[#allocation3 + $0x10] sm:$0x3] %vm367_vm1, %v6725_v4  ;;  %v705_v60 = vstv %s6024_s8  ;;  %s6030_s26 = sld [smem:[#allocation9 + $0x8c]] }
  0x95   : > { %386 = vst.msk [vmem:[#allocation3 + $0x28] sm:$0x3] %vm367_vm1, %v6725_v4  ;;  %389 = vst.msk [vmem:[#allocation3 + $0x40] sm:$0x3] %vm367_vm1, %v6725_v4  ;;  %v719_v63 = vstv %s6025_s29  ;;  %s6031_s11 = sld [smem:[#allocation9 + $0xb9]] }
  0x96   : > { %392 = vst.msk [vmem:[#allocation3 + $0x58] sm:$0x3] %vm367_vm1, %v6725_v4  ;;  %395 = vst.msk [vmem:[#allocation3 + $0x70] sm:$0x3] %vm367_vm1, %v6725_v4  ;;  %v733_v2 = vstv %s6026_s13  ;;  %s6037_s15 = sld [smem:[#allocation9 + $0x7]] }
  0x97   : > { %398 = vst.msk [vmem:[#allocation4 + $0x10] sm:$0x3] %vm367_vm1, %v6725_v4  ;;  %401 = vst.msk [vmem:[#allocation4 + $0x28] sm:$0x3] %vm367_vm1, %v6725_v4  ;;  %v747_v5 = vstv %s6027_s14  ;;  %s6038_s16 = sld [smem:[#allocation9 + $0x34]] }
  0x98   : > { %404 = vst.msk [vmem:[#allocation4 + $0x40] sm:$0x3] %vm367_vm1, %v6725_v4  ;;  %407 = vst.msk [vmem:[#allocation4 + $0x58] sm:$0x3] %vm367_vm1, %v6725_v4  ;;  %v761_v8 = vstv %s6028_s21  ;;  %s6039_s19 = sld [smem:[#allocation9 + $0x61]] }
  0x99   : > { %410 = vst.msk [vmem:[#allocation4 + $0x70] sm:$0x3] %vm367_vm1, %v6725_v4  ;;  %s6040_s20 = sld [smem:[#allocation9 + $0x8e]] }
  0x9a   : > { %s6041_s22 = sld [smem:[#allocation9 + $0xbb]] }
  0x9b   : > { %s6042_s24 = sld [smem:[#allocation9 + $0x8]] }
  0x9c   : > { %s6043_s6 = sld [smem:[#allocation9 + $0x35]] }
  0x9d   : > { %s6044_s30 = sld [smem:[#allocation9 + $0x62]] }
  0x9e   : > { %s6045_s8 = sld [smem:[#allocation9 + $0x8f]] }
  0x9f   : > { %s6046_s29 = sld [smem:[#allocation9 + $0xbc]] }
  0xa0   : > { %s6052_s13 = sld [smem:[#allocation9 + $0xa]] }
  0xa1   : > { %s7145_s14 = sld [smem:[#allocation9 + $0x37]] }
  0xa2   : > { %s7153_s21 = sld [smem:[#allocation9 + $0x64]] }
  0xf4   : > { %v432_v11 = vpop.permute.xlu0 %431  ;;  %v436_v12 = vpop.permute.xlu1 %435 }
  0xf5   : > { %462 = vst.msk [vmem:[#allocation2 + $0x1] sm:$0xff] %vm461_vm2, %v432_v11  ;;  %464 = vst.msk [vmem:[#allocation2 + $0x19] sm:$0xff] %vm461_vm2, %v436_v12  ;;  %v775_v11 = vstv %s6029_s25  ;;  %s7162_s25 = sld [smem:[#allocation9 + $0x91]] }
  0xf8   : > { %v434_v13 = vpop.permute.xlu0 %433  ;;  %v438_v14 = vpop.permute.xlu1 %437 }
  0xf9   : > { %463 = vst.msk [vmem:[#allocation2 + $0x9] sm:$0xff] %vm461_vm2, %v434_v13  ;;  %465 = vst.msk [vmem:[#allocation2 + $0x21] sm:$0xff] %vm461_vm2, %v438_v14  ;;  %v789_v14 = vstv %s6030_s26  ;;  %s7164_s26 = sld [smem:[#allocation9]] }
  0xfc   : > { %v7011_v16 = vld [vmem:[#allocation2] sm:$0xff]  ;;  %v440_v17 = vpop.permute.xlu0 %439  ;;  %v442_v18 = vpop.permute.xlu1 %441 }
  0xfd   : > { %v506_v19 = vmul.f32 %v505_v15, %v7011_v16  ;;  %466 = vst.msk [vmem:[#allocation2 + $0x31] sm:$0xff] %vm461_vm2, %v440_v17  ;;  %467 = vst.msk [vmem:[#allocation2 + $0x39] sm:$0xff] %vm461_vm2, %v442_v18  ;;  %v520_v25 = vmul.f32 %v519_v20, %v7011_v16  ;;  %v534_v30 = vmul.f32 %v533_v26, %v7011_v16  ;;  %v7061_v52 = vld [vmem:[#allocation2 + $0x1] sm:$0xff]  ;;  %v803_v18 = vstv %s6031_s11  ;;  %s7168_s11 = sld [smem:[#allocation9 + $0x2d]] }
  0xfe   : > { %v548_v33 = vmul.f32 %v547_v31, %v7011_v16  ;;  %v562_v36 = vmul.f32 %v561_v34, %v7011_v16  ;;  %v576_v39 = vmul.f32 %v575_v37, %v7011_v16  ;;  %v590_v42 = vmul.f32 %v589_v40, %v7011_v16 }
  0xff   : > { %510 = vrot.lane.b32.xlu0 %v506_v19, %s6726_s12  ;;  %v604_v45 = vmul.f32 %v603_v43, %v7011_v16  ;;  %v618_v48 = vmul.f32 %v617_v46, %v7011_v16  ;;  %v632_v51 = vmul.f32 %v631_v49, %v7011_v16  ;;  %v678_v55 = vmul.f32 %v677_v53, %v7061_v52 }
 0x100   : > { %v7019_v21 = vld [vmem:[#allocation2 + $0x8] sm:$0xff]  ;;  %v444_v22 = vpop.permute.xlu0 %443  ;;  %v446_v23 = vpop.permute.xlu1 %445  ;;  %v692_v59 = vmul.f32 %v691_v57, %v7061_v52  ;;  %v706_v62 = vmul.f32 %v705_v60, %v7061_v52  ;;  %v720_v1 = vmul.f32 %v719_v63, %v7061_v52  ;;  %v734_v4 = vmul.f32 %v733_v2, %v7061_v52 }
 0x101   : > { %v507_v24 = vmul.f32 %v505_v15, %v7019_v21  ;;  %468 = vst.msk [vmem:[#allocation2 + $0x49] sm:$0xff] %vm461_vm2, %v444_v22  ;;  %469 = vst.msk [vmem:[#allocation2 + $0x51] sm:$0xff] %vm461_vm2, %v446_v23  ;;  %v521_v29 = vmul.f32 %v519_v20, %v7019_v21  ;;  %v535_v32 = vmul.f32 %v533_v26, %v7019_v21  ;;  %v7067_v56 = vld [vmem:[#allocation2 + $0x9] sm:$0xff]  ;;  %v849_v23 = vstv %s6037_s15  ;;  %s7177_s15 = sld [smem:[#allocation9 + $0xbe]] }
 0x102   : > { %v549_v35 = vmul.f32 %v547_v31, %v7019_v21  ;;  %v563_v38 = vmul.f32 %v561_v34, %v7019_v21  ;;  %v577_v41 = vmul.f32 %v575_v37, %v7019_v21  ;;  %v591_v44 = vmul.f32 %v589_v40, %v7019_v21  ;;  %v7105_v22 = vld [vmem:[#allocation2 + $0x2] sm:$0xff]  ;;  %v7111_v26 = vld [vmem:[#allocation2 + $0xa] sm:$0xff] }
 0x103   : > { %512 = vrot.lane.b32.xlu1 %v507_v24, %s6726_s12  ;;  %524 = vrot.lane.b32.xlu0 %v520_v25, %s6726_s12  ;;  %v605_v47 = vmul.f32 %v603_v43, %v7019_v21  ;;  %v619_v50 = vmul.f32 %v617_v46, %v7019_v21  ;;  %v633_v54 = vmul.f32 %v631_v49, %v7019_v21 }
 0x104   : > { %v448_v27 = vpop.permute.xlu0 %447  ;;  %v450_v28 = vpop.permute.xlu1 %449  ;;  %v679_v58 = vmul.f32 %v677_v53, %v7067_v56  ;;  %v693_v61 = vmul.f32 %v691_v57, %v7067_v56  ;;  %v707_v0 = vmul.f32 %v705_v60, %v7067_v56  ;;  %v721_v3 = vmul.f32 %v719_v63, %v7067_v56  ;;  %v7151_v57 = vld [vmem:[#allocation2 + $0x18] sm:$0xff]  ;;  %v7159_v63 = vld [vmem:[#allocation2 + $0x20] sm:$0xff] }
 0x105   : > { %470 = vst.msk [vmem:[#allocation2 + $0x61] sm:$0xff] %vm461_vm2, %v448_v27  ;;  %471 = vst.msk [vmem:[#allocation2 + $0x69] sm:$0xff] %vm461_vm2, %v450_v28  ;;  %v735_v6 = vmul.f32 %v733_v2, %v7067_v56  ;;  %v748_v7 = vmul.f32 %v747_v5, %v7061_v52  ;;  %v749_v9 = vmul.f32 %v747_v5, %v7067_v56  ;;  %v863_v27 = vstv %s6038_s16  ;;  %s7181_s16 = sld [smem:[#allocation9 + $0x3]] }
 0x106   : > { %v762_v10 = vmul.f32 %v761_v8, %v7061_v52  ;;  %v763_v12 = vmul.f32 %v761_v8, %v7067_v56  ;;  %v776_v13 = vmul.f32 %v775_v11, %v7061_v52  ;;  %v777_v15 = vmul.f32 %v775_v11, %v7067_v56 }
 0x107   : > { %526 = vrot.lane.b32.xlu1 %v521_v29, %s6726_s12  ;;  %538 = vrot.lane.b32.xlu0 %v534_v30, %s6726_s12  ;;  %v790_v17 = vmul.f32 %v789_v14, %v7061_v52  ;;  %v791_v19 = vmul.f32 %v789_v14, %v7067_v56  ;;  %v804_v20 = vmul.f32 %v803_v18, %v7061_v52  ;;  %v877_v30 = vstv %s6039_s19  ;;  %s7183_s19 = sld [smem:[#allocation9 + $0x5a]] }
 0x108   : > { %v805_v24 = vmul.f32 %v803_v18, %v7067_v56  ;;  %v850_v25 = vmul.f32 %v849_v23, %v7105_v22  ;;  %v851_v28 = vmul.f32 %v849_v23, %v7111_v26  ;;  %v864_v29 = vmul.f32 %v863_v27, %v7105_v22 }
 0x109   : > { %v865_v31 = vmul.f32 %v863_v27, %v7111_v26  ;;  %v879_v34 = vmul.f32 %v877_v30, %v7111_v26  ;;  %v1050_v5 = vstv %s7153_s21  ;;  %v475_v11 = vstv %s7164_s26  ;;  %s7252_s21 = sld [smem:[#allocation9 + $0xb7]] }
 0x10a   : > { %v1052_v14 = vmul.f32 %v1050_v5, %v7159_v63  ;;  %v1078_v18 = vstv %s7177_s15  ;;  %s7282_s26 = sld [smem:[#allocation9 + $0xd]] }
 0x10b   : > { %540 = vrot.lane.b32.xlu1 %v535_v32, %s6726_s12  ;;  %552 = vrot.lane.b32.xlu0 %v548_v33, %s6726_s12  ;;  %v878_v32 = vmul.f32 %v877_v30, %v7105_v22  ;;  %v891_v33 = vstv %s6040_s20  ;;  %s7191_s20 = sld [smem:[#allocation9 + $0xb]] }
 0x10c   : > { %v893_v37 = vmul.f32 %v891_v33, %v7111_v26  ;;  %s7315_s15 = sld [smem:[#allocation9 + $0x67]] }
 0x10f   : > { %554 = vrot.lane.b32.xlu1 %v549_v35, %s6726_s12  ;;  %566 = vrot.lane.b32.xlu0 %v562_v36, %s6726_s12  ;;  %v892_v35 = vmul.f32 %v891_v33, %v7105_v22  ;;  %v905_v36 = vstv %s6041_s22  ;;  %s7193_s22 = sld [smem:[#allocation9 + $0x87]] }
 0x110   : > { %v907_v40 = vmul.f32 %v905_v36, %v7111_v26 }
 0x111   : > { %v1092_v30 = vstv %s7191_s20  ;;  %s7338_s20 = sld [smem:[#allocation9 + $0x6]] }
 0x113   : > { %568 = vrot.lane.b32.xlu1 %v563_v38, %s6726_s12  ;;  %580 = vrot.lane.b32.xlu0 %v576_v39, %s6727_s23  ;;  %v906_v38 = vmul.f32 %v905_v36, %v7105_v22  ;;  %v919_v39 = vstv %s6042_s24  ;;  %s7199_s24 = sld [smem:[#allocation9 + $0x30]] }
 0x114   : > { %v921_v43 = vmul.f32 %v919_v39, %v7111_v26 }
 0x117   : > { %582 = vrot.lane.b32.xlu1 %v577_v41, %s6727_s23  ;;  %594 = vrot.lane.b32.xlu0 %v590_v42, %s6727_s23  ;;  %v920_v41 = vmul.f32 %v919_v39, %v7105_v22  ;;  %v933_v42 = vstv %s6043_s6  ;;  %s7201_s6 = sld [smem:[#allocation9 + $0x38]] }
 0x118   : > { %v935_v46 = vmul.f32 %v933_v42, %v7111_v26 }
 0x119   : > { %v653_v36 = vstv %s7199_s24  ;;  %s7351_s24 = sld [smem:[#allocation9 + $0x33]] }
 0x11b   : > { %596 = vrot.lane.b32.xlu1 %v591_v44, %s6727_s23  ;;  %608 = vrot.lane.b32.xlu0 %v604_v45, %s6727_s23  ;;  %v934_v44 = vmul.f32 %v933_v42, %v7105_v22  ;;  %v947_v45 = vstv %s6044_s30  ;;  %s7210_s30 = sld [smem:[#allocation9 + $0xb4]] }
 0x11c   : > { %v949_v49 = vmul.f32 %v947_v45, %v7111_v26 }
 0x11d   : > { %v1106_v39 = vstv %s7201_s6  ;;  %s7359_s6 = sld [smem:[#allocation9 + $0x3b]] }
 0x11f   : > { %610 = vrot.lane.b32.xlu1 %v605_v47, %s6727_s23  ;;  %622 = vrot.lane.b32.xlu0 %v618_v48, %s6727_s23  ;;  %v948_v47 = vmul.f32 %v947_v45, %v7105_v22  ;;  %v961_v48 = vstv %s6045_s8  ;;  %s7217_s8 = sld [smem:[#allocation9 + $0x5d]]  ;;  %v1080_v45 = vmul.f32 %v1078_v18, %v7159_v63 }
 0x123   : > { %624 = vrot.lane.b32.xlu1 %v619_v50, %s6727_s23  ;;  %636 = vrot.lane.b32.xlu0 %v632_v51, %s6727_s23  ;;  %v962_v50 = vmul.f32 %v961_v48, %v7105_v22  ;;  %v975_v51 = vstv %s6046_s29  ;;  %s7225_s29 = sld [smem:[#allocation9 + $0x65]] }
 0x127   : > { %638 = vrot.lane.b32.xlu1 %v633_v54, %s6727_s23  ;;  %682 = vrot.lane.b32.xlu0 %v678_v55, %s6726_s12  ;;  %v963_v54 = vmul.f32 %v961_v48, %v7111_v26  ;;  %v976_v55 = vmul.f32 %v975_v51, %v7105_v22 }
 0x12b   : > { %684 = vrot.lane.b32.xlu1 %v679_v58, %s6726_s12  ;;  %696 = vrot.lane.b32.xlu0 %v692_v59, %s6726_s12  ;;  %v1022_v58 = vstv %s6052_s13  ;;  %s7234_s13 = sld [smem:[#allocation9 + $0x8a]] }
 0x12f   : > { %698 = vrot.lane.b32.xlu1 %v693_v61, %s6726_s12  ;;  %710 = vrot.lane.b32.xlu0 %v706_v62, %s6726_s12  ;;  %v977_v61 = vmul.f32 %v975_v51, %v7111_v26  ;;  %v1023_v62 = vmul.f32 %v1022_v58, %v7151_v57 }
 0x133   : > { %712 = vrot.lane.b32.xlu1 %v707_v0, %s6726_s12  ;;  %724 = vrot.lane.b32.xlu0 %v720_v1, %s6726_s12  ;;  %v1036_v0 = vstv %s7145_s14  ;;  %s7243_s14 = sld [smem:[#allocation9 + $0x92]] }
 0x134   : > { %v1038_v8 = vmul.f32 %v1036_v0, %v7159_v63 }
 0x137   : > { %726 = vrot.lane.b32.xlu1 %v721_v3, %s6726_s12  ;;  %738 = vrot.lane.b32.xlu0 %v734_v4, %s6726_s12  ;;  %v1024_v3 = vmul.f32 %v1022_v58, %v7159_v63  ;;  %v1037_v4 = vmul.f32 %v1036_v0, %v7151_v57 }
 0x13b   : > { %740 = vrot.lane.b32.xlu1 %v735_v6, %s6726_s12  ;;  %752 = vrot.lane.b32.xlu0 %v748_v7, %s6727_s23 }
 0x13f   : > { %754 = vrot.lane.b32.xlu1 %v749_v9, %s6727_s23  ;;  %766 = vrot.lane.b32.xlu0 %v762_v10, %s6727_s23  ;;  %v1051_v9 = vmul.f32 %v1050_v5, %v7151_v57  ;;  %v1064_v10 = vstv %s7162_s25  ;;  %v1120_v5 = vstv %s7225_s29  ;;  %s7264_s25 = sld [smem:[#allocation9 + $0xbf]] }
 0x140   : > { %s7379_s29 = sld [smem:[#allocation9 + $0x8d]] }
 0x143   : > { %768 = vrot.lane.b32.xlu1 %v763_v12, %s6727_s23  ;;  %780 = vrot.lane.b32.xlu0 %v776_v13, %s6727_s23 }
 0x147   : > { %782 = vrot.lane.b32.xlu1 %v777_v15, %s6727_s23  ;;  %794 = vrot.lane.b32.xlu0 %v790_v17, %s6727_s23  ;;  %v1065_v15 = vmul.f32 %v1064_v10, %v7151_v57  ;;  %v476_v17 = vmul.f32 %v475_v11, %v7011_v16 }
 0x14b   : > { %796 = vrot.lane.b32.xlu1 %v791_v19, %s6727_s23  ;;  %808 = vrot.lane.b32.xlu0 %v804_v20, %s6727_s23  ;;  %v481_v19 = vstv %s7168_s11  ;;  %v647_v20 = vstv %s7181_s16  ;;  %s7299_s11 = sld [smem:[#allocation9 + $0x3a]] }
 0x14c   : > { %s7327_s16 = sld [smem:[#allocation9 + $0x94]] }
 0x14f   : > { %810 = vrot.lane.b32.xlu1 %v805_v24, %s6727_s23  ;;  %854 = vrot.lane.b32.xlu0 %v850_v25, %s6726_s12  ;;  %v487_v24 = vstv %s7183_s19  ;;  %s7334_s19 = sld [smem:[#allocation9 + $0xc1]] }
 0x150   : > { %v488_v42 = vmul.f32 %v487_v24, %v7011_v16  ;;  %v489_v51 = vmul.f32 %v487_v24, %v7019_v21  ;;  %v1108_v24 = vmul.f32 %v1106_v39, %v7159_v63 }
 0x153   : > { %856 = vrot.lane.b32.xlu1 %v851_v28, %s6726_s12  ;;  %868 = vrot.lane.b32.xlu0 %v864_v29, %s6726_s12  ;;  %v1066_v28 = vmul.f32 %v1064_v10, %v7159_v63  ;;  %v1079_v29 = vmul.f32 %v1078_v18, %v7151_v57 }
 0x157   : > { %870 = vrot.lane.b32.xlu1 %v865_v31, %s6726_s12  ;;  %882 = vrot.lane.b32.xlu0 %v878_v32, %s6726_s12  ;;  %v477_v31 = vmul.f32 %v475_v11, %v7019_v21  ;;  %v482_v32 = vmul.f32 %v481_v19, %v7011_v16  ;;  %v665_v11 = vstv %s7234_s13  ;;  %s7388_s13 = sld [smem:[#allocation9 + $0x95]] }
 0x15b   : > { %884 = vrot.lane.b32.xlu1 %v879_v34, %s6726_s12  ;;  %896 = vrot.lane.b32.xlu0 %v892_v35, %s6726_s12  ;;  %v648_v34 = vmul.f32 %v647_v20, %v7061_v52  ;;  %v493_v35 = vstv %s7193_s22  ;;  %s7347_s22 = sld [smem:[#allocation9 + $0xe]] }
 0x15c   : > { %v495_v10 = vmul.f32 %v493_v35, %v7019_v21 }
 0x15f   : > { %898 = vrot.lane.b32.xlu1 %v893_v37, %s6726_s12  ;;  %910 = vrot.lane.b32.xlu0 %v906_v38, %s6726_s12 }
 0x163   : > { %912 = vrot.lane.b32.xlu1 %v907_v40, %s6726_s12  ;;  %924 = vrot.lane.b32.xlu0 %v920_v41, %s6727_s23  ;;  %v483_v41 = vmul.f32 %v481_v19, %v7019_v21 }
 0x167   : > { %926 = vrot.lane.b32.xlu1 %v921_v43, %s6727_s23  ;;  %938 = vrot.lane.b32.xlu0 %v934_v44, %s6727_s23 }
 0x16b   : > { %940 = vrot.lane.b32.xlu1 %v935_v46, %s6727_s23  ;;  %952 = vrot.lane.b32.xlu0 %v948_v47, %s6727_s23  ;;  %v1093_v46 = vmul.f32 %v1092_v30, %v7151_v57 }
 0x16f   : > { %954 = vrot.lane.b32.xlu1 %v949_v49, %s6727_s23  ;;  %966 = vrot.lane.b32.xlu0 %v962_v50, %s6727_s23  ;;  %v649_v49 = vmul.f32 %v647_v20, %v7067_v56  ;;  %v654_v50 = vmul.f32 %v653_v36, %v7061_v52 }
 0x171   : > { %v511_v53 = vpop.permute.xlu0 %510 }
 0x172   : > { %v516_v23 = vadd.f32 %v511_v53, %v476_v17  ;;  %v499_v53 = vstv %s7210_s30  ;;  %s7365_s30 = sld [smem:[#allocation9 + $0x60]] }
 0x173   : > { %968 = vrot.lane.b32.xlu1 %v963_v54, %s6727_s23  ;;  %980 = vrot.lane.b32.xlu0 %v976_v55, %s6727_s23  ;;  %v659_v54 = vstv %s7217_s8  ;;  %v500_v19 = vmul.f32 %v499_v53, %v7011_v16  ;;  %s7372_s8 = sld [smem:[#allocation9 + $0x68]] }
 0x175   : > { %v513_v59 = vpop.permute.xlu1 %512  ;;  %v525_v60 = vpop.permute.xlu0 %524 }
 0x176   : > { %v517_v37 = vadd.f32 %v513_v59, %v477_v31  ;;  %v530_v38 = vadd.f32 %v525_v60, %v482_v32 }
 0x177   : > { %982 = vrot.lane.b32.xlu1 %v977_v61, %s6727_s23  ;;  %1027 = vrot.lane.b32.xlu0 %v1023_v62, %s6726_s12  ;;  %v494_v61 = vmul.f32 %v493_v35, %v7011_v16  ;;  %v671_v16 = vstv %s7252_s21  ;;  %v501_v35 = vmul.f32 %v499_v53, %v7019_v21  ;;  %s7406_s21 = sld [smem:[#allocation9 + $0xc2]] }
 0x178   : > { %v673_v53 = vmul.f32 %v671_v16, %v7067_v56 }
 0x179   : > { %v7170_v1 = vpop.permute.xlu1 %526  ;;  %v7172_v2 = vpop.permute.xlu0 %538 }
 0x17a   : > { %v531_v55 = vadd.f32 %v7170_v1, %v483_v41  ;;  %v544_v58 = vadd.f32 %v7172_v2, %v488_v42  ;;  %v655_v2 = vmul.f32 %v653_v36, %v7067_v56  ;;  %v1148_v41 = vstv %s7264_s25  ;;  %s7424_s25 = sld [smem:[#allocation9 + $0x10]] }
 0x17b   : > { %1029 = vrot.lane.b32.xlu1 %v1024_v3, %s6726_s12  ;;  %1041 = vrot.lane.b32.xlu0 %v1037_v4, %s6726_s12  ;;  %v1094_v3 = vmul.f32 %v1092_v30, %v7159_v63  ;;  %v1107_v4 = vmul.f32 %v1106_v39, %v7151_v57 }
 0x17d   : > { %v7185_v6 = vpop.permute.xlu1 %540  ;;  %v7187_v7 = vpop.permute.xlu0 %552 }
 0x17f   : > { %1043 = vrot.lane.b32.xlu1 %v1038_v8, %s6726_s12  ;;  %1055 = vrot.lane.b32.xlu0 %v1051_v9, %s6726_s12  ;;  %v660_v9 = vmul.f32 %v659_v54, %v7061_v52 }
 0x181   : > { %v7203_v12 = vpop.permute.xlu1 %554  ;;  %v7205_v13 = vpop.permute.xlu0 %566 }
 0x182   : > { %v559_v31 = vadd.f32 %v7203_v12, %v495_v10  ;;  %v572_v32 = vadd.f32 %v7205_v13, %v500_v19  ;;  %v667_v12 = vmul.f32 %v665_v11, %v7067_v56  ;;  %v672_v13 = vmul.f32 %v671_v16, %v7061_v52 }
 0x183   : > { %1057 = vrot.lane.b32.xlu1 %v1052_v14, %s6726_s12  ;;  %1069 = vrot.lane.b32.xlu0 %v1065_v15, %s6726_s12  ;;  %v545_v14 = vadd.f32 %v7185_v6, %v489_v51  ;;  %v558_v15 = vadd.f32 %v7187_v7, %v494_v61  ;;  %v661_v6 = vmul.f32 %v659_v54, %v7067_v56  ;;  %v1194_v51 = vstv %s7282_s26  ;;  %s7442_s26 = sld [smem:[#allocation9 + $0x3d]] }
 0x184   : > { %v666_v7 = vmul.f32 %v665_v11, %v7061_v52  ;;  %v1236_v11 = vstv %s7327_s16  ;;  %v1264_v16 = vstv %s7347_s22  ;;  %s7478_s16 = sld [smem:[#allocation9 + $0xc4]] }
 0x185   : > { %v7220_v25 = vpop.permute.xlu1 %568  ;;  %v581_v27 = vpop.permute.xlu0 %580  ;;  %s7495_s22 = sld [smem:[#allocation9 + $0x36]] }
 0x186   : > { %v586_v33 = vadd.f32 %v581_v27, %v516_v23  ;;  %v1121_v27 = vmul.f32 %v1120_v5, %v7151_v57  ;;  %v573_v21 = vadd.f32 %v7220_v25, %v501_v35 }
 0x187   : > { %1071 = vrot.lane.b32.xlu1 %v1066_v28, %s6726_s12  ;;  %1083 = vrot.lane.b32.xlu0 %v1079_v29, %s6726_s12  ;;  %v1134_v28 = vstv %s7243_s14  ;;  %s7395_s14 = sld [smem:[#allocation9 + $0xba]] }
 0x188   : > { %v7237_v40 = vadd.f32 %v648_v34, %v586_v33  ;;  %v1135_v39 = vmul.f32 %v1134_v28, %v7151_v57 }
 0x189   : > { %v583_v43 = vpop.permute.xlu1 %582  ;;  %v595_v44 = vpop.permute.xlu0 %594 }
 0x18a   : > { %v587_v47 = vadd.f32 %v583_v43, %v517_v37  ;;  %v600_v48 = vadd.f32 %v595_v44, %v530_v38  ;;  %v1122_v38 = vmul.f32 %v1120_v5, %v7159_v63 }
 0x18b   : > { %1085 = vrot.lane.b32.xlu1 %v1080_v45, %s6726_s12  ;;  %1097 = vrot.lane.b32.xlu0 %v1093_v46, %s6727_s23 }
 0x18c   : > { %v7256_v59 = vadd.f32 %v649_v49, %v587_v47  ;;  %v7258_v60 = vadd.f32 %v654_v50, %v600_v48  ;;  %v1136_v48 = vmul.f32 %v1134_v28, %v7159_v63  ;;  %v1149_v49 = vmul.f32 %v1148_v41, %v7151_v57  ;;  %v7312_v50 = vld [vmem:[#allocation2 + $0x19] sm:$0xff] }
 0x18d   : > { %v597_v62 = vpop.permute.xlu1 %596  ;;  %v609_v0 = vpop.permute.xlu0 %608  ;;  %v1195_v61 = vmul.f32 %v1194_v51, %v7312_v50 }
 0x18e   : > { %v601_v8 = vadd.f32 %v597_v62, %v531_v55  ;;  %v614_v1 = vadd.f32 %v609_v0, %v544_v58  ;;  %v1150_v58 = vmul.f32 %v1148_v41, %v7159_v63  ;;  %v7324_v62 = vld [vmem:[#allocation2 + $0x21] sm:$0xff]  ;;  %v1208_v0 = vstv %s7299_s11  ;;  %s7459_s11 = sld [smem:[#allocation9 + $0x6a]] }
 0x18f   : > { %1099 = vrot.lane.b32.xlu1 %v1094_v3, %s6727_s23  ;;  %1111 = vrot.lane.b32.xlu0 %v1107_v4, %s6727_s23  ;;  %v1196_v4 = vmul.f32 %v1194_v51, %v7324_v62  ;;  %v1209_v5 = vmul.f32 %v1208_v0, %v7312_v50  ;;  %v1265_v41 = vmul.f32 %v1264_v16, %v7312_v50 }
 0x190   : > { %v7274_v17 = vadd.f32 %v655_v2, %v601_v8  ;;  %v7276_v18 = vadd.f32 %v660_v9, %v614_v1  ;;  %v1222_v8 = vstv %s7315_s15  ;;  %v1210_v9 = vmul.f32 %v1208_v0, %v7324_v62  ;;  %s7471_s15 = sld [smem:[#allocation9 + $0x97]] }
 0x191   : > { %v611_v20 = vpop.permute.xlu1 %610  ;;  %v623_v23 = vpop.permute.xlu0 %622  ;;  %v1223_v10 = vmul.f32 %v1222_v8, %v7312_v50  ;;  %v1224_v19 = vmul.f32 %v1222_v8, %v7324_v62  ;;  %v1266_v51 = vmul.f32 %v1264_v16, %v7324_v62  ;;  %v1320_v16 = vstv %s7406_s21  ;;  %s7568_s21 = sld [smem:[#allocation9 + $0x13]] }
 0x192   : > { %v615_v29 = vadd.f32 %v611_v20, %v545_v14  ;;  %v628_v30 = vadd.f32 %v623_v23, %v558_v15  ;;  %v1237_v20 = vmul.f32 %v1236_v11, %v7312_v50  ;;  %v1250_v23 = vstv %s7334_s19  ;;  %s7482_s19 = sld [smem:[#allocation9 + $0x9]] }
 0x193   : > { %1113 = vrot.lane.b32.xlu1 %v1108_v24, %s6727_s23  ;;  %1125 = vrot.lane.b32.xlu0 %v1121_v27, %s6727_s23  ;;  %v819_v24 = vstv %s7338_s20  ;;  %s7491_s20 = sld [smem:[#allocation9 + $0x11]] }
 0x194   : > { %v7291_v33 = vadd.f32 %v661_v6, %v615_v29  ;;  %v7293_v34 = vadd.f32 %v666_v7, %v628_v30  ;;  %v1238_v30 = vmul.f32 %v1236_v11, %v7324_v62  ;;  %v1251_v6 = vmul.f32 %v1250_v23, %v7312_v50 }
 0x195   : > { %v625_v36 = vpop.permute.xlu1 %624  ;;  %v637_v37 = vpop.permute.xlu0 %636  ;;  %v1306_v11 = vstv %s7388_s13  ;;  %s7539_s13 = sld [smem:[#allocation9 + $0xbd]] }
 0x196   : > { %v629_v42 = vadd.f32 %v625_v36, %v559_v31  ;;  %v642_v43 = vadd.f32 %v637_v37, %v572_v32  ;;  %v820_v31 = vmul.f32 %v819_v24, %v7105_v22  ;;  %v825_v32 = vstv %s7351_s24  ;;  %s7503_s24 = sld [smem:[#allocation9 + $0x3e]] }
 0x197   : > { %1127 = vrot.lane.b32.xlu1 %v1122_v38, %s6727_s23  ;;  %1139 = vrot.lane.b32.xlu0 %v1135_v39, %s6727_s23  ;;  %v1252_v39 = vmul.f32 %v1250_v23, %v7324_v62 }
 0x198   : > { %v7306_v44 = vadd.f32 %v667_v12, %v629_v42  ;;  %v7308_v45 = vadd.f32 %v672_v13, %v642_v43  ;;  %v1278_v42 = vstv %s7359_s6  ;;  %v821_v13 = vmul.f32 %v819_v24, %v7111_v26  ;;  %s7509_s6 = sld [smem:[#allocation9 + $0x63]] }
 0x199   : > { %v639_v46 = vpop.permute.xlu1 %638  ;;  %v683_v47 = vpop.permute.xlu0 %682 }
 0x19a   : > { %v643_v52 = vadd.f32 %v639_v46, %v573_v21  ;;  %v688_v27 = vadd.f32 %v683_v47, %v7237_v40 }
 0x19b   : > { %1141 = vrot.lane.b32.xlu1 %v1136_v48, %s6727_s23  ;;  %1153 = vrot.lane.b32.xlu0 %v1149_v49, %s6727_s23 }
 0x19c   : > { %v7320_v25 = vadd.f32 %v673_v53, %v643_v52  ;;  %v1279_v53 = vmul.f32 %v1278_v42, %v7312_v50 }
 0x19d   : > { %v685_v54 = vpop.permute.xlu1 %684  ;;  %v697_v55 = vpop.permute.xlu0 %696 }
 0x19e   : > { %v689_v40 = vadd.f32 %v685_v54, %v7256_v59  ;;  %v702_v35 = vadd.f32 %v697_v55, %v7258_v60  ;;  %v826_v59 = vmul.f32 %v825_v32, %v7105_v22  ;;  %v831_v60 = vstv %s7365_s30  ;;  %s7516_s30 = sld [smem:[#allocation9 + $0x6b]] }
 0x19f   : > { %1155 = vrot.lane.b32.xlu1 %v1150_v58, %s6727_s23  ;;  %1199 = vrot.lane.b32.xlu0 %v1195_v61, %s6726_s12  ;;  %v1292_v54 = vstv %s7372_s8  ;;  %v837_v61 = vstv %s7379_s29  ;;  %s7523_s8 = sld [smem:[#allocation9 + $0x90]] }
 0x1a0   : > { %s7532_s29 = sld [smem:[#allocation9 + $0x98]] }
 0x1a1   : > { %v699_v56 = vpop.permute.xlu1 %698  ;;  %v711_v3 = vpop.permute.xlu0 %710 }
 0x1a2   : > { %v703_v21 = vadd.f32 %v699_v56, %v7274_v17  ;;  %v716_v46 = vadd.f32 %v711_v3, %v7276_v18  ;;  %v827_v17 = vmul.f32 %v825_v32, %v7111_v26  ;;  %v832_v18 = vmul.f32 %v831_v60, %v7105_v22 }
 0x1a3   : > { %1201 = vrot.lane.b32.xlu1 %v1196_v4, %s6726_s12  ;;  %1213 = vrot.lane.b32.xlu0 %v1209_v5, %s6726_s12 }
 0x1a5   : > { %v7340_v1 = vpop.permute.xlu1 %712  ;;  %v7342_v2 = vpop.permute.xlu0 %724 }
 0x1a6   : > { %v717_v0 = vadd.f32 %v7340_v1, %v7291_v33  ;;  %v730_v56 = vadd.f32 %v7342_v2, %v7293_v34  ;;  %v833_v33 = vmul.f32 %v831_v60, %v7111_v26  ;;  %v838_v34 = vmul.f32 %v837_v61, %v7105_v22  ;;  %v7468_v60 = vld [vmem:[#allocation2 + $0x22] sm:$0xff] }
 0x1a7   : > { %1215 = vrot.lane.b32.xlu1 %v1210_v9, %s6726_s12  ;;  %1227 = vrot.lane.b32.xlu0 %v1223_v10, %s6726_s12  ;;  %v1280_v9 = vmul.f32 %v1278_v42, %v7324_v62  ;;  %v1293_v10 = vmul.f32 %v1292_v54, %v7312_v50  ;;  %v843_v1 = vstv %s7395_s14  ;;  %v1366_v42 = vstv %s7424_s25  ;;  %s7550_s14 = sld [smem:[#allocation9 + $0xc5]] }
 0x1a8   : > { %s7586_s25 = sld [smem:[#allocation9 + $0x40]] }
 0x1a9   : > { %v7353_v14 = vpop.permute.xlu1 %726  ;;  %v7355_v15 = vpop.permute.xlu0 %738 }
 0x1aa   : > { %v731_v2 = vadd.f32 %v7353_v14, %v7306_v44  ;;  %v744_v23 = vadd.f32 %v7355_v15, %v7308_v45  ;;  %v839_v44 = vmul.f32 %v837_v61, %v7111_v26  ;;  %v844_v45 = vmul.f32 %v843_v1, %v7105_v22 }
 0x1ab   : > { %1229 = vrot.lane.b32.xlu1 %v1224_v19, %s6726_s12  ;;  %1241 = vrot.lane.b32.xlu0 %v1237_v20, %s6726_s12 }
 0x1ad   : > { %v7368_v28 = vpop.permute.xlu1 %740  ;;  %v753_v29 = vpop.permute.xlu0 %752 }
 0x1ae   : > { %v758_v7 = vadd.f32 %v753_v29, %v688_v27  ;;  %v745_v14 = vadd.f32 %v7368_v28, %v7320_v25 }
 0x1af   : > { %1243 = vrot.lane.b32.xlu1 %v1238_v30, %s6726_s12  ;;  %1255 = vrot.lane.b32.xlu0 %v1251_v6, %s6726_s12  ;;  %v1294_v6 = vmul.f32 %v1292_v54, %v7324_v62 }
 0x1b0   : > { %v7383_v36 = vadd.f32 %v820_v31, %v758_v7  ;;  %v1307_v7 = vmul.f32 %v1306_v11, %v7312_v50 }
 0x1b1   : > { %v755_v37 = vpop.permute.xlu1 %754  ;;  %v767_v38 = vpop.permute.xlu0 %766 }
 0x1b2   : > { %v759_v43 = vadd.f32 %v755_v37, %v689_v40  ;;  %v772_v12 = vadd.f32 %v767_v38, %v702_v35  ;;  %v1308_v38 = vmul.f32 %v1306_v11, %v7324_v62 }
 0x1b3   : > { %1257 = vrot.lane.b32.xlu1 %v1252_v39, %s6726_s12  ;;  %1269 = vrot.lane.b32.xlu0 %v1265_v41, %s6727_s23  ;;  %v1321_v39 = vmul.f32 %v1320_v16, %v7312_v50  ;;  %v7456_v41 = vld [vmem:[#allocation2 + $0x1a] sm:$0xff] }
 0x1b4   : > { %v7399_v47 = vadd.f32 %v821_v13, %v759_v43  ;;  %v7401_v48 = vadd.f32 %v826_v59, %v772_v12  ;;  %v845_v43 = vmul.f32 %v843_v1, %v7111_v26  ;;  %v1322_v13 = vmul.f32 %v1320_v16, %v7324_v62 }
 0x1b5   : > { %v769_v49 = vpop.permute.xlu1 %768  ;;  %v781_v52 = vpop.permute.xlu0 %780  ;;  %v1367_v59 = vmul.f32 %v1366_v42, %v7456_v41 }
 0x1b6   : > { %v773_v55 = vadd.f32 %v769_v49, %v703_v21  ;;  %v786_v58 = vadd.f32 %v781_v52, %v716_v46  ;;  %v1380_v21 = vstv %s7442_s26  ;;  %v1368_v49 = vmul.f32 %v1366_v42, %v7468_v60  ;;  %s7603_s26 = sld [smem:[#allocation9 + $0x6d]] }
 0x1b7   : > { %1271 = vrot.lane.b32.xlu1 %v1266_v51, %s6727_s23  ;;  %1283 = vrot.lane.b32.xlu0 %v1279_v53, %s6727_s23  ;;  %v1381_v52 = vmul.f32 %v1380_v21, %v7456_v41  ;;  %v1394_v51 = vstv %s7459_s11  ;;  %s7615_s11 = sld [smem:[#allocation9 + $0x9a]] }
 0x1b8   : > { %v7417_v3 = vadd.f32 %v827_v17, %v773_v55  ;;  %v7419_v4 = vadd.f32 %v832_v18, %v786_v58  ;;  %v1382_v55 = vmul.f32 %v1380_v21, %v7468_v60  ;;  %v1395_v58 = vmul.f32 %v1394_v51, %v7456_v41 }
 0x1b9   : > { %v783_v5 = vpop.permute.xlu1 %782  ;;  %v795_v8 = vpop.permute.xlu0 %794  ;;  %v1408_v17 = vstv %s7471_s15  ;;  %s7622_s15 = sld [smem:[#allocation9 + $0xc7]] }
 0x1ba   : > { %v787_v19 = vadd.f32 %v783_v5, %v717_v0  ;;  %v800_v20 = vadd.f32 %v795_v8, %v730_v56  ;;  %v1396_v0 = vmul.f32 %v1394_v51, %v7468_v60  ;;  %v1409_v56 = vmul.f32 %v1408_v17, %v7456_v41 }
 0x1bb   : > { %1285 = vrot.lane.b32.xlu1 %v1280_v9, %s6727_s23  ;;  %1297 = vrot.lane.b32.xlu0 %v1293_v10, %s6727_s23  ;;  %v1422_v5 = vstv %s7478_s16  ;;  %v992_v8 = vstv %s7482_s19  ;;  %s7626_s16 = sld [smem:[#allocation9 + $0xc]] }
 0x1bc   : > { %v7435_v24 = vadd.f32 %v833_v33, %v787_v19  ;;  %v7437_v27 = vadd.f32 %v838_v34, %v800_v20  ;;  %v1410_v19 = vmul.f32 %v1408_v17, %v7468_v60  ;;  %v1423_v20 = vmul.f32 %v1422_v5, %v7456_v41  ;;  %s7635_s19 = sld [smem:[#allocation9 + $0x14]] }
 0x1bd   : > { %v797_v29 = vpop.permute.xlu1 %796  ;;  %v809_v30 = vpop.permute.xlu0 %808  ;;  %v1436_v34 = vstv %s7491_s20  ;;  %v993_v1 = vmul.f32 %v992_v8, %v7151_v57  ;;  %v1478_v17 = vstv %s7532_s29  ;;  %s7639_s20 = sld [smem:[#allocation9 + $0x39]] }
 0x1be   : > { %v801_v31 = vadd.f32 %v797_v29, %v731_v2  ;;  %v814_v32 = vadd.f32 %v809_v30, %v744_v23  ;;  %v998_v2 = vstv %s7495_s22  ;;  %v1437_v16 = vmul.f32 %v1436_v34, %v7456_v41  ;;  %s7647_s22 = sld [smem:[#allocation9 + $0x41]] }
 0x1bf   : > { %1299 = vrot.lane.b32.xlu1 %v1294_v6, %s6727_s23  ;;  %1311 = vrot.lane.b32.xlu0 %v1307_v7, %s6727_s23  ;;  %v1424_v7 = vmul.f32 %v1422_v5, %v7468_v60  ;;  %v1438_v42 = vmul.f32 %v1436_v34, %v7468_v60  ;;  %v1492_v34 = vstv %s7550_s14  ;;  %s7683_s29 = sld [smem:[#allocation9 + $0xc0]] }
 0x1c0   : > { %v7450_v15 = vadd.f32 %v839_v44, %v801_v31  ;;  %v7452_v40 = vadd.f32 %v844_v45, %v814_v32  ;;  %v1450_v31 = vstv %s7503_s24  ;;  %v994_v45 = vmul.f32 %v992_v8, %v7159_v63  ;;  %s7653_s24 = sld [smem:[#allocation9 + $0x66]] }
 0x1c1   : > { %v811_v35 = vpop.permute.xlu1 %810  ;;  %v855_v37 = vpop.permute.xlu0 %854  ;;  %s7712_s14 = sld [smem:[#allocation9 + $0x16]] }
 0x1c2   : > { %v815_v22 = vadd.f32 %v811_v35, %v745_v14  ;;  %v860_v9 = vadd.f32 %v855_v37, %v7383_v36 }
 0x1c3   : > { %1313 = vrot.lane.b32.xlu1 %v1308_v38, %s6727_s23  ;;  %1325 = vrot.lane.b32.xlu0 %v1321_v39, %s6727_s23 }
 0x1c4   : > { %v7464_v25 = vadd.f32 %v845_v43, %v815_v22  ;;  %v1451_v43 = vmul.f32 %v1450_v31, %v7456_v41 }
 0x1c5   : > { %v857_v28 = vpop.permute.xlu1 %856  ;;  %v869_v12 = vpop.permute.xlu0 %868 }
 0x1c6   : > { %v861_v36 = vadd.f32 %v857_v28, %v7399_v47  ;;  %v874_v23 = vadd.f32 %v869_v12, %v7401_v48  ;;  %v999_v47 = vmul.f32 %v998_v2, %v7151_v57  ;;  %v1004_v48 = vstv %s7509_s6  ;;  %s7660_s6 = sld [smem:[#allocation9 + $0x6e]] }
 0x1c7   : > { %1327 = vrot.lane.b32.xlu1 %v1322_v13, %s6727_s23  ;;  %1371 = vrot.lane.b32.xlu0 %v1367_v59, %s6726_s12  ;;  %v1464_v28 = vstv %s7516_s30  ;;  %v1010_v59 = vstv %s7523_s8  ;;  %s7667_s30 = sld [smem:[#allocation9 + $0x93]] }
 0x1c8   : > { %s7676_s8 = sld [smem:[#allocation9 + $0x9b]] }
 0x1c9   : > { %v871_v26 = vpop.permute.xlu1 %870  ;;  %v883_v46 = vpop.permute.xlu0 %882 }
 0x1ca   : > { %v875_v14 = vadd.f32 %v871_v26, %v7417_v3  ;;  %v888_v35 = vadd.f32 %v883_v46, %v7419_v4  ;;  %v1000_v3 = vmul.f32 %v998_v2, %v7159_v63  ;;  %v1005_v4 = vmul.f32 %v1004_v48, %v7151_v57 }
 0x1cb   : > { %1373 = vrot.lane.b32.xlu1 %v1368_v49, %s6726_s12  ;;  %1385 = vrot.lane.b32.xlu0 %v1381_v52, %s6726_s12 }
 0x1cd   : > { %v7484_v53 = vpop.permute.xlu1 %884  ;;  %v7486_v54 = vpop.permute.xlu0 %896 }
 0x1ce   : > { %v889_v21 = vadd.f32 %v7484_v53, %v7435_v24  ;;  %v902_v26 = vadd.f32 %v7486_v54, %v7437_v27  ;;  %v1006_v24 = vmul.f32 %v1004_v48, %v7159_v63  ;;  %v1011_v27 = vmul.f32 %v1010_v59, %v7151_v57  ;;  %v7612_v48 = vld [vmem:[#allocation2 + $0x38] sm:$0xff] }
 0x1cf   : > { %1387 = vrot.lane.b32.xlu1 %v1382_v55, %s6726_s12  ;;  %1399 = vrot.lane.b32.xlu0 %v1395_v58, %s6726_s12  ;;  %v1452_v55 = vmul.f32 %v1450_v31, %v7468_v60  ;;  %v1465_v58 = vmul.f32 %v1464_v28, %v7456_v41  ;;  %v1016_v53 = vstv %s7539_s13  ;;  %v1539_v31 = vstv %s7568_s21  ;;  %s7694_s13 = sld [smem:[#allocation9 + $0xc8]] }
 0x1d0   : > { %s7730_s21 = sld [smem:[#allocation9 + $0x43]] }
 0x1d1   : > { %v7497_v18 = vpop.permute.xlu1 %898  ;;  %v7499_v61 = vpop.permute.xlu0 %910 }
 0x1d2   : > { %v903_v54 = vadd.f32 %v7497_v18, %v7450_v15  ;;  %v916_v5 = vadd.f32 %v7499_v61, %v7452_v40  ;;  %v1012_v15 = vmul.f32 %v1010_v59, %v7159_v63  ;;  %v1017_v40 = vmul.f32 %v1016_v53, %v7151_v57 }
 0x1d3   : > { %1401 = vrot.lane.b32.xlu1 %v1396_v0, %s6726_s12  ;;  %1413 = vrot.lane.b32.xlu0 %v1409_v56, %s6726_s12 }
 0x1d5   : > { %v7512_v10 = vpop.permute.xlu1 %912  ;;  %v925_v11 = vpop.permute.xlu0 %924 }
 0x1d6   : > { %v930_v33 = vadd.f32 %v925_v11, %v860_v9  ;;  %v917_v18 = vadd.f32 %v7512_v10, %v7464_v25 }
 0x1d7   : > { %1415 = vrot.lane.b32.xlu1 %v1410_v19, %s6726_s12  ;;  %1427 = vrot.lane.b32.xlu0 %v1423_v20, %s6726_s12  ;;  %v1466_v20 = vmul.f32 %v1464_v28, %v7468_v60 }
 0x1d8   : > { %v7527_v29 = vadd.f32 %v993_v1, %v930_v33  ;;  %v1479_v33 = vmul.f32 %v1478_v17, %v7456_v41 }
 0x1d9   : > { %v927_v30 = vpop.permute.xlu1 %926  ;;  %v939_v6 = vpop.permute.xlu0 %938 }
 0x1da   : > { %v931_v32 = vadd.f32 %v927_v30, %v861_v36  ;;  %v944_v44 = vadd.f32 %v939_v6, %v874_v23  ;;  %v1480_v6 = vmul.f32 %v1478_v17, %v7468_v60 }
 0x1db   : > { %1429 = vrot.lane.b32.xlu1 %v1424_v7, %s6726_s12  ;;  %1441 = vrot.lane.b32.xlu0 %v1437_v16, %s6727_s23  ;;  %v1493_v7 = vmul.f32 %v1492_v34, %v7456_v41  ;;  %v7600_v16 = vld [vmem:[#allocation2 + $0x30] sm:$0xff] }
 0x1dc   : > { %v7543_v37 = vadd.f32 %v994_v45, %v931_v32  ;;  %v7545_v38 = vadd.f32 %v999_v47, %v944_v44  ;;  %v1018_v32 = vmul.f32 %v1016_v53, %v7159_v63  ;;  %v1494_v45 = vmul.f32 %v1492_v34, %v7468_v60 }
 0x1dd   : > { %v941_v39 = vpop.permute.xlu1 %940  ;;  %v953_v22 = vpop.permute.xlu0 %952  ;;  %v1540_v47 = vmul.f32 %v1539_v31, %v7600_v16 }
 0x1de   : > { %v945_v12 = vadd.f32 %v941_v39, %v875_v14  ;;  %v958_v13 = vadd.f32 %v953_v22, %v888_v35  ;;  %v1553_v14 = vstv %s7586_s25  ;;  %v1541_v39 = vmul.f32 %v1539_v31, %v7612_v48  ;;  %s7747_s25 = sld [smem:[#allocation9 + $0x70]] }
 0x1df   : > { %1443 = vrot.lane.b32.xlu1 %v1438_v42, %s6727_s23  ;;  %1455 = vrot.lane.b32.xlu0 %v1451_v43, %s6727_s23  ;;  %v1554_v22 = vmul.f32 %v1553_v14, %v7600_v16  ;;  %v1567_v42 = vstv %s7603_s26  ;;  %s7759_s26 = sld [smem:[#allocation9 + $0x9d]] }
 0x1e0   : > { %v7561_v46 = vadd.f32 %v1000_v3, %v945_v12  ;;  %v7563_v49 = vadd.f32 %v1005_v4, %v958_v13  ;;  %v1555_v12 = vmul.f32 %v1553_v14, %v7612_v48  ;;  %v1568_v13 = vmul.f32 %v1567_v42, %v7600_v16 }
 0x1e1   : > { %v955_v52 = vpop.permute.xlu1 %954  ;;  %v967_v51 = vpop.permute.xlu0 %966  ;;  %v1581_v3 = vstv %s7615_s11  ;;  %s7766_s11 = sld [smem:[#allocation9 + $0xca]] }
 0x1e2   : > { %v959_v0 = vadd.f32 %v955_v52, %v889_v21  ;;  %v972_v56 = vadd.f32 %v967_v51, %v902_v26  ;;  %v1569_v21 = vmul.f32 %v1567_v42, %v7612_v48  ;;  %v1582_v26 = vmul.f32 %v1581_v3, %v7600_v16 }
 0x1e3   : > { %1457 = vrot.lane.b32.xlu1 %v1452_v55, %s6727_s23  ;;  %1469 = vrot.lane.b32.xlu0 %v1465_v58, %s6727_s23  ;;  %v1595_v52 = vstv %s7622_s15  ;;  %v1164_v51 = vstv %s7626_s16  ;;  %s7770_s15 = sld [smem:[#allocation9 + $0xf]] }
 0x1e4   : > { %v7579_v8 = vadd.f32 %v1006_v24, %v959_v0  ;;  %v7581_v9 = vadd.f32 %v1011_v27, %v972_v56  ;;  %v1583_v0 = vmul.f32 %v1581_v3, %v7612_v48  ;;  %v1596_v56 = vmul.f32 %v1595_v52, %v7600_v16  ;;  %s7779_s16 = sld [smem:[#allocation9 + $0x17]] }
 0x1e5   : > { %v969_v11 = vpop.permute.xlu1 %968  ;;  %v981_v19 = vpop.permute.xlu0 %980  ;;  %v1609_v27 = vstv %s7635_s19  ;;  %v1165_v53 = vmul.f32 %v1164_v51, %v7312_v50  ;;  %v1651_v3 = vstv %s7676_s8  ;;  %s7783_s19 = sld [smem:[#allocation9 + $0x3c]] }
 0x1e6   : > { %v973_v1 = vadd.f32 %v969_v11, %v903_v54  ;;  %v986_v2 = vadd.f32 %v981_v19, %v916_v5  ;;  %v1170_v54 = vstv %s7639_s20  ;;  %v1610_v34 = vmul.f32 %v1609_v27, %v7600_v16  ;;  %s7791_s20 = sld [smem:[#allocation9 + $0x44]] }
 0x1e7   : > { %1471 = vrot.lane.b32.xlu1 %v1466_v20, %s6727_s23  ;;  %1483 = vrot.lane.b32.xlu0 %v1479_v33, %s6727_s23  ;;  %v1597_v33 = vmul.f32 %v1595_v52, %v7612_v48  ;;  %v1611_v31 = vmul.f32 %v1609_v27, %v7612_v48  ;;  %v1665_v27 = vstv %s7694_s13  ;;  %s7827_s8 = sld [smem:[#allocation9 + $0xc3]] }
 0x1e8   : > { %v7594_v61 = vadd.f32 %v1012_v15, %v973_v1  ;;  %v7596_v36 = vadd.f32 %v1017_v40, %v986_v2  ;;  %v1623_v1 = vstv %s7647_s22  ;;  %v1166_v40 = vmul.f32 %v1164_v51, %v7324_v62  ;;  %s7797_s22 = sld [smem:[#allocation9 + $0x69]] }
 0x1e9   : > { %v983_v23 = vpop.permute.xlu1 %982  ;;  %v1028_v30 = vpop.permute.xlu0 %1027  ;;  %s7856_s13 = sld [smem:[#allocation9 + $0x19]] }
 0x1ea   : > { %v987_v57 = vadd.f32 %v983_v23, %v917_v18  ;;  %v1033_v55 = vadd.f32 %v1028_v30, %v7527_v29 }
 0x1eb   : > { %1485 = vrot.lane.b32.xlu1 %v1480_v6, %s6727_s23  ;;  %1497 = vrot.lane.b32.xlu0 %v1493_v7, %s6727_s23 }
 0x1ec   : > { %v7608_v25 = vadd.f32 %v1018_v32, %v987_v57  ;;  %v1624_v32 = vmul.f32 %v1623_v1, %v7600_v16 }
 0x1ed   : > { %v1030_v10 = vpop.permute.xlu1 %1029  ;;  %v1042_v44 = vpop.permute.xlu0 %1041 }
 0x1ee   : > { %v1034_v29 = vadd.f32 %v1030_v10, %v7543_v37  ;;  %v1047_v5 = vadd.f32 %v1042_v44, %v7545_v38  ;;  %v1171_v37 = vmul.f32 %v1170_v54, %v7312_v50  ;;  %v1176_v38 = vstv %s7653_s24  ;;  %s7804_s24 = sld [smem:[#allocation9 + $0x71]] }
 0x1ef   : > { %1499 = vrot.lane.b32.xlu1 %v1494_v45, %s6727_s23  ;;  %1544 = vrot.lane.b32.xlu0 %v1540_v47, %s6726_s12  ;;  %v1637_v10 = vstv %s7660_s6  ;;  %v1182_v47 = vstv %s7667_s30  ;;  %s7811_s6 = sld [smem:[#allocation9 + $0x96]] }
 0x1f0   : > { %s7820_s30 = sld [smem:[#allocation9 + $0x9e]] }
 0x1f1   : > { %v1044_v63 = vpop.permute.xlu1 %1043  ;;  %v1056_v35 = vpop.permute.xlu0 %1055 }
 0x1f2   : > { %v1048_v18 = vadd.f32 %v1044_v63, %v7561_v46  ;;  %v1061_v23 = vadd.f32 %v1056_v35, %v7563_v49  ;;  %v1172_v46 = vmul.f32 %v1170_v54, %v7324_v62  ;;  %v1177_v49 = vmul.f32 %v1176_v38, %v7312_v50 }
 0x1f3   : > { %1546 = vrot.lane.b32.xlu1 %v1541_v39, %s6726_s12  ;;  %1558 = vrot.lane.b32.xlu0 %v1554_v22, %s6726_s12 }
 0x1f5   : > { %v7628_v43 = vpop.permute.xlu1 %1057  ;;  %v7630_v28 = vpop.permute.xlu0 %1069 }
 0x1f6   : > { %v1062_v14 = vadd.f32 %v7628_v43, %v7579_v8  ;;  %v1075_v63 = vadd.f32 %v7630_v28, %v7581_v9  ;;  %v1178_v8 = vmul.f32 %v1176_v38, %v7324_v62  ;;  %v1183_v9 = vmul.f32 %v1182_v47, %v7312_v50  ;;  %v7756_v38 = vld [vmem:[#allocation2 + $0x39] sm:$0xff] }
 0x1f7   : > { %1560 = vrot.lane.b32.xlu1 %v1555_v12, %s6726_s12  ;;  %1572 = vrot.lane.b32.xlu0 %v1568_v13, %s6726_s12  ;;  %v1625_v12 = vmul.f32 %v1623_v1, %v7612_v48  ;;  %v1638_v13 = vmul.f32 %v1637_v10, %v7600_v16  ;;  %v1188_v43 = vstv %s7683_s29  ;;  %v1711_v1 = vstv %s7712_s14  ;;  %s7838_s29 = sld [smem:[#allocation9 + $0xcb]] }
 0x1f8   : > { %s7874_s14 = sld [smem:[#allocation9 + $0x46]] }
 0x1f9   : > { %v7641_v4 = vpop.permute.xlu1 %1071  ;;  %v7643_v59 = vpop.permute.xlu0 %1083 }
 0x1fa   : > { %v1076_v28 = vadd.f32 %v7641_v4, %v7594_v61  ;;  %v1089_v52 = vadd.f32 %v7643_v59, %v7596_v36  ;;  %v1184_v61 = vmul.f32 %v1182_v47, %v7324_v62  ;;  %v1189_v36 = vmul.f32 %v1188_v43, %v7312_v50 }
 0x1fb   : > { %1574 = vrot.lane.b32.xlu1 %v1569_v21, %s6726_s12  ;;  %1586 = vrot.lane.b32.xlu0 %v1582_v26, %s6726_s12 }
 0x1fd   : > { %v7656_v58 = vpop.permute.xlu1 %1085  ;;  %v1098_v17 = vpop.permute.xlu0 %1097 }
 0x1fe   : > { %v1103_v24 = vadd.f32 %v1098_v17, %v1033_v55  ;;  %v1090_v4 = vadd.f32 %v7656_v58, %v7608_v25 }
 0x1ff   : > { %1588 = vrot.lane.b32.xlu1 %v1583_v0, %s6726_s12  ;;  %1600 = vrot.lane.b32.xlu0 %v1596_v56, %s6726_s12  ;;  %v1639_v56 = vmul.f32 %v1637_v10, %v7612_v48 }
 0x200   : > { %v7671_v11 = vadd.f32 %v1165_v53, %v1103_v24  ;;  %v1652_v24 = vmul.f32 %v1651_v3, %v7600_v16 }
 0x201   : > { %v1100_v19 = vpop.permute.xlu1 %1099  ;;  %v1112_v20 = vpop.permute.xlu0 %1111 }
 0x202   : > { %v1104_v2 = vadd.f32 %v1100_v19, %v1034_v29  ;;  %v1117_v15 = vadd.f32 %v1112_v20, %v1047_v5  ;;  %v1653_v20 = vmul.f32 %v1651_v3, %v7612_v48 }
 0x203   : > { %1602 = vrot.lane.b32.xlu1 %v1597_v33, %s6726_s12  ;;  %1614 = vrot.lane.b32.xlu0 %v1610_v34, %s6727_s23  ;;  %v1666_v33 = vmul.f32 %v1665_v27, %v7600_v16  ;;  %v7744_v34 = vld [vmem:[#allocation2 + $0x31] sm:$0xff] }
 0x204   : > { %v7687_v30 = vadd.f32 %v1166_v40, %v1104_v2  ;;  %v7689_v6 = vadd.f32 %v1171_v37, %v1117_v15  ;;  %v1190_v2 = vmul.f32 %v1188_v43, %v7324_v62  ;;  %v1667_v40 = vmul.f32 %v1665_v27, %v7612_v48 }
 0x205   : > { %v1114_v7 = vpop.permute.xlu1 %1113  ;;  %v1126_v57 = vpop.permute.xlu0 %1125  ;;  %v1712_v37 = vmul.f32 %v1711_v1, %v7744_v34 }
 0x206   : > { %v1118_v44 = vadd.f32 %v1114_v7, %v1048_v18  ;;  %v1131_v45 = vadd.f32 %v1126_v57, %v1061_v23  ;;  %v1725_v18 = vstv %s7730_s21  ;;  %v1713_v7 = vmul.f32 %v1711_v1, %v7756_v38  ;;  %s7891_s21 = sld [smem:[#allocation9 + $0x73]] }
 0x207   : > { %1616 = vrot.lane.b32.xlu1 %v1611_v31, %s6727_s23  ;;  %1628 = vrot.lane.b32.xlu0 %v1624_v32, %s6727_s23  ;;  %v1726_v57 = vmul.f32 %v1725_v18, %v7744_v34  ;;  %v1739_v31 = vstv %s7747_s25  ;;  %s7903_s25 = sld [smem:[#allocation9 + $0xa0]] }
 0x208   : > { %v7705_v35 = vadd.f32 %v1172_v46, %v1118_v44  ;;  %v7707_v39 = vadd.f32 %v1177_v49, %v1131_v45  ;;  %v1727_v44 = vmul.f32 %v1725_v18, %v7756_v38  ;;  %v1740_v45 = vmul.f32 %v1739_v31, %v7744_v34 }
 0x209   : > { %v1128_v22 = vpop.permute.xlu1 %1127  ;;  %v1140_v42 = vpop.permute.xlu0 %1139  ;;  %v1753_v46 = vstv %s7759_s26  ;;  %s7910_s26 = sld [smem:[#allocation9 + $0xcd]] }
 0x20a   : > { %v1132_v21 = vadd.f32 %v1128_v22, %v1062_v14  ;;  %v1145_v26 = vadd.f32 %v1140_v42, %v1075_v63  ;;  %v1741_v14 = vmul.f32 %v1739_v31, %v7756_v38  ;;  %v1754_v63 = vmul.f32 %v1753_v46, %v7744_v34 }
 0x20b   : > { %1630 = vrot.lane.b32.xlu1 %v1625_v12, %s6727_s23  ;;  %1642 = vrot.lane.b32.xlu0 %v1638_v13, %s6727_s23  ;;  %v1767_v22 = vstv %s7766_s11  ;;  %v1336_v42 = vstv %s7770_s15  ;;  %s7914_s11 = sld [smem:[#allocation9 + $0x12]] }
 0x20c   : > { %v7723_v51 = vadd.f32 %v1178_v8, %v1132_v21  ;;  %v7725_v55 = vadd.f32 %v1183_v9, %v1145_v26  ;;  %v1755_v21 = vmul.f32 %v1753_v46, %v7756_v38  ;;  %v1768_v26 = vmul.f32 %v1767_v22, %v7744_v34  ;;  %s7923_s15 = sld [smem:[#allocation9 + $0x1a]] }
 0x20d   : > { %v1142_v17 = vpop.permute.xlu1 %1141  ;;  %v1154_v0 = vpop.permute.xlu0 %1153  ;;  %v1781_v9 = vstv %s7779_s16  ;;  %v1337_v43 = vmul.f32 %v1336_v42, %v7456_v41  ;;  %v1823_v46 = vstv %s7820_s30  ;;  %s7927_s16 = sld [smem:[#allocation9 + $0x3f]] }
 0x20e   : > { %v1146_v53 = vadd.f32 %v1142_v17, %v1076_v28  ;;  %v1159_v54 = vadd.f32 %v1154_v0, %v1089_v52  ;;  %v1342_v28 = vstv %s7783_s19  ;;  %v1782_v27 = vmul.f32 %v1781_v9, %v7744_v34  ;;  %s7935_s19 = sld [smem:[#allocation9 + $0x47]] }
 0x20f   : > { %1644 = vrot.lane.b32.xlu1 %v1639_v56, %s6727_s23  ;;  %1656 = vrot.lane.b32.xlu0 %v1652_v24, %s6727_s23  ;;  %v1769_v24 = vmul.f32 %v1767_v22, %v7756_v38  ;;  %v1783_v1 = vmul.f32 %v1781_v9, %v7756_v38  ;;  %v1837_v9 = vstv %s7838_s29  ;;  %s7971_s30 = sld [smem:[#allocation9 + $0xc6]] }
 0x210   : > { %v7738_v59 = vadd.f32 %v1184_v61, %v1146_v53  ;;  %v7740_v29 = vadd.f32 %v1189_v36, %v1159_v54  ;;  %v1795_v53 = vstv %s7791_s20  ;;  %v1338_v36 = vmul.f32 %v1336_v42, %v7468_v60  ;;  %s7941_s20 = sld [smem:[#allocation9 + $0x6c]] }
 0x211   : > { %v1156_v5 = vpop.permute.xlu1 %1155  ;;  %v1200_v19 = vpop.permute.xlu0 %1199  ;;  %s8000_s29 = sld [smem:[#allocation9 + $0x1c]] }
 0x212   : > { %v1160_v50 = vadd.f32 %v1156_v5, %v1090_v4  ;;  %v1205_v12 = vadd.f32 %v1200_v19, %v7671_v11 }
 0x213   : > { %1658 = vrot.lane.b32.xlu1 %v1653_v20, %s6727_s23  ;;  %1670 = vrot.lane.b32.xlu0 %v1666_v33, %s6727_s23 }
 0x214   : > { %v7752_v25 = vadd.f32 %v1190_v2, %v1160_v50  ;;  %v1796_v2 = vmul.f32 %v1795_v53, %v7744_v34 }
 0x215   : > { %v1202_v58 = vpop.permute.xlu1 %1201  ;;  %v1214_v15 = vpop.permute.xlu0 %1213 }
 0x216   : > { %v1206_v11 = vadd.f32 %v1202_v58, %v7687_v30  ;;  %v1219_v52 = vadd.f32 %v1214_v15, %v7689_v6  ;;  %v1343_v30 = vmul.f32 %v1342_v28, %v7456_v41  ;;  %v1348_v6 = vstv %s7797_s22  ;;  %s7948_s22 = sld [smem:[#allocation9 + $0x74]] }
 0x217   : > { %1672 = vrot.lane.b32.xlu1 %v1667_v40, %s6727_s23  ;;  %1716 = vrot.lane.b32.xlu0 %v1712_v37, %s6726_s12  ;;  %v1809_v58 = vstv %s7804_s24  ;;  %v1354_v37 = vstv %s7811_s6  ;;  %s7955_s24 = sld [smem:[#allocation9 + $0x99]] }
 0x218   : > { %s7964_s6 = sld [smem:[#allocation9 + $0xa1]] }
 0x219   : > { %v1216_v62 = vpop.permute.xlu1 %1215  ;;  %v1228_v23 = vpop.permute.xlu0 %1227 }
 0x21a   : > { %v1220_v4 = vadd.f32 %v1216_v62, %v7705_v35  ;;  %v1233_v5 = vadd.f32 %v1228_v23, %v7707_v39  ;;  %v1344_v35 = vmul.f32 %v1342_v28, %v7468_v60  ;;  %v1349_v39 = vmul.f32 %v1348_v6, %v7456_v41 }
 0x21b   : > { %1718 = vrot.lane.b32.xlu1 %v1713_v7, %s6726_s12  ;;  %1730 = vrot.lane.b32.xlu0 %v1726_v57, %s6726_s12 }
 0x21d   : > { %v7772_v32 = vpop.permute.xlu1 %1229  ;;  %v7774_v10 = vpop.permute.xlu0 %1241 }
 0x21e   : > { %v1234_v18 = vadd.f32 %v7772_v32, %v7723_v51  ;;  %v1247_v62 = vadd.f32 %v7774_v10, %v7725_v55  ;;  %v1350_v51 = vmul.f32 %v1348_v6, %v7468_v60  ;;  %v1355_v55 = vmul.f32 %v1354_v37, %v7456_v41  ;;  %v7900_v6 = vld [vmem:[#allocation2 + $0x3a] sm:$0xff] }
 0x21f   : > { %1732 = vrot.lane.b32.xlu1 %v1727_v44, %s6726_s12  ;;  %1744 = vrot.lane.b32.xlu0 %v1740_v45, %s6726_s12  ;;  %v1797_v44 = vmul.f32 %v1795_v53, %v7756_v38  ;;  %v1810_v45 = vmul.f32 %v1809_v58, %v7744_v34  ;;  %v1360_v32 = vstv %s7827_s8  ;;  %v1883_v53 = vstv %s7856_s13  ;;  %s7982_s8 = sld [smem:[#allocation9 + $0xce]] }
 0x220   : > { %s8018_s13 = sld [smem:[#allocation9 + $0x49]] }
 0x221   : > { %v7785_v49 = vpop.permute.xlu1 %1243  ;;  %v7787_v47 = vpop.permute.xlu0 %1255 }
 0x222   : > { %v1248_v10 = vadd.f32 %v7785_v49, %v7738_v59  ;;  %v1261_v22 = vadd.f32 %v7787_v47, %v7740_v29  ;;  %v1356_v59 = vmul.f32 %v1354_v37, %v7468_v60  ;;  %v1361_v29 = vmul.f32 %v1360_v32, %v7456_v41 }
 0x223   : > { %1746 = vrot.lane.b32.xlu1 %v1741_v14, %s6726_s12  ;;  %1758 = vrot.lane.b32.xlu0 %v1754_v63, %s6726_s12 }
 0x225   : > { %v7800_v13 = vpop.permute.xlu1 %1257  ;;  %v1270_v3 = vpop.permute.xlu0 %1269 }
 0x226   : > { %v1275_v8 = vadd.f32 %v1270_v3, %v1205_v12  ;;  %v1262_v49 = vadd.f32 %v7800_v13, %v7752_v25 }
 0x227   : > { %1760 = vrot.lane.b32.xlu1 %v1755_v21, %s6726_s12  ;;  %1772 = vrot.lane.b32.xlu0 %v1768_v26, %s6726_s12  ;;  %v1811_v26 = vmul.f32 %v1809_v58, %v7756_v38 }
 0x228   : > { %v7815_v17 = vadd.f32 %v1337_v43, %v1275_v8  ;;  %v1824_v8 = vmul.f32 %v1823_v46, %v7744_v34 }
 0x229   : > { %v1272_v0 = vpop.permute.xlu1 %1271  ;;  %v1284_v56 = vpop.permute.xlu0 %1283 }
 0x22a   : > { %v1276_v54 = vadd.f32 %v1272_v0, %v1206_v11  ;;  %v1289_v61 = vadd.f32 %v1284_v56, %v1219_v52  ;;  %v1825_v56 = vmul.f32 %v1823_v46, %v7756_v38 }
 0x22b   : > { %1774 = vrot.lane.b32.xlu1 %v1769_v24, %s6726_s12  ;;  %1786 = vrot.lane.b32.xlu0 %v1782_v27, %s6727_s23  ;;  %v1838_v24 = vmul.f32 %v1837_v9, %v7744_v34  ;;  %v7888_v27 = vld [vmem:[#allocation2 + $0x32] sm:$0xff] }
 0x22c   : > { %v7831_v19 = vadd.f32 %v1338_v36, %v1276_v54  ;;  %v7833_v20 = vadd.f32 %v1343_v30, %v1289_v61  ;;  %v1362_v54 = vmul.f32 %v1360_v32, %v7468_v60  ;;  %v1839_v36 = vmul.f32 %v1837_v9, %v7756_v38 }
 0x22d   : > { %v1286_v33 = vpop.permute.xlu1 %1285  ;;  %v1298_v50 = vpop.permute.xlu0 %1297  ;;  %v1884_v30 = vmul.f32 %v1883_v53, %v7888_v27 }
 0x22e   : > { %v1290_v15 = vadd.f32 %v1286_v33, %v1220_v4  ;;  %v1303_v40 = vadd.f32 %v1298_v50, %v1233_v5  ;;  %v1897_v4 = vstv %s7874_s14  ;;  %v1885_v33 = vmul.f32 %v1883_v53, %v7900_v6  ;;  %s8035_s14 = sld [smem:[#allocation9 + $0x76]] }
 0x22f   : > { %1788 = vrot.lane.b32.xlu1 %v1783_v1, %s6727_s23  ;;  %1800 = vrot.lane.b32.xlu0 %v1796_v2, %s6727_s23  ;;  %v1898_v50 = vmul.f32 %v1897_v4, %v7888_v27  ;;  %v1911_v1 = vstv %s7891_s21  ;;  %s8047_s21 = sld [smem:[#allocation9 + $0xa3]] }
 0x230   : > { %v7849_v23 = vadd.f32 %v1344_v35, %v1290_v15  ;;  %v7851_v7 = vadd.f32 %v1349_v39, %v1303_v40  ;;  %v1899_v15 = vmul.f32 %v1897_v4, %v7900_v6  ;;  %v1912_v40 = vmul.f32 %v1911_v1, %v7888_v27 }
 0x231   : > { %v1300_v57 = vpop.permute.xlu1 %1299  ;;  %v1312_v31 = vpop.permute.xlu0 %1311  ;;  %v1925_v35 = vstv %s7903_s25  ;;  %s8054_s25 = sld [smem:[#allocation9 + $0xd0]] }
 0x232   : > { %v1304_v14 = vadd.f32 %v1300_v57, %v1234_v18  ;;  %v1317_v63 = vadd.f32 %v1312_v31, %v1247_v62  ;;  %v1913_v18 = vmul.f32 %v1911_v1, %v7900_v6  ;;  %v1926_v62 = vmul.f32 %v1925_v35, %v7888_v27 }
 0x233   : > { %1802 = vrot.lane.b32.xlu1 %v1797_v44, %s6727_s23  ;;  %1814 = vrot.lane.b32.xlu0 %v1810_v45, %s6727_s23  ;;  %v1939_v57 = vstv %s7910_s26  ;;  %v1509_v31 = vstv %s7914_s11  ;;  %s8058_s26 = sld [smem:[#allocation9 + $0x15]] }
 0x234   : > { %v7867_v42 = vadd.f32 %v1350_v51, %v1304_v14  ;;  %v7869_v12 = vadd.f32 %v1355_v55, %v1317_v63  ;;  %v1927_v14 = vmul.f32 %v1925_v35, %v7900_v6  ;;  %v1940_v63 = vmul.f32 %v1939_v57, %v7888_v27  ;;  %s8067_s11 = sld [smem:[#allocation9 + $0x1d]] }
 0x235   : > { %v1314_v3 = vpop.permute.xlu1 %1313  ;;  %v1326_v21 = vpop.permute.xlu0 %1325  ;;  %v1953_v55 = vstv %s7923_s15  ;;  %v1510_v32 = vmul.f32 %v1509_v31, %v7600_v16  ;;  %v1995_v35 = vstv %s7964_s6  ;;  %s8071_s15 = sld [smem:[#allocation9 + $0x42]] }
 0x236   : > { %v1318_v43 = vadd.f32 %v1314_v3, %v1248_v10  ;;  %v1331_v28 = vadd.f32 %v1326_v21, %v1261_v22  ;;  %v1515_v10 = vstv %s7927_s16  ;;  %v1954_v9 = vmul.f32 %v1953_v55, %v7888_v27  ;;  %s8079_s16 = sld [smem:[#allocation9 + $0x4a]] }
 0x237   : > { %1816 = vrot.lane.b32.xlu1 %v1811_v26, %s6727_s23  ;;  %1828 = vrot.lane.b32.xlu0 %v1824_v8, %s6727_s23  ;;  %v1941_v8 = vmul.f32 %v1939_v57, %v7900_v6  ;;  %v1955_v53 = vmul.f32 %v1953_v55, %v7900_v6  ;;  %v2009_v55 = vstv %s7982_s8  ;;  %s8115_s6 = sld [smem:[#allocation9 + $0xc9]] }
 0x238   : > { %v7882_v47 = vadd.f32 %v1356_v59, %v1318_v43  ;;  %v7884_v11 = vadd.f32 %v1361_v29, %v1331_v28  ;;  %v1967_v43 = vstv %s7935_s19  ;;  %v1511_v29 = vmul.f32 %v1509_v31, %v7612_v48  ;;  %s8085_s19 = sld [smem:[#allocation9 + $0x6f]] }
 0x239   : > { %v1328_v52 = vpop.permute.xlu1 %1327  ;;  %v1372_v0 = vpop.permute.xlu0 %1371  ;;  %s8144_s8 = sld [smem:[#allocation9 + $0x1f]] }
 0x23a   : > { %v1332_v41 = vadd.f32 %v1328_v52, %v1262_v49  ;;  %v1377_v44 = vadd.f32 %v1372_v0, %v7815_v17 }
 0x23b   : > { %1830 = vrot.lane.b32.xlu1 %v1825_v56, %s6727_s23  ;;  %1842 = vrot.lane.b32.xlu0 %v1838_v24, %s6727_s23 }
 0x23c   : > { %v7896_v25 = vadd.f32 %v1362_v54, %v1332_v41  ;;  %v1968_v54 = vmul.f32 %v1967_v43, %v7888_v27 }
 0x23d   : > { %v1374_v13 = vpop.permute.xlu1 %1373  ;;  %v1386_v61 = vpop.permute.xlu0 %1385 }
 0x23e   : > { %v1378_v17 = vadd.f32 %v1374_v13, %v7831_v19  ;;  %v1391_v22 = vadd.f32 %v1386_v61, %v7833_v20  ;;  %v1516_v19 = vmul.f32 %v1515_v10, %v7600_v16  ;;  %v1521_v20 = vstv %s7941_s20  ;;  %s8092_s20 = sld [smem:[#allocation9 + $0x77]] }
 0x23f   : > { %1844 = vrot.lane.b32.xlu1 %v1839_v36, %s6727_s23  ;;  %1888 = vrot.lane.b32.xlu0 %v1884_v30, %s6726_s12  ;;  %v1981_v13 = vstv %s7948_s22  ;;  %v1527_v30 = vstv %s7955_s24  ;;  %s8099_s22 = sld [smem:[#allocation9 + $0x9c]] }
 0x240   : > { %s8108_s24 = sld [smem:[#allocation9 + $0xa4]] }
 0x241   : > { %v1388_v60 = vpop.permute.xlu1 %1387  ;;  %v1400_v5 = vpop.permute.xlu0 %1399 }
 0x242   : > { %v1392_v49 = vadd.f32 %v1388_v60, %v7849_v23  ;;  %v1405_v52 = vadd.f32 %v1400_v5, %v7851_v7  ;;  %v1517_v23 = vmul.f32 %v1515_v10, %v7612_v48  ;;  %v1522_v7 = vmul.f32 %v1521_v20, %v7600_v16 }
 0x243   : > { %1890 = vrot.lane.b32.xlu1 %v1885_v33, %s6726_s12  ;;  %1902 = vrot.lane.b32.xlu0 %v1898_v50, %s6726_s12 }
 0x245   : > { %v7916_v2 = vpop.permute.xlu1 %1401  ;;  %v7918_v58 = vpop.permute.xlu0 %1413 }
 0x246   : > { %v1406_v4 = vadd.f32 %v7916_v2, %v7867_v42  ;;  %v1419_v60 = vadd.f32 %v7918_v58, %v7869_v12  ;;  %v1523_v42 = vmul.f32 %v1521_v20, %v7612_v48  ;;  %v1528_v12 = vmul.f32 %v1527_v30, %v7600_v16  ;;  %v8044_v20 = vld [vmem:[#allocation2 + $0x50] sm:$0xff] }
 0x247   : > { %1904 = vrot.lane.b32.xlu1 %v1899_v15, %s6726_s12  ;;  %1916 = vrot.lane.b32.xlu0 %v1912_v40, %s6726_s12  ;;  %v1969_v15 = vmul.f32 %v1967_v43, %v7900_v6  ;;  %v1982_v40 = vmul.f32 %v1981_v13, %v7888_v27  ;;  %v1533_v2 = vstv %s7971_s30  ;;  %v2056_v43 = vstv %s8000_s29  ;;  %s8126_s30 = sld [smem:[#allocation9 + $0xd1]] }
 0x248   : > { %s8162_s29 = sld [smem:[#allocation9 + $0x4c]] }
 0x249   : > { %v7929_v39 = vpop.permute.xlu1 %1415  ;;  %v7931_v37 = vpop.permute.xlu0 %1427 }
 0x24a   : > { %v1420_v58 = vadd.f32 %v7929_v39, %v7882_v47  ;;  %v1433_v57 = vadd.f32 %v7931_v37, %v7884_v11  ;;  %v1529_v47 = vmul.f32 %v1527_v30, %v7612_v48  ;;  %v1534_v11 = vmul.f32 %v1533_v2, %v7600_v16 }
 0x24b   : > { %1918 = vrot.lane.b32.xlu1 %v1913_v18, %s6726_s12  ;;  %1930 = vrot.lane.b32.xlu0 %v1926_v62, %s6726_s12 }
 0x24d   : > { %v7944_v45 = vpop.permute.xlu1 %1429  ;;  %v1442_v46 = vpop.permute.xlu0 %1441 }
 0x24e   : > { %v1447_v51 = vadd.f32 %v1442_v46, %v1377_v44  ;;  %v1434_v39 = vadd.f32 %v7944_v45, %v7896_v25 }
 0x24f   : > { %1932 = vrot.lane.b32.xlu1 %v1927_v14, %s6726_s12  ;;  %1944 = vrot.lane.b32.xlu0 %v1940_v63, %s6726_s12  ;;  %v1983_v63 = vmul.f32 %v1981_v13, %v7900_v6 }
 0x250   : > { %v7959_v3 = vadd.f32 %v1510_v32, %v1447_v51  ;;  %v1996_v51 = vmul.f32 %v1995_v35, %v7888_v27 }
 0x251   : > { %v1444_v21 = vpop.permute.xlu1 %1443  ;;  %v1456_v26 = vpop.permute.xlu0 %1455 }
 0x252   : > { %v1448_v28 = vadd.f32 %v1444_v21, %v1378_v17  ;;  %v1461_v59 = vadd.f32 %v1456_v26, %v1391_v22  ;;  %v1997_v26 = vmul.f32 %v1995_v35, %v7900_v6 }
 0x253   : > { %1946 = vrot.lane.b32.xlu1 %v1941_v8, %s6726_s12  ;;  %1958 = vrot.lane.b32.xlu0 %v1954_v9, %s6727_s23  ;;  %v2010_v8 = vmul.f32 %v2009_v55, %v7888_v27  ;;  %v8032_v9 = vld [vmem:[#allocation2 + $0x48] sm:$0xff] }
 0x254   : > { %v7975_v0 = vadd.f32 %v1511_v29, %v1448_v28  ;;  %v7977_v56 = vadd.f32 %v1516_v19, %v1461_v59  ;;  %v1535_v28 = vmul.f32 %v1533_v2, %v7612_v48  ;;  %v2011_v29 = vmul.f32 %v2009_v55, %v7900_v6 }
 0x255   : > { %v1458_v24 = vpop.permute.xlu1 %1457  ;;  %v1470_v41 = vpop.permute.xlu0 %1469  ;;  %v2057_v19 = vmul.f32 %v2056_v43, %v8032_v9 }
 0x256   : > { %v1462_v61 = vadd.f32 %v1458_v24, %v1392_v49  ;;  %v1475_v36 = vadd.f32 %v1470_v41, %v1405_v52  ;;  %v2070_v49 = vstv %s8018_s13  ;;  %v2058_v24 = vmul.f32 %v2056_v43, %v8044_v20  ;;  %s8179_s13 = sld [smem:[#allocation9 + $0x79]] }
 0x257   : > { %1960 = vrot.lane.b32.xlu1 %v1955_v53, %s6727_s23  ;;  %1972 = vrot.lane.b32.xlu0 %v1968_v54, %s6727_s23  ;;  %v2071_v41 = vmul.f32 %v2070_v49, %v8032_v9  ;;  %v2084_v53 = vstv %s8035_s14  ;;  %s8191_s14 = sld [smem:[#allocation9 + $0xa6]] }
 0x258   : > { %v7993_v5 = vadd.f32 %v1517_v23, %v1462_v61  ;;  %v7995_v33 = vadd.f32 %v1522_v7, %v1475_v36  ;;  %v2072_v61 = vmul.f32 %v2070_v49, %v8044_v20  ;;  %v2085_v36 = vmul.f32 %v2084_v53, %v8032_v9 }
 0x259   : > { %v1472_v50 = vpop.permute.xlu1 %1471  ;;  %v1484_v1 = vpop.permute.xlu0 %1483  ;;  %v2098_v23 = vstv %s8047_s21  ;;  %s8198_s21 = sld [smem:[#allocation9 + $0xd3]] }
 0x25a   : > { %v1476_v18 = vadd.f32 %v1472_v50, %v1406_v4  ;;  %v1489_v62 = vadd.f32 %v1484_v1, %v1419_v60  ;;  %v2086_v4 = vmul.f32 %v2084_v53, %v8044_v20  ;;  %v2099_v60 = vmul.f32 %v2098_v23, %v8032_v9 }
 0x25b   : > { %1974 = vrot.lane.b32.xlu1 %v1969_v15, %s6727_s23  ;;  %1986 = vrot.lane.b32.xlu0 %v1982_v40, %s6727_s23  ;;  %v2112_v50 = vstv %s8054_s25  ;;  %v1681_v1 = vstv %s8058_s26  ;;  %s8202_s25 = sld [smem:[#allocation9 + $0x18]] }
 0x25c   : > { %v8011_v31 = vadd.f32 %v1523_v42, %v1476_v18  ;;  %v8013_v44 = vadd.f32 %v1528_v12, %v1489_v62  ;;  %v2100_v18 = vmul.f32 %v2098_v23, %v8044_v20  ;;  %v2113_v62 = vmul.f32 %v2112_v50, %v8032_v9  ;;  %s8211_s26 = sld [smem:[#allocation9 + $0x20]] }
 0x25d   : > { %v1486_v46 = vpop.permute.xlu1 %1485  ;;  %v1498_v14 = vpop.permute.xlu0 %1497  ;;  %v2126_v12 = vstv %s8067_s11  ;;  %v1682_v2 = vmul.f32 %v1681_v1, %v7744_v34  ;;  %v2168_v23 = vstv %s8108_s24  ;;  %s8215_s11 = sld [smem:[#allocation9 + $0x45]] }
 0x25e   : > { %v1490_v32 = vadd.f32 %v1486_v46, %v1420_v58  ;;  %v1503_v10 = vadd.f32 %v1498_v14, %v1433_v57  ;;  %v1687_v58 = vstv %s8071_s15  ;;  %v2127_v55 = vmul.f32 %v2126_v12, %v8032_v9  ;;  %s8223_s15 = sld [smem:[#allocation9 + $0x4d]] }
 0x25f   : > { %1988 = vrot.lane.b32.xlu1 %v1983_v63, %s6727_s23  ;;  %2000 = vrot.lane.b32.xlu0 %v1996_v51, %s6727_s23  ;;  %v2114_v51 = vmul.f32 %v2112_v50, %v8044_v20  ;;  %v2128_v43 = vmul.f32 %v2126_v12, %v8044_v20  ;;  %v2182_v12 = vstv %s8126_s30  ;;  %s8259_s24 = sld [smem:[#allocation9 + $0xcc]] }
 0x260   : > { %v8026_v37 = vadd.f32 %v1529_v47, %v1490_v32  ;;  %v8028_v17 = vadd.f32 %v1534_v11, %v1503_v10  ;;  %v2140_v32 = vstv %s8079_s16  ;;  %v1683_v11 = vmul.f32 %v1681_v1, %v7756_v38  ;;  %s8229_s16 = sld [smem:[#allocation9 + $0x72]] }
 0x261   : > { %v1500_v22 = vpop.permute.xlu1 %1499  ;;  %v1545_v21 = vpop.permute.xlu0 %1544  ;;  %s8288_s30 = sld [smem:[#allocation9 + $0x22]] }
 0x262   : > { %v1504_v16 = vadd.f32 %v1500_v22, %v1434_v39  ;;  %v1550_v15 = vadd.f32 %v1545_v21, %v7959_v3 }
 0x263   : > { %2002 = vrot.lane.b32.xlu1 %v1997_v26, %s6727_s23  ;;  %2014 = vrot.lane.b32.xlu0 %v2010_v8, %s6727_s23 }
 0x264   : > { %v8040_v25 = vadd.f32 %v1535_v28, %v1504_v16  ;;  %v2141_v28 = vmul.f32 %v2140_v32, %v8032_v9 }
 0x265   : > { %v1547_v45 = vpop.permute.xlu1 %1546  ;;  %v1559_v59 = vpop.permute.xlu0 %1558 }
 0x266   : > { %v1551_v3 = vadd.f32 %v1547_v45, %v7975_v0  ;;  %v1564_v57 = vadd.f32 %v1559_v59, %v7977_v56  ;;  %v1688_v0 = vmul.f32 %v1687_v58, %v7744_v34  ;;  %v1693_v56 = vstv %s8085_s19  ;;  %s8236_s19 = sld [smem:[#allocation9 + $0x7a]] }
 0x267   : > { %2016 = vrot.lane.b32.xlu1 %v2011_v29, %s6727_s23  ;;  %2061 = vrot.lane.b32.xlu0 %v2057_v19, %s6726_s12  ;;  %v2154_v45 = vstv %s8092_s20  ;;  %v1699_v19 = vstv %s8099_s22  ;;  %s8243_s20 = sld [smem:[#allocation9 + $0x9f]] }
 0x268   : > { %s8252_s22 = sld [smem:[#allocation9 + $0xa7]] }
 0x269   : > { %v1561_v48 = vpop.permute.xlu1 %1560  ;;  %v1573_v52 = vpop.permute.xlu0 %1572 }
 0x26a   : > { %v1565_v39 = vadd.f32 %v1561_v48, %v7993_v5  ;;  %v1578_v22 = vadd.f32 %v1573_v52, %v7995_v33  ;;  %v1689_v5 = vmul.f32 %v1687_v58, %v7756_v38  ;;  %v1694_v33 = vmul.f32 %v1693_v56, %v7744_v34 }
 0x26b   : > { %2063 = vrot.lane.b32.xlu1 %v2058_v24, %s6726_s12  ;;  %2075 = vrot.lane.b32.xlu0 %v2071_v41, %s6726_s12 }
 0x26d   : > { %v8060_v54 = vpop.permute.xlu1 %1574  ;;  %v8062_v13 = vpop.permute.xlu0 %1586 }
 0x26e   : > { %v1579_v49 = vadd.f32 %v8060_v54, %v8011_v31  ;;  %v1592_v48 = vadd.f32 %v8062_v13, %v8013_v44  ;;  %v1695_v31 = vmul.f32 %v1693_v56, %v7756_v38  ;;  %v1700_v44 = vmul.f32 %v1699_v19, %v7744_v34  ;;  %v8188_v56 = vld [vmem:[#allocation2 + $0x51] sm:$0xff] }
 0x26f   : > { %2077 = vrot.lane.b32.xlu1 %v2072_v61, %s6726_s12  ;;  %2089 = vrot.lane.b32.xlu0 %v2085_v36, %s6726_s12  ;;  %v2142_v61 = vmul.f32 %v2140_v32, %v8044_v20  ;;  %v2155_v36 = vmul.f32 %v2154_v45, %v8032_v9  ;;  %v1705_v54 = vstv %s8115_s6  ;;  %v2228_v32 = vstv %s8144_s8  ;;  %s8270_s6 = sld [smem:[#allocation9 + $0xd4]] }
 0x270   : > { %s8306_s8 = sld [smem:[#allocation9 + $0x4f]] }
 0x271   : > { %v8073_v7 = vpop.permute.xlu1 %1588  ;;  %v8075_v30 = vpop.permute.xlu0 %1600 }
 0x272   : > { %v1593_v13 = vadd.f32 %v8073_v7, %v8026_v37  ;;  %v1606_v50 = vadd.f32 %v8075_v30, %v8028_v17  ;;  %v1701_v37 = vmul.f32 %v1699_v19, %v7756_v38  ;;  %v1706_v17 = vmul.f32 %v1705_v54, %v7744_v34 }
 0x273   : > { %2091 = vrot.lane.b32.xlu1 %v2086_v4, %s6726_s12  ;;  %2103 = vrot.lane.b32.xlu0 %v2099_v60, %s6726_s12 }
 0x275   : > { %v8088_v40 = vpop.permute.xlu1 %1602  ;;  %v1615_v35 = vpop.permute.xlu0 %1614 }
 0x276   : > { %v1620_v42 = vadd.f32 %v1615_v35, %v1550_v15  ;;  %v1607_v7 = vadd.f32 %v8088_v40, %v8040_v25 }
 0x277   : > { %2105 = vrot.lane.b32.xlu1 %v2100_v18, %s6726_s12  ;;  %2117 = vrot.lane.b32.xlu0 %v2113_v62, %s6726_s12  ;;  %v2156_v62 = vmul.f32 %v2154_v45, %v8044_v20 }
 0x278   : > { %v8103_v46 = vadd.f32 %v1682_v2, %v1620_v42  ;;  %v2169_v42 = vmul.f32 %v2168_v23, %v8032_v9 }
 0x279   : > { %v1617_v14 = vpop.permute.xlu1 %1616  ;;  %v1629_v63 = vpop.permute.xlu0 %1628 }
 0x27a   : > { %v1621_v10 = vadd.f32 %v1617_v14, %v1551_v3  ;;  %v1634_v47 = vadd.f32 %v1629_v63, %v1564_v57  ;;  %v2170_v63 = vmul.f32 %v2168_v23, %v8044_v20 }
 0x27b   : > { %2119 = vrot.lane.b32.xlu1 %v2114_v51, %s6726_s12  ;;  %2131 = vrot.lane.b32.xlu0 %v2127_v55, %s6727_s23  ;;  %v2183_v51 = vmul.f32 %v2182_v12, %v8032_v9  ;;  %v8176_v55 = vld [vmem:[#allocation2 + $0x49] sm:$0xff] }
 0x27c   : > { %v8119_v21 = vadd.f32 %v1683_v11, %v1621_v10  ;;  %v8121_v26 = vadd.f32 %v1688_v0, %v1634_v47  ;;  %v1707_v10 = vmul.f32 %v1705_v54, %v7756_v38  ;;  %v2184_v11 = vmul.f32 %v2182_v12, %v8044_v20 }
 0x27d   : > { %v1631_v8 = vpop.permute.xlu1 %1630  ;;  %v1643_v16 = vpop.permute.xlu0 %1642  ;;  %v2229_v0 = vmul.f32 %v2228_v32, %v8176_v55 }
 0x27e   : > { %v1635_v59 = vadd.f32 %v1631_v8, %v1565_v39  ;;  %v1648_v29 = vadd.f32 %v1643_v16, %v1578_v22  ;;  %v2242_v39 = vstv %s8162_s29  ;;  %v2230_v8 = vmul.f32 %v2228_v32, %v8188_v56  ;;  %s8323_s29 = sld [smem:[#allocation9 + $0x7c]] }
 0x27f   : > { %2133 = vrot.lane.b32.xlu1 %v2128_v43, %s6727_s23  ;;  %2145 = vrot.lane.b32.xlu0 %v2141_v28, %s6727_s23  ;;  %v2243_v16 = vmul.f32 %v2242_v39, %v8176_v55  ;;  %v2256_v43 = vstv %s8179_s13  ;;  %s8335_s13 = sld [smem:[#allocation9 + $0xa9]] }
 0x280   : > { %v8137_v52 = vadd.f32 %v1689_v5, %v1635_v59  ;;  %v8139_v24 = vadd.f32 %v1694_v33, %v1648_v29  ;;  %v2244_v59 = vmul.f32 %v2242_v39, %v8188_v56  ;;  %v2257_v29 = vmul.f32 %v2256_v43, %v8176_v55 }
 0x281   : > { %v1645_v41 = vpop.permute.xlu1 %1644  ;;  %v1657_v53 = vpop.permute.xlu0 %1656  ;;  %v2270_v5 = vstv %s8191_s14  ;;  %s8342_s14 = sld [smem:[#allocation9 + $0xd6]] }
 0x282   : > { %v1649_v4 = vadd.f32 %v1645_v41, %v1579_v49  ;;  %v1662_v60 = vadd.f32 %v1657_v53, %v1592_v48  ;;  %v2258_v49 = vmul.f32 %v2256_v43, %v8188_v56  ;;  %v2271_v48 = vmul.f32 %v2270_v5, %v8176_v55 }
 0x283   : > { %2147 = vrot.lane.b32.xlu1 %v2142_v61, %s6727_s23  ;;  %2159 = vrot.lane.b32.xlu0 %v2155_v36, %s6727_s23  ;;  %v2284_v41 = vstv %s8198_s21  ;;  %v1853_v53 = vstv %s8202_s25  ;;  %s8346_s21 = sld [smem:[#allocation9 + $0x1b]] }
 0x284   : > { %v8155_v1 = vadd.f32 %v1695_v31, %v1649_v4  ;;  %v8157_v15 = vadd.f32 %v1700_v44, %v1662_v60  ;;  %v2272_v4 = vmul.f32 %v2270_v5, %v8188_v56  ;;  %v2285_v60 = vmul.f32 %v2284_v41, %v8176_v55  ;;  %s8355_s25 = sld [smem:[#allocation9 + $0x23]] }
 0x285   : > { %v1659_v35 = vpop.permute.xlu1 %1658  ;;  %v1671_v18 = vpop.permute.xlu0 %1670  ;;  %v2298_v44 = vstv %s8211_s26  ;;  %v1854_v54 = vmul.f32 %v1853_v53, %v7888_v27  ;;  %v2340_v5 = vstv %s8252_s22  ;;  %s8359_s26 = sld [smem:[#allocation9 + $0x48]] }
 0x286   : > { %v1663_v2 = vadd.f32 %v1659_v35, %v1593_v13  ;;  %v1676_v58 = vadd.f32 %v1671_v18, %v1606_v50  ;;  %v1859_v13 = vstv %s8215_s11  ;;  %v2299_v12 = vmul.f32 %v2298_v44, %v8176_v55  ;;  %s8367_s11 = sld [smem:[#allocation9 + $0x50]] }
 0x287   : > { %2161 = vrot.lane.b32.xlu1 %v2156_v62, %s6727_s23  ;;  %2173 = vrot.lane.b32.xlu0 %v2169_v42, %s6727_s23  ;;  %v2286_v42 = vmul.f32 %v2284_v41, %v8188_v56  ;;  %v2300_v32 = vmul.f32 %v2298_v44, %v8188_v56  ;;  %v2354_v44 = vstv %s8270_s6  ;;  %s8403_s22 = sld [smem:[#allocation9 + $0xcf]] }
 0x288   : > { %v8170_v30 = vadd.f32 %v1701_v37, %v1663_v2  ;;  %v8172_v3 = vadd.f32 %v1706_v17, %v1676_v58  ;;  %v2312_v2 = vstv %s8223_s15  ;;  %v1855_v17 = vmul.f32 %v1853_v53, %v7900_v6  ;;  %s8373_s15 = sld [smem:[#allocation9 + $0x75]] }
 0x289   : > { %v1673_v57 = vpop.permute.xlu1 %1672  ;;  %v1717_v14 = vpop.permute.xlu0 %1716  ;;  %s8432_s6 = sld [smem:[#allocation9 + $0x25]] }
 0x28a   : > { %v1677_v34 = vadd.f32 %v1673_v57, %v1607_v7  ;;  %v1722_v61 = vadd.f32 %v1717_v14, %v8103_v46 }
 0x28b   : > { %2175 = vrot.lane.b32.xlu1 %v2170_v63, %s6727_s23  ;;  %2187 = vrot.lane.b32.xlu0 %v2183_v51, %s6727_s23 }
 0x28c   : > { %v8184_v25 = vadd.f32 %v1707_v10, %v1677_v34  ;;  %v2313_v10 = vmul.f32 %v2312_v2, %v8176_v55 }
 0x28d   : > { %v1719_v40 = vpop.permute.xlu1 %1718  ;;  %v1731_v47 = vpop.permute.xlu0 %1730 }
 0x28e   : > { %v1723_v46 = vadd.f32 %v1719_v40, %v8119_v21  ;;  %v1736_v50 = vadd.f32 %v1731_v47, %v8121_v26  ;;  %v1860_v21 = vmul.f32 %v1859_v13, %v7888_v27  ;;  %v1865_v26 = vstv %s8229_s16  ;;  %s8380_s16 = sld [smem:[#allocation9 + $0x7d]] }
 0x28f   : > { %2189 = vrot.lane.b32.xlu1 %v2184_v11, %s6727_s23  ;;  %2233 = vrot.lane.b32.xlu0 %v2229_v0, %s6726_s12  ;;  %v2326_v40 = vstv %s8236_s19  ;;  %v1871_v0 = vstv %s8243_s20  ;;  %s8387_s19 = sld [smem:[#allocation9 + $0xa2]] }
 0x290   : > { %s8396_s20 = sld [smem:[#allocation9 + $0xaa]] }
 0x291   : > { %v1733_v38 = vpop.permute.xlu1 %1732  ;;  %v1745_v22 = vpop.permute.xlu0 %1744 }
 0x292   : > { %v1737_v7 = vadd.f32 %v1733_v38, %v8137_v52  ;;  %v1750_v57 = vadd.f32 %v1745_v22, %v8139_v24  ;;  %v1861_v52 = vmul.f32 %v1859_v13, %v7900_v6  ;;  %v1866_v24 = vmul.f32 %v1865_v26, %v7888_v27 }
 0x293   : > { %2235 = vrot.lane.b32.xlu1 %v2230_v8, %s6726_s12  ;;  %2247 = vrot.lane.b32.xlu0 %v2243_v16, %s6726_s12 }
 0x295   : > { %v8204_v28 = vpop.permute.xlu1 %1746  ;;  %v8206_v45 = vpop.permute.xlu0 %1758 }
 0x296   : > { %v1751_v39 = vadd.f32 %v8204_v28, %v8155_v1  ;;  %v1764_v38 = vadd.f32 %v8206_v45, %v8157_v15  ;;  %v1867_v1 = vmul.f32 %v1865_v26, %v7900_v6  ;;  %v1872_v15 = vmul.f32 %v1871_v0, %v7888_v27  ;;  %v8332_v26 = vld [vmem:[#allocation2 + $0x52] sm:$0xff] }
 0x297   : > { %2249 = vrot.lane.b32.xlu1 %v2244_v59, %s6726_s12  ;;  %2261 = vrot.lane.b32.xlu0 %v2257_v29, %s6726_s12  ;;  %v2314_v59 = vmul.f32 %v2312_v2, %v8188_v56  ;;  %v2327_v29 = vmul.f32 %v2326_v40, %v8176_v55  ;;  %v1877_v28 = vstv %s8259_s24  ;;  %v2400_v2 = vstv %s8288_s30  ;;  %s8414_s24 = sld [smem:[#allocation9 + $0xd7]] }
 0x298   : > { %s8450_s30 = sld [smem:[#allocation9 + $0x52]] }
 0x299   : > { %v8217_v33 = vpop.permute.xlu1 %1760  ;;  %v8219_v19 = vpop.permute.xlu0 %1772 }
 0x29a   : > { %v1765_v45 = vadd.f32 %v8217_v33, %v8170_v30  ;;  %v1778_v41 = vadd.f32 %v8219_v19, %v8172_v3  ;;  %v1873_v30 = vmul.f32 %v1871_v0, %v7900_v6  ;;  %v1878_v3 = vmul.f32 %v1877_v28, %v7888_v27 }
 0x29b   : > { %2263 = vrot.lane.b32.xlu1 %v2258_v49, %s6726_s12  ;;  %2275 = vrot.lane.b32.xlu0 %v2271_v48, %s6726_s12 }
 0x29d   : > { %v8232_v36 = vpop.permute.xlu1 %1774  ;;  %v1787_v23 = vpop.permute.xlu0 %1786 }
 0x29e   : > { %v1792_v31 = vadd.f32 %v1787_v23, %v1722_v61  ;;  %v1779_v33 = vadd.f32 %v8232_v36, %v8184_v25 }
 0x29f   : > { %2277 = vrot.lane.b32.xlu1 %v2272_v4, %s6726_s12  ;;  %2289 = vrot.lane.b32.xlu0 %v2285_v60, %s6726_s12  ;;  %v2328_v60 = vmul.f32 %v2326_v40, %v8188_v56 }
 0x2a0   : > { %v8247_v35 = vadd.f32 %v1854_v54, %v1792_v31  ;;  %v2341_v31 = vmul.f32 %v2340_v5, %v8176_v55 }
 0x2a1   : > { %v1789_v18 = vpop.permute.xlu1 %1788  ;;  %v1801_v62 = vpop.permute.xlu0 %1800 }
 0x2a2   : > { %v1793_v58 = vadd.f32 %v1789_v18, %v1723_v46  ;;  %v1806_v37 = vadd.f32 %v1801_v62, %v1736_v50  ;;  %v2342_v62 = vmul.f32 %v2340_v5, %v8188_v56 }
 0x2a3   : > { %2291 = vrot.lane.b32.xlu1 %v2286_v42, %s6726_s12  ;;  %2303 = vrot.lane.b32.xlu0 %v2299_v12, %s6727_s23  ;;  %v2355_v42 = vmul.f32 %v2354_v44, %v8176_v55  ;;  %v8320_v12 = vld [vmem:[#allocation2 + $0x4a] sm:$0xff] }
 0x2a4   : > { %v8263_v14 = vadd.f32 %v1855_v17, %v1793_v58  ;;  %v8265_v63 = vadd.f32 %v1860_v21, %v1806_v37  ;;  %v1879_v58 = vmul.f32 %v1877_v28, %v7900_v6  ;;  %v2356_v17 = vmul.f32 %v2354_v44, %v8188_v56 }
 0x2a5   : > { %v1803_v51 = vpop.permute.xlu1 %1802  ;;  %v1815_v34 = vpop.permute.xlu0 %1814  ;;  %v2401_v21 = vmul.f32 %v2400_v2, %v8320_v12 }
 0x2a6   : > { %v1807_v47 = vadd.f32 %v1803_v51, %v1737_v7  ;;  %v1820_v11 = vadd.f32 %v1815_v34, %v1750_v57  ;;  %v2414_v7 = vstv %s8306_s8  ;;  %v2402_v51 = vmul.f32 %v2400_v2, %v8332_v26  ;;  %s8467_s8 = sld [smem:[#allocation9 + $0x7f]] }
 0x2a7   : > { %2305 = vrot.lane.b32.xlu1 %v2300_v32, %s6727_s23  ;;  %2317 = vrot.lane.b32.xlu0 %v2313_v10, %s6727_s23  ;;  %v2415_v34 = vmul.f32 %v2414_v7, %v8320_v12  ;;  %v2428_v32 = vstv %s8323_s29  ;;  %s8479_s29 = sld [smem:[#allocation9 + $0xac]] }
 0x2a8   : > { %v8281_v22 = vadd.f32 %v1861_v52, %v1807_v47  ;;  %v8283_v8 = vadd.f32 %v1866_v24, %v1820_v11  ;;  %v2416_v47 = vmul.f32 %v2414_v7, %v8332_v26  ;;  %v2429_v11 = vmul.f32 %v2428_v32, %v8320_v12 }
 0x2a9   : > { %v1817_v16 = vpop.permute.xlu1 %1816  ;;  %v1829_v43 = vpop.permute.xlu0 %1828  ;;  %v2442_v52 = vstv %s8335_s13  ;;  %s8486_s13 = sld [smem:[#allocation9 + $0xd9]] }
 0x2aa   : > { %v1821_v49 = vadd.f32 %v1817_v16, %v1751_v39  ;;  %v1834_v48 = vadd.f32 %v1829_v43, %v1764_v38  ;;  %v2430_v39 = vmul.f32 %v2428_v32, %v8332_v26  ;;  %v2443_v38 = vmul.f32 %v2442_v52, %v8320_v12 }
 0x2ab   : > { %2319 = vrot.lane.b32.xlu1 %v2314_v59, %s6727_s23  ;;  %2331 = vrot.lane.b32.xlu0 %v2327_v29, %s6727_s23  ;;  %v2456_v16 = vstv %s8342_s14  ;;  %v2026_v43 = vstv %s8346_s21  ;;  %s8490_s14 = sld [smem:[#allocation9 + $0x1e]] }
 0x2ac   : > { %v8299_v53 = vadd.f32 %v1867_v1, %v1821_v49  ;;  %v8301_v61 = vadd.f32 %v1872_v15, %v1834_v48  ;;  %v2444_v49 = vmul.f32 %v2442_v52, %v8332_v26  ;;  %v2457_v48 = vmul.f32 %v2456_v16, %v8320_v12  ;;  %s8499_s21 = sld [smem:[#allocation9 + $0x26]] }
 0x2ad   : > { %v1831_v23 = vpop.permute.xlu1 %1830  ;;  %v1843_v4 = vpop.permute.xlu0 %1842  ;;  %v2470_v15 = vstv %s8355_s25  ;;  %v2027_v28 = vmul.f32 %v2026_v43, %v8032_v9  ;;  %v2512_v52 = vstv %s8396_s20  ;;  %s8503_s25 = sld [smem:[#allocation9 + $0x4b]] }
 0x2ae   : > { %v1835_v54 = vadd.f32 %v1831_v23, %v1765_v45  ;;  %v1848_v13 = vadd.f32 %v1843_v4, %v1778_v41  ;;  %v2032_v45 = vstv %s8359_s26  ;;  %v2471_v44 = vmul.f32 %v2470_v15, %v8320_v12  ;;  %s8511_s26 = sld [smem:[#allocation9 + $0x53]] }
 0x2af   : > { %2333 = vrot.lane.b32.xlu1 %v2328_v60, %s6727_s23  ;;  %2345 = vrot.lane.b32.xlu0 %v2341_v31, %s6727_s23  ;;  %v2458_v31 = vmul.f32 %v2456_v16, %v8332_v26  ;;  %v2472_v2 = vmul.f32 %v2470_v15, %v8332_v26  ;;  %v2526_v15 = vstv %s8414_s24  ;;  %s8547_s20 = sld [smem:[#allocation9 + $0xd2]] }
 0x2b0   : > { %v8314_v19 = vadd.f32 %v1873_v30, %v1835_v54  ;;  %v8316_v46 = vadd.f32 %v1878_v3, %v1848_v13  ;;  %v2484_v54 = vstv %s8367_s11  ;;  %v2028_v3 = vmul.f32 %v2026_v43, %v8044_v20  ;;  %s8517_s11 = sld [smem:[#allocation9 + $0x78]] }
 0x2b1   : > { %v1845_v50 = vpop.permute.xlu1 %1844  ;;  %v1889_v18 = vpop.permute.xlu0 %1888  ;;  %s8576_s24 = sld [smem:[#allocation9 + $0x28]] }
 0x2b2   : > { %v1849_v27 = vadd.f32 %v1845_v50, %v1779_v33  ;;  %v1894_v59 = vadd.f32 %v1889_v18, %v8247_v35 }
 0x2b3   : > { %2347 = vrot.lane.b32.xlu1 %v2342_v62, %s6727_s23  ;;  %2359 = vrot.lane.b32.xlu0 %v2355_v42, %s6727_s23 }
 0x2b4   : > { %v8328_v25 = vadd.f32 %v1879_v58, %v1849_v27  ;;  %v2485_v58 = vmul.f32 %v2484_v54, %v8320_v12 }
 0x2b5   : > { %v1891_v36 = vpop.permute.xlu1 %1890  ;;  %v1903_v37 = vpop.permute.xlu0 %1902 }
 0x2b6   : > { %v1895_v35 = vadd.f32 %v1891_v36, %v8263_v14  ;;  %v1908_v41 = vadd.f32 %v1903_v37, %v8265_v63  ;;  %v2033_v14 = vmul.f32 %v2032_v45, %v8032_v9  ;;  %v2038_v63 = vstv %s8373_s15  ;;  %s8524_s15 = sld [smem:[#allocation9 + $0x80]] }
 0x2b7   : > { %2361 = vrot.lane.b32.xlu1 %v2356_v17, %s6727_s23  ;;  %2405 = vrot.lane.b32.xlu0 %v2401_v21, %s6726_s12  ;;  %v2498_v36 = vstv %s8380_s16  ;;  %v2044_v21 = vstv %s8387_s19  ;;  %s8531_s16 = sld [smem:[#allocation9 + $0xa5]] }
 0x2b8   : > { %s8540_s19 = sld [smem:[#allocation9 + $0xad]] }
 0x2b9   : > { %v1905_v6 = vpop.permute.xlu1 %1904  ;;  %v1917_v57 = vpop.permute.xlu0 %1916 }
 0x2ba   : > { %v1909_v33 = vadd.f32 %v1905_v6, %v8281_v22  ;;  %v1922_v50 = vadd.f32 %v1917_v57, %v8283_v8  ;;  %v2034_v22 = vmul.f32 %v2032_v45, %v8044_v20  ;;  %v2039_v8 = vmul.f32 %v2038_v63, %v8032_v9 }
 0x2bb   : > { %2407 = vrot.lane.b32.xlu1 %v2402_v51, %s6726_s12  ;;  %2419 = vrot.lane.b32.xlu0 %v2415_v34, %s6726_s12 }
 0x2bd   : > { %v8348_v10 = vpop.permute.xlu1 %1918  ;;  %v8350_v40 = vpop.permute.xlu0 %1930 }
 0x2be   : > { %v1923_v7 = vadd.f32 %v8348_v10, %v8299_v53  ;;  %v1936_v6 = vadd.f32 %v8350_v40, %v8301_v61  ;;  %v2040_v53 = vmul.f32 %v2038_v63, %v8044_v20  ;;  %v2045_v61 = vmul.f32 %v2044_v21, %v8032_v9  ;;  %v8476_v63 = vld [vmem:[#allocation2 + $0x68] sm:$0xff] }
 0x2bf   : > { %2421 = vrot.lane.b32.xlu1 %v2416_v47, %s6726_s12  ;;  %2433 = vrot.lane.b32.xlu0 %v2429_v11, %s6726_s12  ;;  %v2486_v47 = vmul.f32 %v2484_v54, %v8332_v26  ;;  %v2499_v11 = vmul.f32 %v2498_v36, %v8320_v12  ;;  %v2050_v10 = vstv %s8403_s22  ;;  %v2573_v54 = vstv %s8432_s6  ;;  %s8558_s22 = sld [smem:[#allocation9 + $0xda]] }
 0x2c0   : > { %s8594_s6 = sld [smem:[#allocation9 + $0x55]] }
 0x2c1   : > { %v8361_v24 = vpop.permute.xlu1 %1932  ;;  %v8363_v0 = vpop.permute.xlu0 %1944 }
 0x2c2   : > { %v1937_v40 = vadd.f32 %v8361_v24, %v8314_v19  ;;  %v1950_v16 = vadd.f32 %v8363_v0, %v8316_v46  ;;  %v2046_v19 = vmul.f32 %v2044_v21, %v8044_v20  ;;  %v2051_v46 = vmul.f32 %v2050_v10, %v8032_v9 }
 0x2c3   : > { %2435 = vrot.lane.b32.xlu1 %v2430_v39, %s6726_s12  ;;  %2447 = vrot.lane.b32.xlu0 %v2443_v38, %s6726_s12 }
 0x2c5   : > { %v8376_v29 = vpop.permute.xlu1 %1946  ;;  %v1959_v5 = vpop.permute.xlu0 %1958 }
 0x2c6   : > { %v1964_v1 = vadd.f32 %v1959_v5, %v1894_v59  ;;  %v1951_v24 = vadd.f32 %v8376_v29, %v8328_v25 }
 0x2c7   : > { %2449 = vrot.lane.b32.xlu1 %v2444_v49, %s6726_s12  ;;  %2461 = vrot.lane.b32.xlu0 %v2457_v48, %s6726_s12  ;;  %v2500_v48 = vmul.f32 %v2498_v36, %v8332_v26 }
 0x2c8   : > { %v8391_v23 = vadd.f32 %v2027_v28, %v1964_v1  ;;  %v2513_v1 = vmul.f32 %v2512_v52, %v8320_v12 }
 0x2c9   : > { %v1961_v4 = vpop.permute.xlu1 %1960  ;;  %v1973_v60 = vpop.permute.xlu0 %1972 }
 0x2ca   : > { %v1965_v13 = vadd.f32 %v1961_v4, %v1895_v35  ;;  %v1978_v30 = vadd.f32 %v1973_v60, %v1908_v41  ;;  %v2514_v60 = vmul.f32 %v2512_v52, %v8332_v26 }
 0x2cb   : > { %2463 = vrot.lane.b32.xlu1 %v2458_v31, %s6726_s12  ;;  %2475 = vrot.lane.b32.xlu0 %v2471_v44, %s6727_s23  ;;  %v2527_v31 = vmul.f32 %v2526_v15, %v8320_v12  ;;  %v8464_v44 = vld [vmem:[#allocation2 + $0x60] sm:$0xff] }
 0x2cc   : > { %v8407_v18 = vadd.f32 %v2028_v3, %v1965_v13  ;;  %v8409_v62 = vadd.f32 %v2033_v14, %v1978_v30  ;;  %v2052_v13 = vmul.f32 %v2050_v10, %v8044_v20  ;;  %v2528_v3 = vmul.f32 %v2526_v15, %v8332_v26 }
 0x2cd   : > { %v1975_v42 = vpop.permute.xlu1 %1974  ;;  %v1987_v27 = vpop.permute.xlu0 %1986  ;;  %v2574_v14 = vmul.f32 %v2573_v54, %v8464_v44 }
 0x2ce   : > { %v1979_v37 = vadd.f32 %v1975_v42, %v1909_v33  ;;  %v1992_v17 = vadd.f32 %v1987_v27, %v1922_v50  ;;  %v2587_v33 = vstv %s8450_s30  ;;  %v2575_v42 = vmul.f32 %v2573_v54, %v8476_v63  ;;  %s8611_s30 = sld [smem:[#allocation9 + $0x82]] }
 0x2cf   : > { %2477 = vrot.lane.b32.xlu1 %v2472_v2, %s6727_s23  ;;  %2489 = vrot.lane.b32.xlu0 %v2485_v58, %s6727_s23  ;;  %v2588_v27 = vmul.f32 %v2587_v33, %v8464_v44  ;;  %v2601_v2 = vstv %s8467_s8  ;;  %s8623_s8 = sld [smem:[#allocation9 + $0xaf]] }
 0x2d0   : > { %v8425_v57 = vadd.f32 %v2034_v22, %v1979_v37  ;;  %v8427_v51 = vadd.f32 %v2039_v8, %v1992_v17  ;;  %v2589_v37 = vmul.f32 %v2587_v33, %v8476_v63  ;;  %v2602_v17 = vmul.f32 %v2601_v2, %v8464_v44 }
 0x2d1   : > { %v1989_v34 = vpop.permute.xlu1 %1988  ;;  %v2001_v32 = vpop.permute.xlu0 %2000  ;;  %v2615_v22 = vstv %s8479_s29  ;;  %s8630_s29 = sld [smem:[#allocation9 + $0xdc]] }
 0x2d2   : > { %v1993_v39 = vadd.f32 %v1989_v34, %v1923_v7  ;;  %v2006_v38 = vadd.f32 %v2001_v32, %v1936_v6  ;;  %v2603_v7 = vmul.f32 %v2601_v2, %v8476_v63  ;;  %v2616_v6 = vmul.f32 %v2615_v22, %v8464_v44 }
 0x2d3   : > { %2491 = vrot.lane.b32.xlu1 %v2486_v47, %s6727_s23  ;;  %2503 = vrot.lane.b32.xlu0 %v2499_v11, %s6727_s23  ;;  %v2629_v34 = vstv %s8486_s13  ;;  %v2198_v32 = vstv %s8490_s14  ;;  %s8634_s13 = sld [smem:[#allocation9 + $0x21]] }
 0x2d4   : > { %v8443_v43 = vadd.f32 %v2040_v53, %v1993_v39  ;;  %v8445_v59 = vadd.f32 %v2045_v61, %v2006_v38  ;;  %v2617_v39 = vmul.f32 %v2615_v22, %v8476_v63  ;;  %v2630_v38 = vmul.f32 %v2629_v34, %v8464_v44  ;;  %s8643_s14 = sld [smem:[#allocation9 + $0x29]] }
 0x2d5   : > { %v2003_v5 = vpop.permute.xlu1 %2002  ;;  %v2015_v49 = vpop.permute.xlu0 %2014  ;;  %v2643_v61 = vstv %s8499_s21  ;;  %v2199_v10 = vmul.f32 %v2198_v32, %v8176_v55  ;;  %v2685_v22 = vstv %s8540_s19  ;;  %s8647_s21 = sld [smem:[#allocation9 + $0x4e]] }
 0x2d6   : > { %v2007_v28 = vadd.f32 %v2003_v5, %v1937_v40  ;;  %v2020_v45 = vadd.f32 %v2015_v49, %v1950_v16  ;;  %v2204_v40 = vstv %s8503_s25  ;;  %v2644_v15 = vmul.f32 %v2643_v61, %v8464_v44  ;;  %s8655_s25 = sld [smem:[#allocation9 + $0x56]] }
 0x2d7   : > { %2505 = vrot.lane.b32.xlu1 %v2500_v48, %s6727_s23  ;;  %2517 = vrot.lane.b32.xlu0 %v2513_v1, %s6727_s23  ;;  %v2631_v1 = vmul.f32 %v2629_v34, %v8476_v63  ;;  %v2645_v54 = vmul.f32 %v2643_v61, %v8476_v63  ;;  %v2699_v61 = vstv %s8558_s22  ;;  %s8691_s19 = sld [smem:[#allocation9 + $0xd5]] }
 0x2d8   : > { %v8458_v0 = vadd.f32 %v2046_v19, %v2007_v28  ;;  %v8460_v35 = vadd.f32 %v2051_v46, %v2020_v45  ;;  %v2657_v28 = vstv %s8511_s26  ;;  %v2200_v46 = vmul.f32 %v2198_v32, %v8188_v56  ;;  %s8661_s26 = sld [smem:[#allocation9 + $0x7b]] }
 0x2d9   : > { %v2017_v41 = vpop.permute.xlu1 %2016  ;;  %v2062_v4 = vpop.permute.xlu0 %2061  ;;  %s8720_s22 = sld [smem:[#allocation9 + $0x2b]] }
 0x2da   : > { %v2021_v9 = vadd.f32 %v2017_v41, %v1951_v24  ;;  %v2067_v47 = vadd.f32 %v2062_v4, %v8391_v23 }
 0x2db   : > { %2519 = vrot.lane.b32.xlu1 %v2514_v60, %s6727_s23  ;;  %2531 = vrot.lane.b32.xlu0 %v2527_v31, %s6727_s23 }
 0x2dc   : > { %v8472_v25 = vadd.f32 %v2052_v13, %v2021_v9  ;;  %v2658_v13 = vmul.f32 %v2657_v28, %v8464_v44 }
 0x2dd   : > { %v2064_v29 = vpop.permute.xlu1 %2063  ;;  %v2076_v30 = vpop.permute.xlu0 %2075 }
 0x2de   : > { %v2068_v23 = vadd.f32 %v2064_v29, %v8407_v18  ;;  %v2081_v16 = vadd.f32 %v2076_v30, %v8409_v62  ;;  %v2205_v18 = vmul.f32 %v2204_v40, %v8176_v55  ;;  %v2210_v62 = vstv %s8517_s11  ;;  %s8668_s11 = sld [smem:[#allocation9 + $0x83]] }
 0x2df   : > { %2533 = vrot.lane.b32.xlu1 %v2528_v3, %s6727_s23  ;;  %2578 = vrot.lane.b32.xlu0 %v2574_v14, %s6726_s12  ;;  %v2671_v29 = vstv %s8524_s15  ;;  %v2216_v14 = vstv %s8531_s16  ;;  %s8675_s15 = sld [smem:[#allocation9 + $0xa8]] }
 0x2e0   : > { %s8684_s16 = sld [smem:[#allocation9 + $0xb0]] }
 0x2e1   : > { %v2078_v20 = vpop.permute.xlu1 %2077  ;;  %v2090_v50 = vpop.permute.xlu0 %2089 }
 0x2e2   : > { %v2082_v24 = vadd.f32 %v2078_v20, %v8425_v57  ;;  %v2095_v41 = vadd.f32 %v2090_v50, %v8427_v51  ;;  %v2206_v57 = vmul.f32 %v2204_v40, %v8188_v56  ;;  %v2211_v51 = vmul.f32 %v2210_v62, %v8176_v55 }
 0x2e3   : > { %2580 = vrot.lane.b32.xlu1 %v2575_v42, %s6726_s12  ;;  %2592 = vrot.lane.b32.xlu0 %v2588_v27, %s6726_s12 }
 0x2e5   : > { %v8492_v58 = vpop.permute.xlu1 %2091  ;;  %v8494_v36 = vpop.permute.xlu0 %2103 }
 0x2e6   : > { %v2096_v33 = vadd.f32 %v8492_v58, %v8443_v43  ;;  %v2109_v20 = vadd.f32 %v8494_v36, %v8445_v59  ;;  %v2212_v43 = vmul.f32 %v2210_v62, %v8188_v56  ;;  %v2217_v59 = vmul.f32 %v2216_v14, %v8176_v55  ;;  %v8620_v62 = vld [vmem:[#allocation2 + $0x69] sm:$0xff] }
 0x2e7   : > { %2594 = vrot.lane.b32.xlu1 %v2589_v37, %s6726_s12  ;;  %2606 = vrot.lane.b32.xlu0 %v2602_v17, %s6726_s12  ;;  %v2659_v37 = vmul.f32 %v2657_v28, %v8476_v63  ;;  %v2672_v17 = vmul.f32 %v2671_v29, %v8464_v44  ;;  %v2222_v58 = vstv %s8547_s20  ;;  %v2745_v28 = vstv %s8576_s24  ;;  %s8702_s20 = sld [smem:[#allocation9 + $0xdd]] }
 0x2e8   : > { %s8738_s24 = sld [smem:[#allocation9 + $0x58]] }
 0x2e9   : > { %v8505_v8 = vpop.permute.xlu1 %2105  ;;  %v8507_v21 = vpop.permute.xlu0 %2117 }
 0x2ea   : > { %v2110_v36 = vadd.f32 %v8505_v8, %v8458_v0  ;;  %v2123_v34 = vadd.f32 %v8507_v21, %v8460_v35  ;;  %v2218_v0 = vmul.f32 %v2216_v14, %v8188_v56  ;;  %v2223_v35 = vmul.f32 %v2222_v58, %v8176_v55 }
 0x2eb   : > { %2608 = vrot.lane.b32.xlu1 %v2603_v7, %s6726_s12  ;;  %2620 = vrot.lane.b32.xlu0 %v2616_v6, %s6726_s12 }
 0x2ed   : > { %v8520_v11 = vpop.permute.xlu1 %2119  ;;  %v2132_v52 = vpop.permute.xlu0 %2131 }
 0x2ee   : > { %v2137_v53 = vadd.f32 %v2132_v52, %v2067_v47  ;;  %v2124_v8 = vadd.f32 %v8520_v11, %v8472_v25 }
 0x2ef   : > { %2622 = vrot.lane.b32.xlu1 %v2617_v39, %s6726_s12  ;;  %2634 = vrot.lane.b32.xlu0 %v2630_v38, %s6726_s12  ;;  %v2673_v38 = vmul.f32 %v2671_v29, %v8476_v63 }
 0x2f0   : > { %v8535_v5 = vadd.f32 %v2199_v10, %v2137_v53  ;;  %v2686_v53 = vmul.f32 %v2685_v22, %v8464_v44 }
 0x2f1   : > { %v2134_v49 = vpop.permute.xlu1 %2133  ;;  %v2146_v48 = vpop.permute.xlu0 %2145 }
 0x2f2   : > { %v2138_v45 = vadd.f32 %v2134_v49, %v2068_v23  ;;  %v2151_v19 = vadd.f32 %v2146_v48, %v2081_v16  ;;  %v2687_v48 = vmul.f32 %v2685_v22, %v8476_v63 }
 0x2f3   : > { %2636 = vrot.lane.b32.xlu1 %v2631_v1, %s6726_s12  ;;  %2648 = vrot.lane.b32.xlu0 %v2644_v15, %s6727_s23  ;;  %v2700_v1 = vmul.f32 %v2699_v61, %v8464_v44  ;;  %v8608_v15 = vld [vmem:[#allocation2 + $0x61] sm:$0xff] }
 0x2f4   : > { %v8551_v4 = vadd.f32 %v2200_v46, %v2138_v45  ;;  %v8553_v60 = vadd.f32 %v2205_v18, %v2151_v19  ;;  %v2224_v45 = vmul.f32 %v2222_v58, %v8188_v56  ;;  %v2701_v46 = vmul.f32 %v2699_v61, %v8476_v63 }
 0x2f5   : > { %v2148_v31 = vpop.permute.xlu1 %2147  ;;  %v2160_v9 = vpop.permute.xlu0 %2159  ;;  %v2746_v18 = vmul.f32 %v2745_v28, %v8608_v15 }
 0x2f6   : > { %v2152_v30 = vadd.f32 %v2148_v31, %v2082_v24  ;;  %v2165_v3 = vadd.f32 %v2160_v9, %v2095_v41  ;;  %v2759_v24 = vstv %s8594_s6  ;;  %v2747_v31 = vmul.f32 %v2745_v28, %v8620_v62  ;;  %s8755_s6 = sld [smem:[#allocation9 + $0x85]] }
 0x2f7   : > { %2650 = vrot.lane.b32.xlu1 %v2645_v54, %s6727_s23  ;;  %2662 = vrot.lane.b32.xlu0 %v2658_v13, %s6727_s23  ;;  %v2760_v9 = vmul.f32 %v2759_v24, %v8608_v15  ;;  %v2773_v54 = vstv %s8611_s30  ;;  %s8767_s30 = sld [smem:[#allocation9 + $0xb2]] }
 0x2f8   : > { %v8569_v50 = vadd.f32 %v2206_v57, %v2152_v30  ;;  %v8571_v42 = vadd.f32 %v2211_v51, %v2165_v3  ;;  %v2761_v30 = vmul.f32 %v2759_v24, %v8620_v62  ;;  %v2774_v3 = vmul.f32 %v2773_v54, %v8608_v15 }
 0x2f9   : > { %v2162_v27 = vpop.permute.xlu1 %2161  ;;  %v2174_v2 = vpop.permute.xlu0 %2173  ;;  %v2787_v57 = vstv %s8623_s8  ;;  %s8774_s8 = sld [smem:[#allocation9 + $0xdf]] }
 0x2fa   : > { %v2166_v7 = vadd.f32 %v2162_v27, %v2096_v33  ;;  %v2179_v6 = vadd.f32 %v2174_v2, %v2109_v20  ;;  %v2775_v33 = vmul.f32 %v2773_v54, %v8620_v62  ;;  %v2788_v20 = vmul.f32 %v2787_v57, %v8608_v15 }
 0x2fb   : > { %2664 = vrot.lane.b32.xlu1 %v2659_v37, %s6727_s23  ;;  %2676 = vrot.lane.b32.xlu0 %v2672_v17, %s6727_s23  ;;  %v2801_v27 = vstv %s8630_s29  ;;  %v2370_v2 = vstv %s8634_s13  ;;  %s8778_s29 = sld [smem:[#allocation9 + $0x24]] }
 0x2fc   : > { %v8587_v32 = vadd.f32 %v2212_v43, %v2166_v7  ;;  %v8589_v47 = vadd.f32 %v2217_v59, %v2179_v6  ;;  %v2789_v7 = vmul.f32 %v2787_v57, %v8620_v62  ;;  %v2802_v6 = vmul.f32 %v2801_v27, %v8608_v15  ;;  %s8787_s13 = sld [smem:[#allocation9 + $0x2c]] }
 0x2fd   : > { %v2176_v52 = vpop.permute.xlu1 %2175  ;;  %v2188_v39 = vpop.permute.xlu0 %2187  ;;  %v2815_v59 = vstv %s8643_s14  ;;  %v2371_v58 = vmul.f32 %v2370_v2, %v8320_v12  ;;  %v2857_v57 = vstv %s8684_s16  ;;  %s8791_s14 = sld [smem:[#allocation9 + $0x51]] }
 0x2fe   : > { %v2180_v10 = vadd.f32 %v2176_v52, %v2110_v36  ;;  %v2193_v40 = vadd.f32 %v2188_v39, %v2123_v34  ;;  %v2376_v36 = vstv %s8647_s21  ;;  %v2816_v61 = vmul.f32 %v2815_v59, %v8608_v15  ;;  %s8799_s21 = sld [smem:[#allocation9 + $0x59]] }
 0x2ff   : > { %2678 = vrot.lane.b32.xlu1 %v2673_v38, %s6727_s23  ;;  %2690 = vrot.lane.b32.xlu0 %v2686_v53, %s6727_s23  ;;  %v2803_v53 = vmul.f32 %v2801_v27, %v8620_v62  ;;  %v2817_v28 = vmul.f32 %v2815_v59, %v8620_v62  ;;  %v2871_v59 = vstv %s8702_s20  ;;  %s8835_s16 = sld [smem:[#allocation9 + $0xd8]] }
 0x300   : > { %v8602_v21 = vadd.f32 %v2218_v0, %v2180_v10  ;;  %v8604_v23 = vadd.f32 %v2223_v35, %v2193_v40  ;;  %v2829_v10 = vstv %s8655_s25  ;;  %v2372_v35 = vmul.f32 %v2370_v2, %v8332_v26  ;;  %s8805_s25 = sld [smem:[#allocation9 + $0x7e]] }
 0x301   : > { %v2190_v16 = vpop.permute.xlu1 %2189  ;;  %v2234_v49 = vpop.permute.xlu0 %2233  ;;  %s6197_s20 = sld [smem:[#allocation9 + $0x27]] }
 0x302   : > { %v2194_v55 = vadd.f32 %v2190_v16, %v2124_v8  ;;  %v2239_v37 = vadd.f32 %v2234_v49, %v8535_v5 }
 0x303   : > { %2692 = vrot.lane.b32.xlu1 %v2687_v48, %s6727_s23  ;;  %2704 = vrot.lane.b32.xlu0 %v2700_v1, %s6727_s23 }
 0x304   : > { %v8616_v25 = vadd.f32 %v2224_v45, %v2194_v55  ;;  %v2830_v45 = vmul.f32 %v2829_v10, %v8608_v15 }
 0x305   : > { %v2236_v11 = vpop.permute.xlu1 %2235  ;;  %v2248_v19 = vpop.permute.xlu0 %2247 }
 0x306   : > { %v2240_v5 = vadd.f32 %v2236_v11, %v8551_v4  ;;  %v2253_v34 = vadd.f32 %v2248_v19, %v8553_v60  ;;  %v2377_v4 = vmul.f32 %v2376_v36, %v8320_v12  ;;  %v2382_v60 = vstv %s8661_s26  ;;  %s8812_s26 = sld [smem:[#allocation9 + $0x86]] }
 0x307   : > { %2706 = vrot.lane.b32.xlu1 %v2701_v46, %s6727_s23  ;;  %2750 = vrot.lane.b32.xlu0 %v2746_v18, %s6726_s12  ;;  %v2843_v11 = vstv %s8668_s11  ;;  %v2388_v18 = vstv %s8675_s15  ;;  %s8819_s11 = sld [smem:[#allocation9 + $0xab]] }
 0x308   : > { %s8828_s15 = sld [smem:[#allocation9 + $0xb3]] }
 0x309   : > { %v2250_v56 = vpop.permute.xlu1 %2249  ;;  %v2262_v41 = vpop.permute.xlu0 %2261 }
 0x30a   : > { %v2254_v8 = vadd.f32 %v2250_v56, %v8569_v50  ;;  %v2267_v16 = vadd.f32 %v2262_v41, %v8571_v42  ;;  %v2378_v50 = vmul.f32 %v2376_v36, %v8332_v26  ;;  %v2383_v42 = vmul.f32 %v2382_v60, %v8320_v12 }
 0x30b   : > { %2752 = vrot.lane.b32.xlu1 %v2747_v31, %s6726_s12  ;;  %2764 = vrot.lane.b32.xlu0 %v2760_v9, %s6726_s12 }
 0x30d   : > { %v8636_v13 = vpop.permute.xlu1 %2263  ;;  %v8638_v29 = vpop.permute.xlu0 %2275 }
 0x30e   : > { %v2268_v24 = vadd.f32 %v8636_v13, %v8587_v32  ;;  %v2281_v56 = vadd.f32 %v8638_v29, %v8589_v47  ;;  %v2384_v32 = vmul.f32 %v2382_v60, %v8332_v26  ;;  %v2389_v47 = vmul.f32 %v2388_v18, %v8320_v12  ;;  %v8764_v60 = vld [vmem:[#allocation2 + $0x6a] sm:$0xff] }
 0x30f   : > { %2766 = vrot.lane.b32.xlu1 %v2761_v30, %s6726_s12  ;;  %2778 = vrot.lane.b32.xlu0 %v2774_v3, %s6726_s12  ;;  %v2831_v30 = vmul.f32 %v2829_v10, %v8620_v62  ;;  %v2844_v3 = vmul.f32 %v2843_v11, %v8608_v15  ;;  %v2394_v13 = vstv %s8691_s19  ;;  %v2917_v10 = vstv %s8720_s22  ;;  %s8846_s19 = sld [smem:[#allocation9 + $0xe0]] }
 0x310   : > { %s8899_s22 = sld [smem:[#allocation9 + $0x54]] }
 0x311   : > { %v8649_v51 = vpop.permute.xlu1 %2277  ;;  %v8651_v14 = vpop.permute.xlu0 %2289 }
 0x312   : > { %v2282_v29 = vadd.f32 %v8649_v51, %v8602_v21  ;;  %v2295_v27 = vadd.f32 %v8651_v14, %v8604_v23  ;;  %v2390_v21 = vmul.f32 %v2388_v18, %v8332_v26  ;;  %v2395_v23 = vmul.f32 %v2394_v13, %v8320_v12 }
 0x313   : > { %2780 = vrot.lane.b32.xlu1 %v2775_v33, %s6726_s12  ;;  %2792 = vrot.lane.b32.xlu0 %v2788_v20, %s6726_s12 }
 0x315   : > { %v8664_v17 = vpop.permute.xlu1 %2291  ;;  %v2304_v22 = vpop.permute.xlu0 %2303 }
 0x316   : > { %v2309_v43 = vadd.f32 %v2304_v22, %v2239_v37  ;;  %v2296_v51 = vadd.f32 %v8664_v17, %v8616_v25 }
 0x317   : > { %2794 = vrot.lane.b32.xlu1 %v2789_v7, %s6726_s12  ;;  %2806 = vrot.lane.b32.xlu0 %v2802_v6, %s6726_s12  ;;  %v2845_v6 = vmul.f32 %v2843_v11, %v8620_v62 }
 0x318   : > { %v8679_v52 = vadd.f32 %v2371_v58, %v2309_v43  ;;  %v2858_v43 = vmul.f32 %v2857_v57, %v8608_v15 }
 0x319   : > { %v2306_v39 = vpop.permute.xlu1 %2305  ;;  %v2318_v38 = vpop.permute.xlu0 %2317 }
 0x31a   : > { %v2310_v40 = vadd.f32 %v2306_v39, %v2240_v5  ;;  %v2323_v0 = vadd.f32 %v2318_v38, %v2253_v34  ;;  %v2859_v38 = vmul.f32 %v2857_v57, %v8620_v62 }
 0x31b   : > { %2808 = vrot.lane.b32.xlu1 %v2803_v53, %s6726_s12  ;;  %2820 = vrot.lane.b32.xlu0 %v2816_v61, %s6727_s23  ;;  %v2872_v53 = vmul.f32 %v2871_v59, %v8608_v15  ;;  %v8752_v61 = vld [vmem:[#allocation2 + $0x62] sm:$0xff] }
 0x31c   : > { %v8695_v49 = vadd.f32 %v2372_v35, %v2310_v40  ;;  %v8697_v48 = vadd.f32 %v2377_v4, %v2323_v0  ;;  %v2396_v40 = vmul.f32 %v2394_v13, %v8332_v26  ;;  %v2873_v35 = vmul.f32 %v2871_v59, %v8620_v62 }
 0x31d   : > { %v2320_v1 = vpop.permute.xlu1 %2319  ;;  %v2332_v55 = vpop.permute.xlu0 %2331  ;;  %v2918_v4 = vmul.f32 %v2917_v10, %v8752_v61 }
 0x31e   : > { %v2324_v19 = vadd.f32 %v2320_v1, %v2254_v8  ;;  %v2337_v46 = vadd.f32 %v2332_v55, %v2267_v16  ;;  %v2931_v8 = vstv %s8738_s24  ;;  %v2919_v1 = vmul.f32 %v2917_v10, %v8764_v60  ;;  %s8901_s24 = sld [smem:[#allocation9 + $0x81]] }
 0x31f   : > { %2822 = vrot.lane.b32.xlu1 %v2817_v28, %s6727_s23  ;;  %2834 = vrot.lane.b32.xlu0 %v2830_v45, %s6727_s23  ;;  %v2932_v55 = vmul.f32 %v2931_v8, %v8752_v61  ;;  %v2945_v28 = vstv %s8755_s6  ;;  %s8906_s6 = sld [smem:[#allocation9 + $0xae]] }
 0x320   : > { %v8713_v41 = vadd.f32 %v2378_v50, %v2324_v19  ;;  %v8715_v31 = vadd.f32 %v2383_v42, %v2337_v46  ;;  %v2933_v19 = vmul.f32 %v2931_v8, %v8764_v60  ;;  %v2946_v46 = vmul.f32 %v2945_v28, %v8752_v61 }
 0x321   : > { %v2334_v9 = vpop.permute.xlu1 %2333  ;;  %v2346_v54 = vpop.permute.xlu0 %2345  ;;  %v2959_v50 = vstv %s8767_s30  ;;  %s8913_s30 = sld [smem:[#allocation9 + $0xdb]] }
 0x322   : > { %v2338_v33 = vadd.f32 %v2334_v9, %v2268_v24  ;;  %v2351_v20 = vadd.f32 %v2346_v54, %v2281_v56  ;;  %v2947_v24 = vmul.f32 %v2945_v28, %v8764_v60  ;;  %v2960_v56 = vmul.f32 %v2959_v50, %v8752_v61 }
 0x323   : > { %2836 = vrot.lane.b32.xlu1 %v2831_v30, %s6727_s23  ;;  %2848 = vrot.lane.b32.xlu0 %v2844_v3, %s6727_s23  ;;  %v2973_v9 = vstv %s8774_s8  ;;  %v2543_v54 = vstv %s8778_s29  ;;  %s6212_s8 = sld [smem:[#allocation9 + $0x2a]] }
 0x324   : > { %v8731_v2 = vadd.f32 %v2384_v32, %v2338_v33  ;;  %v8733_v37 = vadd.f32 %v2389_v47, %v2351_v20  ;;  %v2961_v33 = vmul.f32 %v2959_v50, %v8764_v60  ;;  %v2974_v20 = vmul.f32 %v2973_v9, %v8752_v61  ;;  %s8933_s29 = sld [smem:[#allocation9 + $0x57]] }
 0x325   : > { %v2348_v22 = vpop.permute.xlu1 %2347  ;;  %v2360_v7 = vpop.permute.xlu0 %2359  ;;  %v2987_v47 = vstv %s8787_s13  ;;  %v2544_v13 = vmul.f32 %v2543_v54, %v8464_v44  ;;  %v3029_v50 = vstv %s8828_s15  ;;  %s8935_s13 = sld [smem:[#allocation9 + $0x84]] }
 0x326   : > { %v2352_v58 = vadd.f32 %v2348_v22, %v2282_v29  ;;  %v2365_v36 = vadd.f32 %v2360_v7, %v2295_v27  ;;  %v2549_v29 = vstv %s8791_s14  ;;  %v2988_v59 = vmul.f32 %v2987_v47, %v8752_v61  ;;  %s8939_s14 = sld [smem:[#allocation9 + $0xb1]] }
 0x327   : > { %2850 = vrot.lane.b32.xlu1 %v2845_v6, %s6727_s23  ;;  %2862 = vrot.lane.b32.xlu0 %v2858_v43, %s6727_s23  ;;  %v2975_v43 = vmul.f32 %v2973_v9, %v8764_v60  ;;  %v2989_v10 = vmul.f32 %v2987_v47, %v8764_v60  ;;  %v3043_v47 = vstv %s8846_s19  ;;  %s8963_s15 = sld [smem:[#allocation10 + $0x3]] }
 0x328   : > { %v8746_v14 = vadd.f32 %v2390_v21, %v2352_v58  ;;  %v8748_v5 = vadd.f32 %v2395_v23, %v2365_v36  ;;  %v3001_v58 = vstv %s8799_s21  ;;  %v2545_v23 = vmul.f32 %v2543_v54, %v8476_v63  ;;  %s8944_s21 = sld [smem:[#allocation9 + $0xde]] }
 0x329   : > { %v2362_v34 = vpop.permute.xlu1 %2361  ;;  %v2406_v39 = vpop.permute.xlu0 %2405  ;;  %s6235_s19 = sld [smem:[#allocation12 + $0x1]] }
 0x32a   : > { %v2366_v12 = vadd.f32 %v2362_v34, %v2296_v51  ;;  %v2411_v30 = vadd.f32 %v2406_v39, %v8679_v52 }
 0x32b   : > { %2864 = vrot.lane.b32.xlu1 %v2859_v38, %s6727_s23  ;;  %2876 = vrot.lane.b32.xlu0 %v2872_v53, %s6727_s23 }
 0x32c   : > { %v8760_v25 = vadd.f32 %v2396_v40, %v2366_v12  ;;  %v3002_v40 = vmul.f32 %v3001_v58, %v8752_v61 }
 0x32d   : > { %v2408_v17 = vpop.permute.xlu1 %2407  ;;  %v2420_v0 = vpop.permute.xlu0 %2419 }
 0x32e   : > { %v2412_v52 = vadd.f32 %v2408_v17, %v8695_v49  ;;  %v2425_v27 = vadd.f32 %v2420_v0, %v8697_v48  ;;  %v2550_v49 = vmul.f32 %v2549_v29, %v8464_v44  ;;  %v2555_v48 = vstv %s8805_s25  ;;  %s3056_s25 = sld [smem:[#allocation10]] }
 0x32f   : > { %2878 = vrot.lane.b32.xlu1 %v2873_v35, %s6727_s23  ;;  %2922 = vrot.lane.b32.xlu0 %v2918_v4, %s6726_s12  ;;  %v3015_v17 = vstv %s8812_s26  ;;  %v2561_v4 = vstv %s8819_s11  ;;  %v2557_v9 = vmul.f32 %v2555_v48, %v8476_v63  ;;  %s8958_s26 = sld [smem:[#allocation10 + $0x1]] }
 0x330   : > { %s8960_s11 = sld [smem:[#allocation10 + $0x2]] }
 0x331   : > { %v2422_v26 = vpop.permute.xlu1 %2421  ;;  %v2434_v16 = vpop.permute.xlu0 %2433 }
 0x332   : > { %v2426_v51 = vadd.f32 %v2422_v26, %v8713_v41  ;;  %v2439_v34 = vadd.f32 %v2434_v16, %v8715_v31  ;;  %v2551_v41 = vmul.f32 %v2549_v29, %v8476_v63  ;;  %v2556_v31 = vmul.f32 %v2555_v48, %v8464_v44 }
 0x333   : > { %2924 = vrot.lane.b32.xlu1 %v2919_v1, %s6726_s12  ;;  %2936 = vrot.lane.b32.xlu0 %v2932_v55, %s6726_s12 }
 0x335   : > { %v8780_v45 = vpop.permute.xlu1 %2435  ;;  %v8782_v11 = vpop.permute.xlu0 %2447 }
 0x336   : > { %v2440_v8 = vadd.f32 %v8780_v45, %v8731_v2  ;;  %v2453_v26 = vadd.f32 %v8782_v11, %v8733_v37  ;;  %v2562_v2 = vmul.f32 %v2561_v4, %v8464_v44  ;;  %v2567_v37 = vstv %s8835_s16  ;;  %s8967_s16 = sld [smem:[#allocation10 + $0x4]] }
 0x337   : > { %2938 = vrot.lane.b32.xlu1 %v2933_v19, %s6726_s12  ;;  %2950 = vrot.lane.b32.xlu0 %v2946_v46, %s6726_s12  ;;  %v3003_v19 = vmul.f32 %v3001_v58, %v8764_v60  ;;  %v3016_v46 = vmul.f32 %v3015_v17, %v8752_v61 }
 0x339   : > { %v8793_v42 = vpop.permute.xlu1 %2449  ;;  %v8795_v18 = vpop.permute.xlu0 %2461 }
 0x33a   : > { %v2454_v45 = vadd.f32 %v8793_v42, %v8746_v14  ;;  %v2467_v11 = vadd.f32 %v8795_v18, %v8748_v5  ;;  %v2568_v14 = vmul.f32 %v2567_v37, %v8464_v44  ;;  %v2569_v44 = vmul.f32 %v2567_v37, %v8476_v63 }
 0x33b   : > { %2952 = vrot.lane.b32.xlu1 %v2947_v24, %s6726_s12  ;;  %2964 = vrot.lane.b32.xlu0 %v2960_v56, %s6726_s12 }
 0x33d   : > { %v8808_v3 = vpop.permute.xlu1 %2463  ;;  %v2476_v57 = vpop.permute.xlu0 %2475 }
 0x33e   : > { %v2481_v32 = vadd.f32 %v2476_v57, %v2411_v30  ;;  %v2468_v5 = vadd.f32 %v8808_v3, %v8760_v25 }
 0x33f   : > { %2966 = vrot.lane.b32.xlu1 %v2961_v33, %s6726_s12  ;;  %2978 = vrot.lane.b32.xlu0 %v2974_v20, %s6726_s12  ;;  %v3017_v20 = vmul.f32 %v3015_v17, %v8764_v60 }
 0x340   : > { %v8823_v22 = vadd.f32 %v2544_v13, %v2481_v32  ;;  %v3030_v32 = vmul.f32 %v3029_v50, %v8752_v61 }
 0x341   : > { %v2478_v7 = vpop.permute.xlu1 %2477  ;;  %v2490_v6 = vpop.permute.xlu0 %2489 }
 0x342   : > { %v2482_v36 = vadd.f32 %v2478_v7, %v2412_v52  ;;  %v2495_v21 = vadd.f32 %v2490_v6, %v2425_v27  ;;  %v2563_v52 = vmul.f32 %v2561_v4, %v8476_v63  ;;  %v3031_v6 = vmul.f32 %v3029_v50, %v8764_v60 }
 0x343   : > { %2980 = vrot.lane.b32.xlu1 %v2975_v43, %s6726_s12  ;;  %2992 = vrot.lane.b32.xlu0 %v2988_v59, %s6727_s23  ;;  %v3044_v43 = vmul.f32 %v3043_v47, %v8752_v61 }
 0x344   : > { %v8839_v39 = vadd.f32 %v2545_v23, %v2482_v36  ;;  %v8841_v38 = vadd.f32 %v2550_v49, %v2495_v21  ;;  %v3045_v36 = vmul.f32 %v3043_v47, %v8764_v60 }
 0x345   : > { %v2492_v53 = vpop.permute.xlu1 %2491  ;;  %v2504_v12 = vpop.permute.xlu0 %2503 }
 0x346   : > { %v2496_v0 = vadd.f32 %v2492_v53, %v2426_v51  ;;  %v2509_v35 = vadd.f32 %v2504_v12, %v2439_v34  ;;  %v2715_v34 = vstv %s6197_s20  ;;  %s8982_s20 = sld [smem:[#allocation12 + $0x2e]] }
 0x347   : > { %2994 = vrot.lane.b32.xlu1 %v2989_v10, %s6727_s23  ;;  %3006 = vrot.lane.b32.xlu0 %v3002_v40, %s6727_s23  ;;  %v2716_v17 = vmul.f32 %v2715_v34, %v8608_v15 }
 0x348   : > { %v8857_v16 = vadd.f32 %v2551_v41, %v2496_v0  ;;  %v8859_v1 = vadd.f32 %v2556_v31, %v2509_v35  ;;  %v2721_v0 = vstv %s8899_s22  ;;  %s8986_s22 = sld [smem:[#allocation12 + $0x5b]] }
 0x349   : > { %v2506_v55 = vpop.permute.xlu1 %2505  ;;  %v2518_v28 = vpop.permute.xlu0 %2517  ;;  %v2723_v37 = vmul.f32 %v2721_v0, %v8620_v62 }
 0x34a   : > { %v2510_v24 = vadd.f32 %v2506_v55, %v2440_v8  ;;  %v2523_v56 = vadd.f32 %v2518_v28, %v2453_v26  ;;  %v2722_v28 = vmul.f32 %v2721_v0, %v8608_v15 }
 0x34b   : > { %3008 = vrot.lane.b32.xlu1 %v3003_v19, %s6727_s23  ;;  %3020 = vrot.lane.b32.xlu0 %v3016_v46, %s6727_s23  ;;  %v2727_v19 = vstv %s8901_s24  ;;  %s8994_s24 = sld [smem:[#allocation12 + $0x88]] }
 0x34c   : > { %v8873_v54 = vadd.f32 %v2557_v9, %v2510_v24  ;;  %v8875_v30 = vadd.f32 %v2562_v2, %v2523_v56 }
 0x34d   : > { %v2520_v57 = vpop.permute.xlu1 %2519  ;;  %v2532_v33 = vpop.permute.xlu0 %2531 }
 0x34e   : > { %v2524_v13 = vadd.f32 %v2520_v57, %v2454_v45  ;;  %v2537_v29 = vadd.f32 %v2532_v33, %v2467_v11  ;;  %v2728_v45 = vmul.f32 %v2727_v19, %v8608_v15  ;;  %v2733_v11 = vstv %s8906_s6  ;;  %s6239_s6 = sld [smem:[#allocation12 + $0xb5]] }
 0x34f   : > { %3022 = vrot.lane.b32.xlu1 %v3017_v20, %s6727_s23  ;;  %3034 = vrot.lane.b32.xlu0 %v3030_v32, %s6727_s23 }
 0x350   : > { %v8886_v42 = vadd.f32 %v2563_v52, %v2524_v13  ;;  %v8888_v18 = vadd.f32 %v2568_v14, %v2537_v29  ;;  %v2729_v29 = vmul.f32 %v2727_v19, %v8620_v62  ;;  %v2734_v52 = vmul.f32 %v2733_v11, %v8608_v15 }
 0x351   : > { %v2534_v27 = vpop.permute.xlu1 %2533  ;;  %v2579_v7 = vpop.permute.xlu0 %2578  ;;  %v2739_v14 = vstv %s8913_s30  ;;  %s6240_s30 = sld [smem:[#allocation12 + $0x2]] }
 0x352   : > { %v2538_v59 = vadd.f32 %v2534_v27, %v2468_v5  ;;  %v2584_v53 = vadd.f32 %v2579_v7, %v8823_v22  ;;  %v2717_v22 = vmul.f32 %v2715_v34, %v8620_v62 }
 0x353   : > { %3036 = vrot.lane.b32.xlu1 %v3031_v6, %s6727_s23  ;;  %3048 = vrot.lane.b32.xlu0 %v3044_v43, %s6727_s23 }
 0x354   : > { %v8895_v58 = vadd.f32 %v2569_v44, %v2538_v59  ;;  %v2735_v44 = vmul.f32 %v2733_v11, %v8620_v62 }
 0x355   : > { %v2581_v25 = vpop.permute.xlu1 %2580  ;;  %v2593_v3 = vpop.permute.xlu0 %2592 }
 0x356   : > { %v2585_v35 = vadd.f32 %v2581_v25, %v8839_v39  ;;  %v2598_v41 = vadd.f32 %v2593_v3, %v8841_v38  ;;  %v2740_v25 = vmul.f32 %v2739_v14, %v8608_v15 }
 0x357   : > { %3050 = vrot.lane.b32.xlu1 %v3045_v36, %s6727_s23 }
 0x359   : > { %v2595_v21 = vpop.permute.xlu1 %2594  ;;  %v2607_v23 = vpop.permute.xlu0 %2606 }
 0x35a   : > { %v2599_v46 = vadd.f32 %v2595_v21, %v8857_v16  ;;  %v2612_v50 = vadd.f32 %v2607_v23, %v8859_v1 }
 0x35d   : > { %v2609_v49 = vpop.permute.xlu1 %2608  ;;  %v2621_v48 = vpop.permute.xlu0 %2620 }
 0x35e   : > { %v2613_v57 = vadd.f32 %v2609_v49, %v8873_v54  ;;  %v2626_v33 = vadd.f32 %v2621_v48, %v8875_v30 }
 0x361   : > { %v2623_v63 = vpop.permute.xlu1 %2622  ;;  %v2635_v51 = vpop.permute.xlu0 %2634 }
 0x362   : > { %v2627_v5 = vadd.f32 %v2623_v63, %v8886_v42  ;;  %v2640_v27 = vadd.f32 %v2635_v51, %v8888_v18  ;;  %v2741_v42 = vmul.f32 %v2739_v14, %v8620_v62 }
 0x365   : > { %v2637_v12 = vpop.permute.xlu1 %2636  ;;  %v2649_v10 = vpop.permute.xlu0 %2648 }
 0x366   : > { %v2654_v40 = vadd.f32 %v2649_v10, %v2584_v53  ;;  %v2641_v3 = vadd.f32 %v2637_v12, %v8895_v58  ;;  %v2887_v12 = vstv %s6212_s8  ;;  %s6241_s8 = sld [smem:[#allocation12 + $0x2f]] }
 0x368   : > { %v2718_v31 = vadd.f32 %v2716_v17, %v2654_v40 }
 0x369   : > { %v2651_v4 = vpop.permute.xlu1 %2650  ;;  %v2663_v8 = vpop.permute.xlu0 %2662 }
 0x36a   : > { %v2655_v26 = vadd.f32 %v2651_v4, %v2585_v35  ;;  %v2668_v55 = vadd.f32 %v2663_v8, %v2598_v41  ;;  %v2888_v41 = vmul.f32 %v2887_v12, %v8752_v61  ;;  %v2893_v4 = vstv %s8933_s29  ;;  %s6242_s29 = sld [smem:[#allocation12 + $0x5c]] }
 0x36c   : > { %v2719_v39 = vadd.f32 %v2717_v22, %v2655_v26  ;;  %v2724_v24 = vadd.f32 %v2722_v28, %v2668_v55 }
 0x36d   : > { %v2665_v38 = vpop.permute.xlu1 %2664  ;;  %v2677_v56 = vpop.permute.xlu0 %2676 }
 0x36e   : > { %v2669_v9 = vadd.f32 %v2665_v38, %v2599_v46  ;;  %v2682_v2 = vadd.f32 %v2677_v56, %v2612_v50  ;;  %v2889_v50 = vmul.f32 %v2887_v12, %v8764_v60  ;;  %v2899_v38 = vstv %s8935_s13  ;;  %s6243_s13 = sld [smem:[#allocation12 + $0x89]] }
 0x370   : > { %v2725_v20 = vadd.f32 %v2723_v37, %v2669_v9  ;;  %v2730_v16 = vadd.f32 %v2728_v45, %v2682_v2 }
 0x371   : > { %v2679_v32 = vpop.permute.xlu1 %2678  ;;  %v2691_v1 = vpop.permute.xlu0 %2690 }
 0x372   : > { %v2683_v47 = vadd.f32 %v2679_v32, %v2613_v57  ;;  %v2696_v13 = vadd.f32 %v2691_v1, %v2626_v33  ;;  %v2895_v57 = vmul.f32 %v2893_v4, %v8764_v60  ;;  %v2900_v33 = vmul.f32 %v2899_v38, %v8752_v61 }
 0x373   : > { %v2905_v32 = vstv %s8939_s14  ;;  %s6244_s14 = sld [smem:[#allocation12 + $0xb6]] }
 0x374   : > { %v2731_v7 = vadd.f32 %v2729_v29, %v2683_v47  ;;  %v2736_v6 = vadd.f32 %v2734_v52, %v2696_v13 }
 0x375   : > { %v2693_v54 = vpop.permute.xlu1 %2692  ;;  %v2705_v43 = vpop.permute.xlu0 %2704 }
 0x376   : > { %v2697_v30 = vadd.f32 %v2693_v54, %v2627_v5  ;;  %v2710_v59 = vadd.f32 %v2705_v43, %v2640_v27  ;;  %v2901_v5 = vmul.f32 %v2899_v38, %v8764_v60  ;;  %v2906_v27 = vmul.f32 %v2905_v32, %v8752_v61 }
 0x377   : > { %v2911_v54 = vstv %s8944_s21  ;;  %s6250_s21 = sld [smem:[#allocation12 + $0x4]] }
 0x378   : > { %v2737_v36 = vadd.f32 %v2735_v44, %v2697_v30  ;;  %v2742_v21 = vadd.f32 %v2740_v25, %v2710_v59 }
 0x379   : > { %v2707_v23 = vpop.permute.xlu1 %2706  ;;  %v2751_v49 = vpop.permute.xlu0 %2750 }
 0x37a   : > { %v2711_v48 = vadd.f32 %v2707_v23, %v2641_v3  ;;  %v2756_v17 = vadd.f32 %v2751_v49, %v2718_v31  ;;  %v2894_v31 = vmul.f32 %v2893_v4, %v8752_v61  ;;  %v2912_v49 = vmul.f32 %v2911_v54, %v8752_v61 }
 0x37c   : > { %v8931_v18 = vadd.f32 %v2741_v42, %v2711_v48 }
 0x37d   : > { %v2753_v63 = vpop.permute.xlu1 %2752  ;;  %v2765_v51 = vpop.permute.xlu0 %2764 }
 0x37e   : > { %v2757_v8 = vadd.f32 %v2753_v63, %v2719_v39  ;;  %v2770_v26 = vadd.f32 %v2765_v51, %v2724_v24 }
 0x381   : > { %v2767_v34 = vpop.permute.xlu1 %2766  ;;  %v2779_v53 = vpop.permute.xlu0 %2778 }
 0x382   : > { %v2771_v56 = vadd.f32 %v2767_v34, %v2725_v20  ;;  %v2784_v9 = vadd.f32 %v2779_v53, %v2730_v16 }
 0x385   : > { %v2781_v10 = vpop.permute.xlu1 %2780  ;;  %v2793_v40 = vpop.permute.xlu0 %2792 }
 0x386   : > { %v2785_v1 = vadd.f32 %v2781_v10, %v2731_v7  ;;  %v2798_v47 = vadd.f32 %v2793_v40, %v2736_v6  ;;  %v2907_v6 = vmul.f32 %v2905_v32, %v8764_v60 }
 0x389   : > { %v2795_v15 = vpop.permute.xlu1 %2794  ;;  %v2807_v58 = vpop.permute.xlu0 %2806 }
 0x38a   : > { %v2799_v43 = vadd.f32 %v2795_v15, %v2737_v36  ;;  %v2812_v30 = vadd.f32 %v2807_v58, %v2742_v21  ;;  %v2913_v36 = vmul.f32 %v2911_v54, %v8764_v60 }
 0x38d   : > { %v2809_v62 = vpop.permute.xlu1 %2808  ;;  %v2821_v0 = vpop.permute.xlu0 %2820 }
 0x38e   : > { %v2826_v35 = vadd.f32 %v2821_v0, %v2756_v17  ;;  %v2813_v48 = vadd.f32 %v2809_v62, %v8931_v18 }
 0x390   : > { %v2890_v55 = vadd.f32 %v2888_v41, %v2826_v35  ;;  %v3057_v35 = vstv %s3056_s25  ;;  %s6251_s25 = sld [smem:[#allocation12 + $0x31]] }
 0x391   : > { %v2823_v22 = vpop.permute.xlu1 %2822  ;;  %v2835_v28 = vpop.permute.xlu0 %2834 }
 0x392   : > { %v2827_v19 = vadd.f32 %v2823_v22, %v2757_v8  ;;  %v2840_v46 = vadd.f32 %v2835_v28, %v2770_v26  ;;  %v3073_v28 = vstv %s8958_s26  ;;  %s6252_s26 = sld [smem:[#allocation12 + $0x5e]] }
 0x394   : > { %v2891_v2 = vadd.f32 %v2889_v50, %v2827_v19  ;;  %v2896_v37 = vadd.f32 %v2894_v31, %v2840_v46 }
 0x395   : > { %v2837_v45 = vpop.permute.xlu1 %2836  ;;  %v2849_v39 = vpop.permute.xlu0 %2848 }
 0x396   : > { %v2841_v24 = vadd.f32 %v2837_v45, %v2771_v56  ;;  %v2854_v11 = vadd.f32 %v2849_v39, %v2784_v9 }
 0x398   : > { %v2897_v13 = vadd.f32 %v2895_v57, %v2841_v24  ;;  %v2902_v29 = vadd.f32 %v2900_v33, %v2854_v11 }
 0x399   : > { %v2851_v52 = vpop.permute.xlu1 %2850  ;;  %v2863_v14 = vpop.permute.xlu0 %2862 }
 0x39a   : > { %v2855_v20 = vadd.f32 %v2851_v52, %v2785_v1  ;;  %v2868_v16 = vadd.f32 %v2863_v14, %v2798_v47 }
 0x39c   : > { %v2903_v59 = vadd.f32 %v2901_v5, %v2855_v20  ;;  %v2908_v44 = vadd.f32 %v2906_v27, %v2868_v16 }
 0x39d   : > { %v2865_v25 = vpop.permute.xlu1 %2864  ;;  %v2877_v3 = vpop.permute.xlu0 %2876 }
 0x39e   : > { %v2869_v23 = vadd.f32 %v2865_v25, %v2799_v43  ;;  %v2882_v7 = vadd.f32 %v2877_v3, %v2812_v30 }
 0x3a0   : > { %v2909_v42 = vadd.f32 %v2907_v6, %v2869_v23  ;;  %v2914_v63 = vadd.f32 %v2912_v49, %v2882_v7 }
 0x3a1   : > { %v2879_v51 = vpop.permute.xlu1 %2878  ;;  %v2923_v34 = vpop.permute.xlu0 %2922 }
 0x3a2   : > { %v2883_v53 = vadd.f32 %v2879_v51, %v2813_v48  ;;  %v2928_v18 = vadd.f32 %v2923_v34, %v2890_v55 }
 0x3a4   : > { %v8956_v21 = vadd.f32 %v2913_v36, %v2883_v53 }
 0x3a5   : > { %v2925_v10 = vpop.permute.xlu1 %2924  ;;  %v2937_v40 = vpop.permute.xlu0 %2936 }
 0x3a6   : > { %v2929_v4 = vadd.f32 %v2925_v10, %v2891_v2  ;;  %v2942_v8 = vadd.f32 %v2937_v40, %v2896_v37  ;;  %v3090_v2 = vstv %s8960_s11  ;;  %s6253_s11 = sld [smem:[#allocation12 + $0x8b]] }
 0x3a9   : > { %v2939_v15 = vpop.permute.xlu1 %2938  ;;  %v2951_v58 = vpop.permute.xlu0 %2950 }
 0x3aa   : > { %v2943_v38 = vadd.f32 %v2939_v15, %v2897_v13  ;;  %v2956_v55 = vadd.f32 %v2951_v58, %v2902_v29  ;;  %v3107_v29 = vstv %s8963_s15  ;;  %v3173_v58 = vstv %s6235_s19  ;;  %s6254_s15 = sld [smem:[#allocation12 + $0xb8]] }
 0x3ab   : > { %s6256_s19 = sld [smem:[#allocation12 + $0x32]] }
 0x3ad   : > { %v2953_v12 = vpop.permute.xlu1 %2952  ;;  %v2965_v17 = vpop.permute.xlu0 %2964 }
 0x3ae   : > { %v2957_v33 = vadd.f32 %v2953_v12, %v2903_v59  ;;  %v2970_v32 = vadd.f32 %v2965_v17, %v2908_v44  ;;  %v3124_v44 = vstv %s8967_s16  ;;  %s6255_s16 = sld [smem:[#allocation12 + $0x5]] }
 0x3b1   : > { %v2967_v0 = vpop.permute.xlu1 %2966  ;;  %v2979_v61 = vpop.permute.xlu0 %2978 }
 0x3b2   : > { %v2971_v27 = vadd.f32 %v2967_v0, %v2909_v42  ;;  %v2984_v54 = vadd.f32 %v2979_v61, %v2914_v63 }
 0x3b5   : > { %v2981_v62 = vpop.permute.xlu1 %2980  ;;  %v2993_v41 = vpop.permute.xlu0 %2992 }
 0x3b6   : > { %v2998_v60 = vadd.f32 %v2993_v41, %v2928_v18  ;;  %v2985_v49 = vadd.f32 %v2981_v62, %v8956_v21  ;;  %v3187_v18 = vstv %s8982_s20  ;;  %s6257_s20 = sld [smem:[#allocation12 + $0x5f]] }
 0x3b8   : > { %v3058_v26 = vadd.f32 %v3057_v35, %v2998_v60 }
 0x3b9   : > { %v2995_v22 = vpop.permute.xlu1 %2994  ;;  %v3007_v19 = vpop.permute.xlu0 %3006 }
 0x3ba   : > { %v3060_v46 = vmax.f32 %v3058_v26, 0.0  ;;  %v2999_v50 = vadd.f32 %v2995_v22, %v2929_v4  ;;  %v3012_v31 = vadd.f32 %v3007_v19, %v2942_v8  ;;  %v3201_v8 = vstv %s8986_s22  ;;  %s6258_s22 = sld [smem:[#allocation12 + $0x8c]] }
 0x3bc   : > { %v3059_v56 = vadd.f32 %v3057_v35, %v2999_v50  ;;  %v3074_v9 = vadd.f32 %v3073_v28, %v3012_v31  ;;  %3064 = vrot.lane.b32.xlu0 %v3060_v46, %s6724_s10  ;;  %v3215_v46 = vstv %s8994_s24  ;;  %s6259_s24 = sld [smem:[#allocation12 + $0xb9]] }
 0x3bd   : > { %v3009_v45 = vpop.permute.xlu1 %3008  ;;  %v3021_v39 = vpop.permute.xlu0 %3020 }
 0x3be   : > { %v3061_v37 = vmax.f32 %v3059_v56, 0.0  ;;  %v3076_v24 = vmax.f32 %v3074_v9, 0.0  ;;  %v3013_v11 = vadd.f32 %v3009_v45, %v2943_v38  ;;  %v3026_v57 = vadd.f32 %v3021_v39, %v2956_v55 }
 0x3bf   : > { %v3229_v55 = vstv %s6239_s6  ;;  %v3243_v45 = vstv %s6240_s30  ;;  %s6265_s6 = sld [smem:[#allocation12 + $0x7]] }
 0x3c0   : > { %v3075_v1 = vadd.f32 %v3073_v28, %v3013_v11  ;;  %v3091_v47 = vadd.f32 %v3090_v2, %v3026_v57  ;;  %3066 = vrot.lane.b32.xlu1 %v3061_v37, %s6724_s10  ;;  %3080 = vrot.lane.b32.xlu0 %v3076_v24, %s6724_s10  ;;  %v3257_v37 = vstv %s6241_s8  ;;  %v3271_v57 = vstv %s6242_s29  ;;  %s6266_s30 = sld [smem:[#allocation12 + $0x34]] }
 0x3c1   : > { %v3023_v13 = vpop.permute.xlu1 %3022  ;;  %v3035_v52 = vpop.permute.xlu0 %3034  ;;  %s6267_s8 = sld [smem:[#allocation12 + $0x61]] }
 0x3c2   : > { %v3077_v14 = vmax.f32 %v3075_v1, 0.0  ;;  %v3093_v20 = vmax.f32 %v3091_v47, 0.0  ;;  %v3027_v16 = vadd.f32 %v3023_v13, %v2957_v33  ;;  %v3040_v5 = vadd.f32 %v3035_v52, %v2970_v32  ;;  %s6268_s29 = sld [smem:[#allocation12 + $0x8e]] }
 0x3c3   : > { %v3285_v1 = vstv %s6243_s13  ;;  %s6269_s13 = sld [smem:[#allocation12 + $0xbb]] }
 0x3c4   : > { %v3092_v43 = vadd.f32 %v3090_v2, %v3027_v16  ;;  %v3108_v30 = vadd.f32 %v3107_v29, %v3040_v5  ;;  %3082 = vrot.lane.b32.xlu1 %v3077_v14, %s6724_s10  ;;  %3097 = vrot.lane.b32.xlu0 %v3093_v20, %s6724_s10  ;;  %v3345_v16 = vstv %s6250_s21  ;;  %s6271_s21 = sld [smem:[#allocation12 + $0x35]] }
 0x3c5   : > { %v3037_v59 = vpop.permute.xlu1 %3036  ;;  %v3049_v25 = vpop.permute.xlu0 %3048 }
 0x3c6   : > { %v3094_v3 = vmax.f32 %v3092_v43, 0.0  ;;  %v3110_v23 = vmax.f32 %v3108_v30, 0.0  ;;  %v3041_v7 = vadd.f32 %v3037_v59, %v2971_v27  ;;  %v3054_v6 = vadd.f32 %v3049_v25, %v2984_v54 }
 0x3c7   : > { %v3359_v43 = vstv %s6251_s25  ;;  %s6272_s25 = sld [smem:[#allocation12 + $0x62]] }
 0x3c8   : > { %v3109_v48 = vadd.f32 %v3107_v29, %v3041_v7  ;;  %v3125_v51 = vadd.f32 %v3124_v44, %v3054_v6  ;;  %3099 = vrot.lane.b32.xlu1 %v3094_v3, %s6724_s10  ;;  %3114 = vrot.lane.b32.xlu0 %v3110_v23, %s6724_s10  ;;  %v3299_v29 = vstv %s6244_s14  ;;  %v3387_v23 = vstv %s6253_s11  ;;  %s6270_s14 = sld [smem:[#allocation12 + $0x8]] }
 0x3c9   : > { %v3051_v42 = vpop.permute.xlu1 %3050  ;;  %s6274_s11 = sld [smem:[#allocation12 + $0xbc]] }
 0x3ca   : > { %v3111_v63 = vmax.f32 %v3109_v48, 0.0  ;;  %v3127_v34 = vmax.f32 %v3125_v51, 0.0  ;;  %v3055_v53 = vadd.f32 %v3051_v42, %v2985_v49  ;;  %v3401_v49 = vstv %s6254_s15  ;;  %s9120_s15 = sld [smem:[#allocation12 + $0xa]] }
 0x3cb   : > { %v3415_v42 = vstv %s6255_s16  ;;  %s9126_s16 = sld [smem:[#allocation12 + $0x37]] }
 0x3cc   : > { %v3126_v36 = vadd.f32 %v3124_v44, %v3055_v53  ;;  %3116 = vrot.lane.b32.xlu1 %v3111_v63, %s6724_s10  ;;  %3131 = vrot.lane.b32.xlu0 %v3127_v34, %s6724_s10  ;;  %v3373_v44 = vstv %s6252_s26  ;;  %v3429_v53 = vstv %s6256_s19  ;;  %s6273_s26 = sld [smem:[#allocation12 + $0x8f]] }
 0x3cd   : > { %s9135_s19 = sld [smem:[#allocation12 + $0x64]] }
 0x3ce   : > { %v3128_v10 = vmax.f32 %v3126_v36, 0.0 }
 0x3d0   : > { %3133 = vrot.lane.b32.xlu1 %v3128_v10, %s6724_s10 }
 0x42e   : > { %v3065_v21 = vpop.permute.xlu0 %3064 }
 0x42f   : > { %3070 = vst.msk [vmem:[#allocation3 + $0x1] sm:$0xff] %vm461_vm2, %v3065_v21  ;;  %v3443_v21 = vstv %s6257_s20  ;;  %s9148_s20 = sld [smem:[#allocation12 + $0x91]] }
 0x432   : > { %v3067_v40 = vpop.permute.xlu1 %3066  ;;  %v3081_v15 = vpop.permute.xlu0 %3080 }
 0x433   : > { %3071 = vst.msk [vmem:[#allocation3 + $0x9] sm:$0xff] %vm461_vm2, %v3067_v40  ;;  %3087 = vst.msk [vmem:[#allocation3 + $0x19] sm:$0xff] %vm461_vm2, %v3081_v15 }
 0x436   : > { %v8988_v12 = vld [vmem:[#allocation3] sm:$0xff]  ;;  %v3083_v17 = vpop.permute.xlu1 %3082  ;;  %v3098_v0 = vpop.permute.xlu0 %3097 }
 0x437   : > { %3088 = vst.msk [vmem:[#allocation3 + $0x21] sm:$0xff] %vm461_vm2, %v3083_v17  ;;  %3104 = vst.msk [vmem:[#allocation3 + $0x31] sm:$0xff] %vm461_vm2, %v3098_v0  ;;  %v3174_v61 = vmul.f32 %v3173_v58, %v8988_v12  ;;  %v3188_v4 = vmul.f32 %v3187_v18, %v8988_v12  ;;  %v3202_v19 = vmul.f32 %v3201_v8, %v8988_v12  ;;  %v9040_v20 = vld [vmem:[#allocation3 + $0x1] sm:$0xff] }
 0x438   : > { %v3216_v38 = vmul.f32 %v3215_v46, %v8988_v12  ;;  %v3230_v9 = vmul.f32 %v3229_v55, %v8988_v12  ;;  %v3244_v39 = vmul.f32 %v3243_v45, %v8988_v12  ;;  %v3258_v11 = vmul.f32 %v3257_v37, %v8988_v12 }
 0x439   : > { %3178 = vrot.lane.b32.xlu0 %v3174_v61, %s6726_s12  ;;  %v3272_v32 = vmul.f32 %v3271_v57, %v8988_v12  ;;  %v3286_v13 = vmul.f32 %v3285_v1, %v8988_v12  ;;  %v3300_v14 = vmul.f32 %v3299_v29, %v8988_v12  ;;  %v3346_v27 = vmul.f32 %v3345_v16, %v9040_v20 }
 0x43a   : > { %v8997_v62 = vld [vmem:[#allocation3 + $0x8] sm:$0xff]  ;;  %v3100_v35 = vpop.permute.xlu1 %3099  ;;  %v3115_v41 = vpop.permute.xlu0 %3114  ;;  %v3360_v59 = vmul.f32 %v3359_v43, %v9040_v20  ;;  %v3374_v3 = vmul.f32 %v3373_v44, %v9040_v20  ;;  %v3388_v6 = vmul.f32 %v3387_v23, %v9040_v20  ;;  %v3402_v51 = vmul.f32 %v3401_v49, %v9040_v20 }
 0x43b   : > { %3105 = vst.msk [vmem:[#allocation3 + $0x39] sm:$0xff] %vm461_vm2, %v3100_v35  ;;  %3121 = vst.msk [vmem:[#allocation3 + $0x49] sm:$0xff] %vm461_vm2, %v3115_v41  ;;  %v3175_v60 = vmul.f32 %v3173_v58, %v8997_v62  ;;  %v3189_v28 = vmul.f32 %v3187_v18, %v8997_v62  ;;  %v3203_v31 = vmul.f32 %v3201_v8, %v8997_v62  ;;  %v9046_v54 = vld [vmem:[#allocation3 + $0x9] sm:$0xff]  ;;  %v3457_v58 = vstv %s6258_s22  ;;  %s9150_s22 = sld [smem:[#allocation12]] }
 0x43c   : > { %v3217_v56 = vmul.f32 %v3215_v46, %v8997_v62  ;;  %v3231_v2 = vmul.f32 %v3229_v55, %v8997_v62  ;;  %v3245_v24 = vmul.f32 %v3243_v45, %v8997_v62  ;;  %v3259_v33 = vmul.f32 %v3257_v37, %v8997_v62  ;;  %v9084_v41 = vld [vmem:[#allocation3 + $0x2] sm:$0xff] }
 0x43d   : > { %3180 = vrot.lane.b32.xlu1 %v3175_v60, %s6726_s12  ;;  %3192 = vrot.lane.b32.xlu0 %v3188_v4, %s6726_s12  ;;  %v3273_v47 = vmul.f32 %v3271_v57, %v8997_v62  ;;  %v3287_v52 = vmul.f32 %v3285_v1, %v8997_v62  ;;  %v3301_v5 = vmul.f32 %v3299_v29, %v8997_v62  ;;  %v3471_v61 = vstv %s6259_s24  ;;  %s9154_s24 = sld [smem:[#allocation12 + $0x2d]] }
 0x43e   : > { %v3117_v26 = vpop.permute.xlu1 %3116  ;;  %v3132_v22 = vpop.permute.xlu0 %3131  ;;  %v3347_v30 = vmul.f32 %v3345_v16, %v9046_v54  ;;  %v3361_v25 = vmul.f32 %v3359_v43, %v9046_v54  ;;  %v3375_v7 = vmul.f32 %v3373_v44, %v9046_v54  ;;  %v3389_v48 = vmul.f32 %v3387_v23, %v9046_v54  ;;  %v9132_v43 = vld [vmem:[#allocation3 + $0x18] sm:$0xff]  ;;  %v9145_v23 = vld [vmem:[#allocation3 + $0x20] sm:$0xff] }
 0x43f   : > { %3122 = vst.msk [vmem:[#allocation3 + $0x51] sm:$0xff] %vm461_vm2, %v3117_v26  ;;  %3138 = vst.msk [vmem:[#allocation3 + $0x61] sm:$0xff] %vm461_vm2, %v3132_v22  ;;  %v3403_v63 = vmul.f32 %v3401_v49, %v9046_v54  ;;  %v3416_v34 = vmul.f32 %v3415_v42, %v9040_v20  ;;  %v3417_v36 = vmul.f32 %v3415_v42, %v9046_v54  ;;  %v3517_v60 = vstv %s6265_s6  ;;  %v9090_v26 = vld [vmem:[#allocation3 + $0xa] sm:$0xff]  ;;  %s9158_s6 = sld [smem:[#allocation12 + $0x5a]] }
 0x440   : > { %v3430_v10 = vmul.f32 %v3429_v53, %v9040_v20  ;;  %v3431_v40 = vmul.f32 %v3429_v53, %v9046_v54  ;;  %v3444_v15 = vmul.f32 %v3443_v21, %v9040_v20  ;;  %v3445_v17 = vmul.f32 %v3443_v21, %v9046_v54 }
 0x441   : > { %3194 = vrot.lane.b32.xlu1 %v3189_v28, %s6726_s12  ;;  %3206 = vrot.lane.b32.xlu0 %v3202_v19, %s6726_s12  ;;  %v3458_v0 = vmul.f32 %v3457_v58, %v9040_v20  ;;  %v3459_v18 = vmul.f32 %v3457_v58, %v9046_v54  ;;  %v3472_v35 = vmul.f32 %v3471_v61, %v9040_v20  ;;  %v3531_v22 = vstv %s6266_s30  ;;  %s9165_s30 = sld [smem:[#allocation12 + $0xbe]] }
 0x442   : > { %v3134_v50 = vpop.permute.xlu1 %3133  ;;  %v3473_v4 = vmul.f32 %v3471_v61, %v9046_v54  ;;  %v3518_v8 = vmul.f32 %v3517_v60, %v9084_v41  ;;  %v3519_v28 = vmul.f32 %v3517_v60, %v9090_v26  ;;  %v3532_v19 = vmul.f32 %v3531_v22, %v9084_v41 }
 0x443   : > { %3139 = vst.msk [vmem:[#allocation3 + $0x69] sm:$0xff] %vm461_vm2, %v3134_v50  ;;  %v3545_v46 = vstv %s6267_s8  ;;  %v3533_v50 = vmul.f32 %v3531_v22, %v9090_v26  ;;  %v3717_v42 = vstv %s9135_s19  ;;  %s9169_s8 = sld [smem:[#allocation12 + $0x3]]  ;;  %v3143_v21 = vstv %s9150_s22 }
 0x444   : > { %v3547_v55 = vmul.f32 %v3545_v46, %v9090_v26  ;;  %v3719_v58 = vmul.f32 %v3717_v42, %v9145_v23  ;;  %s9240_s19 = sld [smem:[#allocation12 + $0xb7]] }
 0x445   : > { %3208 = vrot.lane.b32.xlu1 %v3203_v31, %s6726_s12  ;;  %3220 = vrot.lane.b32.xlu0 %v3216_v38, %s6726_s12  ;;  %v3546_v31 = vmul.f32 %v3545_v46, %v9084_v41  ;;  %v3559_v38 = vstv %s6268_s29  ;;  %s9171_s29 = sld [smem:[#allocation12 + $0x87]] }
 0x446   : > { %v3561_v45 = vmul.f32 %v3559_v38, %v9090_v26  ;;  %s9272_s22 = sld [smem:[#allocation12 + $0xd]] }
 0x447   : > { %v3745_v61 = vstv %s9165_s30  ;;  %s9319_s30 = sld [smem:[#allocation12 + $0x94]] }
 0x448   : > { %v3746_v46 = vmul.f32 %v3745_v61, %v9132_v43 }
 0x449   : > { %3222 = vrot.lane.b32.xlu1 %v3217_v56, %s6726_s12  ;;  %3234 = vrot.lane.b32.xlu0 %v3230_v9, %s6726_s12  ;;  %v3560_v56 = vmul.f32 %v3559_v38, %v9084_v41  ;;  %v3573_v9 = vstv %s6269_s13  ;;  %s9179_s13 = sld [smem:[#allocation12 + $0xb]] }
 0x44a   : > { %v3575_v37 = vmul.f32 %v3573_v9, %v9090_v26 }
 0x44d   : > { %3236 = vrot.lane.b32.xlu1 %v3231_v2, %s6726_s12  ;;  %3248 = vrot.lane.b32.xlu0 %v3244_v39, %s6727_s23  ;;  %v3574_v2 = vmul.f32 %v3573_v9, %v9084_v41  ;;  %v3587_v39 = vstv %s6270_s14  ;;  %s9181_s14 = sld [smem:[#allocation12 + $0xb4]] }
 0x44e   : > { %v3589_v57 = vmul.f32 %v3587_v39, %v9090_v26 }
 0x451   : > { %3250 = vrot.lane.b32.xlu1 %v3245_v24, %s6727_s23  ;;  %3262 = vrot.lane.b32.xlu0 %v3258_v11, %s6727_s23  ;;  %v3588_v24 = vmul.f32 %v3587_v39, %v9084_v41  ;;  %v3601_v11 = vstv %s6271_s21  ;;  %s9187_s21 = sld [smem:[#allocation12 + $0x30]] }
 0x452   : > { %v3603_v1 = vmul.f32 %v3601_v11, %v9090_v26 }
 0x453   : > { %v3167_v9 = vstv %s9181_s14  ;;  %s9343_s14 = sld [smem:[#allocation12 + $0x33]] }
 0x455   : > { %3264 = vrot.lane.b32.xlu1 %v3259_v33, %s6727_s23  ;;  %3276 = vrot.lane.b32.xlu0 %v3272_v32, %s6727_s23  ;;  %v3602_v33 = vmul.f32 %v3601_v11, %v9084_v41  ;;  %v3615_v32 = vstv %s6272_s25  ;;  %s9189_s25 = sld [smem:[#allocation12 + $0x38]] }
 0x456   : > { %v3617_v29 = vmul.f32 %v3615_v32, %v9090_v26 }
 0x459   : > { %3278 = vrot.lane.b32.xlu1 %v3273_v47, %s6727_s23  ;;  %3290 = vrot.lane.b32.xlu0 %v3286_v13, %s6727_s23  ;;  %v3616_v47 = vmul.f32 %v3615_v32, %v9084_v41  ;;  %v3629_v13 = vstv %s6273_s26  ;;  %s9199_s26 = sld [smem:[#allocation12 + $0x65]] }
 0x45d   : > { %3292 = vrot.lane.b32.xlu1 %v3287_v52, %s6727_s23  ;;  %3304 = vrot.lane.b32.xlu0 %v3300_v14, %s6727_s23  ;;  %v3630_v52 = vmul.f32 %v3629_v13, %v9084_v41  ;;  %v3643_v14 = vstv %s6274_s11  ;;  %s9205_s11 = sld [smem:[#allocation12 + $0x5d]] }
 0x461   : > { %3306 = vrot.lane.b32.xlu1 %v3301_v5, %s6727_s23  ;;  %3350 = vrot.lane.b32.xlu0 %v3346_v27, %s6726_s12  ;;  %v3631_v5 = vmul.f32 %v3629_v13, %v9090_v26  ;;  %v3644_v27 = vmul.f32 %v3643_v14, %v9084_v41 }
 0x465   : > { %3352 = vrot.lane.b32.xlu1 %v3347_v30, %s6726_s12  ;;  %3364 = vrot.lane.b32.xlu0 %v3360_v59, %s6726_s12  ;;  %v3689_v30 = vstv %s9120_s15  ;;  %s9216_s15 = sld [smem:[#allocation12 + $0x92]] }
 0x469   : > { %3366 = vrot.lane.b32.xlu1 %v3361_v25, %s6726_s12  ;;  %3378 = vrot.lane.b32.xlu0 %v3374_v3, %s6726_s12  ;;  %v3645_v25 = vmul.f32 %v3643_v14, %v9090_v26  ;;  %v3690_v3 = vmul.f32 %v3689_v30, %v9132_v43 }
 0x46d   : > { %3380 = vrot.lane.b32.xlu1 %v3375_v7, %s6726_s12  ;;  %3392 = vrot.lane.b32.xlu0 %v3388_v6, %s6726_s12  ;;  %v3703_v7 = vstv %s9126_s16  ;;  %s9223_s16 = sld [smem:[#allocation12 + $0x8a]] }
 0x46e   : > { %v3705_v53 = vmul.f32 %v3703_v7, %v9145_v23 }
 0x471   : > { %3394 = vrot.lane.b32.xlu1 %v3389_v48, %s6726_s12  ;;  %3406 = vrot.lane.b32.xlu0 %v3402_v51, %s6726_s12  ;;  %v3691_v48 = vmul.f32 %v3689_v30, %v9145_v23  ;;  %v3704_v51 = vmul.f32 %v3703_v7, %v9132_v43 }
 0x475   : > { %3408 = vrot.lane.b32.xlu1 %v3403_v63, %s6726_s12  ;;  %3420 = vrot.lane.b32.xlu0 %v3416_v34, %s6727_s23 }
 0x479   : > { %3422 = vrot.lane.b32.xlu1 %v3417_v36, %s6727_s23  ;;  %3434 = vrot.lane.b32.xlu0 %v3430_v10, %s6727_s23  ;;  %v3718_v36 = vmul.f32 %v3717_v42, %v9132_v43  ;;  %v3731_v10 = vstv %s9148_s20  ;;  %s9252_s20 = sld [smem:[#allocation12 + $0xbf]] }
 0x47d   : > { %3436 = vrot.lane.b32.xlu1 %v3431_v40, %s6727_s23  ;;  %3448 = vrot.lane.b32.xlu0 %v3444_v15, %s6727_s23 }
 0x481   : > { %3450 = vrot.lane.b32.xlu1 %v3445_v17, %s6727_s23  ;;  %3462 = vrot.lane.b32.xlu0 %v3458_v0, %s6727_s23  ;;  %v3732_v17 = vmul.f32 %v3731_v10, %v9132_v43  ;;  %v3144_v0 = vmul.f32 %v3143_v21, %v8988_v12 }
 0x485   : > { %3464 = vrot.lane.b32.xlu1 %v3459_v18, %s6727_s23  ;;  %3476 = vrot.lane.b32.xlu0 %v3472_v35, %s6727_s23  ;;  %v3149_v18 = vstv %s9154_s24  ;;  %v3315_v35 = vstv %s9169_s8  ;;  %s9291_s24 = sld [smem:[#allocation12 + $0x3a]] }
 0x486   : > { %v3150_v38 = vmul.f32 %v3149_v18, %v8988_v12  ;;  %v3151_v11 = vmul.f32 %v3149_v18, %v8997_v62  ;;  %s9326_s8 = sld [smem:[#allocation12 + $0xc1]] }
 0x489   : > { %3478 = vrot.lane.b32.xlu1 %v3473_v4, %s6727_s23  ;;  %3522 = vrot.lane.b32.xlu0 %v3518_v8, %s6726_s12  ;;  %v3155_v4 = vstv %s9158_s6  ;;  %v3161_v8 = vstv %s9171_s29  ;;  %s9307_s6 = sld [smem:[#allocation12 + $0x67]] }
 0x48a   : > { %v3163_v18 = vmul.f32 %v3161_v8, %v8997_v62  ;;  %s9330_s29 = sld [smem:[#allocation12 + $0x6]] }
 0x48d   : > { %3524 = vrot.lane.b32.xlu1 %v3519_v28, %s6726_s12  ;;  %3536 = vrot.lane.b32.xlu0 %v3532_v19, %s6726_s12  ;;  %v3733_v19 = vmul.f32 %v3731_v10, %v9145_v23  ;;  %v3801_v10 = vstv %s9216_s15  ;;  %s9380_s15 = sld [smem:[#allocation12 + $0x95]] }
 0x491   : > { %3538 = vrot.lane.b32.xlu1 %v3533_v50, %s6726_s12  ;;  %3550 = vrot.lane.b32.xlu0 %v3546_v31, %s6726_s12  ;;  %v3759_v50 = vstv %s9179_s13  ;;  %v3145_v31 = vmul.f32 %v3143_v21, %v8997_v62  ;;  %v3333_v21 = vstv %s9223_s16  ;;  %s9339_s13 = sld [smem:[#allocation12 + $0xe]] }
 0x492   : > { %s9387_s16 = sld [smem:[#allocation12 + $0xba]] }
 0x495   : > { %3552 = vrot.lane.b32.xlu1 %v3547_v55, %s6726_s12  ;;  %3564 = vrot.lane.b32.xlu0 %v3560_v56, %s6726_s12  ;;  %v3316_v56 = vmul.f32 %v3315_v35, %v9040_v20 }
 0x499   : > { %3566 = vrot.lane.b32.xlu1 %v3561_v45, %s6726_s12  ;;  %3578 = vrot.lane.b32.xlu0 %v3574_v2, %s6726_s12  ;;  %v3321_v45 = vstv %s9187_s21  ;;  %s9351_s21 = sld [smem:[#allocation12 + $0x3b]] }
 0x49a   : > { %v3322_v14 = vmul.f32 %v3321_v45, %v9040_v20 }
 0x49d   : > { %3580 = vrot.lane.b32.xlu1 %v3575_v37, %s6726_s12  ;;  %3592 = vrot.lane.b32.xlu0 %v3588_v24, %s6727_s23  ;;  %v3773_v37 = vstv %s9189_s25  ;;  %s9357_s25 = sld [smem:[#allocation12 + $0x60]] }
 0x49e   : > { %v3774_v42 = vmul.f32 %v3773_v37, %v9132_v43 }
 0x4a1   : > { %3594 = vrot.lane.b32.xlu1 %v3589_v57, %s6727_s23  ;;  %3606 = vrot.lane.b32.xlu0 %v3602_v33, %s6727_s23  ;;  %v3156_v57 = vmul.f32 %v3155_v4, %v8988_v12 }
 0x4a5   : > { %3608 = vrot.lane.b32.xlu1 %v3603_v1, %s6727_s23  ;;  %3620 = vrot.lane.b32.xlu0 %v3616_v47, %s6727_s23  ;;  %v3747_v1 = vmul.f32 %v3745_v61, %v9145_v23  ;;  %v3760_v47 = vmul.f32 %v3759_v50, %v9132_v43 }
 0x4a9   : > { %3622 = vrot.lane.b32.xlu1 %v3617_v29, %s6727_s23  ;;  %3634 = vrot.lane.b32.xlu0 %v3630_v52, %s6727_s23  ;;  %v3317_v52 = vmul.f32 %v3315_v35, %v9046_v54  ;;  %v3168_v35 = vmul.f32 %v3167_v9, %v8988_v12 }
 0x4ab   : > { %v3179_v16 = vpop.permute.xlu0 %3178 }
 0x4ac   : > { %v3184_v60 = vadd.f32 %v3179_v16, %v3144_v0  ;;  %v3787_v16 = vstv %s9199_s26  ;;  %s9364_s26 = sld [smem:[#allocation12 + $0x68]] }
 0x4ad   : > { %3636 = vrot.lane.b32.xlu1 %v3631_v5, %s6727_s23  ;;  %3648 = vrot.lane.b32.xlu0 %v3644_v27, %s6727_s23  ;;  %v3327_v5 = vstv %s9205_s11  ;;  %s9371_s11 = sld [smem:[#allocation12 + $0x8d]] }
 0x4af   : > { %v9139_v59 = vpop.permute.xlu1 %3180  ;;  %v9141_v44 = vpop.permute.xlu0 %3192 }
 0x4b0   : > { %v3185_v2 = vadd.f32 %v9139_v59, %v3145_v31  ;;  %v3198_v39 = vadd.f32 %v9141_v44, %v3150_v38 }
 0x4b1   : > { %3650 = vrot.lane.b32.xlu1 %v3645_v25, %s6727_s23  ;;  %3694 = vrot.lane.b32.xlu0 %v3690_v3, %s6726_s12  ;;  %v3157_v25 = vmul.f32 %v3155_v4, %v8997_v62  ;;  %v3162_v3 = vmul.f32 %v3161_v8, %v8988_v12  ;;  %v3339_v12 = vstv %s9240_s19  ;;  %s9398_s19 = sld [smem:[#allocation12 + $0xc2]] }
 0x4b3   : > { %v9156_v6 = vpop.permute.xlu1 %3194  ;;  %v9160_v49 = vpop.permute.xlu0 %3206 }
 0x4b4   : > { %v3199_v27 = vadd.f32 %v9156_v6, %v3151_v11  ;;  %v3212_v30 = vadd.f32 %v9160_v49, %v3156_v57  ;;  %v3815_v11 = vstv %s9252_s20  ;;  %s9416_s20 = sld [smem:[#allocation12 + $0x10]] }
 0x4b5   : > { %3696 = vrot.lane.b32.xlu1 %v3691_v48, %s6726_s12  ;;  %3708 = vrot.lane.b32.xlu0 %v3704_v51, %s6726_s12  ;;  %v3761_v51 = vmul.f32 %v3759_v50, %v9145_v23  ;;  %v3334_v50 = vmul.f32 %v3333_v21, %v9040_v20 }
 0x4b7   : > { %v9173_v63 = vpop.permute.xlu1 %3208  ;;  %v9175_v34 = vpop.permute.xlu0 %3220 }
 0x4b9   : > { %3710 = vrot.lane.b32.xlu1 %v3705_v53, %s6726_s12  ;;  %3722 = vrot.lane.b32.xlu0 %v3718_v36, %s6726_s12  ;;  %v3323_v53 = vmul.f32 %v3321_v45, %v9046_v54  ;;  %v3328_v36 = vmul.f32 %v3327_v5, %v9040_v20 }
 0x4bb   : > { %v9191_v40 = vpop.permute.xlu1 %3222  ;;  %v9193_v15 = vpop.permute.xlu0 %3234 }
 0x4bc   : > { %v3227_v8 = vadd.f32 %v9191_v40, %v3163_v18  ;;  %v3240_v31 = vadd.f32 %v9193_v15, %v3168_v35  ;;  %v3335_v40 = vmul.f32 %v3333_v21, %v9046_v54  ;;  %v3340_v15 = vmul.f32 %v3339_v12, %v9040_v20 }
 0x4bd   : > { %3724 = vrot.lane.b32.xlu1 %v3719_v58, %s6726_s12  ;;  %3736 = vrot.lane.b32.xlu0 %v3732_v17, %s6726_s12  ;;  %v3213_v58 = vadd.f32 %v9173_v63, %v3157_v25  ;;  %v3226_v17 = vadd.f32 %v9175_v34, %v3162_v3  ;;  %v3329_v34 = vmul.f32 %v3327_v5, %v9046_v54  ;;  %v9316_v3 = vld [vmem:[#allocation3 + $0x21] sm:$0xff]  ;;  %v3903_v21 = vstv %s9319_s30  ;;  %s9470_s30 = sld [smem:[#allocation12 + $0xc4]] }
 0x4bf   : > { %v9209_v22 = vpop.permute.xlu1 %3236  ;;  %v3249_v28 = vpop.permute.xlu0 %3248 }
 0x4c0   : > { %v3254_v55 = vadd.f32 %v3249_v28, %v3184_v60  ;;  %v3775_v28 = vmul.f32 %v3773_v37, %v9145_v23  ;;  %v3802_v37 = vmul.f32 %v3801_v10, %v9132_v43 }
 0x4c1   : > { %3738 = vrot.lane.b32.xlu1 %v3733_v19, %s6726_s12  ;;  %3750 = vrot.lane.b32.xlu0 %v3746_v46, %s6726_s12  ;;  %v3788_v19 = vmul.f32 %v3787_v16, %v9132_v43 }
 0x4c2   : > { %v9228_v24 = vadd.f32 %v3316_v56, %v3254_v55  ;;  %v3169_v56 = vmul.f32 %v3167_v9, %v8997_v62 }
 0x4c3   : > { %v3251_v33 = vpop.permute.xlu1 %3250  ;;  %v3263_v32 = vpop.permute.xlu0 %3262 }
 0x4c4   : > { %v3255_v13 = vadd.f32 %v3251_v33, %v3185_v2  ;;  %v3268_v29 = vadd.f32 %v3263_v32, %v3198_v39  ;;  %v3789_v39 = vmul.f32 %v3787_v16, %v9145_v23  ;;  %v3241_v62 = vadd.f32 %v9209_v22, %v3169_v56 }
 0x4c5   : > { %3752 = vrot.lane.b32.xlu1 %v3747_v1, %s6726_s12  ;;  %3764 = vrot.lane.b32.xlu0 %v3760_v47, %s6727_s23  ;;  %v3341_v16 = vmul.f32 %v3339_v12, %v9046_v54  ;;  %v3931_v12 = vstv %s9339_s13  ;;  %s9487_s13 = sld [smem:[#allocation12 + $0x36]] }
 0x4c6   : > { %v9244_v59 = vadd.f32 %v3317_v52, %v3255_v13  ;;  %v9246_v44 = vadd.f32 %v3322_v14, %v3268_v29  ;;  %v3803_v13 = vmul.f32 %v3801_v10, %v9145_v23  ;;  %v3816_v29 = vmul.f32 %v3815_v11, %v9132_v43  ;;  %v9304_v52 = vld [vmem:[#allocation3 + $0x19] sm:$0xff] }
 0x4c7   : > { %v3265_v7 = vpop.permute.xlu1 %3264  ;;  %v3277_v48 = vpop.permute.xlu0 %3276  ;;  %v3861_v14 = vstv %s9272_s22  ;;  %v3904_v35 = vmul.f32 %v3903_v21, %v9304_v52  ;;  %s9434_s22 = sld [smem:[#allocation12 + $0x3d]] }
 0x4c8   : > { %v3269_v6 = vadd.f32 %v3265_v7, %v3199_v27  ;;  %v3282_v49 = vadd.f32 %v3277_v48, %v3212_v30  ;;  %v3817_v30 = vmul.f32 %v3815_v11, %v9145_v23  ;;  %v3862_v25 = vmul.f32 %v3861_v14, %v9304_v52 }
 0x4c9   : > { %3766 = vrot.lane.b32.xlu1 %v3761_v51, %s6727_s23  ;;  %3778 = vrot.lane.b32.xlu0 %v3774_v42, %s6727_s23  ;;  %v3875_v7 = vstv %s9291_s24  ;;  %v3863_v51 = vmul.f32 %v3861_v14, %v9316_v3  ;;  %v3932_v11 = vmul.f32 %v3931_v12, %v9304_v52  ;;  %v3933_v14 = vmul.f32 %v3931_v12, %v9316_v3  ;;  %s9451_s24 = sld [smem:[#allocation12 + $0x6a]] }
 0x4ca   : > { %v9262_v0 = vadd.f32 %v3323_v53, %v3269_v6  ;;  %v9264_v61 = vadd.f32 %v3328_v36, %v3282_v49  ;;  %v3876_v42 = vmul.f32 %v3875_v7, %v9304_v52  ;;  %v3889_v6 = vstv %s9307_s6  ;;  %s9463_s6 = sld [smem:[#allocation12 + $0x97]] }
 0x4cb   : > { %v3279_v60 = vpop.permute.xlu1 %3278  ;;  %v3291_v4 = vpop.permute.xlu0 %3290  ;;  %v3877_v36 = vmul.f32 %v3875_v7, %v9316_v3  ;;  %v3890_v10 = vmul.f32 %v3889_v6, %v9304_v52  ;;  %v3891_v18 = vmul.f32 %v3889_v6, %v9316_v3  ;;  %v3987_v12 = vstv %s9398_s19  ;;  %s9560_s19 = sld [smem:[#allocation12 + $0x13]] }
 0x4cc   : > { %v3283_v63 = vadd.f32 %v3279_v60, %v3213_v58  ;;  %v3296_v46 = vadd.f32 %v3291_v4, %v3226_v17  ;;  %v3917_v60 = vstv %s9326_s8  ;;  %v3487_v4 = vstv %s9330_s29  ;;  %s9474_s8 = sld [smem:[#allocation12 + $0x9]] }
 0x4cd   : > { %3780 = vrot.lane.b32.xlu1 %v3775_v28, %s6727_s23  ;;  %3792 = vrot.lane.b32.xlu0 %v3788_v19, %s6727_s23  ;;  %s9483_s29 = sld [smem:[#allocation12 + $0x11]] }
 0x4ce   : > { %v9281_v38 = vadd.f32 %v3329_v34, %v3283_v63  ;;  %v9283_v55 = vadd.f32 %v3334_v50, %v3296_v46  ;;  %v3905_v46 = vmul.f32 %v3903_v21, %v9316_v3  ;;  %v3918_v34 = vmul.f32 %v3917_v60, %v9304_v52 }
 0x4cf   : > { %v3293_v45 = vpop.permute.xlu1 %3292  ;;  %v3305_v2 = vpop.permute.xlu0 %3304  ;;  %v3973_v21 = vstv %s9380_s15  ;;  %s9531_s15 = sld [smem:[#allocation12 + $0xbd]] }
 0x4d0   : > { %v3297_v57 = vadd.f32 %v3293_v45, %v3227_v8  ;;  %v3310_v33 = vadd.f32 %v3305_v2, %v3240_v31  ;;  %v3488_v8 = vmul.f32 %v3487_v4, %v9084_v41  ;;  %v3493_v31 = vstv %s9343_s14  ;;  %s9495_s14 = sld [smem:[#allocation12 + $0x3e]] }
 0x4d1   : > { %3794 = vrot.lane.b32.xlu1 %v3789_v39, %s6727_s23  ;;  %3806 = vrot.lane.b32.xlu0 %v3802_v37, %s6727_s23  ;;  %v3919_v37 = vmul.f32 %v3917_v60, %v9316_v3 }
 0x4d2   : > { %v9298_v9 = vadd.f32 %v3335_v40, %v3297_v57  ;;  %v9300_v32 = vadd.f32 %v3340_v15, %v3310_v33  ;;  %v3945_v57 = vstv %s9351_s21  ;;  %v3489_v15 = vmul.f32 %v3487_v4, %v9090_v26  ;;  %s9501_s21 = sld [smem:[#allocation12 + $0x63]] }
 0x4d3   : > { %v3307_v1 = vpop.permute.xlu1 %3306  ;;  %v3351_v47 = vpop.permute.xlu0 %3350 }
 0x4d4   : > { %v3311_v20 = vadd.f32 %v3307_v1, %v3241_v62  ;;  %v3356_v28 = vadd.f32 %v3351_v47, %v9228_v24 }
 0x4d5   : > { %3808 = vrot.lane.b32.xlu1 %v3803_v13, %s6727_s23  ;;  %3820 = vrot.lane.b32.xlu0 %v3816_v29, %s6727_s23 }
 0x4d6   : > { %v9312_v22 = vadd.f32 %v3341_v16, %v3311_v20  ;;  %v3946_v16 = vmul.f32 %v3945_v57, %v9304_v52 }
 0x4d7   : > { %v3353_v5 = vpop.permute.xlu1 %3352  ;;  %v3365_v27 = vpop.permute.xlu0 %3364 }
 0x4d8   : > { %v3357_v24 = vadd.f32 %v3353_v5, %v9244_v59  ;;  %v3370_v56 = vadd.f32 %v3365_v27, %v9246_v44  ;;  %v3494_v59 = vmul.f32 %v3493_v31, %v9084_v41  ;;  %v3499_v44 = vstv %s9357_s25  ;;  %s9508_s25 = sld [smem:[#allocation12 + $0x6b]] }
 0x4d9   : > { %3822 = vrot.lane.b32.xlu1 %v3817_v30, %s6727_s23  ;;  %3866 = vrot.lane.b32.xlu0 %v3862_v25, %s6726_s12  ;;  %v3959_v5 = vstv %s9364_s26  ;;  %v3505_v25 = vstv %s9371_s11  ;;  %s9515_s26 = sld [smem:[#allocation12 + $0x90]] }
 0x4da   : > { %s9524_s11 = sld [smem:[#allocation12 + $0x98]] }
 0x4db   : > { %v3367_v54 = vpop.permute.xlu1 %3366  ;;  %v3379_v48 = vpop.permute.xlu0 %3378 }
 0x4dc   : > { %v3371_v62 = vadd.f32 %v3367_v54, %v9262_v0  ;;  %v3384_v1 = vadd.f32 %v3379_v48, %v9264_v61  ;;  %v3495_v0 = vmul.f32 %v3493_v31, %v9090_v26  ;;  %v3500_v61 = vmul.f32 %v3499_v44, %v9084_v41 }
 0x4dd   : > { %3868 = vrot.lane.b32.xlu1 %v3863_v51, %s6726_s12  ;;  %3880 = vrot.lane.b32.xlu0 %v3876_v42, %s6726_s12 }
 0x4df   : > { %v9332_v49 = vpop.permute.xlu1 %3380  ;;  %v9334_v53 = vpop.permute.xlu0 %3392 }
 0x4e0   : > { %v3385_v7 = vadd.f32 %v9332_v49, %v9281_v38  ;;  %v3398_v54 = vadd.f32 %v9334_v53, %v9283_v55  ;;  %v3501_v38 = vmul.f32 %v3499_v44, %v9090_v26  ;;  %v3506_v55 = vmul.f32 %v3505_v25, %v9084_v41  ;;  %v9460_v44 = vld [vmem:[#allocation3 + $0x22] sm:$0xff] }
 0x4e1   : > { %3882 = vrot.lane.b32.xlu1 %v3877_v36, %s6726_s12  ;;  %3894 = vrot.lane.b32.xlu0 %v3890_v10, %s6726_s12  ;;  %v3947_v36 = vmul.f32 %v3945_v57, %v9316_v3  ;;  %v3960_v10 = vmul.f32 %v3959_v5, %v9304_v52  ;;  %v3511_v49 = vstv %s9387_s16  ;;  %v4033_v57 = vstv %s9416_s20  ;;  %s9542_s16 = sld [smem:[#allocation12 + $0xc5]] }
 0x4e2   : > { %s9578_s20 = sld [smem:[#allocation12 + $0x40]] }
 0x4e3   : > { %v9345_v58 = vpop.permute.xlu1 %3394  ;;  %v9347_v17 = vpop.permute.xlu0 %3406 }
 0x4e4   : > { %v3399_v53 = vadd.f32 %v9345_v58, %v9298_v9  ;;  %v3412_v60 = vadd.f32 %v9347_v17, %v9300_v32  ;;  %v3507_v9 = vmul.f32 %v3505_v25, %v9090_v26  ;;  %v3512_v32 = vmul.f32 %v3511_v49, %v9084_v41 }
 0x4e5   : > { %3896 = vrot.lane.b32.xlu1 %v3891_v18, %s6726_s12  ;;  %3908 = vrot.lane.b32.xlu0 %v3904_v35, %s6726_s12 }
 0x4e7   : > { %v9360_v19 = vpop.permute.xlu1 %3408  ;;  %v3421_v63 = vpop.permute.xlu0 %3420 }
 0x4e8   : > { %v3426_v50 = vadd.f32 %v3421_v63, %v3356_v28  ;;  %v3413_v58 = vadd.f32 %v9360_v19, %v9312_v22 }
 0x4e9   : > { %3910 = vrot.lane.b32.xlu1 %v3905_v46, %s6726_s12  ;;  %3922 = vrot.lane.b32.xlu0 %v3918_v34, %s6726_s12  ;;  %v3961_v34 = vmul.f32 %v3959_v5, %v9316_v3 }
 0x4ea   : > { %v9375_v45 = vadd.f32 %v3488_v8, %v3426_v50  ;;  %v3974_v50 = vmul.f32 %v3973_v21, %v9304_v52 }
 0x4eb   : > { %v3423_v2 = vpop.permute.xlu1 %3422  ;;  %v3435_v39 = vpop.permute.xlu0 %3434 }
 0x4ec   : > { %v3427_v33 = vadd.f32 %v3423_v2, %v3357_v24  ;;  %v3440_v40 = vadd.f32 %v3435_v39, %v3370_v56  ;;  %v3975_v39 = vmul.f32 %v3973_v21, %v9316_v3 }
 0x4ed   : > { %3924 = vrot.lane.b32.xlu1 %v3919_v37, %s6726_s12  ;;  %3936 = vrot.lane.b32.xlu0 %v3932_v11, %s6727_s23  ;;  %v3988_v37 = vmul.f32 %v3987_v12, %v9304_v52  ;;  %v9448_v11 = vld [vmem:[#allocation3 + $0x1a] sm:$0xff] }
 0x4ee   : > { %v9391_v47 = vadd.f32 %v3489_v15, %v3427_v33  ;;  %v9393_v13 = vadd.f32 %v3494_v59, %v3440_v40  ;;  %v3513_v33 = vmul.f32 %v3511_v49, %v9090_v26  ;;  %v3989_v15 = vmul.f32 %v3987_v12, %v9316_v3 }
 0x4ef   : > { %v3437_v29 = vpop.permute.xlu1 %3436  ;;  %v3449_v20 = vpop.permute.xlu0 %3448  ;;  %v4034_v59 = vmul.f32 %v4033_v57, %v9448_v11 }
 0x4f0   : > { %v3441_v27 = vadd.f32 %v3437_v29, %v3371_v62  ;;  %v3454_v30 = vadd.f32 %v3449_v20, %v3384_v1  ;;  %v4047_v62 = vstv %s9434_s22  ;;  %v4035_v29 = vmul.f32 %v4033_v57, %v9460_v44  ;;  %s9595_s22 = sld [smem:[#allocation12 + $0x6d]] }
 0x4f1   : > { %3938 = vrot.lane.b32.xlu1 %v3933_v14, %s6727_s23  ;;  %3950 = vrot.lane.b32.xlu0 %v3946_v16, %s6727_s23  ;;  %v4048_v20 = vmul.f32 %v4047_v62, %v9448_v11  ;;  %v4061_v14 = vstv %s9451_s24  ;;  %s9607_s24 = sld [smem:[#allocation12 + $0x9a]] }
 0x4f2   : > { %v9409_v48 = vadd.f32 %v3495_v0, %v3441_v27  ;;  %v9411_v51 = vadd.f32 %v3500_v61, %v3454_v30  ;;  %v4049_v27 = vmul.f32 %v4047_v62, %v9460_v44  ;;  %v4062_v30 = vmul.f32 %v4061_v14, %v9448_v11 }
 0x4f3   : > { %v3451_v42 = vpop.permute.xlu1 %3450  ;;  %v3463_v6 = vpop.permute.xlu0 %3462  ;;  %v4075_v0 = vstv %s9463_s6  ;;  %s9614_s6 = sld [smem:[#allocation12 + $0xc7]] }
 0x4f4   : > { %v3455_v18 = vadd.f32 %v3451_v42, %v3385_v7  ;;  %v3468_v35 = vadd.f32 %v3463_v6, %v3398_v54  ;;  %v4063_v7 = vmul.f32 %v4061_v14, %v9460_v44  ;;  %v4076_v54 = vmul.f32 %v4075_v0, %v9448_v11 }
 0x4f5   : > { %3952 = vrot.lane.b32.xlu1 %v3947_v36, %s6727_s23  ;;  %3964 = vrot.lane.b32.xlu0 %v3960_v10, %s6727_s23  ;;  %v4089_v42 = vstv %s9470_s30  ;;  %v3659_v6 = vstv %s9474_s8  ;;  %s9618_s30 = sld [smem:[#allocation12 + $0xc]] }
 0x4f6   : > { %v9427_v4 = vadd.f32 %v3501_v38, %v3455_v18  ;;  %v9429_v28 = vadd.f32 %v3506_v55, %v3468_v35  ;;  %v4077_v18 = vmul.f32 %v4075_v0, %v9460_v44  ;;  %v4090_v35 = vmul.f32 %v4089_v42, %v9448_v11  ;;  %s9627_s8 = sld [smem:[#allocation12 + $0x14]] }
 0x4f7   : > { %v3465_v63 = vpop.permute.xlu1 %3464  ;;  %v3477_v46 = vpop.permute.xlu0 %3476  ;;  %v4103_v55 = vstv %s9483_s29  ;;  %v3660_v49 = vmul.f32 %v3659_v6, %v9132_v43  ;;  %v4145_v0 = vstv %s9524_s11  ;;  %s9631_s29 = sld [smem:[#allocation12 + $0x39]] }
 0x4f8   : > { %v3469_v8 = vadd.f32 %v3465_v63, %v3399_v53  ;;  %v3482_v31 = vadd.f32 %v3477_v46, %v3412_v60  ;;  %v3665_v53 = vstv %s9487_s13  ;;  %v4104_v12 = vmul.f32 %v4103_v55, %v9448_v11  ;;  %s9639_s13 = sld [smem:[#allocation12 + $0x41]] }
 0x4f9   : > { %3966 = vrot.lane.b32.xlu1 %v3961_v34, %s6727_s23  ;;  %3978 = vrot.lane.b32.xlu0 %v3974_v50, %s6727_s23  ;;  %v4091_v50 = vmul.f32 %v4089_v42, %v9460_v44  ;;  %v4105_v57 = vmul.f32 %v4103_v55, %v9460_v44  ;;  %v4159_v55 = vstv %s9542_s16  ;;  %s9675_s11 = sld [smem:[#allocation12 + $0xc0]] }
 0x4fa   : > { %v9442_v17 = vadd.f32 %v3507_v9, %v3469_v8  ;;  %v9444_v24 = vadd.f32 %v3512_v32, %v3482_v31  ;;  %v4117_v8 = vstv %s9495_s14  ;;  %v3661_v32 = vmul.f32 %v3659_v6, %v9145_v23  ;;  %s9645_s14 = sld [smem:[#allocation12 + $0x66]] }
 0x4fb   : > { %v3479_v56 = vpop.permute.xlu1 %3478  ;;  %v3523_v2 = vpop.permute.xlu0 %3522  ;;  %s9704_s16 = sld [smem:[#allocation12 + $0x16]] }
 0x4fc   : > { %v3483_v41 = vadd.f32 %v3479_v56, %v3413_v58  ;;  %v3528_v36 = vadd.f32 %v3523_v2, %v9375_v45 }
 0x4fd   : > { %3980 = vrot.lane.b32.xlu1 %v3975_v39, %s6727_s23  ;;  %3992 = vrot.lane.b32.xlu0 %v3988_v37, %s6727_s23 }
 0x4fe   : > { %v9456_v22 = vadd.f32 %v3513_v33, %v3483_v41  ;;  %v4118_v33 = vmul.f32 %v4117_v8, %v9448_v11 }
 0x4ff   : > { %v3525_v19 = vpop.permute.xlu1 %3524  ;;  %v3537_v40 = vpop.permute.xlu0 %3536 }
 0x500   : > { %v3529_v45 = vadd.f32 %v3525_v19, %v9391_v47  ;;  %v3542_v60 = vadd.f32 %v3537_v40, %v9393_v13  ;;  %v3666_v47 = vmul.f32 %v3665_v53, %v9132_v43  ;;  %v3671_v13 = vstv %s9501_s21  ;;  %s9652_s21 = sld [smem:[#allocation12 + $0x6e]] }
 0x501   : > { %3994 = vrot.lane.b32.xlu1 %v3989_v15, %s6727_s23  ;;  %4038 = vrot.lane.b32.xlu0 %v4034_v59, %s6726_s12  ;;  %v4131_v19 = vstv %s9508_s25  ;;  %v3677_v59 = vstv %s9515_s26  ;;  %s9659_s25 = sld [smem:[#allocation12 + $0x93]] }
 0x502   : > { %s9668_s26 = sld [smem:[#allocation12 + $0x9b]] }
 0x503   : > { %v3539_v26 = vpop.permute.xlu1 %3538  ;;  %v3551_v1 = vpop.permute.xlu0 %3550 }
 0x504   : > { %v3543_v58 = vadd.f32 %v3539_v26, %v9409_v48  ;;  %v3556_v56 = vadd.f32 %v3551_v1, %v9411_v51  ;;  %v3667_v48 = vmul.f32 %v3665_v53, %v9145_v23  ;;  %v3672_v51 = vmul.f32 %v3671_v13, %v9132_v43 }
 0x505   : > { %4040 = vrot.lane.b32.xlu1 %v4035_v29, %s6726_s12  ;;  %4052 = vrot.lane.b32.xlu0 %v4048_v20, %s6726_s12 }
 0x507   : > { %v9476_v16 = vpop.permute.xlu1 %3552  ;;  %v9478_v5 = vpop.permute.xlu0 %3564 }
 0x508   : > { %v3557_v62 = vadd.f32 %v9476_v16, %v9427_v4  ;;  %v3570_v26 = vadd.f32 %v9478_v5, %v9429_v28  ;;  %v3673_v4 = vmul.f32 %v3671_v13, %v9145_v23  ;;  %v3678_v28 = vmul.f32 %v3677_v59, %v9132_v43  ;;  %v9604_v13 = vld [vmem:[#allocation3 + $0x38] sm:$0xff] }
 0x509   : > { %4054 = vrot.lane.b32.xlu1 %v4049_v27, %s6726_s12  ;;  %4066 = vrot.lane.b32.xlu0 %v4062_v30, %s6726_s12  ;;  %v4119_v27 = vmul.f32 %v4117_v8, %v9460_v44  ;;  %v4132_v30 = vmul.f32 %v4131_v19, %v9448_v11  ;;  %v3683_v16 = vstv %s9531_s15  ;;  %v4205_v8 = vstv %s9560_s19  ;;  %s9686_s15 = sld [smem:[#allocation12 + $0xc8]] }
 0x50a   : > { %s9722_s19 = sld [smem:[#allocation12 + $0x43]] }
 0x50b   : > { %v9489_v61 = vpop.permute.xlu1 %3566  ;;  %v9491_v25 = vpop.permute.xlu0 %3578 }
 0x50c   : > { %v3571_v5 = vadd.f32 %v9489_v61, %v9442_v17  ;;  %v3584_v42 = vadd.f32 %v9491_v25, %v9444_v24  ;;  %v3679_v17 = vmul.f32 %v3677_v59, %v9145_v23  ;;  %v3684_v24 = vmul.f32 %v3683_v16, %v9132_v43 }
 0x50d   : > { %4068 = vrot.lane.b32.xlu1 %v4063_v7, %s6726_s12  ;;  %4080 = vrot.lane.b32.xlu0 %v4076_v54, %s6726_s12 }
 0x50f   : > { %v9504_v10 = vpop.permute.xlu1 %3580  ;;  %v3593_v21 = vpop.permute.xlu0 %3592 }
 0x510   : > { %v3598_v38 = vadd.f32 %v3593_v21, %v3528_v36  ;;  %v3585_v61 = vadd.f32 %v9504_v10, %v9456_v22 }
 0x511   : > { %4082 = vrot.lane.b32.xlu1 %v4077_v18, %s6726_s12  ;;  %4094 = vrot.lane.b32.xlu0 %v4090_v35, %s6726_s12  ;;  %v4133_v35 = vmul.f32 %v4131_v19, %v9460_v44 }
 0x512   : > { %v9519_v63 = vadd.f32 %v3660_v49, %v3598_v38  ;;  %v4146_v38 = vmul.f32 %v4145_v0, %v9448_v11 }
 0x513   : > { %v3595_v46 = vpop.permute.xlu1 %3594  ;;  %v3607_v34 = vpop.permute.xlu0 %3606 }
 0x514   : > { %v3599_v31 = vadd.f32 %v3595_v46, %v3529_v45  ;;  %v3612_v9 = vadd.f32 %v3607_v34, %v3542_v60  ;;  %v4147_v34 = vmul.f32 %v4145_v0, %v9460_v44 }
 0x515   : > { %4096 = vrot.lane.b32.xlu1 %v4091_v50, %s6726_s12  ;;  %4108 = vrot.lane.b32.xlu0 %v4104_v12, %s6727_s23  ;;  %v4160_v50 = vmul.f32 %v4159_v55, %v9448_v11  ;;  %v9592_v12 = vld [vmem:[#allocation3 + $0x30] sm:$0xff] }
 0x516   : > { %v9535_v2 = vadd.f32 %v3661_v32, %v3599_v31  ;;  %v9537_v39 = vadd.f32 %v3666_v47, %v3612_v9  ;;  %v3685_v31 = vmul.f32 %v3683_v16, %v9145_v23  ;;  %v4161_v32 = vmul.f32 %v4159_v55, %v9460_v44 }
 0x517   : > { %v3609_v37 = vpop.permute.xlu1 %3608  ;;  %v3621_v41 = vpop.permute.xlu0 %3620  ;;  %v4206_v47 = vmul.f32 %v4205_v8, %v9592_v12 }
 0x518   : > { %v3613_v40 = vadd.f32 %v3609_v37, %v3543_v58  ;;  %v3626_v15 = vadd.f32 %v3621_v41, %v3556_v56  ;;  %v4219_v58 = vstv %s9578_s20  ;;  %v4207_v37 = vmul.f32 %v4205_v8, %v9604_v13  ;;  %s9739_s20 = sld [smem:[#allocation12 + $0x70]] }
 0x519   : > { %4110 = vrot.lane.b32.xlu1 %v4105_v57, %s6727_s23  ;;  %4122 = vrot.lane.b32.xlu0 %v4118_v33, %s6727_s23  ;;  %v4220_v41 = vmul.f32 %v4219_v58, %v9592_v12  ;;  %v4233_v57 = vstv %s9595_s22  ;;  %s9751_s22 = sld [smem:[#allocation12 + $0x9d]] }
 0x51a   : > { %v9553_v1 = vadd.f32 %v3667_v48, %v3613_v40  ;;  %v9555_v29 = vadd.f32 %v3672_v51, %v3626_v15  ;;  %v4221_v40 = vmul.f32 %v4219_v58, %v9604_v13  ;;  %v4234_v15 = vmul.f32 %v4233_v57, %v9592_v12 }
 0x51b   : > { %v3623_v20 = vpop.permute.xlu1 %3622  ;;  %v3635_v14 = vpop.permute.xlu0 %3634  ;;  %v4247_v48 = vstv %s9607_s24  ;;  %s9758_s24 = sld [smem:[#allocation12 + $0xca]] }
 0x51c   : > { %v3627_v7 = vadd.f32 %v3623_v20, %v3557_v62  ;;  %v3640_v54 = vadd.f32 %v3635_v14, %v3570_v26  ;;  %v4235_v62 = vmul.f32 %v4233_v57, %v9604_v13  ;;  %v4248_v26 = vmul.f32 %v4247_v48, %v9592_v12 }
 0x51d   : > { %4124 = vrot.lane.b32.xlu1 %v4119_v27, %s6727_s23  ;;  %4136 = vrot.lane.b32.xlu0 %v4132_v30, %s6727_s23  ;;  %v4261_v20 = vstv %s9614_s6  ;;  %v3831_v14 = vstv %s9618_s30  ;;  %s9762_s6 = sld [smem:[#allocation12 + $0xf]] }
 0x51e   : > { %v9571_v6 = vadd.f32 %v3673_v4, %v3627_v7  ;;  %v9573_v36 = vadd.f32 %v3678_v28, %v3640_v54  ;;  %v4249_v7 = vmul.f32 %v4247_v48, %v9604_v13  ;;  %v4262_v54 = vmul.f32 %v4261_v20, %v9592_v12  ;;  %s9771_s30 = sld [smem:[#allocation12 + $0x17]] }
 0x51f   : > { %v3637_v21 = vpop.permute.xlu1 %3636  ;;  %v3649_v18 = vpop.permute.xlu0 %3648  ;;  %v4275_v28 = vstv %s9627_s8  ;;  %v3832_v16 = vmul.f32 %v3831_v14, %v9304_v52  ;;  %v4317_v48 = vstv %s9668_s26  ;;  %s9775_s8 = sld [smem:[#allocation12 + $0x3c]] }
 0x520   : > { %v3641_v49 = vadd.f32 %v3637_v21, %v3571_v5  ;;  %v3654_v53 = vadd.f32 %v3649_v18, %v3584_v42  ;;  %v3837_v5 = vstv %s9631_s29  ;;  %v4276_v55 = vmul.f32 %v4275_v28, %v9592_v12  ;;  %s9783_s29 = sld [smem:[#allocation12 + $0x44]] }
 0x521   : > { %4138 = vrot.lane.b32.xlu1 %v4133_v35, %s6727_s23  ;;  %4150 = vrot.lane.b32.xlu0 %v4146_v38, %s6727_s23  ;;  %v4263_v38 = vmul.f32 %v4261_v20, %v9604_v13  ;;  %v4277_v8 = vmul.f32 %v4275_v28, %v9604_v13  ;;  %v4331_v28 = vstv %s9686_s15  ;;  %s9819_s26 = sld [smem:[#allocation12 + $0xc3]] }
 0x522   : > { %v9586_v25 = vadd.f32 %v3679_v17, %v3641_v49  ;;  %v9588_v45 = vadd.f32 %v3684_v24, %v3654_v53  ;;  %v4289_v49 = vstv %s9639_s13  ;;  %v3833_v24 = vmul.f32 %v3831_v14, %v9316_v3  ;;  %s9789_s13 = sld [smem:[#allocation12 + $0x69]] }
 0x523   : > { %v3651_v60 = vpop.permute.xlu1 %3650  ;;  %v3695_v46 = vpop.permute.xlu0 %3694  ;;  %s9848_s15 = sld [smem:[#allocation12 + $0x19]] }
 0x524   : > { %v3655_v43 = vadd.f32 %v3651_v60, %v3585_v61  ;;  %v3700_v27 = vadd.f32 %v3695_v46, %v9519_v63 }
 0x525   : > { %4152 = vrot.lane.b32.xlu1 %v4147_v34, %s6727_s23  ;;  %4164 = vrot.lane.b32.xlu0 %v4160_v50, %s6727_s23 }
 0x526   : > { %v9600_v22 = vadd.f32 %v3685_v31, %v3655_v43  ;;  %v4290_v31 = vmul.f32 %v4289_v49, %v9592_v12 }
 0x527   : > { %v3697_v10 = vpop.permute.xlu1 %3696  ;;  %v3709_v9 = vpop.permute.xlu0 %3708 }
 0x528   : > { %v3701_v63 = vadd.f32 %v3697_v10, %v9535_v2  ;;  %v3714_v42 = vadd.f32 %v3709_v9, %v9537_v39  ;;  %v3838_v2 = vmul.f32 %v3837_v5, %v9304_v52  ;;  %v3843_v39 = vstv %s9645_s14  ;;  %s9796_s14 = sld [smem:[#allocation12 + $0x71]] }
 0x529   : > { %4166 = vrot.lane.b32.xlu1 %v4161_v32, %s6727_s23  ;;  %4210 = vrot.lane.b32.xlu0 %v4206_v47, %s6726_s12  ;;  %v4303_v10 = vstv %s9652_s21  ;;  %v3849_v47 = vstv %s9659_s25  ;;  %s9803_s21 = sld [smem:[#allocation12 + $0x96]] }
 0x52a   : > { %s9812_s25 = sld [smem:[#allocation12 + $0x9e]] }
 0x52b   : > { %v3711_v23 = vpop.permute.xlu1 %3710  ;;  %v3723_v56 = vpop.permute.xlu0 %3722 }
 0x52c   : > { %v3715_v61 = vadd.f32 %v3711_v23, %v9553_v1  ;;  %v3728_v60 = vadd.f32 %v3723_v56, %v9555_v29  ;;  %v3839_v1 = vmul.f32 %v3837_v5, %v9316_v3  ;;  %v3844_v29 = vmul.f32 %v3843_v39, %v9304_v52 }
 0x52d   : > { %4212 = vrot.lane.b32.xlu1 %v4207_v37, %s6726_s12  ;;  %4224 = vrot.lane.b32.xlu0 %v4220_v41, %s6726_s12 }
 0x52f   : > { %v9620_v33 = vpop.permute.xlu1 %3724  ;;  %v9622_v19 = vpop.permute.xlu0 %3736 }
 0x530   : > { %v3729_v58 = vadd.f32 %v9620_v33, %v9571_v6  ;;  %v3742_v23 = vadd.f32 %v9622_v19, %v9573_v36  ;;  %v3845_v6 = vmul.f32 %v3843_v39, %v9316_v3  ;;  %v3850_v36 = vmul.f32 %v3849_v47, %v9304_v52  ;;  %v9748_v39 = vld [vmem:[#allocation3 + $0x39] sm:$0xff] }
 0x531   : > { %4226 = vrot.lane.b32.xlu1 %v4221_v40, %s6726_s12  ;;  %4238 = vrot.lane.b32.xlu0 %v4234_v15, %s6726_s12  ;;  %v4291_v40 = vmul.f32 %v4289_v49, %v9604_v13  ;;  %v4304_v15 = vmul.f32 %v4303_v10, %v9592_v12  ;;  %v3855_v33 = vstv %s9675_s11  ;;  %v4377_v49 = vstv %s9704_s16  ;;  %s9830_s11 = sld [smem:[#allocation12 + $0xcb]] }
 0x532   : > { %s9866_s16 = sld [smem:[#allocation12 + $0x46]] }
 0x533   : > { %v9633_v51 = vpop.permute.xlu1 %3738  ;;  %v9635_v59 = vpop.permute.xlu0 %3750 }
 0x534   : > { %v3743_v19 = vadd.f32 %v9633_v51, %v9586_v25  ;;  %v3756_v20 = vadd.f32 %v9635_v59, %v9588_v45  ;;  %v3851_v25 = vmul.f32 %v3849_v47, %v9316_v3  ;;  %v3856_v45 = vmul.f32 %v3855_v33, %v9304_v52 }
 0x535   : > { %4240 = vrot.lane.b32.xlu1 %v4235_v62, %s6726_s12  ;;  %4252 = vrot.lane.b32.xlu0 %v4248_v26, %s6726_s12 }
 0x537   : > { %v9648_v30 = vpop.permute.xlu1 %3752  ;;  %v3765_v0 = vpop.permute.xlu0 %3764 }
 0x538   : > { %v3770_v4 = vadd.f32 %v3765_v0, %v3700_v27  ;;  %v3757_v51 = vadd.f32 %v9648_v30, %v9600_v22 }
 0x539   : > { %4254 = vrot.lane.b32.xlu1 %v4249_v7, %s6726_s12  ;;  %4266 = vrot.lane.b32.xlu0 %v4262_v54, %s6726_s12  ;;  %v4305_v54 = vmul.f32 %v4303_v10, %v9604_v13 }
 0x53a   : > { %v9663_v21 = vadd.f32 %v3832_v16, %v3770_v4  ;;  %v4318_v4 = vmul.f32 %v4317_v48, %v9592_v12 }
 0x53b   : > { %v3767_v18 = vpop.permute.xlu1 %3766  ;;  %v3779_v35 = vpop.permute.xlu0 %3778 }
 0x53c   : > { %v3771_v53 = vadd.f32 %v3767_v18, %v3701_v63  ;;  %v3784_v17 = vadd.f32 %v3779_v35, %v3714_v42  ;;  %v4319_v35 = vmul.f32 %v4317_v48, %v9604_v13 }
 0x53d   : > { %4268 = vrot.lane.b32.xlu1 %v4263_v38, %s6726_s12  ;;  %4280 = vrot.lane.b32.xlu0 %v4276_v55, %s6727_s23  ;;  %v4332_v38 = vmul.f32 %v4331_v28, %v9592_v12  ;;  %v9736_v55 = vld [vmem:[#allocation3 + $0x31] sm:$0xff] }
 0x53e   : > { %v9679_v46 = vadd.f32 %v3833_v24, %v3771_v53  ;;  %v9681_v34 = vadd.f32 %v3838_v2, %v3784_v17  ;;  %v3857_v53 = vmul.f32 %v3855_v33, %v9316_v3  ;;  %v4333_v24 = vmul.f32 %v4331_v28, %v9604_v13 }
 0x53f   : > { %v3781_v50 = vpop.permute.xlu1 %3780  ;;  %v3793_v43 = vpop.permute.xlu0 %3792  ;;  %v4378_v2 = vmul.f32 %v4377_v49, %v9736_v55 }
 0x540   : > { %v3785_v9 = vadd.f32 %v3781_v50, %v3715_v61  ;;  %v3798_v32 = vadd.f32 %v3793_v43, %v3728_v60  ;;  %v4391_v61 = vstv %s9722_s19  ;;  %v4379_v50 = vmul.f32 %v4377_v49, %v9748_v39  ;;  %s9883_s19 = sld [smem:[#allocation12 + $0x73]] }
 0x541   : > { %4282 = vrot.lane.b32.xlu1 %v4277_v8, %s6727_s23  ;;  %4294 = vrot.lane.b32.xlu0 %v4290_v31, %s6727_s23  ;;  %v4392_v43 = vmul.f32 %v4391_v61, %v9736_v55  ;;  %v4405_v8 = vstv %s9739_s20  ;;  %s9895_s20 = sld [smem:[#allocation12 + $0xa0]] }
 0x542   : > { %v9697_v56 = vadd.f32 %v3839_v1, %v3785_v9  ;;  %v9699_v37 = vadd.f32 %v3844_v29, %v3798_v32  ;;  %v4393_v9 = vmul.f32 %v4391_v61, %v9748_v39  ;;  %v4406_v32 = vmul.f32 %v4405_v8, %v9736_v55 }
 0x543   : > { %v3795_v41 = vpop.permute.xlu1 %3794  ;;  %v3807_v57 = vpop.permute.xlu0 %3806  ;;  %v4419_v1 = vstv %s9751_s22  ;;  %s9902_s22 = sld [smem:[#allocation12 + $0xcd]] }
 0x544   : > { %v3799_v62 = vadd.f32 %v3795_v41, %v3729_v58  ;;  %v3812_v26 = vadd.f32 %v3807_v57, %v3742_v23  ;;  %v4407_v58 = vmul.f32 %v4405_v8, %v9748_v39  ;;  %v4420_v23 = vmul.f32 %v4419_v1, %v9736_v55 }
 0x545   : > { %4296 = vrot.lane.b32.xlu1 %v4291_v40, %s6727_s23  ;;  %4308 = vrot.lane.b32.xlu0 %v4304_v15, %s6727_s23  ;;  %v4433_v41 = vstv %s9758_s24  ;;  %v4003_v57 = vstv %s9762_s6  ;;  %s9906_s24 = sld [smem:[#allocation12 + $0x12]] }
 0x546   : > { %v9715_v14 = vadd.f32 %v3845_v6, %v3799_v62  ;;  %v9717_v27 = vadd.f32 %v3850_v36, %v3812_v26  ;;  %v4421_v62 = vmul.f32 %v4419_v1, %v9748_v39  ;;  %v4434_v26 = vmul.f32 %v4433_v41, %v9736_v55  ;;  %s9915_s6 = sld [smem:[#allocation12 + $0x1a]] }
 0x547   : > { %v3809_v0 = vpop.permute.xlu1 %3808  ;;  %v3821_v7 = vpop.permute.xlu0 %3820  ;;  %v4447_v36 = vstv %s9771_s30  ;;  %v4004_v33 = vmul.f32 %v4003_v57, %v9448_v11  ;;  %v4489_v1 = vstv %s9812_s25  ;;  %s9919_s30 = sld [smem:[#allocation12 + $0x3f]] }
 0x548   : > { %v3813_v16 = vadd.f32 %v3809_v0, %v3743_v19  ;;  %v3826_v5 = vadd.f32 %v3821_v7, %v3756_v20  ;;  %v4009_v19 = vstv %s9775_s8  ;;  %v4448_v28 = vmul.f32 %v4447_v36, %v9736_v55  ;;  %s9927_s8 = sld [smem:[#allocation12 + $0x47]] }
 0x549   : > { %4310 = vrot.lane.b32.xlu1 %v4305_v54, %s6727_s23  ;;  %4322 = vrot.lane.b32.xlu0 %v4318_v4, %s6727_s23  ;;  %v4435_v4 = vmul.f32 %v4433_v41, %v9748_v39  ;;  %v4449_v49 = vmul.f32 %v4447_v36, %v9748_v39  ;;  %v4503_v36 = vstv %s9830_s11  ;;  %s9963_s25 = sld [smem:[#allocation12 + $0xc6]] }
 0x54a   : > { %v9730_v59 = vadd.f32 %v3851_v25, %v3813_v16  ;;  %v9732_v63 = vadd.f32 %v3856_v45, %v3826_v5  ;;  %v4461_v16 = vstv %s9783_s29  ;;  %v4005_v45 = vmul.f32 %v4003_v57, %v9460_v44  ;;  %s9933_s29 = sld [smem:[#allocation12 + $0x6c]] }
 0x54b   : > { %v3823_v42 = vpop.permute.xlu1 %3822  ;;  %v3867_v18 = vpop.permute.xlu0 %3866  ;;  %s9992_s11 = sld [smem:[#allocation12 + $0x1c]] }
 0x54c   : > { %v3827_v52 = vadd.f32 %v3823_v42, %v3757_v51  ;;  %v3872_v40 = vadd.f32 %v3867_v18, %v9663_v21 }
 0x54d   : > { %4324 = vrot.lane.b32.xlu1 %v4319_v35, %s6727_s23  ;;  %4336 = vrot.lane.b32.xlu0 %v4332_v38, %s6727_s23 }
 0x54e   : > { %v9744_v22 = vadd.f32 %v3857_v53, %v3827_v52  ;;  %v4462_v53 = vmul.f32 %v4461_v16, %v9736_v55 }
 0x54f   : > { %v3869_v30 = vpop.permute.xlu1 %3868  ;;  %v3881_v17 = vpop.permute.xlu0 %3880 }
 0x550   : > { %v3873_v21 = vadd.f32 %v3869_v30, %v9679_v46  ;;  %v3886_v20 = vadd.f32 %v3881_v17, %v9681_v34  ;;  %v4010_v46 = vmul.f32 %v4009_v19, %v9448_v11  ;;  %v4015_v34 = vstv %s9789_s13  ;;  %s9940_s13 = sld [smem:[#allocation12 + $0x74]] }
 0x551   : > { %4338 = vrot.lane.b32.xlu1 %v4333_v24, %s6727_s23  ;;  %4382 = vrot.lane.b32.xlu0 %v4378_v2, %s6726_s12  ;;  %v4475_v30 = vstv %s9796_s14  ;;  %v4021_v2 = vstv %s9803_s21  ;;  %s9947_s14 = sld [smem:[#allocation12 + $0x99]] }
 0x552   : > { %s9956_s21 = sld [smem:[#allocation12 + $0xa1]] }
 0x553   : > { %v3883_v3 = vpop.permute.xlu1 %3882  ;;  %v3895_v60 = vpop.permute.xlu0 %3894 }
 0x554   : > { %v3887_v51 = vadd.f32 %v3883_v3, %v9697_v56  ;;  %v3900_v42 = vadd.f32 %v3895_v60, %v9699_v37  ;;  %v4011_v56 = vmul.f32 %v4009_v19, %v9460_v44  ;;  %v4016_v37 = vmul.f32 %v4015_v34, %v9448_v11 }
 0x555   : > { %4384 = vrot.lane.b32.xlu1 %v4379_v50, %s6726_s12  ;;  %4396 = vrot.lane.b32.xlu0 %v4392_v43, %s6726_s12 }
 0x557   : > { %v9764_v31 = vpop.permute.xlu1 %3896  ;;  %v9766_v10 = vpop.permute.xlu0 %3908 }
 0x558   : > { %v3901_v61 = vadd.f32 %v9764_v31, %v9715_v14  ;;  %v3914_v3 = vadd.f32 %v9766_v10, %v9717_v27  ;;  %v4017_v14 = vmul.f32 %v4015_v34, %v9460_v44  ;;  %v4022_v27 = vmul.f32 %v4021_v2, %v9448_v11  ;;  %v9892_v34 = vld [vmem:[#allocation3 + $0x3a] sm:$0xff] }
 0x559   : > { %4398 = vrot.lane.b32.xlu1 %v4393_v9, %s6726_s12  ;;  %4410 = vrot.lane.b32.xlu0 %v4406_v32, %s6726_s12  ;;  %v4463_v9 = vmul.f32 %v4461_v16, %v9748_v39  ;;  %v4476_v32 = vmul.f32 %v4475_v30, %v9736_v55  ;;  %v4027_v31 = vstv %s9819_s26  ;;  %v4549_v16 = vstv %s9848_s15  ;;  %s9974_s26 = sld [smem:[#allocation12 + $0xce]] }
 0x55a   : > { %s10010_s15 = sld [smem:[#allocation12 + $0x49]] }
 0x55b   : > { %v9777_v29 = vpop.permute.xlu1 %3910  ;;  %v9779_v47 = vpop.permute.xlu0 %3922 }
 0x55c   : > { %v3915_v10 = vadd.f32 %v9777_v29, %v9730_v59  ;;  %v3928_v41 = vadd.f32 %v9779_v47, %v9732_v63  ;;  %v4023_v59 = vmul.f32 %v4021_v2, %v9460_v44  ;;  %v4028_v63 = vmul.f32 %v4027_v31, %v9448_v11 }
 0x55d   : > { %4412 = vrot.lane.b32.xlu1 %v4407_v58, %s6726_s12  ;;  %4424 = vrot.lane.b32.xlu0 %v4420_v23, %s6726_s12 }
 0x55f   : > { %v9792_v15 = vpop.permute.xlu1 %3924  ;;  %v3937_v48 = vpop.permute.xlu0 %3936 }
 0x560   : > { %v3942_v6 = vadd.f32 %v3937_v48, %v3872_v40  ;;  %v3929_v29 = vadd.f32 %v9792_v15, %v9744_v22 }
 0x561   : > { %4426 = vrot.lane.b32.xlu1 %v4421_v62, %s6726_s12  ;;  %4438 = vrot.lane.b32.xlu0 %v4434_v26, %s6726_s12  ;;  %v4477_v26 = vmul.f32 %v4475_v30, %v9748_v39 }
 0x562   : > { %v9807_v0 = vadd.f32 %v4004_v33, %v3942_v6  ;;  %v4490_v6 = vmul.f32 %v4489_v1, %v9736_v55 }
 0x563   : > { %v3939_v7 = vpop.permute.xlu1 %3938  ;;  %v3951_v54 = vpop.permute.xlu0 %3950 }
 0x564   : > { %v3943_v5 = vadd.f32 %v3939_v7, %v3873_v21  ;;  %v3956_v25 = vadd.f32 %v3951_v54, %v3886_v20  ;;  %v4491_v54 = vmul.f32 %v4489_v1, %v9748_v39 }
 0x565   : > { %4440 = vrot.lane.b32.xlu1 %v4435_v4, %s6726_s12  ;;  %4452 = vrot.lane.b32.xlu0 %v4448_v28, %s6727_s23  ;;  %v4504_v4 = vmul.f32 %v4503_v36, %v9736_v55  ;;  %v9880_v28 = vld [vmem:[#allocation3 + $0x32] sm:$0xff] }
 0x566   : > { %v9823_v18 = vadd.f32 %v4005_v45, %v3943_v5  ;;  %v9825_v35 = vadd.f32 %v4010_v46, %v3956_v25  ;;  %v4029_v5 = vmul.f32 %v4027_v31, %v9460_v44  ;;  %v4505_v45 = vmul.f32 %v4503_v36, %v9748_v39 }
 0x567   : > { %v3953_v38 = vpop.permute.xlu1 %3952  ;;  %v3965_v52 = vpop.permute.xlu0 %3964  ;;  %v4550_v46 = vmul.f32 %v4549_v16, %v9880_v28 }
 0x568   : > { %v3957_v17 = vadd.f32 %v3953_v38, %v3887_v51  ;;  %v3970_v24 = vadd.f32 %v3965_v52, %v3900_v42  ;;  %v4563_v51 = vstv %s9866_s16  ;;  %v4551_v38 = vmul.f32 %v4549_v16, %v9892_v34  ;;  %s10027_s16 = sld [smem:[#allocation12 + $0x76]] }
 0x569   : > { %4454 = vrot.lane.b32.xlu1 %v4449_v49, %s6727_s23  ;;  %4466 = vrot.lane.b32.xlu0 %v4462_v53, %s6727_s23  ;;  %v4564_v52 = vmul.f32 %v4563_v51, %v9880_v28  ;;  %v4577_v49 = vstv %s9883_s19  ;;  %s10039_s19 = sld [smem:[#allocation12 + $0xa3]] }
 0x56a   : > { %v9841_v60 = vadd.f32 %v4011_v56, %v3957_v17  ;;  %v9843_v50 = vadd.f32 %v4016_v37, %v3970_v24  ;;  %v4565_v17 = vmul.f32 %v4563_v51, %v9892_v34  ;;  %v4578_v24 = vmul.f32 %v4577_v49, %v9880_v28 }
 0x56b   : > { %v3967_v43 = vpop.permute.xlu1 %3966  ;;  %v3979_v8 = vpop.permute.xlu0 %3978  ;;  %v4591_v56 = vstv %s9895_s20  ;;  %s10046_s20 = sld [smem:[#allocation12 + $0xd0]] }
 0x56c   : > { %v3971_v58 = vadd.f32 %v3967_v43, %v3901_v61  ;;  %v3984_v23 = vadd.f32 %v3979_v8, %v3914_v3  ;;  %v4579_v61 = vmul.f32 %v4577_v49, %v9892_v34  ;;  %v4592_v3 = vmul.f32 %v4591_v56, %v9880_v28 }
 0x56d   : > { %4468 = vrot.lane.b32.xlu1 %v4463_v9, %s6727_s23  ;;  %4480 = vrot.lane.b32.xlu0 %v4476_v32, %s6727_s23  ;;  %v4605_v43 = vstv %s9902_s22  ;;  %v4175_v8 = vstv %s9906_s24  ;;  %s10050_s22 = sld [smem:[#allocation12 + $0x15]] }
 0x56e   : > { %v9859_v57 = vadd.f32 %v4017_v14, %v3971_v58  ;;  %v9861_v40 = vadd.f32 %v4022_v27, %v3984_v23  ;;  %v4593_v58 = vmul.f32 %v4591_v56, %v9892_v34  ;;  %v4606_v23 = vmul.f32 %v4605_v43, %v9880_v28  ;;  %s10059_s24 = sld [smem:[#allocation12 + $0x1d]] }
 0x56f   : > { %v3981_v48 = vpop.permute.xlu1 %3980  ;;  %v3993_v62 = vpop.permute.xlu0 %3992  ;;  %v4619_v27 = vstv %s9915_s6  ;;  %v4176_v31 = vmul.f32 %v4175_v8, %v9592_v12  ;;  %v4661_v56 = vstv %s9956_s21  ;;  %s10063_s6 = sld [smem:[#allocation12 + $0x42]] }
 0x570   : > { %v3985_v33 = vadd.f32 %v3981_v48, %v3915_v10  ;;  %v3998_v19 = vadd.f32 %v3993_v62, %v3928_v41  ;;  %v4181_v10 = vstv %s9919_s30  ;;  %v4620_v36 = vmul.f32 %v4619_v27, %v9880_v28  ;;  %s10071_s30 = sld [smem:[#allocation12 + $0x4a]] }
 0x571   : > { %4482 = vrot.lane.b32.xlu1 %v4477_v26, %s6727_s23  ;;  %4494 = vrot.lane.b32.xlu0 %v4490_v6, %s6727_s23  ;;  %v4607_v6 = vmul.f32 %v4605_v43, %v9892_v34  ;;  %v4621_v16 = vmul.f32 %v4619_v27, %v9892_v34  ;;  %v4675_v27 = vstv %s9974_s26  ;;  %s10107_s21 = sld [smem:[#allocation12 + $0xc9]] }
 0x572   : > { %v9874_v47 = vadd.f32 %v4023_v59, %v3985_v33  ;;  %v9876_v21 = vadd.f32 %v4028_v63, %v3998_v19  ;;  %v4633_v33 = vstv %s9927_s8  ;;  %v4177_v63 = vmul.f32 %v4175_v8, %v9604_v13  ;;  %s10077_s8 = sld [smem:[#allocation12 + $0x6f]] }
 0x573   : > { %v3995_v20 = vpop.permute.xlu1 %3994  ;;  %v4039_v7 = vpop.permute.xlu0 %4038  ;;  %s10136_s26 = sld [smem:[#allocation12 + $0x1f]] }
 0x574   : > { %v3999_v11 = vadd.f32 %v3995_v20, %v3929_v29  ;;  %v4044_v9 = vadd.f32 %v4039_v7, %v9807_v0 }
 0x575   : > { %4496 = vrot.lane.b32.xlu1 %v4491_v54, %s6727_s23  ;;  %4508 = vrot.lane.b32.xlu0 %v4504_v4, %s6727_s23 }
 0x576   : > { %v9888_v22 = vadd.f32 %v4029_v5, %v3999_v11  ;;  %v4634_v5 = vmul.f32 %v4633_v33, %v9880_v28 }
 0x577   : > { %v4041_v15 = vpop.permute.xlu1 %4040  ;;  %v4053_v25 = vpop.permute.xlu0 %4052 }
 0x578   : > { %v4045_v0 = vadd.f32 %v4041_v15, %v9823_v18  ;;  %v4058_v41 = vadd.f32 %v4053_v25, %v9825_v35  ;;  %v4182_v18 = vmul.f32 %v4181_v10, %v9592_v12  ;;  %v4187_v35 = vstv %s9933_s29  ;;  %s10084_s29 = sld [smem:[#allocation12 + $0x77]] }
 0x579   : > { %4510 = vrot.lane.b32.xlu1 %v4505_v45, %s6727_s23  ;;  %4554 = vrot.lane.b32.xlu0 %v4550_v46, %s6726_s12  ;;  %v4647_v15 = vstv %s9940_s13  ;;  %v4193_v46 = vstv %s9947_s14  ;;  %s10091_s13 = sld [smem:[#allocation12 + $0x9c]] }
 0x57a   : > { %s10100_s14 = sld [smem:[#allocation12 + $0xa4]] }
 0x57b   : > { %v4055_v44 = vpop.permute.xlu1 %4054  ;;  %v4067_v42 = vpop.permute.xlu0 %4066 }
 0x57c   : > { %v4059_v29 = vadd.f32 %v4055_v44, %v9841_v60  ;;  %v4072_v20 = vadd.f32 %v4067_v42, %v9843_v50  ;;  %v4183_v60 = vmul.f32 %v4181_v10, %v9604_v13  ;;  %v4188_v50 = vmul.f32 %v4187_v35, %v9592_v12 }
 0x57d   : > { %4556 = vrot.lane.b32.xlu1 %v4551_v38, %s6726_s12  ;;  %4568 = vrot.lane.b32.xlu0 %v4564_v52, %s6726_s12 }
 0x57f   : > { %v9908_v53 = vpop.permute.xlu1 %4068  ;;  %v9910_v30 = vpop.permute.xlu0 %4080 }
 0x580   : > { %v4073_v51 = vadd.f32 %v9908_v53, %v9859_v57  ;;  %v4086_v44 = vadd.f32 %v9910_v30, %v9861_v40  ;;  %v4189_v57 = vmul.f32 %v4187_v35, %v9604_v13  ;;  %v4194_v40 = vmul.f32 %v4193_v46, %v9592_v12  ;;  %v10036_v35 = vld [vmem:[#allocation3 + $0x50] sm:$0xff] }
 0x581   : > { %4570 = vrot.lane.b32.xlu1 %v4565_v17, %s6726_s12  ;;  %4582 = vrot.lane.b32.xlu0 %v4578_v24, %s6726_s12  ;;  %v4635_v17 = vmul.f32 %v4633_v33, %v9892_v34  ;;  %v4648_v24 = vmul.f32 %v4647_v15, %v9880_v28  ;;  %v4199_v53 = vstv %s9963_s25  ;;  %v4721_v33 = vstv %s9992_s11  ;;  %s10118_s25 = sld [smem:[#allocation12 + $0xd1]] }
 0x582   : > { %s10154_s11 = sld [smem:[#allocation12 + $0x4c]] }
 0x583   : > { %v9921_v37 = vpop.permute.xlu1 %4082  ;;  %v9923_v2 = vpop.permute.xlu0 %4094 }
 0x584   : > { %v4087_v30 = vadd.f32 %v9921_v37, %v9874_v47  ;;  %v4100_v43 = vadd.f32 %v9923_v2, %v9876_v21  ;;  %v4195_v47 = vmul.f32 %v4193_v46, %v9604_v13  ;;  %v4200_v21 = vmul.f32 %v4199_v53, %v9592_v12 }
 0x585   : > { %4584 = vrot.lane.b32.xlu1 %v4579_v61, %s6726_s12  ;;  %4596 = vrot.lane.b32.xlu0 %v4592_v3, %s6726_s12 }
 0x587   : > { %v9936_v32 = vpop.permute.xlu1 %4096  ;;  %v4109_v1 = vpop.permute.xlu0 %4108 }
 0x588   : > { %v4114_v14 = vadd.f32 %v4109_v1, %v4044_v9  ;;  %v4101_v37 = vadd.f32 %v9936_v32, %v9888_v22 }
 0x589   : > { %4598 = vrot.lane.b32.xlu1 %v4593_v58, %s6726_s12  ;;  %4610 = vrot.lane.b32.xlu0 %v4606_v23, %s6726_s12  ;;  %v4649_v23 = vmul.f32 %v4647_v15, %v9892_v34 }
 0x58a   : > { %v9951_v48 = vadd.f32 %v4176_v31, %v4114_v14  ;;  %v4662_v14 = vmul.f32 %v4661_v56, %v9880_v28 }
 0x58b   : > { %v4111_v62 = vpop.permute.xlu1 %4110  ;;  %v4123_v26 = vpop.permute.xlu0 %4122 }
 0x58c   : > { %v4115_v19 = vadd.f32 %v4111_v62, %v4045_v0  ;;  %v4128_v59 = vadd.f32 %v4123_v26, %v4058_v41  ;;  %v4663_v26 = vmul.f32 %v4661_v56, %v9892_v34 }
 0x58d   : > { %4612 = vrot.lane.b32.xlu1 %v4607_v6, %s6726_s12  ;;  %4624 = vrot.lane.b32.xlu0 %v4620_v36, %s6727_s23  ;;  %v4676_v6 = vmul.f32 %v4675_v27, %v9880_v28  ;;  %v10024_v36 = vld [vmem:[#allocation3 + $0x48] sm:$0xff] }
 0x58e   : > { %v9967_v7 = vadd.f32 %v4177_v63, %v4115_v19  ;;  %v9969_v54 = vadd.f32 %v4182_v18, %v4128_v59  ;;  %v4201_v19 = vmul.f32 %v4199_v53, %v9604_v13  ;;  %v4677_v63 = vmul.f32 %v4675_v27, %v9892_v34 }
 0x58f   : > { %v4125_v4 = vpop.permute.xlu1 %4124  ;;  %v4137_v11 = vpop.permute.xlu0 %4136  ;;  %v4722_v18 = vmul.f32 %v4721_v33, %v10024_v36 }
 0x590   : > { %v4129_v25 = vadd.f32 %v4125_v4, %v4059_v29  ;;  %v4142_v45 = vadd.f32 %v4137_v11, %v4072_v20  ;;  %v4735_v29 = vstv %s10010_s15  ;;  %v4723_v4 = vmul.f32 %v4721_v33, %v10036_v35  ;;  %s10171_s15 = sld [smem:[#allocation12 + $0x79]] }
 0x591   : > { %4626 = vrot.lane.b32.xlu1 %v4621_v16, %s6727_s23  ;;  %4638 = vrot.lane.b32.xlu0 %v4634_v5, %s6727_s23  ;;  %v4736_v11 = vmul.f32 %v4735_v29, %v10024_v36  ;;  %v4749_v16 = vstv %s10027_s16  ;;  %s10183_s16 = sld [smem:[#allocation12 + $0xa6]] }
 0x592   : > { %v9985_v42 = vadd.f32 %v4183_v60, %v4129_v25  ;;  %v9987_v38 = vadd.f32 %v4188_v50, %v4142_v45  ;;  %v4737_v25 = vmul.f32 %v4735_v29, %v10036_v35  ;;  %v4750_v45 = vmul.f32 %v4749_v16, %v10024_v36 }
 0x593   : > { %v4139_v52 = vpop.permute.xlu1 %4138  ;;  %v4151_v49 = vpop.permute.xlu0 %4150  ;;  %v4763_v60 = vstv %s10039_s19  ;;  %s10190_s19 = sld [smem:[#allocation12 + $0xd3]] }
 0x594   : > { %v4143_v61 = vadd.f32 %v4139_v52, %v4073_v51  ;;  %v4156_v3 = vadd.f32 %v4151_v49, %v4086_v44  ;;  %v4751_v51 = vmul.f32 %v4749_v16, %v10036_v35  ;;  %v4764_v44 = vmul.f32 %v4763_v60, %v10024_v36 }
 0x595   : > { %4640 = vrot.lane.b32.xlu1 %v4635_v17, %s6727_s23  ;;  %4652 = vrot.lane.b32.xlu0 %v4648_v24, %s6727_s23  ;;  %v4777_v52 = vstv %s10046_s20  ;;  %v4347_v49 = vstv %s10050_s22  ;;  %s10194_s20 = sld [smem:[#allocation12 + $0x18]] }
 0x596   : > { %v10003_v8 = vadd.f32 %v4189_v57, %v4143_v61  ;;  %v10005_v9 = vadd.f32 %v4194_v40, %v4156_v3  ;;  %v4765_v61 = vmul.f32 %v4763_v60, %v10036_v35  ;;  %v4778_v3 = vmul.f32 %v4777_v52, %v10024_v36  ;;  %s10203_s22 = sld [smem:[#allocation12 + $0x20]] }
 0x597   : > { %v4153_v1 = vpop.permute.xlu1 %4152  ;;  %v4165_v58 = vpop.permute.xlu0 %4164  ;;  %v4791_v40 = vstv %s10059_s24  ;;  %v4348_v53 = vmul.f32 %v4347_v49, %v9736_v55  ;;  %v4833_v60 = vstv %s10100_s14  ;;  %s10207_s24 = sld [smem:[#allocation12 + $0x45]] }
 0x598   : > { %v4157_v31 = vadd.f32 %v4153_v1, %v4087_v30  ;;  %v4170_v10 = vadd.f32 %v4165_v58, %v4100_v43  ;;  %v4353_v30 = vstv %s10063_s6  ;;  %v4792_v27 = vmul.f32 %v4791_v40, %v10024_v36  ;;  %s10215_s6 = sld [smem:[#allocation12 + $0x4d]] }
 0x599   : > { %4654 = vrot.lane.b32.xlu1 %v4649_v23, %s6727_s23  ;;  %4666 = vrot.lane.b32.xlu0 %v4662_v14, %s6727_s23  ;;  %v4779_v14 = vmul.f32 %v4777_v52, %v10036_v35  ;;  %v4793_v33 = vmul.f32 %v4791_v40, %v10036_v35  ;;  %v4847_v40 = vstv %s10118_s25  ;;  %s10251_s14 = sld [smem:[#allocation12 + $0xcc]] }
 0x59a   : > { %v10018_v2 = vadd.f32 %v4195_v47, %v4157_v31  ;;  %v10020_v0 = vadd.f32 %v4200_v21, %v4170_v10  ;;  %v4805_v31 = vstv %s10071_s30  ;;  %v4349_v21 = vmul.f32 %v4347_v49, %v9748_v39  ;;  %s10221_s30 = sld [smem:[#allocation12 + $0x72]] }
 0x59b   : > { %v4167_v41 = vpop.permute.xlu1 %4166  ;;  %v4211_v62 = vpop.permute.xlu0 %4210  ;;  %s10280_s25 = sld [smem:[#allocation12 + $0x22]] }
 0x59c   : > { %v4171_v12 = vadd.f32 %v4167_v41, %v4101_v37  ;;  %v4216_v17 = vadd.f32 %v4211_v62, %v9951_v48 }
 0x59d   : > { %4668 = vrot.lane.b32.xlu1 %v4663_v26, %s6727_s23  ;;  %4680 = vrot.lane.b32.xlu0 %v4676_v6, %s6727_s23 }
 0x59e   : > { %v10032_v22 = vadd.f32 %v4201_v19, %v4171_v12  ;;  %v4806_v19 = vmul.f32 %v4805_v31, %v10024_v36 }
 0x59f   : > { %v4213_v32 = vpop.permute.xlu1 %4212  ;;  %v4225_v59 = vpop.permute.xlu0 %4224 }
 0x5a0   : > { %v4217_v48 = vadd.f32 %v4213_v32, %v9967_v7  ;;  %v4230_v43 = vadd.f32 %v4225_v59, %v9969_v54  ;;  %v4354_v7 = vmul.f32 %v4353_v30, %v9736_v55  ;;  %v4359_v54 = vstv %s10077_s8  ;;  %s10228_s8 = sld [smem:[#allocation12 + $0x7a]] }
 0x5a1   : > { %4682 = vrot.lane.b32.xlu1 %v4677_v63, %s6727_s23  ;;  %4726 = vrot.lane.b32.xlu0 %v4722_v18, %s6726_s12  ;;  %v4819_v32 = vstv %s10084_s29  ;;  %v4365_v18 = vstv %s10091_s13  ;;  %s10235_s29 = sld [smem:[#allocation12 + $0x9f]] }
 0x5a2   : > { %s10244_s13 = sld [smem:[#allocation12 + $0xa7]] }
 0x5a3   : > { %v4227_v13 = vpop.permute.xlu1 %4226  ;;  %v4239_v20 = vpop.permute.xlu0 %4238 }
 0x5a4   : > { %v4231_v37 = vadd.f32 %v4227_v13, %v9985_v42  ;;  %v4244_v41 = vadd.f32 %v4239_v20, %v9987_v38  ;;  %v4355_v42 = vmul.f32 %v4353_v30, %v9748_v39  ;;  %v4360_v38 = vmul.f32 %v4359_v54, %v9736_v55 }
 0x5a5   : > { %4728 = vrot.lane.b32.xlu1 %v4723_v4, %s6726_s12  ;;  %4740 = vrot.lane.b32.xlu0 %v4736_v11, %s6726_s12 }
 0x5a7   : > { %v10052_v5 = vpop.permute.xlu1 %4240  ;;  %v10054_v15 = vpop.permute.xlu0 %4252 }
 0x5a8   : > { %v4245_v29 = vadd.f32 %v10052_v5, %v10003_v8  ;;  %v4258_v13 = vadd.f32 %v10054_v15, %v10005_v9  ;;  %v4361_v8 = vmul.f32 %v4359_v54, %v9748_v39  ;;  %v4366_v9 = vmul.f32 %v4365_v18, %v9736_v55  ;;  %v10180_v54 = vld [vmem:[#allocation3 + $0x51] sm:$0xff] }
 0x5a9   : > { %4742 = vrot.lane.b32.xlu1 %v4737_v25, %s6726_s12  ;;  %4754 = vrot.lane.b32.xlu0 %v4750_v45, %s6726_s12  ;;  %v4807_v25 = vmul.f32 %v4805_v31, %v10036_v35  ;;  %v4820_v45 = vmul.f32 %v4819_v32, %v10024_v36  ;;  %v4371_v5 = vstv %s10107_s21  ;;  %v4893_v31 = vstv %s10136_s26  ;;  %s10262_s21 = sld [smem:[#allocation12 + $0xd4]] }
 0x5aa   : > { %s10298_s26 = sld [smem:[#allocation12 + $0x4f]] }
 0x5ab   : > { %v10065_v50 = vpop.permute.xlu1 %4254  ;;  %v10067_v46 = vpop.permute.xlu0 %4266 }
 0x5ac   : > { %v4259_v15 = vadd.f32 %v10065_v50, %v10018_v2  ;;  %v4272_v52 = vadd.f32 %v10067_v46, %v10020_v0  ;;  %v4367_v2 = vmul.f32 %v4365_v18, %v9748_v39  ;;  %v4372_v0 = vmul.f32 %v4371_v5, %v9736_v55 }
 0x5ad   : > { %4756 = vrot.lane.b32.xlu1 %v4751_v51, %s6726_s12  ;;  %4768 = vrot.lane.b32.xlu0 %v4764_v44, %s6726_s12 }
 0x5af   : > { %v10080_v24 = vpop.permute.xlu1 %4268  ;;  %v4281_v56 = vpop.permute.xlu0 %4280 }
 0x5b0   : > { %v4286_v57 = vadd.f32 %v4281_v56, %v4216_v17  ;;  %v4273_v50 = vadd.f32 %v10080_v24, %v10032_v22 }
 0x5b1   : > { %4770 = vrot.lane.b32.xlu1 %v4765_v61, %s6726_s12  ;;  %4782 = vrot.lane.b32.xlu0 %v4778_v3, %s6726_s12  ;;  %v4821_v3 = vmul.f32 %v4819_v32, %v10036_v35 }
 0x5b2   : > { %v10095_v1 = vadd.f32 %v4348_v53, %v4286_v57  ;;  %v4834_v57 = vmul.f32 %v4833_v60, %v10024_v36 }
 0x5b3   : > { %v4283_v58 = vpop.permute.xlu1 %4282  ;;  %v4295_v23 = vpop.permute.xlu0 %4294 }
 0x5b4   : > { %v4287_v10 = vadd.f32 %v4283_v58, %v4217_v48  ;;  %v4300_v47 = vadd.f32 %v4295_v23, %v4230_v43  ;;  %v4835_v23 = vmul.f32 %v4833_v60, %v10036_v35 }
 0x5b5   : > { %4784 = vrot.lane.b32.xlu1 %v4779_v14, %s6726_s12  ;;  %4796 = vrot.lane.b32.xlu0 %v4792_v27, %s6727_s23  ;;  %v4848_v14 = vmul.f32 %v4847_v40, %v10024_v36  ;;  %v10168_v27 = vld [vmem:[#allocation3 + $0x49] sm:$0xff] }
 0x5b6   : > { %v10111_v62 = vadd.f32 %v4349_v21, %v4287_v10  ;;  %v10113_v26 = vadd.f32 %v4354_v7, %v4300_v47  ;;  %v4373_v10 = vmul.f32 %v4371_v5, %v9748_v39  ;;  %v4849_v21 = vmul.f32 %v4847_v40, %v10036_v35 }
 0x5b7   : > { %v4297_v6 = vpop.permute.xlu1 %4296  ;;  %v4309_v12 = vpop.permute.xlu0 %4308  ;;  %v4894_v7 = vmul.f32 %v4893_v31, %v10168_v27 }
 0x5b8   : > { %v4301_v59 = vadd.f32 %v4297_v6, %v4231_v37  ;;  %v4314_v63 = vadd.f32 %v4309_v12, %v4244_v41  ;;  %v4907_v37 = vstv %s10154_s11  ;;  %v4895_v6 = vmul.f32 %v4893_v31, %v10180_v54  ;;  %s10315_s11 = sld [smem:[#allocation12 + $0x7c]] }
 0x5b9   : > { %4798 = vrot.lane.b32.xlu1 %v4793_v33, %s6727_s23  ;;  %4810 = vrot.lane.b32.xlu0 %v4806_v19, %s6727_s23  ;;  %v4908_v12 = vmul.f32 %v4907_v37, %v10168_v27  ;;  %v4921_v33 = vstv %s10171_s15  ;;  %s10327_s15 = sld [smem:[#allocation12 + $0xa9]] }
 0x5ba   : > { %v10129_v20 = vadd.f32 %v4355_v42, %v4301_v59  ;;  %v10131_v4 = vadd.f32 %v4360_v38, %v4314_v63  ;;  %v4909_v59 = vmul.f32 %v4907_v37, %v10180_v54  ;;  %v4922_v63 = vmul.f32 %v4921_v33, %v10168_v27 }
 0x5bb   : > { %v4311_v11 = vpop.permute.xlu1 %4310  ;;  %v4323_v16 = vpop.permute.xlu0 %4322  ;;  %v4935_v42 = vstv %s10183_s16  ;;  %s10334_s16 = sld [smem:[#allocation12 + $0xd6]] }
 0x5bc   : > { %v4315_v51 = vadd.f32 %v4311_v11, %v4245_v29  ;;  %v4328_v44 = vadd.f32 %v4323_v16, %v4258_v13  ;;  %v4923_v29 = vmul.f32 %v4921_v33, %v10180_v54  ;;  %v4936_v13 = vmul.f32 %v4935_v42, %v10168_v27 }
 0x5bd   : > { %4812 = vrot.lane.b32.xlu1 %v4807_v25, %s6727_s23  ;;  %4824 = vrot.lane.b32.xlu0 %v4820_v45, %s6727_s23  ;;  %v4949_v11 = vstv %s10190_s19  ;;  %v4519_v16 = vstv %s10194_s20  ;;  %s10338_s19 = sld [smem:[#allocation12 + $0x1b]] }
 0x5be   : > { %v10147_v49 = vadd.f32 %v4361_v8, %v4315_v51  ;;  %v10149_v17 = vadd.f32 %v4366_v9, %v4328_v44  ;;  %v4937_v51 = vmul.f32 %v4935_v42, %v10180_v54  ;;  %v4950_v44 = vmul.f32 %v4949_v11, %v10168_v27  ;;  %s10347_s20 = sld [smem:[#allocation12 + $0x23]] }
 0x5bf   : > { %v4325_v56 = vpop.permute.xlu1 %4324  ;;  %v4337_v61 = vpop.permute.xlu0 %4336  ;;  %v4963_v9 = vstv %s10203_s22  ;;  %v4520_v5 = vmul.f32 %v4519_v16, %v9880_v28  ;;  %v5005_v42 = vstv %s10244_s13  ;;  %s10351_s22 = sld [smem:[#allocation12 + $0x48]] }
 0x5c0   : > { %v4329_v53 = vadd.f32 %v4325_v56, %v4259_v15  ;;  %v4342_v30 = vadd.f32 %v4337_v61, %v4272_v52  ;;  %v4525_v15 = vstv %s10207_s24  ;;  %v4964_v40 = vmul.f32 %v4963_v9, %v10168_v27  ;;  %s10359_s24 = sld [smem:[#allocation12 + $0x50]] }
 0x5c1   : > { %4826 = vrot.lane.b32.xlu1 %v4821_v3, %s6727_s23  ;;  %4838 = vrot.lane.b32.xlu0 %v4834_v57, %s6727_s23  ;;  %v4951_v57 = vmul.f32 %v4949_v11, %v10180_v54  ;;  %v4965_v31 = vmul.f32 %v4963_v9, %v10180_v54  ;;  %v5019_v9 = vstv %s10262_s21  ;;  %s10397_s13 = sld [smem:[#allocation12 + $0xcf]] }
 0x5c2   : > { %v10162_v46 = vadd.f32 %v4367_v2, %v4329_v53  ;;  %v10164_v48 = vadd.f32 %v4372_v0, %v4342_v30  ;;  %v4977_v53 = vstv %s10215_s6  ;;  %v4521_v0 = vmul.f32 %v4519_v16, %v9892_v34  ;;  %s10365_s6 = sld [smem:[#allocation12 + $0x75]] }
 0x5c3   : > { %v4339_v43 = vpop.permute.xlu1 %4338  ;;  %v4383_v58 = vpop.permute.xlu0 %4382  ;;  %s10426_s21 = sld [smem:[#allocation12 + $0x52]] }
 0x5c4   : > { %v4343_v55 = vadd.f32 %v4339_v43, %v4273_v50  ;;  %v4388_v25 = vadd.f32 %v4383_v58, %v10095_v1 }
 0x5c5   : > { %4840 = vrot.lane.b32.xlu1 %v4835_v23, %s6727_s23  ;;  %4852 = vrot.lane.b32.xlu0 %v4848_v14, %s6727_s23 }
 0x5c6   : > { %v10176_v22 = vadd.f32 %v4373_v10, %v4343_v55  ;;  %v4978_v10 = vmul.f32 %v4977_v53, %v10168_v27 }
 0x5c7   : > { %v4385_v24 = vpop.permute.xlu1 %4384  ;;  %v4397_v47 = vpop.permute.xlu0 %4396 }
 0x5c8   : > { %v4389_v1 = vadd.f32 %v4385_v24, %v10111_v62  ;;  %v4402_v52 = vadd.f32 %v4397_v47, %v10113_v26  ;;  %v4526_v62 = vmul.f32 %v4525_v15, %v9880_v28  ;;  %v4531_v26 = vstv %s10221_s30  ;;  %s10374_s30 = sld [smem:[#allocation12 + $0x7d]] }
 0x5c9   : > { %4854 = vrot.lane.b32.xlu1 %v4849_v21, %s6727_s23  ;;  %4898 = vrot.lane.b32.xlu0 %v4894_v7, %s6726_s12  ;;  %v4991_v24 = vstv %s10228_s8  ;;  %v4537_v7 = vstv %s10235_s29  ;;  %s10381_s8 = sld [smem:[#allocation12 + $0xa2]] }
 0x5ca   : > { %s10390_s29 = sld [smem:[#allocation12 + $0xaa]] }
 0x5cb   : > { %v4399_v39 = vpop.permute.xlu1 %4398  ;;  %v4411_v41 = vpop.permute.xlu0 %4410 }
 0x5cc   : > { %v4403_v50 = vadd.f32 %v4399_v39, %v10129_v20  ;;  %v4416_v43 = vadd.f32 %v4411_v41, %v10131_v4  ;;  %v4527_v20 = vmul.f32 %v4525_v15, %v9892_v34  ;;  %v4532_v4 = vmul.f32 %v4531_v26, %v9880_v28 }
 0x5cd   : > { %4900 = vrot.lane.b32.xlu1 %v4895_v6, %s6726_s12  ;;  %4912 = vrot.lane.b32.xlu0 %v4908_v12, %s6726_s12 }
 0x5cf   : > { %v10196_v19 = vpop.permute.xlu1 %4412  ;;  %v10198_v32 = vpop.permute.xlu0 %4424 }
 0x5d0   : > { %v4417_v37 = vadd.f32 %v10196_v19, %v10147_v49  ;;  %v4430_v39 = vadd.f32 %v10198_v32, %v10149_v17  ;;  %v4533_v49 = vmul.f32 %v4531_v26, %v9892_v34  ;;  %v4538_v17 = vmul.f32 %v4537_v7, %v9880_v28  ;;  %v10324_v26 = vld [vmem:[#allocation3 + $0x52] sm:$0xff] }
 0x5d1   : > { %4914 = vrot.lane.b32.xlu1 %v4909_v59, %s6726_s12  ;;  %4926 = vrot.lane.b32.xlu0 %v4922_v63, %s6726_s12  ;;  %v4979_v59 = vmul.f32 %v4977_v53, %v10180_v54  ;;  %v4992_v63 = vmul.f32 %v4991_v24, %v10168_v27  ;;  %v4543_v19 = vstv %s10251_s14  ;;  %v5065_v53 = vstv %s10280_s25  ;;  %s10408_s14 = sld [smem:[#allocation12 + $0x25]] }
 0x5d2   : > { %s10448_s25 = sld [smem:[#allocation12 + $0xd7]] }
 0x5d3   : > { %v10209_v38 = vpop.permute.xlu1 %4426  ;;  %v10211_v18 = vpop.permute.xlu0 %4438 }
 0x5d4   : > { %v4431_v32 = vadd.f32 %v10209_v38, %v10162_v46  ;;  %v4444_v11 = vadd.f32 %v10211_v18, %v10164_v48  ;;  %v4539_v46 = vmul.f32 %v4537_v7, %v9892_v34  ;;  %v4544_v48 = vmul.f32 %v4543_v19, %v9880_v28 }
 0x5d5   : > { %4928 = vrot.lane.b32.xlu1 %v4923_v29, %s6726_s12  ;;  %4940 = vrot.lane.b32.xlu0 %v4936_v13, %s6726_s12 }
 0x5d7   : > { %v10224_v45 = vpop.permute.xlu1 %4440  ;;  %v4453_v60 = vpop.permute.xlu0 %4452 }
 0x5d8   : > { %v4458_v8 = vadd.f32 %v4453_v60, %v4388_v25  ;;  %v4445_v38 = vadd.f32 %v10224_v45, %v10176_v22 }
 0x5d9   : > { %4942 = vrot.lane.b32.xlu1 %v4937_v51, %s6726_s12  ;;  %4954 = vrot.lane.b32.xlu0 %v4950_v44, %s6726_s12  ;;  %v4993_v44 = vmul.f32 %v4991_v24, %v10180_v54 }
 0x5da   : > { %v10239_v56 = vadd.f32 %v4520_v5, %v4458_v8  ;;  %v5006_v8 = vmul.f32 %v5005_v42, %v10168_v27 }
 0x5db   : > { %v4455_v61 = vpop.permute.xlu1 %4454  ;;  %v4467_v3 = vpop.permute.xlu0 %4466 }
 0x5dc   : > { %v4459_v30 = vadd.f32 %v4455_v61, %v4389_v1  ;;  %v4472_v2 = vadd.f32 %v4467_v3, %v4402_v52  ;;  %v5007_v3 = vmul.f32 %v5005_v42, %v10180_v54 }
 0x5dd   : > { %4956 = vrot.lane.b32.xlu1 %v4951_v57, %s6726_s12  ;;  %4968 = vrot.lane.b32.xlu0 %v4964_v40, %s6727_s23  ;;  %v5020_v57 = vmul.f32 %v5019_v9, %v10168_v27  ;;  %v10312_v40 = vld [vmem:[#allocation3 + $0x4a] sm:$0xff] }
 0x5de   : > { %v10255_v58 = vadd.f32 %v4521_v0, %v4459_v30  ;;  %v10257_v23 = vadd.f32 %v4526_v62, %v4472_v2  ;;  %v4545_v30 = vmul.f32 %v4543_v19, %v9892_v34  ;;  %v5021_v0 = vmul.f32 %v5019_v9, %v10180_v54 }
 0x5df   : > { %v4469_v14 = vpop.permute.xlu1 %4468  ;;  %v4481_v55 = vpop.permute.xlu0 %4480  ;;  %v5066_v62 = vmul.f32 %v5065_v53, %v10312_v40 }
 0x5e0   : > { %v4473_v47 = vadd.f32 %v4469_v14, %v4403_v50  ;;  %v4486_v21 = vadd.f32 %v4481_v55, %v4416_v43  ;;  %v5079_v50 = vstv %s10298_s26  ;;  %v5067_v14 = vmul.f32 %v5065_v53, %v10324_v26  ;;  %s10465_s26 = sld [smem:[#allocation12 + $0x7f]] }
 0x5e1   : > { %4970 = vrot.lane.b32.xlu1 %v4965_v31, %s6727_s23  ;;  %4982 = vrot.lane.b32.xlu0 %v4978_v10, %s6727_s23  ;;  %v5080_v55 = vmul.f32 %v5079_v50, %v10312_v40  ;;  %v5093_v31 = vstv %s10315_s11  ;;  %s10475_s11 = sld [smem:[#allocation12 + $0x26]] }
 0x5e2   : > { %v10273_v41 = vadd.f32 %v4527_v20, %v4473_v47  ;;  %v10275_v6 = vadd.f32 %v4532_v4, %v4486_v21  ;;  %v5081_v47 = vmul.f32 %v5079_v50, %v10324_v26  ;;  %v5094_v21 = vmul.f32 %v5093_v31, %v10312_v40 }
 0x5e3   : > { %v4483_v12 = vpop.permute.xlu1 %4482  ;;  %v4495_v33 = vpop.permute.xlu0 %4494  ;;  %v5107_v20 = vstv %s10327_s15  ;;  %s10482_s15 = sld [smem:[#allocation12 + $0x53]] }
 0x5e4   : > { %v4487_v29 = vadd.f32 %v4483_v12, %v4417_v37  ;;  %v4500_v13 = vadd.f32 %v4495_v33, %v4430_v39  ;;  %v5095_v37 = vmul.f32 %v5093_v31, %v10324_v26  ;;  %v5108_v39 = vmul.f32 %v5107_v20, %v10312_v40 }
 0x5e5   : > { %4984 = vrot.lane.b32.xlu1 %v4979_v59, %s6727_s23  ;;  %4996 = vrot.lane.b32.xlu0 %v4992_v63, %s6727_s23  ;;  %v5121_v12 = vstv %s10334_s16  ;;  %v4691_v33 = vstv %s10338_s19  ;;  %s10486_s16 = sld [smem:[#allocation12 + $0x1e]] }
 0x5e6   : > { %v10291_v16 = vadd.f32 %v4533_v49, %v4487_v29  ;;  %v10293_v25 = vadd.f32 %v4538_v17, %v4500_v13  ;;  %v5109_v29 = vmul.f32 %v5107_v20, %v10324_v26  ;;  %v5122_v13 = vmul.f32 %v5121_v12, %v10312_v40  ;;  %s10495_s19 = sld [smem:[#allocation12 + $0xac]] }
 0x5e7   : > { %v4497_v60 = vpop.permute.xlu1 %4496  ;;  %v4509_v51 = vpop.permute.xlu0 %4508  ;;  %v5135_v17 = vstv %s10347_s20  ;;  %v4692_v19 = vmul.f32 %v4691_v33, %v10024_v36  ;;  %v5177_v20 = vstv %s10390_s29  ;;  %s10499_s20 = sld [smem:[#allocation12 + $0x4b]] }
 0x5e8   : > { %v4501_v5 = vadd.f32 %v4497_v60, %v4431_v32  ;;  %v4514_v15 = vadd.f32 %v4509_v51, %v4444_v11  ;;  %v5137_v9 = vmul.f32 %v5135_v17, %v10324_v26  ;;  %s10543_s29 = sld [smem:[#allocation12 + $0xd2]] }
 0x5e9   : > { %4998 = vrot.lane.b32.xlu1 %v4993_v44, %s6727_s23  ;;  %5010 = vrot.lane.b32.xlu0 %v5006_v8, %s6727_s23  ;;  %v5136_v8 = vmul.f32 %v5135_v17, %v10312_v40  ;;  %v5178_v17 = vmul.f32 %v5177_v20, %v10312_v40 }
 0x5ea   : > { %v10306_v18 = vadd.f32 %v4539_v46, %v4501_v5  ;;  %v10308_v1 = vadd.f32 %v4544_v48, %v4514_v15  ;;  %v5149_v5 = vstv %s10359_s24  ;;  %v4693_v48 = vmul.f32 %v4691_v33, %v10036_v35  ;;  %s10513_s24 = sld [smem:[#allocation12 + $0x78]] }
 0x5eb   : > { %v4511_v52 = vpop.permute.xlu1 %4510  ;;  %v4555_v61 = vpop.permute.xlu0 %4554  ;;  %v5150_v53 = vmul.f32 %v5149_v5, %v10312_v40 }
 0x5ec   : > { %v4515_v28 = vadd.f32 %v4511_v52, %v4445_v38  ;;  %v4560_v59 = vadd.f32 %v4555_v61, %v10239_v56  ;;  %v4697_v56 = vstv %s10351_s22  ;;  %s10507_s22 = sld [smem:[#allocation12 + $0x80]] }
 0x5ed   : > { %5012 = vrot.lane.b32.xlu1 %v5007_v3, %s6727_s23  ;;  %5024 = vrot.lane.b32.xlu0 %v5020_v57, %s6727_s23 }
 0x5ee   : > { %v10320_v22 = vadd.f32 %v4545_v30, %v4515_v28  ;;  %v5151_v30 = vmul.f32 %v5149_v5, %v10324_v26  ;;  %v10462_v5 = vld [vmem:[#allocation3 + $0x68] sm:$0xff] }
 0x5ef   : > { %v4557_v45 = vpop.permute.xlu1 %4556  ;;  %v4569_v2 = vpop.permute.xlu0 %4568 }
 0x5f0   : > { %v4561_v32 = vadd.f32 %v4557_v45, %v10255_v58  ;;  %v4574_v11 = vadd.f32 %v4569_v2, %v10257_v23  ;;  %v4698_v58 = vmul.f32 %v4697_v56, %v10024_v36  ;;  %v4703_v23 = vstv %s10365_s6  ;;  %s10520_s6 = sld [smem:[#allocation12 + $0xd9]] }
 0x5f1   : > { %5026 = vrot.lane.b32.xlu1 %v5021_v0, %s6727_s23  ;;  %5070 = vrot.lane.b32.xlu0 %v5066_v62, %s6726_s12  ;;  %v5163_v45 = vstv %s10374_s30  ;;  %v4709_v62 = vstv %s10381_s8  ;;  %s10527_s30 = sld [smem:[#allocation12 + $0xa5]] }
 0x5f2   : > { %s10536_s8 = sld [smem:[#allocation12 + $0xad]] }
 0x5f3   : > { %v4571_v34 = vpop.permute.xlu1 %4570  ;;  %v4583_v43 = vpop.permute.xlu0 %4582 }
 0x5f4   : > { %v4575_v38 = vadd.f32 %v4571_v34, %v10273_v41  ;;  %v4588_v52 = vadd.f32 %v4583_v43, %v10275_v6  ;;  %v4699_v41 = vmul.f32 %v4697_v56, %v10036_v35  ;;  %v4704_v6 = vmul.f32 %v4703_v23, %v10024_v36  ;;  %v10446_v56 = vld [vmem:[#allocation3 + $0x60] sm:$0xff] }
 0x5f5   : > { %5072 = vrot.lane.b32.xlu1 %v5067_v14, %s6726_s12  ;;  %5084 = vrot.lane.b32.xlu0 %v5080_v55, %s6726_s12 }
 0x5f7   : > { %v10340_v10 = vpop.permute.xlu1 %4584  ;;  %v10342_v24 = vpop.permute.xlu0 %4596 }
 0x5f8   : > { %v4589_v50 = vadd.f32 %v10340_v10, %v10291_v16  ;;  %v4602_v34 = vadd.f32 %v10342_v24, %v10293_v25  ;;  %v4705_v16 = vmul.f32 %v4703_v23, %v10036_v35  ;;  %v4710_v25 = vmul.f32 %v4709_v62, %v10024_v36 }
 0x5f9   : > { %5086 = vrot.lane.b32.xlu1 %v5081_v47, %s6726_s12  ;;  %5098 = vrot.lane.b32.xlu0 %v5094_v21, %s6726_s12  ;;  %v5164_v47 = vmul.f32 %v5163_v45, %v10312_v40  ;;  %v5165_v21 = vmul.f32 %v5163_v45, %v10324_v26  ;;  %v4715_v10 = vstv %s10397_s13  ;;  %s10554_s13 = sld [smem:[#allocation12 + $0x28]] }
 0x5fb   : > { %v10353_v4 = vpop.permute.xlu1 %4598  ;;  %v10355_v7 = vpop.permute.xlu0 %4610 }
 0x5fc   : > { %v4603_v24 = vadd.f32 %v10353_v4, %v10306_v18  ;;  %v4616_v33 = vadd.f32 %v10355_v7, %v10308_v1  ;;  %v4711_v1 = vmul.f32 %v4709_v62, %v10036_v35  ;;  %v4716_v4 = vmul.f32 %v4715_v10, %v10024_v36 }
 0x5fd   : > { %5100 = vrot.lane.b32.xlu1 %v5095_v37, %s6726_s12  ;;  %5112 = vrot.lane.b32.xlu0 %v5108_v39, %s6726_s12 }
 0x5ff   : > { %v10368_v63 = vpop.permute.xlu1 %4612  ;;  %v4625_v42 = vpop.permute.xlu0 %4624 }
 0x600   : > { %v4630_v49 = vadd.f32 %v4625_v42, %v4560_v59  ;;  %v4617_v7 = vadd.f32 %v10368_v63, %v10320_v22 }
 0x601   : > { %5114 = vrot.lane.b32.xlu1 %v5109_v29, %s6726_s12  ;;  %5126 = vrot.lane.b32.xlu0 %v5122_v13, %s6726_s12 }
 0x602   : > { %v10385_v60 = vadd.f32 %v4692_v19, %v4630_v49  ;;  %v5123_v49 = vmul.f32 %v5121_v12, %v10324_v26  ;;  %v5237_v19 = vstv %s10408_s14  ;;  %s10572_s14 = sld [smem:[#allocation12 + $0x55]] }
 0x603   : > { %v4627_v51 = vpop.permute.xlu1 %4626  ;;  %v4639_v44 = vpop.permute.xlu0 %4638 }
 0x604   : > { %v4631_v15 = vadd.f32 %v4627_v51, %v4561_v32  ;;  %v4644_v46 = vadd.f32 %v4639_v44, %v4574_v11 }
 0x605   : > { %5140 = vrot.lane.b32.xlu1 %v5136_v8, %s6727_s23  ;;  %5142 = vrot.lane.b32.xlu0 %v5137_v9, %s6727_s23  ;;  %v5179_v8 = vmul.f32 %v5177_v20, %v10324_v26  ;;  %v5238_v9 = vmul.f32 %v5237_v19, %v10446_v56 }
 0x606   : > { %v10401_v61 = vadd.f32 %v4693_v48, %v4631_v15  ;;  %v10403_v3 = vadd.f32 %v4698_v58, %v4644_v46  ;;  %v5251_v15 = vstv %s10426_s21  ;;  %v4717_v46 = vmul.f32 %v4715_v10, %v10036_v35  ;;  %s10592_s21 = sld [smem:[#allocation12 + $0xda]] }
 0x607   : > { %v4641_v57 = vpop.permute.xlu1 %4640  ;;  %v4653_v28 = vpop.permute.xlu0 %4652  ;;  %v5239_v58 = vmul.f32 %v5237_v19, %v10462_v5  ;;  %v5252_v23 = vmul.f32 %v5251_v15, %v10446_v56 }
 0x608   : > { %v4645_v2 = vadd.f32 %v4641_v57, %v4575_v38  ;;  %v4658_v0 = vadd.f32 %v4653_v28, %v4588_v52  ;;  %v5191_v38 = vstv %s10448_s25  ;;  %v5253_v57 = vmul.f32 %v5251_v15, %v10462_v5  ;;  %s10609_s25 = sld [smem:[#allocation12 + $0x82]] }
 0x609   : > { %5154 = vrot.lane.b32.xlu1 %v5150_v53, %s6727_s23  ;;  %5156 = vrot.lane.b32.xlu0 %v5151_v30, %s6727_s23  ;;  %v5192_v28 = vmul.f32 %v5191_v38, %v10312_v40  ;;  %v5265_v53 = vstv %s10465_s26  ;;  %s10619_s26 = sld [smem:[#allocation12 + $0x29]] }
 0x60a   : > { %v10419_v43 = vadd.f32 %v4699_v41, %v4645_v2  ;;  %v10421_v14 = vadd.f32 %v4704_v6, %v4658_v0  ;;  %v5193_v2 = vmul.f32 %v5191_v38, %v10324_v26  ;;  %v5266_v0 = vmul.f32 %v5265_v53, %v10446_v56 }
 0x60b   : > { %v4655_v55 = vpop.permute.xlu1 %4654  ;;  %v4667_v31 = vpop.permute.xlu0 %4666  ;;  %v5307_v41 = vstv %s10475_s11  ;;  %s10626_s11 = sld [smem:[#allocation12 + $0x56]] }
 0x60c   : > { %v4659_v37 = vadd.f32 %v4655_v55, %v4589_v50  ;;  %v4672_v39 = vadd.f32 %v4667_v31, %v4602_v34  ;;  %v5267_v50 = vmul.f32 %v5265_v53, %v10462_v5  ;;  %v5308_v34 = vmul.f32 %v5307_v41, %v10446_v56 }
 0x60d   : > { %5168 = vrot.lane.b32.xlu1 %v5164_v47, %s6727_s23  ;;  %5170 = vrot.lane.b32.xlu0 %v5165_v21, %s6727_s23  ;;  %v5321_v55 = vstv %s10482_s15  ;;  %v4863_v31 = vstv %s10486_s16  ;;  %s10630_s15 = sld [smem:[#allocation12 + $0x21]] }
 0x60e   : > { %v10437_v59 = vadd.f32 %v4705_v16, %v4659_v37  ;;  %v10439_v42 = vadd.f32 %v4710_v25, %v4672_v39  ;;  %v5309_v37 = vmul.f32 %v5307_v41, %v10462_v5  ;;  %v5322_v39 = vmul.f32 %v5321_v55, %v10446_v56  ;;  %s10639_s16 = sld [smem:[#allocation12 + $0xaf]] }
 0x60f   : > { %v4669_v29 = vpop.permute.xlu1 %4668  ;;  %v4681_v13 = vpop.permute.xlu0 %4680  ;;  %v5279_v25 = vstv %s10495_s19  ;;  %v4864_v10 = vmul.f32 %v4863_v31, %v10168_v27  ;;  %v5349_v41 = vstv %s10536_s8  ;;  %s10643_s19 = sld [smem:[#allocation12 + $0x4e]] }
 0x610   : > { %v4673_v32 = vadd.f32 %v4669_v29, %v4603_v24  ;;  %v4686_v18 = vadd.f32 %v4681_v13, %v4616_v33  ;;  %v4869_v24 = vstv %s10499_s20  ;;  %v5280_v19 = vmul.f32 %v5279_v25, %v10446_v56  ;;  %s10651_s20 = sld [smem:[#allocation12 + $0x83]] }
 0x611   : > { %5128 = vrot.lane.b32.xlu1 %v5123_v49, %s6726_s12  ;;  %5182 = vrot.lane.b32.xlu0 %v5178_v17, %s6727_s23  ;;  %v5323_v17 = vmul.f32 %v5321_v55, %v10462_v5  ;;  %v5281_v15 = vmul.f32 %v5279_v25, %v10462_v5  ;;  %v5409_v25 = vstv %s10554_s13  ;;  %s10687_s8 = sld [smem:[#allocation12 + $0xd5]] }
 0x612   : > { %v10456_v12 = vadd.f32 %v4711_v1, %v4673_v32  ;;  %v10458_v11 = vadd.f32 %v4716_v4, %v4686_v18  ;;  %v5335_v32 = vstv %s10507_s22  ;;  %v4865_v4 = vmul.f32 %v4863_v31, %v10180_v54  ;;  %s10657_s22 = sld [smem:[#allocation12 + $0x7b]] }
 0x613   : > { %v4683_v51 = vpop.permute.xlu1 %4682  ;;  %v4727_v44 = vpop.permute.xlu0 %4726  ;;  %s10712_s13 = sld [smem:[#allocation12 + $0x58]] }
 0x614   : > { %v4687_v36 = vadd.f32 %v4683_v51, %v4617_v7  ;;  %v4732_v47 = vadd.f32 %v4727_v44, %v10385_v60 }
 0x615   : > { %5184 = vrot.lane.b32.xlu1 %v5179_v8, %s6727_s23  ;;  %5242 = vrot.lane.b32.xlu0 %v5238_v9, %s6726_s12 }
 0x616   : > { %v10470_v22 = vadd.f32 %v4717_v46, %v4687_v36  ;;  %v5336_v46 = vmul.f32 %v5335_v32, %v10446_v56 }
 0x617   : > { %v4729_v63 = vpop.permute.xlu1 %4728  ;;  %v4741_v48 = vpop.permute.xlu0 %4740 }
 0x618   : > { %v4733_v60 = vadd.f32 %v4729_v63, %v10401_v61  ;;  %v4746_v33 = vadd.f32 %v4741_v48, %v10403_v3  ;;  %v4870_v61 = vmul.f32 %v4869_v24, %v10168_v27  ;;  %v4875_v3 = vstv %s10513_s24  ;;  %s10664_s24 = sld [smem:[#allocation12 + $0xdc]] }
 0x619   : > { %5244 = vrot.lane.b32.xlu1 %v5239_v58, %s6726_s12  ;;  %5256 = vrot.lane.b32.xlu0 %v5252_v23, %s6726_s12  ;;  %v5293_v63 = vstv %s10520_s6  ;;  %v4881_v23 = vstv %s10527_s30  ;;  %s10671_s6 = sld [smem:[#allocation12 + $0xa8]] }
 0x61a   : > { %s10680_s30 = sld [smem:[#allocation12 + $0xb0]] }
 0x61b   : > { %v4743_v35 = vpop.permute.xlu1 %4742  ;;  %v4755_v52 = vpop.permute.xlu0 %4754 }
 0x61c   : > { %v4747_v7 = vadd.f32 %v4743_v35, %v10419_v43  ;;  %v4760_v51 = vadd.f32 %v4755_v52, %v10421_v14  ;;  %v4871_v43 = vmul.f32 %v4869_v24, %v10180_v54  ;;  %v4876_v14 = vmul.f32 %v4875_v3, %v10168_v27 }
 0x61d   : > { %5258 = vrot.lane.b32.xlu1 %v5253_v57, %s6726_s12  ;;  %5196 = vrot.lane.b32.xlu0 %v5192_v28, %s6727_s23 }
 0x61f   : > { %v10488_v30 = vpop.permute.xlu1 %4756  ;;  %v10490_v45 = vpop.permute.xlu0 %4768 }
 0x620   : > { %v4761_v38 = vadd.f32 %v10488_v30, %v10437_v59  ;;  %v4774_v35 = vadd.f32 %v10490_v45, %v10439_v42  ;;  %v4877_v59 = vmul.f32 %v4875_v3, %v10180_v54  ;;  %v4882_v42 = vmul.f32 %v4881_v23, %v10168_v27 }
 0x621   : > { %5198 = vrot.lane.b32.xlu1 %v5193_v2, %s6727_s23  ;;  %5270 = vrot.lane.b32.xlu0 %v5266_v0, %s6726_s12  ;;  %v5337_v2 = vmul.f32 %v5335_v32, %v10462_v5  ;;  %v5294_v0 = vmul.f32 %v5293_v63, %v10446_v56  ;;  %v4887_v30 = vstv %s10543_s29  ;;  %v10606_v32 = vld [vmem:[#allocation3 + $0x69] sm:$0xff]  ;;  %s10698_s29 = sld [smem:[#allocation12 + $0x2b]] }
 0x623   : > { %v10501_v6 = vpop.permute.xlu1 %4770  ;;  %v10503_v62 = vpop.permute.xlu0 %4782 }
 0x624   : > { %v4775_v45 = vadd.f32 %v10501_v6, %v10456_v12  ;;  %v4788_v55 = vadd.f32 %v10503_v62, %v10458_v11  ;;  %v4883_v12 = vmul.f32 %v4881_v23, %v10180_v54  ;;  %v4888_v11 = vmul.f32 %v4887_v30, %v10168_v27 }
 0x625   : > { %5272 = vrot.lane.b32.xlu1 %v5267_v50, %s6726_s12  ;;  %5312 = vrot.lane.b32.xlu0 %v5308_v34, %s6727_s23 }
 0x627   : > { %v10516_v21 = vpop.permute.xlu1 %4784  ;;  %v4797_v20 = vpop.permute.xlu0 %4796 }
 0x628   : > { %v4802_v16 = vadd.f32 %v4797_v20, %v4732_v47  ;;  %v4789_v6 = vadd.f32 %v10516_v21, %v10470_v22 }
 0x629   : > { %5314 = vrot.lane.b32.xlu1 %v5309_v37, %s6727_s23  ;;  %5326 = vrot.lane.b32.xlu0 %v5322_v39, %s6727_s23  ;;  %v5295_v39 = vmul.f32 %v5293_v63, %v10462_v5 }
 0x62a   : > { %v10531_v29 = vadd.f32 %v4864_v10, %v4802_v16  ;;  %v5350_v16 = vmul.f32 %v5349_v41, %v10446_v56  ;;  %v10590_v10 = vld [vmem:[#allocation3 + $0x61] sm:$0xff] }
 0x62b   : > { %v4799_v13 = vpop.permute.xlu1 %4798  ;;  %v4811_v49 = vpop.permute.xlu0 %4810 }
 0x62c   : > { %v4803_v18 = vadd.f32 %v4799_v13, %v4733_v60  ;;  %v4816_v1 = vadd.f32 %v4811_v49, %v4746_v33 }
 0x62d   : > { %5328 = vrot.lane.b32.xlu1 %v5323_v17, %s6727_s23  ;;  %5284 = vrot.lane.b32.xlu0 %v5280_v19, %s6726_s12  ;;  %v5351_v17 = vmul.f32 %v5349_v41, %v10462_v5  ;;  %v5410_v19 = vmul.f32 %v5409_v25, %v10590_v10 }
 0x62e   : > { %v10547_v44 = vadd.f32 %v4865_v4, %v4803_v18  ;;  %v10549_v8 = vadd.f32 %v4870_v61, %v4816_v1  ;;  %v5423_v18 = vstv %s10572_s14  ;;  %v4889_v1 = vmul.f32 %v4887_v30, %v10180_v54  ;;  %s10728_s14 = sld [smem:[#allocation12 + $0xdd]] }
 0x62f   : > { %v4813_v9 = vpop.permute.xlu1 %4812  ;;  %v4825_v36 = vpop.permute.xlu0 %4824  ;;  %v5411_v61 = vmul.f32 %v5409_v25, %v10606_v32  ;;  %v5424_v3 = vmul.f32 %v5423_v18, %v10590_v10 }
 0x630   : > { %v4817_v48 = vadd.f32 %v4813_v9, %v4747_v7  ;;  %v4830_v58 = vadd.f32 %v4825_v36, %v4760_v51  ;;  %v5363_v7 = vstv %s10592_s21  ;;  %v5425_v9 = vmul.f32 %v5423_v18, %v10606_v32  ;;  %s10742_s21 = sld [smem:[#allocation12 + $0x85]] }
 0x631   : > { %5286 = vrot.lane.b32.xlu1 %v5281_v15, %s6726_s12  ;;  %5340 = vrot.lane.b32.xlu0 %v5336_v46, %s6727_s23  ;;  %v5364_v36 = vmul.f32 %v5363_v7, %v10446_v56  ;;  %v5437_v15 = vstv %s10609_s25  ;;  %s10754_s25 = sld [smem:[#allocation12 + $0x2c]] }
 0x632   : > { %v10565_v52 = vadd.f32 %v4871_v43, %v4817_v48  ;;  %v10567_v57 = vadd.f32 %v4876_v14, %v4830_v58  ;;  %v5365_v48 = vmul.f32 %v5363_v7, %v10462_v5  ;;  %v5438_v58 = vmul.f32 %v5437_v15, %v10590_v10 }
 0x633   : > { %v4827_v28 = vpop.permute.xlu1 %4826  ;;  %v4839_v53 = vpop.permute.xlu0 %4838  ;;  %v5479_v43 = vstv %s10619_s26  ;;  %s10763_s26 = sld [smem:[#allocation12 + $0x59]] }
 0x634   : > { %v4831_v50 = vadd.f32 %v4827_v28, %v4761_v38  ;;  %v4844_v34 = vadd.f32 %v4839_v53, %v4774_v35  ;;  %v5439_v38 = vmul.f32 %v5437_v15, %v10606_v32  ;;  %v5480_v35 = vmul.f32 %v5479_v43, %v10590_v10 }
 0x635   : > { %5342 = vrot.lane.b32.xlu1 %v5337_v2, %s6727_s23  ;;  %5298 = vrot.lane.b32.xlu0 %v5294_v0, %s6726_s12  ;;  %v5493_v28 = vstv %s10626_s11  ;;  %v5035_v53 = vstv %s10630_s15  ;;  %s10767_s11 = sld [smem:[#allocation12 + $0x24]] }
 0x636   : > { %v10583_v31 = vadd.f32 %v4877_v59, %v4831_v50  ;;  %v10585_v47 = vadd.f32 %v4882_v42, %v4844_v34  ;;  %v5481_v50 = vmul.f32 %v5479_v43, %v10606_v32  ;;  %v5494_v34 = vmul.f32 %v5493_v28, %v10590_v10  ;;  %s10771_s15 = sld [smem:[#allocation12 + $0xb2]] }
 0x637   : > { %v4841_v20 = vpop.permute.xlu1 %4840  ;;  %v4853_v37 = vpop.permute.xlu0 %4852  ;;  %v5451_v42 = vstv %s10639_s16  ;;  %v5036_v30 = vmul.f32 %v5035_v53, %v10312_v40  ;;  %v5521_v43 = vstv %s10680_s30  ;;  %s10778_s16 = sld [smem:[#allocation12 + $0x51]] }
 0x638   : > { %v4845_v24 = vadd.f32 %v4841_v20, %v4775_v45  ;;  %v4858_v60 = vadd.f32 %v4853_v37, %v4788_v55  ;;  %v5041_v45 = vstv %s10643_s19  ;;  %v5452_v25 = vmul.f32 %v5451_v42, %v10590_v10  ;;  %s10782_s19 = sld [smem:[#allocation12 + $0x86]] }
 0x639   : > { %5300 = vrot.lane.b32.xlu1 %v5295_v39, %s6726_s12  ;;  %5354 = vrot.lane.b32.xlu0 %v5350_v16, %s6727_s23  ;;  %v5495_v16 = vmul.f32 %v5493_v28, %v10606_v32  ;;  %v5453_v18 = vmul.f32 %v5451_v42, %v10606_v32  ;;  %v5581_v42 = vstv %s10698_s29  ;;  %s10820_s30 = sld [smem:[#allocation12 + $0xe0]] }
 0x63a   : > { %v10600_v62 = vadd.f32 %v4883_v12, %v4845_v24  ;;  %v10602_v33 = vadd.f32 %v4888_v11, %v4858_v60  ;;  %v5507_v24 = vstv %s10651_s20  ;;  %v5037_v11 = vmul.f32 %v5035_v53, %v10324_v26  ;;  %s10792_s20 = sld [smem:[#allocation12 + $0x7e]] }
 0x63b   : > { %v4855_v13 = vpop.permute.xlu1 %4854  ;;  %v4899_v49 = vpop.permute.xlu0 %4898  ;;  %s6425_s29 = sld [smem:[#allocation12 + $0x27]] }
 0x63c   : > { %v4859_v27 = vadd.f32 %v4855_v13, %v4789_v6  ;;  %v4904_v2 = vadd.f32 %v4899_v49, %v10531_v29 }
 0x63d   : > { %5356 = vrot.lane.b32.xlu1 %v5351_v17, %s6727_s23  ;;  %5414 = vrot.lane.b32.xlu0 %v5410_v19, %s6726_s12 }
 0x63e   : > { %v10614_v22 = vadd.f32 %v4889_v1, %v4859_v27  ;;  %v5508_v1 = vmul.f32 %v5507_v24, %v10590_v10 }
 0x63f   : > { %v4901_v21 = vpop.permute.xlu1 %4900  ;;  %v4913_v4 = vpop.permute.xlu0 %4912 }
 0x640   : > { %v4905_v29 = vadd.f32 %v4901_v21, %v10547_v44  ;;  %v4918_v55 = vadd.f32 %v4913_v4, %v10549_v8  ;;  %v5042_v44 = vmul.f32 %v5041_v45, %v10312_v40  ;;  %v5047_v8 = vstv %s10657_s22  ;;  %s10797_s22 = sld [smem:[#allocation12 + $0xdf]] }
 0x641   : > { %5416 = vrot.lane.b32.xlu1 %v5411_v61, %s6726_s12  ;;  %5428 = vrot.lane.b32.xlu0 %v5424_v3, %s6726_s12  ;;  %v5465_v21 = vstv %s10664_s24  ;;  %v5053_v3 = vstv %s10671_s6  ;;  %s10804_s24 = sld [smem:[#allocation12 + $0xab]] }
 0x642   : > { %s10809_s6 = sld [smem:[#allocation12 + $0xb3]] }
 0x643   : > { %v4915_v54 = vpop.permute.xlu1 %4914  ;;  %v4927_v51 = vpop.permute.xlu0 %4926 }
 0x644   : > { %v4919_v6 = vadd.f32 %v4915_v54, %v10565_v52  ;;  %v4932_v13 = vadd.f32 %v4927_v51, %v10567_v57  ;;  %v5043_v52 = vmul.f32 %v5041_v45, %v10324_v26  ;;  %v5048_v57 = vmul.f32 %v5047_v8, %v10312_v40 }
 0x645   : > { %5430 = vrot.lane.b32.xlu1 %v5425_v9, %s6726_s12  ;;  %5368 = vrot.lane.b32.xlu0 %v5364_v36, %s6727_s23 }
 0x647   : > { %v10632_v46 = vpop.permute.xlu1 %4928  ;;  %v10634_v63 = vpop.permute.xlu0 %4940 }
 0x648   : > { %v4933_v7 = vadd.f32 %v10632_v46, %v10583_v31  ;;  %v4946_v54 = vadd.f32 %v10634_v63, %v10585_v47  ;;  %v5049_v31 = vmul.f32 %v5047_v8, %v10324_v26  ;;  %v5054_v46 = vmul.f32 %v5053_v3, %v10312_v40 }
 0x649   : > { %5370 = vrot.lane.b32.xlu1 %v5365_v48, %s6727_s23  ;;  %5442 = vrot.lane.b32.xlu0 %v5438_v58, %s6726_s12  ;;  %v5509_v48 = vmul.f32 %v5507_v24, %v10606_v32  ;;  %v5466_v58 = vmul.f32 %v5465_v21, %v10590_v10  ;;  %v5059_v47 = vstv %s10687_s8  ;;  %v10738_v24 = vld [vmem:[#allocation3 + $0x6a] sm:$0xff]  ;;  %s10835_s8 = sld [smem:[#allocation12 + $0xd8]] }
 0x64a   : > { %v5583_v8 = vmul.f32 %v5581_v42, %v10738_v24 }
 0x64b   : > { %v10645_v14 = vpop.permute.xlu1 %4942  ;;  %v10647_v23 = vpop.permute.xlu0 %4954 }
 0x64c   : > { %v4947_v63 = vadd.f32 %v10645_v14, %v10600_v62  ;;  %v4960_v28 = vadd.f32 %v10647_v23, %v10602_v33  ;;  %v5055_v62 = vmul.f32 %v5053_v3, %v10324_v26  ;;  %v5060_v33 = vmul.f32 %v5059_v47, %v10312_v40 }
 0x64d   : > { %5444 = vrot.lane.b32.xlu1 %v5439_v38, %s6726_s12  ;;  %5484 = vrot.lane.b32.xlu0 %v5480_v35, %s6727_s23 }
 0x64f   : > { %v10660_v0 = vpop.permute.xlu1 %4956  ;;  %v4969_v41 = vpop.permute.xlu0 %4968 }
 0x650   : > { %v4974_v59 = vadd.f32 %v4969_v41, %v4904_v2  ;;  %v4961_v14 = vadd.f32 %v10660_v0, %v10614_v22 }
 0x651   : > { %5486 = vrot.lane.b32.xlu1 %v5481_v50, %s6727_s23  ;;  %5498 = vrot.lane.b32.xlu0 %v5494_v34, %s6727_s23  ;;  %v5467_v34 = vmul.f32 %v5465_v21, %v10606_v32 }
 0x652   : > { %v10675_v20 = vadd.f32 %v5036_v30, %v4974_v59  ;;  %v5522_v59 = vmul.f32 %v5521_v43, %v10590_v10  ;;  %v10726_v30 = vld [vmem:[#allocation3 + $0x62] sm:$0xff] }
 0x653   : > { %v4971_v37 = vpop.permute.xlu1 %4970  ;;  %v4983_v39 = vpop.permute.xlu0 %4982 }
 0x654   : > { %v4975_v60 = vadd.f32 %v4971_v37, %v4905_v29  ;;  %v4988_v12 = vadd.f32 %v4983_v39, %v4918_v55 }
 0x655   : > { %5500 = vrot.lane.b32.xlu1 %v5495_v16, %s6727_s23  ;;  %5456 = vrot.lane.b32.xlu0 %v5452_v25, %s6726_s12  ;;  %v5523_v16 = vmul.f32 %v5521_v43, %v10606_v32  ;;  %v5582_v25 = vmul.f32 %v5581_v42, %v10726_v30  ;;  %v5665_v43 = vstv %s10763_s26  ;;  %s6442_s26 = sld [smem:[#allocation12 + $0x84]] }
 0x656   : > { %v10691_v49 = vadd.f32 %v5037_v11, %v4975_v60  ;;  %v10693_v17 = vadd.f32 %v5042_v44, %v4988_v12  ;;  %v5595_v12 = vstv %s10712_s13  ;;  %v5061_v11 = vmul.f32 %v5059_v47, %v10324_v26  ;;  %s6427_s13 = sld [smem:[#allocation12 + $0x81]] }
 0x657   : > { %v4985_v19 = vpop.permute.xlu1 %4984  ;;  %v4997_v27 = vpop.permute.xlu0 %4996  ;;  %v5666_v47 = vmul.f32 %v5665_v43, %v10726_v30 }
 0x658   : > { %v4989_v4 = vadd.f32 %v4985_v19, %v4919_v6  ;;  %v5002_v61 = vadd.f32 %v4997_v27, %v4932_v13  ;;  %v5596_v6 = vmul.f32 %v5595_v12, %v10726_v30  ;;  %v5535_v19 = vstv %s10728_s14  ;;  %s6429_s14 = sld [smem:[#allocation12 + $0xdb]] }
 0x659   : > { %5458 = vrot.lane.b32.xlu1 %v5453_v18, %s6726_s12  ;;  %5512 = vrot.lane.b32.xlu0 %v5508_v1, %s6727_s23  ;;  %v5597_v18 = vmul.f32 %v5595_v12, %v10738_v24  ;;  %v5536_v1 = vmul.f32 %v5535_v19, %v10590_v10 }
 0x65a   : > { %v5045_v51 = vadd.f32 %v5043_v52, %v4989_v4  ;;  %v5050_v9 = vadd.f32 %v5048_v57, %v5002_v61  ;;  %v5537_v52 = vmul.f32 %v5535_v19, %v10606_v32 }
 0x65b   : > { %v4999_v36 = vpop.permute.xlu1 %4998  ;;  %v5011_v15 = vpop.permute.xlu0 %5010 }
 0x65c   : > { %v5003_v38 = vadd.f32 %v4999_v36, %v4933_v7  ;;  %v5016_v35 = vadd.f32 %v5011_v15, %v4946_v54  ;;  %v5651_v54 = vstv %s10754_s25  ;;  %s6441_s25 = sld [smem:[#allocation12 + $0x57]] }
 0x65d   : > { %5514 = vrot.lane.b32.xlu1 %v5509_v48, %s6727_s23  ;;  %5470 = vrot.lane.b32.xlu0 %v5466_v58, %s6726_s12  ;;  %v5652_v15 = vmul.f32 %v5651_v54, %v10726_v30 }
 0x65e   : > { %v5051_v53 = vadd.f32 %v5049_v31, %v5003_v38  ;;  %v5056_v2 = vadd.f32 %v5054_v46, %v5016_v35  ;;  %v5207_v38 = vstv %s10767_s11  ;;  %v5653_v46 = vmul.f32 %v5651_v54, %v10738_v24  ;;  %s6443_s11 = sld [smem:[#allocation12 + $0xb1]] }
 0x65f   : > { %v5013_v41 = vpop.permute.xlu1 %5012  ;;  %v5025_v50 = vpop.permute.xlu0 %5024 }
 0x660   : > { %v5017_v45 = vadd.f32 %v5013_v41, %v4947_v63  ;;  %v5030_v29 = vadd.f32 %v5025_v50, %v4960_v28  ;;  %v5623_v63 = vstv %s10771_s15  ;;  %v5209_v41 = vmul.f32 %v5207_v38, %v10462_v5  ;;  %s6444_s15 = sld [smem:[#allocation12 + $0xde]] }
 0x661   : > { %5472 = vrot.lane.b32.xlu1 %v5467_v34, %s6726_s12  ;;  %5526 = vrot.lane.b32.xlu0 %v5522_v59, %s6727_s23  ;;  %v5213_v50 = vstv %s10778_s16  ;;  %v5625_v12 = vmul.f32 %v5623_v63, %v10738_v24  ;;  %s5720_s16 = sld [smem:[#allocation13]] }
 0x662   : > { %v5057_v23 = vadd.f32 %v5055_v62, %v5017_v45  ;;  %v5062_v55 = vadd.f32 %v5060_v33, %v5030_v29  ;;  %v5667_v29 = vmul.f32 %v5665_v43, %v10738_v24  ;;  %v5624_v62 = vmul.f32 %v5623_v63, %v10726_v30 }
 0x663   : > { %v5027_v37 = vpop.permute.xlu1 %5026  ;;  %v5071_v39 = vpop.permute.xlu0 %5070  ;;  %v5679_v33 = vstv %s10782_s19  ;;  %s6455_s19 = sld [smem:[#allocation13 + $0x1]] }
 0x664   : > { %v5031_v60 = vadd.f32 %v5027_v37, %v4961_v14  ;;  %v5076_v40 = vadd.f32 %v5071_v39, %v10675_v20  ;;  %v5215_v37 = vmul.f32 %v5213_v50, %v10462_v5  ;;  %v5219_v39 = vstv %s10792_s20  ;;  %s10880_s20 = sld [smem:[#allocation13 + $0x2]] }
 0x665   : > { %5528 = vrot.lane.b32.xlu1 %v5523_v16, %s6727_s23  ;;  %5586 = vrot.lane.b32.xlu0 %v5582_v25, %s6726_s12 }
 0x666   : > { %v10747_v22 = vadd.f32 %v5061_v11, %v5031_v60  ;;  %v5680_v11 = vmul.f32 %v5679_v33, %v10726_v30 }
 0x667   : > { %v5073_v0 = vpop.permute.xlu1 %5072  ;;  %v5085_v44 = vpop.permute.xlu0 %5084 }
 0x668   : > { %v5077_v20 = vadd.f32 %v5073_v0, %v10691_v49  ;;  %v5090_v13 = vadd.f32 %v5085_v44, %v10693_v17  ;;  %v5609_v49 = vstv %s10742_s21  ;;  %v5637_v0 = vstv %s10797_s22  ;;  %s6440_s21 = sld [smem:[#allocation12 + $0x2a]] }
 0x669   : > { %5588 = vrot.lane.b32.xlu1 %v5583_v8, %s6726_s12  ;;  %5600 = vrot.lane.b32.xlu0 %v5596_v6, %s6726_s12  ;;  %v5610_v57 = vmul.f32 %v5609_v49, %v10726_v30  ;;  %v5611_v36 = vmul.f32 %v5609_v49, %v10738_v24  ;;  %v5220_v6 = vmul.f32 %v5219_v39, %v10446_v56  ;;  %s6457_s22 = sld [smem:[#allocation13 + $0x3]] }
 0x66a   : > { %v5639_v54 = vmul.f32 %v5637_v0, %v10738_v24 }
 0x66b   : > { %v5087_v26 = vpop.permute.xlu1 %5086  ;;  %v5099_v27 = vpop.permute.xlu0 %5098 }
 0x66c   : > { %v5091_v21 = vadd.f32 %v5087_v26, %v5045_v51  ;;  %v10760_v4 = vadd.f32 %v5099_v27, %v5050_v9 }
 0x66d   : > { %5602 = vrot.lane.b32.xlu1 %v5597_v18, %s6726_s12  ;;  %5540 = vrot.lane.b32.xlu0 %v5536_v1, %s6727_s23  ;;  %v5681_v1 = vmul.f32 %v5679_v33, %v10738_v24  ;;  %v5379_v33 = vstv %s6425_s29  ;;  %s10903_s29 = sld [smem:[#allocation15 + $0x4]] }
 0x66f   : > { %v5101_v17 = vpop.permute.xlu1 %5100  ;;  %v5113_v61 = vpop.permute.xlu0 %5112 }
 0x670   : > { %v5105_v3 = vadd.f32 %v5101_v17, %v5051_v53  ;;  %v10773_v7 = vadd.f32 %v5113_v61, %v5056_v2  ;;  %v5208_v2 = vmul.f32 %v5207_v38, %v10446_v56  ;;  %v5693_v17 = vstv %s10809_s6  ;;  %s6459_s6 = sld [smem:[#allocation15 + $0x1]] }
 0x671   : > { %5542 = vrot.lane.b32.xlu1 %v5537_v52, %s6727_s23  ;;  %5614 = vrot.lane.b32.xlu0 %v5610_v57, %s6726_s12 }
 0x673   : > { %v5115_v51 = vpop.permute.xlu1 %5114  ;;  %v5127_v9 = vpop.permute.xlu0 %5126 }
 0x674   : > { %v10784_v48 = vadd.f32 %v5115_v51, %v5057_v23  ;;  %v10786_v58 = vadd.f32 %v5127_v9, %v5062_v55  ;;  %v5214_v55 = vmul.f32 %v5213_v50, %v10446_v56  ;;  %v5694_v51 = vmul.f32 %v5693_v17, %v10726_v30 }
 0x675   : > { %5616 = vrot.lane.b32.xlu1 %v5611_v36, %s6726_s12  ;;  %5656 = vrot.lane.b32.xlu0 %v5652_v15, %s6727_s23  ;;  %v5707_v9 = vstv %s10820_s30  ;;  %s5807_s30 = sld [smem:[#allocation15]] }
 0x677   : > { %v5141_v35 = vpop.permute.xlu1 %5140  ;;  %v5143_v31 = vpop.permute.xlu0 %5142 }
 0x678   : > { %v5146_v28 = vadd.f32 %v5141_v35, %v5076_v40  ;;  %v5147_v53 = vadd.f32 %v5143_v31, %v5077_v20  ;;  %v5221_v20 = vmul.f32 %v5219_v39, %v10462_v5  ;;  %v5695_v35 = vmul.f32 %v5693_v17, %v10738_v24 }
 0x679   : > { %5658 = vrot.lane.b32.xlu1 %v5653_v46, %s6727_s23  ;;  %5670 = vrot.lane.b32.xlu0 %v5666_v47, %s6727_s23  ;;  %v5708_v31 = vmul.f32 %v5707_v9, %v10726_v30 }
 0x67a   : > { %v5210_v34 = vadd.f32 %v5208_v2, %v5146_v28  ;;  %v5211_v59 = vadd.f32 %v5209_v41, %v5147_v53  ;;  %v5709_v53 = vmul.f32 %v5707_v9, %v10738_v24 }
 0x67b   : > { %v5155_v42 = vpop.permute.xlu1 %5154  ;;  %v5157_v45 = vpop.permute.xlu0 %5156 }
 0x67c   : > { %v5160_v14 = vadd.f32 %v5155_v42, %v5090_v13  ;;  %v5161_v23 = vadd.f32 %v5157_v45, %v5091_v21  ;;  %v5225_v13 = vstv %s10804_s24  ;;  %v5638_v21 = vmul.f32 %v5637_v0, %v10726_v30  ;;  %s6458_s24 = sld [smem:[#allocation13 + $0x4]] }
 0x67d   : > { %5672 = vrot.lane.b32.xlu1 %v5667_v29, %s6727_s23  ;;  %5628 = vrot.lane.b32.xlu0 %v5624_v62, %s6726_s12  ;;  %v5226_v61 = vmul.f32 %v5225_v13, %v10446_v56  ;;  %v5227_v36 = vmul.f32 %v5225_v13, %v10462_v5 }
 0x67e   : > { %v5216_v16 = vadd.f32 %v5214_v55, %v5160_v14  ;;  %v5217_v25 = vadd.f32 %v5215_v37, %v5161_v23 }
 0x67f   : > { %v5169_v60 = vpop.permute.xlu1 %5168  ;;  %v5171_v40 = vpop.permute.xlu0 %5170 }
 0x680   : > { %v5174_v44 = vadd.f32 %v5169_v60, %v10760_v4  ;;  %v5175_v8 = vadd.f32 %v5171_v40, %v5105_v3 }
 0x681   : > { %5630 = vrot.lane.b32.xlu1 %v5625_v12, %s6726_s12  ;;  %5684 = vrot.lane.b32.xlu0 %v5680_v11, %s6727_s23  ;;  %v5381_v11 = vmul.f32 %v5379_v33, %v10606_v32 }
 0x682   : > { %v5222_v19 = vadd.f32 %v5220_v6, %v5174_v44  ;;  %v5223_v26 = vadd.f32 %v5221_v20, %v5175_v8 }
 0x683   : > { %v5129_v27 = vpop.permute.xlu1 %5128  ;;  %v5183_v18 = vpop.permute.xlu0 %5182 }
 0x684   : > { %v5133_v4 = vadd.f32 %v5129_v27, %v10747_v22  ;;  %v5188_v49 = vadd.f32 %v5183_v18, %v10773_v7 }
 0x685   : > { %5686 = vrot.lane.b32.xlu1 %v5681_v1, %s6727_s23  ;;  %5642 = vrot.lane.b32.xlu0 %v5638_v21, %s6726_s12 }
 0x686   : > { %v5228_v52 = vadd.f32 %v5226_v61, %v5188_v49 }
 0x687   : > { %v5185_v57 = vpop.permute.xlu1 %5184  ;;  %v5243_v3 = vpop.permute.xlu0 %5242 }
 0x688   : > { %v5189_v22 = vadd.f32 %v5185_v57, %v10784_v48  ;;  %v5248_v7 = vadd.f32 %v5243_v3, %v5210_v34  ;;  %v5231_v48 = vstv %s10835_s8  ;;  %s6460_s8 = sld [smem:[#allocation15 + $0x2]] }
 0x689   : > { %5644 = vrot.lane.b32.xlu1 %v5639_v54, %s6726_s12  ;;  %5698 = vrot.lane.b32.xlu0 %v5694_v51, %s6727_s23  ;;  %v5232_v50 = vmul.f32 %v5231_v48, %v10446_v56  ;;  %s6426_s12 = sld [smem:[#allocation12 + $0x54]]  ;;  %v5233_v62 = vmul.f32 %v5231_v48, %v10462_v5 }
 0x68a   : > { %v5229_v15 = vadd.f32 %v5227_v36, %v5189_v22 }
 0x68b   : > { %v5245_v43 = vpop.permute.xlu1 %5244  ;;  %v5257_v38 = vpop.permute.xlu0 %5256 }
 0x68c   : > { %v5249_v46 = vadd.f32 %v5245_v43, %v5211_v59  ;;  %v5262_v47 = vadd.f32 %v5257_v38, %v5216_v16 }
 0x68d   : > { %5700 = vrot.lane.b32.xlu1 %v5695_v35, %s6727_s23  ;;  %5712 = vrot.lane.b32.xlu0 %v5708_v31, %s6727_s23 }
 0x68f   : > { %v5259_v63 = vpop.permute.xlu1 %5258  ;;  %v5197_v28 = vpop.permute.xlu0 %5196  ;;  %v5385_v16 = vstv %s6426_s12  ;;  %s10907_s12 = sld [smem:[#allocation5]] }
 0x690   : > { %v5263_v2 = vadd.f32 %v5259_v63, %v5217_v25  ;;  %v5202_v41 = vadd.f32 %v5197_v28, %v10786_v58  ;;  %v5380_v58 = vmul.f32 %v5379_v33, %v10590_v10  ;;  %v5386_v0 = vmul.f32 %v5385_v16, %v10590_v10 }
 0x691   : > { %5714 = vrot.lane.b32.xlu1 %v5709_v53, %s6727_s23  ;;  %s6428_s23 = sld [smem:[#allocation12 + $0xae]]  ;;  %v5403_v53 = vstv %s6429_s14  ;;  %v5551_v33 = vstv %s6440_s21 }
 0x692   : > { %v5234_v34 = vadd.f32 %v5232_v50, %v5202_v41 }
 0x693   : > { %v5199_v59 = vpop.permute.xlu1 %5198  ;;  %v5271_v42 = vpop.permute.xlu0 %5270 }
 0x694   : > { %v5203_v45 = vadd.f32 %v5199_v59, %v5133_v4  ;;  %v5276_v29 = vadd.f32 %v5271_v42, %v5222_v19  ;;  %v5387_v19 = vmul.f32 %v5385_v16, %v10606_v32  ;;  %v5557_v16 = vstv %s6441_s25 }
 0x696   : > { %v5235_v14 = vadd.f32 %v5233_v62, %v5203_v45  ;;  %v5405_v62 = vmul.f32 %v5403_v53, %v10606_v32 }
 0x697   : > { %v5273_v23 = vpop.permute.xlu1 %5272  ;;  %v5313_v55 = vpop.permute.xlu0 %5312  ;;  %v5397_v22 = vstv %s6428_s23 }
 0x698   : > { %v5277_v37 = vadd.f32 %v5273_v23, %v5223_v26  ;;  %v5318_v39 = vadd.f32 %v5313_v55, %v5248_v7  ;;  %v5391_v26 = vstv %s6427_s13  ;;  %v5398_v38 = vmul.f32 %v5397_v22, %v10590_v10  ;;  %s6468_s13 = smul.u32 24, %s10965_s9 }
 0x699   : > { %v5392_v49 = vmul.f32 %v5391_v26, %v10590_v10  ;;  %v5393_v51 = vmul.f32 %v5391_v26, %v10606_v32 }
 0x69a   : > { %v5382_v56 = vadd.f32 %v5380_v58, %v5318_v39  ;;  %v5552_v58 = vmul.f32 %v5551_v33, %v10726_v30  ;;  %s363_s21 = scalar_lea.vmem %s10942_s7, %s6468_s13 }
 0x69b   : > { %v5315_v25 = vpop.permute.xlu1 %5314  ;;  %v5327_v60 = vpop.permute.xlu0 %5326 }
 0x69c   : > { %v5319_v40 = vadd.f32 %v5315_v25, %v5249_v46  ;;  %v5332_v12 = vadd.f32 %v5327_v60, %v5262_v47  ;;  %v5399_v47 = vmul.f32 %v5397_v22, %v10606_v32  ;;  %v5558_v32 = vmul.f32 %v5557_v16, %v10726_v30 }
 0x69e   : > { %v5383_v5 = vadd.f32 %v5381_v11, %v5319_v40  ;;  %v5388_v44 = vadd.f32 %v5386_v0, %v5332_v12 }
 0x69f   : > { %v5329_v8 = vpop.permute.xlu1 %5328  ;;  %v5285_v6 = vpop.permute.xlu0 %5284 }
 0x6a0   : > { %v5333_v20 = vadd.f32 %v5329_v8, %v5263_v2  ;;  %v5290_v13 = vadd.f32 %v5285_v6, %v5228_v52  ;;  %v5553_v8 = vmul.f32 %v5551_v33, %v10738_v24 }
 0x6a2   : > { %v5389_v27 = vadd.f32 %v5387_v19, %v5333_v20 }
 0x6a3   : > { %v5287_v18 = vpop.permute.xlu1 %5286  ;;  %v5341_v1 = vpop.permute.xlu0 %5340 }
 0x6a4   : > { %v5291_v21 = vadd.f32 %v5287_v18, %v5229_v15  ;;  %v5346_v4 = vadd.f32 %v5341_v1, %v5276_v29  ;;  %v5559_v18 = vmul.f32 %v5557_v16, %v10738_v24  ;;  %v5563_v1 = vstv %s6442_s26 }
 0x6a5   : > { %v5565_v22 = vmul.f32 %v5563_v1, %v10738_v24 }
 0x6a6   : > { %v5394_v17 = vadd.f32 %v5392_v49, %v5346_v4 }
 0x6a7   : > { %v5343_v61 = vpop.permute.xlu1 %5342  ;;  %v5299_v57 = vpop.permute.xlu0 %5298 }
 0x6a8   : > { %v5347_v3 = vadd.f32 %v5343_v61, %v5277_v37  ;;  %v5304_v54 = vadd.f32 %v5299_v57, %v5234_v34  ;;  %v5404_v34 = vmul.f32 %v5403_v53, %v10590_v10  ;;  %v5564_v61 = vmul.f32 %v5563_v1, %v10726_v30 }
 0x6aa   : > { %v5395_v52 = vadd.f32 %v5393_v51, %v5347_v3 }
 0x6ab   : > { %v5301_v7 = vpop.permute.xlu1 %5300  ;;  %v5355_v9 = vpop.permute.xlu0 %5354 }
 0x6ac   : > { %v5305_v36 = vadd.f32 %v5301_v7, %v5235_v14  ;;  %v5360_v43 = vadd.f32 %v5355_v9, %v5290_v13  ;;  %v5569_v7 = vstv %s6443_s11 }
 0x6ae   : > { %v5400_v15 = vadd.f32 %v5398_v38, %v5360_v43 }
 0x6af   : > { %v5357_v35 = vpop.permute.xlu1 %5356  ;;  %v5415_v31 = vpop.permute.xlu0 %5414 }
 0x6b0   : > { %v5361_v46 = vadd.f32 %v5357_v35, %v5291_v21  ;;  %v5420_v14 = vadd.f32 %v5415_v31, %v5382_v56  ;;  %v5570_v35 = vmul.f32 %v5569_v7, %v10726_v30 }
 0x6b2   : > { %v5401_v48 = vadd.f32 %v5399_v47, %v5361_v46 }
 0x6b3   : > { %v5417_v63 = vpop.permute.xlu1 %5416  ;;  %v5429_v28 = vpop.permute.xlu0 %5428 }
 0x6b4   : > { %v5421_v25 = vadd.f32 %v5417_v63, %v5383_v5  ;;  %v5434_v60 = vadd.f32 %v5429_v28, %v5388_v44  ;;  %v5571_v28 = vmul.f32 %v5569_v7, %v10738_v24 }
 0x6b7   : > { %v5431_v2 = vpop.permute.xlu1 %5430  ;;  %v5369_v41 = vpop.permute.xlu0 %5368 }
 0x6b8   : > { %v5374_v50 = vadd.f32 %v5369_v41, %v5304_v54  ;;  %v5435_v56 = vadd.f32 %v5431_v2, %v5389_v27  ;;  %v5575_v41 = vstv %s6444_s15 }
 0x6ba   : > { %v5406_v59 = vadd.f32 %v5404_v34, %v5374_v50 }
 0x6bb   : > { %v5371_v42 = vpop.permute.xlu1 %5370  ;;  %v5443_v45 = vpop.permute.xlu0 %5442 }
 0x6bc   : > { %v5375_v29 = vadd.f32 %v5371_v42, %v5305_v36  ;;  %v5448_v5 = vadd.f32 %v5443_v45, %v5394_v17 }
 0x6be   : > { %v5407_v23 = vadd.f32 %v5405_v62, %v5375_v29  ;;  %v5576_v29 = vmul.f32 %v5575_v41, %v10726_v30 }
 0x6bf   : > { %v5445_v55 = vpop.permute.xlu1 %5444  ;;  %v5485_v37 = vpop.permute.xlu0 %5484 }
 0x6c0   : > { %v5490_v39 = vadd.f32 %v5485_v37, %v5420_v14  ;;  %v5449_v57 = vadd.f32 %v5445_v55, %v5395_v52  ;;  %v5577_v37 = vmul.f32 %v5575_v41, %v10738_v24 }
 0x6c2   : > { %v5554_v10 = vadd.f32 %v5552_v58, %v5490_v39 }
 0x6c3   : > { %v5487_v40 = vpop.permute.xlu1 %5486  ;;  %v5499_v12 = vpop.permute.xlu0 %5498 }
 0x6c4   : > { %v5491_v11 = vadd.f32 %v5487_v40, %v5421_v25  ;;  %v5504_v0 = vadd.f32 %v5499_v12, %v5434_v60  ;;  %v5721_v25 = vstv %s5720_s16 }
 0x6c6   : > { %v5555_v6 = vadd.f32 %v5553_v8, %v5491_v11  ;;  %v5560_v20 = vadd.f32 %v5558_v32, %v5504_v0  ;;  %v5737_v8 = vstv %s6455_s19 }
 0x6c7   : > { %v5501_v13 = vpop.permute.xlu1 %5500  ;;  %v5457_v19 = vpop.permute.xlu0 %5456 }
 0x6c8   : > { %v5505_v26 = vadd.f32 %v5501_v13, %v5435_v56  ;;  %v5462_v9 = vadd.f32 %v5457_v19, %v5400_v15 }
 0x6ca   : > { %v5561_v44 = vadd.f32 %v5559_v18, %v5505_v26 }
 0x6cb   : > { %v5459_v21 = vpop.permute.xlu1 %5458  ;;  %v5513_v4 = vpop.permute.xlu0 %5512 }
 0x6cc   : > { %v5518_v49 = vadd.f32 %v5513_v4, %v5448_v5  ;;  %v5463_v31 = vadd.f32 %v5459_v21, %v5401_v48  ;;  %v5754_v4 = vstv %s10880_s20 }
 0x6ce   : > { %v5566_v3 = vadd.f32 %v5564_v61, %v5518_v49 }
 0x6cf   : > { %v5515_v54 = vpop.permute.xlu1 %5514  ;;  %v5471_v27 = vpop.permute.xlu0 %5470 }
 0x6d0   : > { %v5519_v51 = vadd.f32 %v5515_v54, %v5449_v57  ;;  %v5476_v50 = vadd.f32 %v5471_v27, %v5406_v59 }
 0x6d2   : > { %v10870_v36 = vadd.f32 %v5565_v22, %v5519_v51 }
 0x6d3   : > { %v5473_v43 = vpop.permute.xlu1 %5472  ;;  %v5527_v38 = vpop.permute.xlu0 %5526 }
 0x6d4   : > { %v5532_v17 = vadd.f32 %v5527_v38, %v5462_v9  ;;  %v5477_v48 = vadd.f32 %v5473_v43, %v5407_v23  ;;  %v5771_v38 = vstv %s6457_s22 }
 0x6d6   : > { %v10873_v46 = vadd.f32 %v5570_v35, %v5532_v17 }
 0x6d7   : > { %v5529_v52 = vpop.permute.xlu1 %5528  ;;  %v5587_v47 = vpop.permute.xlu0 %5586 }
 0x6d8   : > { %v5533_v63 = vadd.f32 %v5529_v52, %v5463_v31  ;;  %v5592_v39 = vadd.f32 %v5587_v47, %v5554_v10 }
 0x6da   : > { %v10876_v53 = vadd.f32 %v5571_v28, %v5533_v63  ;;  %v5788_v28 = vstv %s6458_s24 }
 0x6db   : > { %v5589_v2 = vpop.permute.xlu1 %5588  ;;  %v5601_v15 = vpop.permute.xlu0 %5600 }
 0x6dc   : > { %v5593_v40 = vadd.f32 %v5589_v2, %v5555_v6  ;;  %v5606_v12 = vadd.f32 %v5601_v15, %v5560_v20 }
 0x6df   : > { %v5603_v34 = vpop.permute.xlu1 %5602  ;;  %v5541_v42 = vpop.permute.xlu0 %5540 }
 0x6e0   : > { %v5546_v45 = vadd.f32 %v5541_v42, %v5476_v50  ;;  %v5607_v13 = vadd.f32 %v5603_v34, %v5561_v44 }
 0x6e2   : > { %v5578_v62 = vadd.f32 %v5576_v29, %v5546_v45 }
 0x6e3   : > { %v5543_v33 = vpop.permute.xlu1 %5542  ;;  %v5615_v14 = vpop.permute.xlu0 %5614 }
 0x6e4   : > { %v5547_v55 = vadd.f32 %v5543_v33, %v5477_v48  ;;  %v5620_v1 = vadd.f32 %v5615_v14, %v5566_v3 }
 0x6e6   : > { %v5579_v58 = vadd.f32 %v5577_v37, %v5547_v55 }
 0x6e7   : > { %v5617_v16 = vpop.permute.xlu1 %5616  ;;  %v5657_v60 = vpop.permute.xlu0 %5656 }
 0x6e8   : > { %v5662_v59 = vadd.f32 %v5657_v60, %v5592_v39  ;;  %v5621_v57 = vadd.f32 %v5617_v16, %v10870_v36  ;;  %v5819_v60 = vstv %s6459_s6 }
 0x6ea   : > { %v5722_v11 = vadd.f32 %v5721_v25, %v5662_v59 }
 0x6eb   : > { %v5659_v0 = vpop.permute.xlu1 %5658  ;;  %v5671_v30 = vpop.permute.xlu0 %5670 }
 0x6ec   : > { %v5724_v23 = vmax.f32 %v5722_v11, 0.0  ;;  %v5663_v32 = vadd.f32 %v5659_v0, %v5593_v40  ;;  %v5676_v56 = vadd.f32 %v5671_v30, %v5606_v12  ;;  %v5808_v40 = vstv %s5807_s30 }
 0x6ed   : > { %v5830_v11 = vstv %s6460_s8 }
 0x6ee   : > { %v5723_v24 = vadd.f32 %v5721_v25, %v5663_v32  ;;  %v5738_v10 = vadd.f32 %v5737_v8, %v5676_v56  ;;  %5728 = vrot.lane.b32.xlu0 %v5724_v23, %s6724_s10 }
 0x6ef   : > { %v5673_v19 = vpop.permute.xlu1 %5672  ;;  %v5629_v26 = vpop.permute.xlu0 %5628 }
 0x6f0   : > { %v5725_v18 = vmax.f32 %v5723_v24, 0.0  ;;  %v5740_v6 = vmax.f32 %v5738_v10, 0.0  ;;  %v5677_v20 = vadd.f32 %v5673_v19, %v5607_v13  ;;  %v5634_v7 = vadd.f32 %v5629_v26, %v10873_v46 }
 0x6f2   : > { %v5739_v5 = vadd.f32 %v5737_v8, %v5677_v20  ;;  %5730 = vrot.lane.b32.xlu1 %v5725_v18, %s6724_s10  ;;  %5744 = vrot.lane.b32.xlu0 %v5740_v6, %s6724_s10 }
 0x6f3   : > { %v5631_v21 = vpop.permute.xlu1 %5630  ;;  %v5685_v49 = vpop.permute.xlu0 %5684 }
 0x6f4   : > { %v5741_v44 = vmax.f32 %v5739_v5, 0.0  ;;  %v5690_v61 = vadd.f32 %v5685_v49, %v5620_v1  ;;  %v5635_v36 = vadd.f32 %v5631_v21, %v10876_v53 }
 0x6f6   : > { %v5755_v54 = vadd.f32 %v5754_v4, %v5690_v61  ;;  %5746 = vrot.lane.b32.xlu1 %v5741_v44, %s6724_s10 }
 0x6f7   : > { %v5687_v27 = vpop.permute.xlu1 %5686  ;;  %v5643_v51 = vpop.permute.xlu0 %5642 }
 0x6f8   : > { %v5757_v3 = vmax.f32 %v5755_v54, 0.0  ;;  %v5691_v22 = vadd.f32 %v5687_v27, %v5621_v57  ;;  %v5648_v52 = vadd.f32 %v5643_v51, %v5578_v62  ;;  %v5852_v54 = vstv %s10903_s29 }
 0x6fa   : > { %v5756_v9 = vadd.f32 %v5754_v4, %v5691_v22  ;;  %5761 = vrot.lane.b32.xlu0 %v5757_v3, %s6724_s10 }
 0x6fb   : > { %v5645_v43 = vpop.permute.xlu1 %5644  ;;  %v5699_v17 = vpop.permute.xlu0 %5698 }
 0x6fc   : > { %v5758_v35 = vmax.f32 %v5756_v9, 0.0  ;;  %v5704_v31 = vadd.f32 %v5699_v17, %v5634_v7  ;;  %v5649_v50 = vadd.f32 %v5645_v43, %v5579_v58 }
 0x6fe   : > { %v5772_v47 = vadd.f32 %v5771_v38, %v5704_v31  ;;  %5763 = vrot.lane.b32.xlu1 %v5758_v35, %s6724_s10 }
 0x6ff   : > { %v5701_v63 = vpop.permute.xlu1 %5700  ;;  %v5713_v2 = vpop.permute.xlu0 %5712 }
 0x700   : > { %v5774_v15 = vmax.f32 %v5772_v47, 0.0  ;;  %v5705_v41 = vadd.f32 %v5701_v63, %v5635_v36  ;;  %v5718_v46 = vadd.f32 %v5713_v2, %v5648_v52  ;;  %v5860_v52 = vstv %s10907_s12 }
 0x702   : > { %v5773_v34 = vadd.f32 %v5771_v38, %v5705_v41  ;;  %v5789_v42 = vadd.f32 %v5788_v28, %v5718_v46  ;;  %5778 = vrot.lane.b32.xlu0 %v5774_v15, %s6724_s10 }
 0x703   : > { %v5715_v45 = vpop.permute.xlu1 %5714 }
 0x704   : > { %v5775_v29 = vmax.f32 %v5773_v34, 0.0  ;;  %v5791_v48 = vmax.f32 %v5789_v42, 0.0  ;;  %v5719_v33 = vadd.f32 %v5715_v45, %v5649_v50 }
 0x706   : > { %v5790_v53 = vadd.f32 %v5788_v28, %v5719_v33  ;;  %5780 = vrot.lane.b32.xlu1 %v5775_v29, %s6724_s10  ;;  %5795 = vrot.lane.b32.xlu0 %v5791_v48, %s6724_s10 }
 0x708   : > { %v5792_v62 = vmax.f32 %v5790_v53, 0.0 }
 0x70a   : > { %5797 = vrot.lane.b32.xlu1 %v5792_v62, %s6724_s10  ;;  %s6461_s10 = sld [smem:[#allocation15 + $0x3]] }
 0x710   : > { %v5841_v13 = vstv %s6461_s10 }
 0x760   : > { %v5729_v14 = vpop.permute.xlu0 %5728 }
 0x761   : > { %5734 = vst.msk [vmem:[#allocation4 + $0x1] sm:$0xff] %vm461_vm2, %v5729_v14 }
 0x764   : > { %v5731_v55 = vpop.permute.xlu1 %5730  ;;  %v5745_v37 = vpop.permute.xlu0 %5744 }
 0x765   : > { %5735 = vst.msk [vmem:[#allocation4 + $0x9] sm:$0xff] %vm461_vm2, %v5731_v55  ;;  %5751 = vst.msk [vmem:[#allocation4 + $0x19] sm:$0xff] %vm461_vm2, %v5745_v37 }
 0x768   : > { %v5747_v39 = vpop.permute.xlu1 %5746  ;;  %v5804_v12 = vld [vmem:[#allocation4] sm:$0xff] }
 0x769   : > { %5752 = vst.msk [vmem:[#allocation4 + $0x21] sm:$0xff] %vm461_vm2, %v5747_v39  ;;  %v5809_v24 = vmul.f32 %v5808_v40, %v5804_v12 }
 0x76c   : > { %v5762_v58 = vpop.permute.xlu0 %5761  ;;  %v5815_v59 = vld [vmem:[#allocation4 + $0x18] sm:$0xff]  ;;  %v5805_v10 = vld [vmem:[#allocation4 + $0x8] sm:$0xff]  ;;  %v5806_v19 = vld [vmem:[#allocation4 + $0x10] sm:$0x3] }
 0x76d   : > { %5768 = vst.msk [vmem:[#allocation4 + $0x31] sm:$0xff] %vm461_vm2, %v5762_v58  ;;  %v5820_v23 = vmul.f32 %v5819_v60, %v5815_v59  ;;  %v5810_v44 = vmul.f32 %v5808_v40, %v5805_v10  ;;  %v5811_v61 = vmul.f32 %v5808_v40, %v5806_v19 }
 0x76f   : > { %v5823_v4 = vadd.f32 %v5820_v23, %v5809_v24 }
 0x770   : > { %v5764_v16 = vpop.permute.xlu1 %5763  ;;  %v5816_v32 = vld [vmem:[#allocation4 + $0x20] sm:$0xff]  ;;  %v5817_v56 = vld [vmem:[#allocation4 + $0x28] sm:$0x3] }
 0x771   : > { %5769 = vst.msk [vmem:[#allocation4 + $0x39] sm:$0xff] %vm461_vm2, %v5764_v16  ;;  %v5821_v6 = vmul.f32 %v5819_v60, %v5816_v32  ;;  %v5822_v20 = vmul.f32 %v5819_v60, %v5817_v56 }
 0x773   : > { %v5824_v3 = vadd.f32 %v5821_v6, %v5810_v44  ;;  %v5825_v22 = vadd.f32 %v5822_v20, %v5811_v61 }
 0x774   : > { %v5779_v25 = vpop.permute.xlu0 %5778  ;;  %v5826_v0 = vld [vmem:[#allocation4 + $0x30] sm:$0xff] }
 0x775   : > { %5785 = vst.msk [vmem:[#allocation4 + $0x49] sm:$0xff] %vm461_vm2, %v5779_v25  ;;  %v5831_v26 = vmul.f32 %v5830_v11, %v5826_v0 }
 0x777   : > { %v5834_v27 = vadd.f32 %v5831_v26, %v5823_v4 }
 0x778   : > { %v5781_v8 = vpop.permute.xlu1 %5780  ;;  %v5796_v30 = vpop.permute.xlu0 %5795  ;;  %v5827_v18 = vld [vmem:[#allocation4 + $0x38] sm:$0xff]  ;;  %v5828_v1 = vld [vmem:[#allocation4 + $0x40] sm:$0x3] }
 0x779   : > { %5786 = vst.msk [vmem:[#allocation4 + $0x51] sm:$0xff] %vm461_vm2, %v5781_v8  ;;  %5802 = vst.msk [vmem:[#allocation4 + $0x61] sm:$0xff] %vm461_vm2, %v5796_v30  ;;  %v5832_v57 = vmul.f32 %v5830_v11, %v5827_v18  ;;  %v5833_v51 = vmul.f32 %v5830_v11, %v5828_v1 }
 0x77b   : > { %v5835_v36 = vadd.f32 %v5832_v57, %v5824_v3  ;;  %v5836_v47 = vadd.f32 %v5833_v51, %v5825_v22 }
 0x77c   : > { %v5837_v5 = vld [vmem:[#allocation4 + $0x48] sm:$0xff]  ;;  %v5798_v21 = vpop.permute.xlu1 %5797 }
 0x77d   : > { %v5842_v49 = vmul.f32 %v5841_v13, %v5837_v5  ;;  %5803 = vst.msk [vmem:[#allocation4 + $0x69] sm:$0xff] %vm461_vm2, %v5798_v21 }
 0x77f   : > { %v5845_v38 = vadd.f32 %v5842_v49, %v5834_v27 }
 0x780   : > { %v5838_v7 = vld [vmem:[#allocation4 + $0x50] sm:$0xff]  ;;  %v5839_v9 = vld [vmem:[#allocation4 + $0x58] sm:$0x3]  ;;  %v5848_v43 = vld [vmem:[#allocation4 + $0x60] sm:$0xff] }
 0x781   : > { %v5843_v17 = vmul.f32 %v5841_v13, %v5838_v7  ;;  %v5844_v35 = vmul.f32 %v5841_v13, %v5839_v9  ;;  %v5853_v31 = vmul.f32 %v5852_v54, %v5848_v43 }
 0x783   : > { %v5856_v63 = vadd.f32 %v5853_v31, %v5845_v38  ;;  %v5846_v28 = vadd.f32 %v5843_v17, %v5835_v36  ;;  %v5847_v41 = vadd.f32 %v5844_v35, %v5836_v47 }
 0x784   : > { %v5849_v2 = vld [vmem:[#allocation4 + $0x68] sm:$0xff]  ;;  %v5850_v15 = vld [vmem:[#allocation4 + $0x70] sm:$0x3] }
 0x785   : > { %v5861_v46 = vadd.f32 %v5860_v52, %v5856_v63  ;;  %v5854_v50 = vmul.f32 %v5852_v54, %v5849_v2  ;;  %v5855_v34 = vmul.f32 %v5852_v54, %v5850_v15 }
 0x787   : > { %v5864_v42 = vmax.f32 %v5861_v46, 0.0  ;;  %v5857_v45 = vadd.f32 %v5854_v50, %v5846_v28  ;;  %v5858_v29 = vadd.f32 %v5855_v34, %v5847_v41 }
 0x789   : > { %5867 = vst.msk [vmem:[%s363_s21] sm:$0xff] %vm364_vm0, %v5864_v42  ;;  %v5862_v48 = vadd.f32 %v5860_v52, %v5857_v45  ;;  %v5863_v33 = vadd.f32 %v5860_v52, %v5858_v29 }
 0x78b   : > { %v5865_v53 = vmax.f32 %v5862_v48, 0.0  ;;  %v5866_v62 = vmax.f32 %v5863_v33, 0.0 }
 0x78d   : > { %5868 = vst.msk [vmem:[%s363_s21 + $0x8] sm:$0xff] %vm364_vm0, %v5865_v53 }
 0x78e   : > { %5869 = vst.msk [vmem:[%s363_s21 + $0x10] sm:$0x3] %vm367_vm1, %v5866_v62 }
 0x78f PF: > { %p21_p9 = scmp.ge.s32.totalorder %s6865_s18, 4   ;;  %s10960_s26 = smov %s6706_s27 }
 0x790   : > { %s10961_s27 = smov %s6710_s28  ;;  %s10962_s28 = smov %s6876_s17 }
 0x791   : > { %s10963_s29 = smov %s6865_s18  ;;  %23 = sbr.rel (!%p21_p9) target bundleno = 8 (0x8), region = 121 }
 0x796   :  { %5891 = vsyncpa [#allocation7], 1 }
 0x797   :  { %5893 = vsyncpa [#allocation7 + $0x1], 1 }
 0x798   :  { %5894 = vsyncpa [#allocation8], 1 }
 0x799   :  { %5896 = vsyncpa [#allocation8 + $0x1], 1 }
 0x79a   :  { %5897 = vsyncpa [#allocation11], 1 }
 0x79b   :  { %5898 = vsyncpa [#allocation14], 1 }

</bundles_post_ra>
